<compile_context>
chip_gen: v6e
topology: v6e:2x2x1
jax: 0.10.0
libtpu: 0.0.40
codegen_flags: <defaults>
</compile_context>

<pallas_src>
import functools
import math

import numpy as np
import jax
import jax.numpy as jnp
from jax import lax
from jax.experimental import pallas as pl
from jax.experimental.pallas import tpu as pltpu


_TILE_ROWS = 32            # 4 f32 vregs of grid points per block
_TILE_LANES = 128


def _wesper_kernel(it_ref, cw_ref, wot_ref, x_ref, f_ref, *,
                   p, n_iter, inner, tol, n_polish, c):
    """Solve m_tilde(x) = 1 / (1 + c * sum_j wt_j / (m_tilde - x/t_j)),
    then Im m(x) = Im sum_j (wt_j/t_j) / (m_tilde - x/t_j),  f = |Im m| / pi.
    (d = wd = ones(1): the outer Dirac sum over d collapses to one term.)

    it_ref  : SMEM (P,) f32  = 1 / tau_j
    cw_ref  : SMEM (P,) f32  = c * wt_j
    wot_ref : SMEM (P,) f32  = wt_j / tau_j
    x_ref / f_ref : (32, 128) VMEM blocks of grid points / density.
    """
    x = x_ref[...]                               # (32, 128), loop-invariant

    # Loop-invariant scalar reads, hoisted once.
    it_s = [it_ref[j] for j in range(p)]
    cw_s = [cw_ref[j] for j in range(p)]
    wot_s = [wot_ref[j] for j in range(p)]

    one = jnp.float32(1.0)
    half = jnp.float32(0.5)
    two = jnp.float32(2.0)
    neg_floor = jnp.float32(-1e-9)               # keep Im m_tilde < 0

    def _recip_fast(d):
        # EUP approximate reciprocal, no VALU tail (used inside the hot loop).
        return pl.reciprocal(d, approx=True)

    def _recip_exact(d):
        # Approx reciprocal + one Newton step (~f32-exact, for polish/final).
        r = pl.reciprocal(d, approx=True)
        return r * (two - d * r)

    def damped_step(mr, mi, recip):
        # Theta = 1 + c * sum_j wt_j / (m - x/t_j); new m = 1/Theta; damp 0.5.
        mi_sq = mi * mi                          # shared across all P terms
        ur_acc = None                            # sum_j c*wt_j * dr_j / den_j
        sw_acc = None                            # sum_j c*wt_j / den_j
        for j in range(p):
            dr = mr - x * it_s[j]
            den = dr * dr + mi_sq
            inv = recip(den)
            tr = (cw_s[j] * dr) * inv
            ti = cw_s[j] * inv
            if ur_acc is None:                   # init from j=0 term (no splat)
                ur_acc, sw_acc = tr, ti
            else:
                ur_acc = ur_acc + tr
                sw_acc = sw_acc + ti
        ur = one + ur_acc                        # Re Theta
        ui = -(mi * sw_acc)                      # Im Theta (> 0 for mi < 0)
        inv_u = recip(ur * ur + ui * ui)
        nmr = ur * inv_u                         # Re 1/Theta
        nmi = -(ui * inv_u)                      # Im 1/Theta (< 0)
        mr_new = half * (mr + nmr)
        mi_new = jnp.minimum(half * (mi + nmi), neg_floor)
        return mr_new, mi_new

    # Warm start in the lower half-plane, near 1/(1+c).
    mr0 = jnp.full_like(x, jnp.float32(1.0 / (1.0 + c)))
    mi0 = jnp.full_like(x, jnp.float32(-0.5))

    n_chunks = max(1, -(-int(n_iter) // int(inner)))
    tol_f = jnp.float32(tol)

    def cond(carry):
        k, _, _, delta = carry
        return jnp.logical_and(k < n_chunks, delta > tol_f)

    def body(carry):
        k, mr, mi, _ = carry
        mr_s, mi_s = mr, mi
        for _ in range(inner):                   # unrolled chunk of 8 steps
            mr, mi = damped_step(mr, mi, _recip_fast)
        delta = jnp.maximum(jnp.max(jnp.abs(mr - mr_s)),
                            jnp.max(jnp.abs(mi - mi_s)))
        return (k + jnp.int32(1), mr, mi, delta)

    carry0 = (jnp.int32(0), mr0, mi0, jnp.float32(jnp.inf))
    _, mr, mi, _ = lax.while_loop(cond, body, carry0)

    # Short polish with refined reciprocals (removes the ~1e-3 approx bias).
    for _ in range(n_polish):
        mr, mi = damped_step(mr, mi, _recip_exact)

    # Im m(x) = -mi * sum_j (wt_j/t_j) / ((mr - x/t_j)^2 + mi^2)
    mi_sq = mi * mi
    im_acc = None
    for j in range(p):
        dr = mr - x * it_s[j]
        den = dr * dr + mi_sq
        inv = _recip_exact(den)
        term = wot_s[j] * inv
        im_acc = term if im_acc is None else im_acc + term
    im_m = mi * im_acc                           # sign irrelevant under abs()

    f_ref[...] = jnp.abs(im_m) * jnp.float32(1.0 / math.pi)


def _run_kernel(x_grid, tau, wt, c, n_iter=200):
    """Run the Pallas solver; returns the density f on the N grid points."""
    n = int(x_grid.shape[-1])
    p = int(tau.shape[0])
    tile = _TILE_ROWS * _TILE_LANES
    n_tiles = max(1, -(-n // tile))
    # >= 2 even grid steps so the "parallel" axis splits across v7x's 2 TCs.
    if n_tiles < 2:
        n_tiles = 2
    if n_tiles % 2:
        n_tiles += 1
    n_pad = n_tiles * tile

    # Pad with a benign in-support value (padding results are discarded).
    x_pad = jnp.full((n_pad,), 1.0, jnp.float32).at[:n].set(
        x_grid.astype(jnp.float32))
    x2d = x_pad.reshape(n_tiles * _TILE_ROWS, _TILE_LANES)

    tau32 = tau.reshape(p).astype(jnp.float32)
    wt32 = wt.reshape(p).astype(jnp.float32)
    inv_tau = jnp.float32(1.0) / tau32           # 1 / tau_j
    cwt = jnp.float32(c) * wt32                  # c * wt_j
    wot = wt32 * inv_tau                         # wt_j / tau_j

    kernel = functools.partial(
        _wesper_kernel, p=p, n_iter=int(n_iter),
        inner=8, tol=1e-6, n_polish=4, c=float(c))

    # Advisory cost estimate: ~(9P+16) VALU ops and (P+1) recips per point/iter.
    cost = pl.CostEstimate(
        flops=int(n_pad) * int(n_iter) * (9 * p + 16),
        transcendentals=int(n_pad) * int(n_iter) * (p + 1),
        bytes_accessed=8 * int(n_pad),
    )

    f2d = pl.pallas_call(
        kernel,
        grid=(n_tiles,),
        in_specs=[
            pl.BlockSpec(memory_space=pltpu.MemorySpace.SMEM),   # 1/tau (P,)
            pl.BlockSpec(memory_space=pltpu.MemorySpace.SMEM),   # c*wt  (P,)
            pl.BlockSpec(memory_space=pltpu.MemorySpace.SMEM),   # wt/tau(P,)
            pl.BlockSpec((_TILE_ROWS, _TILE_LANES), lambda i: (i, 0)),
        ],
        out_specs=pl.BlockSpec((_TILE_ROWS, _TILE_LANES), lambda i: (i, 0)),
        out_shape=jax.ShapeDtypeStruct((n_tiles * _TILE_ROWS, _TILE_LANES),
                                       jnp.float32),
        compiler_params=pltpu.CompilerParams(
            dimension_semantics=("parallel",)),
        cost_estimate=cost,
    )(inv_tau, cwt, wot, x2d)

    return f2d.reshape(n_pad)[:n]


def wesper_md_forward(logtau, tau_mean, wt=None, c=0.1, mu=0.1, omega=16,
                      n_iter=200):
    """Forward pass of WeSpeR_MD_model (weights='test', d=wd=ones(1)).
    Returns concat([f, F, xi, omegai, nu]) like f_xi.forward."""
    p = logtau.shape[0]
    idx = jnp.argsort(logtau)
    tau = jnp.exp(logtau[idx]) * tau_mean
    if wt is None:
        wt_s = jnp.ones((p,), jnp.float32) / p
    else:
        wt_s = wt[idx].astype(jnp.float32)

    # --- WeSpeR_support_u, weights='test' branch (static, host-side) ---
    support = np.array([0.1, 10.0], dtype=np.float64)
    tildeomegai = np.ones(1, dtype=np.float64)
    nu = support.shape[0] // 2                     # = 1
    mu = max(0.0, min(float(mu), 1.0))

    # --- omegai (number of grid points per support interval) ---
    omegai_f = (mu / nu + (1.0 - mu) * tildeomegai) * omega
    s = omegai_f.sum()
    if s > 0:
        omegai = np.round(omegai_f * omega / s + 0.5).astype(np.int64)
    else:
        omegai = np.round(omega * np.ones(nu) / nu + 0.5).astype(np.int64)
    N = int(omegai[0])

    # --- Chebyshev-like grid inside the (single) support interval ---
    ul, ur = float(support[0]), float(support[1])
    jj = np.arange(1, N + 1, dtype=np.float64)
    sin2 = np.sin(np.pi * jj / 2.0 / (N + 1)) ** 2
    xij = jnp.asarray(ul + (ur - ul) * sin2, dtype=jnp.float32)

    # --- Pallas hot path: fixed-point solve + Stieltjes transform -> density f
    f = _run_kernel(xij, tau, wt_s, c, n_iter)

    dt = jnp.float32
    xi = jnp.concatenate([jnp.array([ul], dt), xij, jnp.array([ur], dt)])
    f_full = jnp.concatenate([jnp.zeros(1, dt), f, jnp.zeros(1, dt)])

    # --- cumulative distribution G (trapezoid rule) and normalized F ---
    F0 = dt(max(0.0, 1.0 - 1.0 / float(c)))
    dG = 0.5 * (xi[1:] - xi[:-1]) * (f_full[1:] + f_full[:-1])
    G = jnp.concatenate([jnp.array([F0], dt), F0 + jnp.cumsum(dG)])

    denom = G[-1] - F0
    j_lin = jnp.arange(1, N + 2, dtype=dt) / dt(N + 1)
    t0 = dt(tildeomegai[0])
    F_tail = jnp.where(denom > 0,
                       F0 + t0 * (1.0 - F0) * (G[1:] - F0) / denom,
                       F0 + t0 * (1.0 - F0) * j_lin)
    F = jnp.concatenate([jnp.array([F0], dt), F_tail])

    output = jnp.concatenate([
        f_full, F, xi,
        jnp.array([float(N)], dt),          # omegai (promoted to float, as torch.cat does)
        jnp.array([float(nu)], dt),         # nu * ones(1)
    ])
    return output


if __name__ == "__main__":
    key = jax.random.PRNGKey(0)
    p = 8                                   # population spectrum size (tau_init shape)
    omega = 16                              # small grid for the demo

    # Deterministic module parameters (WeSpeR_MD_model.__init__):
    tau_init = 0.5 + jax.random.uniform(key, (p,), dtype=jnp.float32)
    tau_mean = jnp.mean(tau_init)
    logtau = jnp.log(tau_init / tau_mean)   # the nn.Parameter (float32 here, not float64)

    out = wesper_md_forward(logtau, tau_mean, wt=None, c=0.1, mu=0.1, omega=omega)
    out = jax.block_until_ready(out)
    assert out.shape[0] == 3 * (omega + 2) + 1 + 1
    assert bool(jnp.all(jnp.isfinite(out)))
    print("KERNEL_OK")
</pallas_src>

<mosaic_0001>
module attributes {stable_mosaic.version = 11 : i64} {
  func.func @_wesper_kernel(%arg0: i32, %arg1: memref<8xf32, #tpu.memory_space<smem>>, %arg2: memref<8xf32, #tpu.memory_space<smem>>, %arg3: memref<8xf32, #tpu.memory_space<smem>>, %arg4: memref<32x128xf32, #tpu.memory_space<vmem>>, %arg5: memref<32x128xf32, #tpu.memory_space<vmem>>) attributes {dimension_semantics = [#tpu.dimension_semantics<parallel>], iteration_bounds = array<i64: 2>, scalar_prefetch = 0 : i64, scratch_operands = 0 : i64, tpu.core_type = #tpu.core_type<tc>, window_params = [{transform_indices = @transform_0, window_bounds = array<i64: 8>}, {transform_indices = @transform_1, window_bounds = array<i64: 8>}, {transform_indices = @transform_2, window_bounds = array<i64: 8>}, {transform_indices = @transform_3, window_bounds = array<i64: 32, 128>}, {transform_indices = @transform_4, window_bounds = array<i64: 32, 128>}]} {
    %c0 = arith.constant 0 : index
    %c0_0 = arith.constant 0 : index
    %0 = vector.load %arg4[%c0, %c0_0] : memref<32x128xf32, #tpu.memory_space<vmem>>, vector<32x128xf32>
    %c0_1 = arith.constant 0 : index
    %1 = memref.load %arg1[%c0_1] : memref<8xf32, #tpu.memory_space<smem>>
    %c1 = arith.constant 1 : index
    %2 = memref.load %arg1[%c1] : memref<8xf32, #tpu.memory_space<smem>>
    %c2 = arith.constant 2 : index
    %3 = memref.load %arg1[%c2] : memref<8xf32, #tpu.memory_space<smem>>
    %c3 = arith.constant 3 : index
    %4 = memref.load %arg1[%c3] : memref<8xf32, #tpu.memory_space<smem>>
    %c4 = arith.constant 4 : index
    %5 = memref.load %arg1[%c4] : memref<8xf32, #tpu.memory_space<smem>>
    %c5 = arith.constant 5 : index
    %6 = memref.load %arg1[%c5] : memref<8xf32, #tpu.memory_space<smem>>
    %c6 = arith.constant 6 : index
    %7 = memref.load %arg1[%c6] : memref<8xf32, #tpu.memory_space<smem>>
    %c7 = arith.constant 7 : index
    %8 = memref.load %arg1[%c7] : memref<8xf32, #tpu.memory_space<smem>>
    %c0_2 = arith.constant 0 : index
    %9 = memref.load %arg2[%c0_2] : memref<8xf32, #tpu.memory_space<smem>>
    %c1_3 = arith.constant 1 : index
    %10 = memref.load %arg2[%c1_3] : memref<8xf32, #tpu.memory_space<smem>>
    %c2_4 = arith.constant 2 : index
    %11 = memref.load %arg2[%c2_4] : memref<8xf32, #tpu.memory_space<smem>>
    %c3_5 = arith.constant 3 : index
    %12 = memref.load %arg2[%c3_5] : memref<8xf32, #tpu.memory_space<smem>>
    %c4_6 = arith.constant 4 : index
    %13 = memref.load %arg2[%c4_6] : memref<8xf32, #tpu.memory_space<smem>>
    %c5_7 = arith.constant 5 : index
    %14 = memref.load %arg2[%c5_7] : memref<8xf32, #tpu.memory_space<smem>>
    %c6_8 = arith.constant 6 : index
    %15 = memref.load %arg2[%c6_8] : memref<8xf32, #tpu.memory_space<smem>>
    %c7_9 = arith.constant 7 : index
    %16 = memref.load %arg2[%c7_9] : memref<8xf32, #tpu.memory_space<smem>>
    %c0_10 = arith.constant 0 : index
    %17 = memref.load %arg3[%c0_10] : memref<8xf32, #tpu.memory_space<smem>>
    %c1_11 = arith.constant 1 : index
    %18 = memref.load %arg3[%c1_11] : memref<8xf32, #tpu.memory_space<smem>>
    %c2_12 = arith.constant 2 : index
    %19 = memref.load %arg3[%c2_12] : memref<8xf32, #tpu.memory_space<smem>>
    %c3_13 = arith.constant 3 : index
    %20 = memref.load %arg3[%c3_13] : memref<8xf32, #tpu.memory_space<smem>>
    %c4_14 = arith.constant 4 : index
    %21 = memref.load %arg3[%c4_14] : memref<8xf32, #tpu.memory_space<smem>>
    %c5_15 = arith.constant 5 : index
    %22 = memref.load %arg3[%c5_15] : memref<8xf32, #tpu.memory_space<smem>>
    %c6_16 = arith.constant 6 : index
    %23 = memref.load %arg3[%c6_16] : memref<8xf32, #tpu.memory_space<smem>>
    %c7_17 = arith.constant 7 : index
    %24 = memref.load %arg3[%c7_17] : memref<8xf32, #tpu.memory_space<smem>>
    %cst = arith.constant 0.909090936 : f32
    %25 = vector.broadcast %cst : f32 to vector<32x128xf32>
    %cst_18 = arith.constant -5.000000e-01 : f32
    %26 = vector.broadcast %cst_18 : f32 to vector<32x128xf32>
    %cst_19 = arith.constant 9.99999997E-7 : f32
    %cst_20 = arith.constant 1.000000e+00 : f32
    %cst_21 = arith.constant 5.000000e-01 : f32
    %cst_22 = arith.constant -9.99999971E-10 : f32
    %c0_i32 = arith.constant 0 : i32
    %cst_23 = arith.constant 0x7F800000 : f32
    %27:4 = scf.while (%arg6 = %c0_i32, %arg7 = %25, %arg8 = %26, %arg9 = %cst_23) : (i32, vector<32x128xf32>, vector<32x128xf32>, f32) -> (i32, vector<32x128xf32>, vector<32x128xf32>, f32) {
      %c25_i32 = arith.constant 25 : i32
      %777 = arith.cmpi slt, %arg6, %c25_i32 : i32
      %778 = arith.cmpf ogt, %arg9, %cst_19 : f32
      %779 = arith.andi %777, %778 : i1
      scf.condition(%779) %arg6, %arg7, %arg8, %arg9 : i32, vector<32x128xf32>, vector<32x128xf32>, f32
    } do {
    ^bb0(%arg6: i32, %arg7: vector<32x128xf32>, %arg8: vector<32x128xf32>, %arg9: f32):
      %777 = arith.mulf %arg8, %arg8 : vector<32x128xf32>
      %778 = vector.broadcast %1 : f32 to vector<32x128xf32>
      %779 = arith.mulf %0, %778 : vector<32x128xf32>
      %780 = arith.subf %arg7, %779 : vector<32x128xf32>
      %781 = arith.mulf %780, %780 : vector<32x128xf32>
      %782 = arith.addf %781, %777 : vector<32x128xf32>
      %783 = tpu.reciprocal %782 {approx = true} : vector<32x128xf32> -> vector<32x128xf32>
      %784 = vector.broadcast %9 : f32 to vector<32x128xf32>
      %785 = arith.mulf %784, %780 : vector<32x128xf32>
      %786 = arith.mulf %785, %783 : vector<32x128xf32>
      %787 = vector.broadcast %9 : f32 to vector<32x128xf32>
      %788 = arith.mulf %787, %783 : vector<32x128xf32>
      %789 = vector.broadcast %2 : f32 to vector<32x128xf32>
      %790 = arith.mulf %0, %789 : vector<32x128xf32>
      %791 = arith.subf %arg7, %790 : vector<32x128xf32>
      %792 = arith.mulf %791, %791 : vector<32x128xf32>
      %793 = arith.addf %792, %777 : vector<32x128xf32>
      %794 = tpu.reciprocal %793 {approx = true} : vector<32x128xf32> -> vector<32x128xf32>
      %795 = vector.broadcast %10 : f32 to vector<32x128xf32>
      %796 = arith.mulf %795, %791 : vector<32x128xf32>
      %797 = arith.mulf %796, %794 : vector<32x128xf32>
      %798 = vector.broadcast %10 : f32 to vector<32x128xf32>
      %799 = arith.mulf %798, %794 : vector<32x128xf32>
      %800 = arith.addf %786, %797 : vector<32x128xf32>
      %801 = arith.addf %788, %799 : vector<32x128xf32>
      %802 = vector.broadcast %3 : f32 to vector<32x128xf32>
      %803 = arith.mulf %0, %802 : vector<32x128xf32>
      %804 = arith.subf %arg7, %803 : vector<32x128xf32>
      %805 = arith.mulf %804, %804 : vector<32x128xf32>
      %806 = arith.addf %805, %777 : vector<32x128xf32>
      %807 = tpu.reciprocal %806 {approx = true} : vector<32x128xf32> -> vector<32x128xf32>
      %808 = vector.broadcast %11 : f32 to vector<32x128xf32>
      %809 = arith.mulf %808, %804 : vector<32x128xf32>
      %810 = arith.mulf %809, %807 : vector<32x128xf32>
      %811 = vector.broadcast %11 : f32 to vector<32x128xf32>
      %812 = arith.mulf %811, %807 : vector<32x128xf32>
      %813 = arith.addf %800, %810 : vector<32x128xf32>
      %814 = arith.addf %801, %812 : vector<32x128xf32>
      %815 = vector.broadcast %4 : f32 to vector<32x128xf32>
      %816 = arith.mulf %0, %815 : vector<32x128xf32>
      %817 = arith.subf %arg7, %816 : vector<32x128xf32>
      %818 = arith.mulf %817, %817 : vector<32x128xf32>
      %819 = arith.addf %818, %777 : vector<32x128xf32>
      %820 = tpu.reciprocal %819 {approx = true} : vector<32x128xf32> -> vector<32x128xf32>
      %821 = vector.broadcast %12 : f32 to vector<32x128xf32>
      %822 = arith.mulf %821, %817 : vector<32x128xf32>
      %823 = arith.mulf %822, %820 : vector<32x128xf32>
      %824 = vector.broadcast %12 : f32 to vector<32x128xf32>
      %825 = arith.mulf %824, %820 : vector<32x128xf32>
      %826 = arith.addf %813, %823 : vector<32x128xf32>
      %827 = arith.addf %814, %825 : vector<32x128xf32>
      %828 = vector.broadcast %5 : f32 to vector<32x128xf32>
      %829 = arith.mulf %0, %828 : vector<32x128xf32>
      %830 = arith.subf %arg7, %829 : vector<32x128xf32>
      %831 = arith.mulf %830, %830 : vector<32x128xf32>
      %832 = arith.addf %831, %777 : vector<32x128xf32>
      %833 = tpu.reciprocal %832 {approx = true} : vector<32x128xf32> -> vector<32x128xf32>
      %834 = vector.broadcast %13 : f32 to vector<32x128xf32>
      %835 = arith.mulf %834, %830 : vector<32x128xf32>
      %836 = arith.mulf %835, %833 : vector<32x128xf32>
      %837 = vector.broadcast %13 : f32 to vector<32x128xf32>
      %838 = arith.mulf %837, %833 : vector<32x128xf32>
      %839 = arith.addf %826, %836 : vector<32x128xf32>
      %840 = arith.addf %827, %838 : vector<32x128xf32>
      %841 = vector.broadcast %6 : f32 to vector<32x128xf32>
      %842 = arith.mulf %0, %841 : vector<32x128xf32>
      %843 = arith.subf %arg7, %842 : vector<32x128xf32>
      %844 = arith.mulf %843, %843 : vector<32x128xf32>
      %845 = arith.addf %844, %777 : vector<32x128xf32>
      %846 = tpu.reciprocal %845 {approx = true} : vector<32x128xf32> -> vector<32x128xf32>
      %847 = vector.broadcast %14 : f32 to vector<32x128xf32>
      %848 = arith.mulf %847, %843 : vector<32x128xf32>
      %849 = arith.mulf %848, %846 : vector<32x128xf32>
      %850 = vector.broadcast %14 : f32 to vector<32x128xf32>
      %851 = arith.mulf %850, %846 : vector<32x128xf32>
      %852 = arith.addf %839, %849 : vector<32x128xf32>
      %853 = arith.addf %840, %851 : vector<32x128xf32>
      %854 = vector.broadcast %7 : f32 to vector<32x128xf32>
      %855 = arith.mulf %0, %854 : vector<32x128xf32>
      %856 = arith.subf %arg7, %855 : vector<32x128xf32>
      %857 = arith.mulf %856, %856 : vector<32x128xf32>
      %858 = arith.addf %857, %777 : vector<32x128xf32>
      %859 = tpu.reciprocal %858 {approx = true} : vector<32x128xf32> -> vector<32x128xf32>
      %860 = vector.broadcast %15 : f32 to vector<32x128xf32>
      %861 = arith.mulf %860, %856 : vector<32x128xf32>
      %862 = arith.mulf %861, %859 : vector<32x128xf32>
      %863 = vector.broadcast %15 : f32 to vector<32x128xf32>
      %864 = arith.mulf %863, %859 : vector<32x128xf32>
      %865 = arith.addf %852, %862 : vector<32x128xf32>
      %866 = arith.addf %853, %864 : vector<32x128xf32>
      %867 = vector.broadcast %8 : f32 to vector<32x128xf32>
      %868 = arith.mulf %0, %867 : vector<32x128xf32>
      %869 = arith.subf %arg7, %868 : vector<32x128xf32>
      %870 = arith.mulf %869, %869 : vector<32x128xf32>
      %871 = arith.addf %870, %777 : vector<32x128xf32>
      %872 = tpu.reciprocal %871 {approx = true} : vector<32x128xf32> -> vector<32x128xf32>
      %873 = vector.broadcast %16 : f32 to vector<32x128xf32>
      %874 = arith.mulf %873, %869 : vector<32x128xf32>
      %875 = arith.mulf %874, %872 : vector<32x128xf32>
      %876 = vector.broadcast %16 : f32 to vector<32x128xf32>
      %877 = arith.mulf %876, %872 : vector<32x128xf32>
      %878 = arith.addf %865, %875 : vector<32x128xf32>
      %879 = arith.addf %866, %877 : vector<32x128xf32>
      %880 = vector.broadcast %cst_20 : f32 to vector<32x128xf32>
      %881 = arith.addf %880, %878 : vector<32x128xf32>
      %882 = arith.mulf %arg8, %879 : vector<32x128xf32>
      %cst_95 = arith.constant 0.000000e+00 : f32
      %883 = vector.broadcast %cst_95 : f32 to vector<32x128xf32>
      %884 = arith.subf %883, %882 : vector<32x128xf32>
      %885 = arith.mulf %881, %881 : vector<32x128xf32>
      %886 = arith.mulf %884, %884 : vector<32x128xf32>
      %887 = arith.addf %885, %886 : vector<32x128xf32>
      %888 = tpu.reciprocal %887 {approx = true} : vector<32x128xf32> -> vector<32x128xf32>
      %889 = arith.mulf %881, %888 : vector<32x128xf32>
      %890 = arith.mulf %884, %888 : vector<32x128xf32>
      %cst_96 = arith.constant 0.000000e+00 : f32
      %891 = vector.broadcast %cst_96 : f32 to vector<32x128xf32>
      %892 = arith.subf %891, %890 : vector<32x128xf32>
      %893 = arith.addf %arg7, %889 : vector<32x128xf32>
      %894 = vector.broadcast %cst_21 : f32 to vector<32x128xf32>
      %895 = arith.mulf %894, %893 : vector<32x128xf32>
      %896 = arith.addf %arg8, %892 : vector<32x128xf32>
      %897 = vector.broadcast %cst_21 : f32 to vector<32x128xf32>
      %898 = arith.mulf %897, %896 : vector<32x128xf32>
      %899 = vector.broadcast %cst_22 : f32 to vector<32x128xf32>
      %900 = arith.minimumf %898, %899 : vector<32x128xf32>
      %901 = arith.mulf %900, %900 : vector<32x128xf32>
      %902 = vector.broadcast %1 : f32 to vector<32x128xf32>
      %903 = arith.mulf %0, %902 : vector<32x128xf32>
      %904 = arith.subf %895, %903 : vector<32x128xf32>
      %905 = arith.mulf %904, %904 : vector<32x128xf32>
      %906 = arith.addf %905, %901 : vector<32x128xf32>
      %907 = tpu.reciprocal %906 {approx = true} : vector<32x128xf32> -> vector<32x128xf32>
      %908 = vector.broadcast %9 : f32 to vector<32x128xf32>
      %909 = arith.mulf %908, %904 : vector<32x128xf32>
      %910 = arith.mulf %909, %907 : vector<32x128xf32>
      %911 = vector.broadcast %9 : f32 to vector<32x128xf32>
      %912 = arith.mulf %911, %907 : vector<32x128xf32>
      %913 = vector.broadcast %2 : f32 to vector<32x128xf32>
      %914 = arith.mulf %0, %913 : vector<32x128xf32>
      %915 = arith.subf %895, %914 : vector<32x128xf32>
      %916 = arith.mulf %915, %915 : vector<32x128xf32>
      %917 = arith.addf %916, %901 : vector<32x128xf32>
      %918 = tpu.reciprocal %917 {approx = true} : vector<32x128xf32> -> vector<32x128xf32>
      %919 = vector.broadcast %10 : f32 to vector<32x128xf32>
      %920 = arith.mulf %919, %915 : vector<32x128xf32>
      %921 = arith.mulf %920, %918 : vector<32x128xf32>
      %922 = vector.broadcast %10 : f32 to vector<32x128xf32>
      %923 = arith.mulf %922, %918 : vector<32x128xf32>
      %924 = arith.addf %910, %921 : vector<32x128xf32>
      %925 = arith.addf %912, %923 : vector<32x128xf32>
      %926 = vector.broadcast %3 : f32 to vector<32x128xf32>
      %927 = arith.mulf %0, %926 : vector<32x128xf32>
      %928 = arith.subf %895, %927 : vector<32x128xf32>
      %929 = arith.mulf %928, %928 : vector<32x128xf32>
      %930 = arith.addf %929, %901 : vector<32x128xf32>
      %931 = tpu.reciprocal %930 {approx = true} : vector<32x128xf32> -> vector<32x128xf32>
      %932 = vector.broadcast %11 : f32 to vector<32x128xf32>
      %933 = arith.mulf %932, %928 : vector<32x128xf32>
      %934 = arith.mulf %933, %931 : vector<32x128xf32>
      %935 = vector.broadcast %11 : f32 to vector<32x128xf32>
      %936 = arith.mulf %935, %931 : vector<32x128xf32>
      %937 = arith.addf %924, %934 : vector<32x128xf32>
      %938 = arith.addf %925, %936 : vector<32x128xf32>
      %939 = vector.broadcast %4 : f32 to vector<32x128xf32>
      %940 = arith.mulf %0, %939 : vector<32x128xf32>
      %941 = arith.subf %895, %940 : vector<32x128xf32>
      %942 = arith.mulf %941, %941 : vector<32x128xf32>
      %943 = arith.addf %942, %901 : vector<32x128xf32>
      %944 = tpu.reciprocal %943 {approx = true} : vector<32x128xf32> -> vector<32x128xf32>
      %945 = vector.broadcast %12 : f32 to vector<32x128xf32>
      %946 = arith.mulf %945, %941 : vector<32x128xf32>
      %947 = arith.mulf %946, %944 : vector<32x128xf32>
      %948 = vector.broadcast %12 : f32 to vector<32x128xf32>
      %949 = arith.mulf %948, %944 : vector<32x128xf32>
      %950 = arith.addf %937, %947 : vector<32x128xf32>
      %951 = arith.addf %938, %949 : vector<32x128xf32>
      %952 = vector.broadcast %5 : f32 to vector<32x128xf32>
      %953 = arith.mulf %0, %952 : vector<32x128xf32>
      %954 = arith.subf %895, %953 : vector<32x128xf32>
      %955 = arith.mulf %954, %954 : vector<32x128xf32>
      %956 = arith.addf %955, %901 : vector<32x128xf32>
      %957 = tpu.reciprocal %956 {approx = true} : vector<32x128xf32> -> vector<32x128xf32>
      %958 = vector.broadcast %13 : f32 to vector<32x128xf32>
      %959 = arith.mulf %958, %954 : vector<32x128xf32>
      %960 = arith.mulf %959, %957 : vector<32x128xf32>
      %961 = vector.broadcast %13 : f32 to vector<32x128xf32>
      %962 = arith.mulf %961, %957 : vector<32x128xf32>
      %963 = arith.addf %950, %960 : vector<32x128xf32>
      %964 = arith.addf %951, %962 : vector<32x128xf32>
      %965 = vector.broadcast %6 : f32 to vector<32x128xf32>
      %966 = arith.mulf %0, %965 : vector<32x128xf32>
      %967 = arith.subf %895, %966 : vector<32x128xf32>
      %968 = arith.mulf %967, %967 : vector<32x128xf32>
      %969 = arith.addf %968, %901 : vector<32x128xf32>
      %970 = tpu.reciprocal %969 {approx = true} : vector<32x128xf32> -> vector<32x128xf32>
      %971 = vector.broadcast %14 : f32 to vector<32x128xf32>
      %972 = arith.mulf %971, %967 : vector<32x128xf32>
      %973 = arith.mulf %972, %970 : vector<32x128xf32>
      %974 = vector.broadcast %14 : f32 to vector<32x128xf32>
      %975 = arith.mulf %974, %970 : vector<32x128xf32>
      %976 = arith.addf %963, %973 : vector<32x128xf32>
      %977 = arith.addf %964, %975 : vector<32x128xf32>
      %978 = vector.broadcast %7 : f32 to vector<32x128xf32>
      %979 = arith.mulf %0, %978 : vector<32x128xf32>
      %980 = arith.subf %895, %979 : vector<32x128xf32>
      %981 = arith.mulf %980, %980 : vector<32x128xf32>
      %982 = arith.addf %981, %901 : vector<32x128xf32>
      %983 = tpu.reciprocal %982 {approx = true} : vector<32x128xf32> -> vector<32x128xf32>
      %984 = vector.broadcast %15 : f32 to vector<32x128xf32>
      %985 = arith.mulf %984, %980 : vector<32x128xf32>
      %986 = arith.mulf %985, %983 : vector<32x128xf32>
      %987 = vector.broadcast %15 : f32 to vector<32x128xf32>
      %988 = arith.mulf %987, %983 : vector<32x128xf32>
      %989 = arith.addf %976, %986 : vector<32x128xf32>
      %990 = arith.addf %977, %988 : vector<32x128xf32>
      %991 = vector.broadcast %8 : f32 to vector<32x128xf32>
      %992 = arith.mulf %0, %991 : vector<32x128xf32>
      %993 = arith.subf %895, %992 : vector<32x128xf32>
      %994 = arith.mulf %993, %993 : vector<32x128xf32>
      %995 = arith.addf %994, %901 : vector<32x128xf32>
      %996 = tpu.reciprocal %995 {approx = true} : vector<32x128xf32> -> vector<32x128xf32>
      %997 = vector.broadcast %16 : f32 to vector<32x128xf32>
      %998 = arith.mulf %997, %993 : vector<32x128xf32>
      %999 = arith.mulf %998, %996 : vector<32x128xf32>
      %1000 = vector.broadcast %16 : f32 to vector<32x128xf32>
      %1001 = arith.mulf %1000, %996 : vector<32x128xf32>
      %1002 = arith.addf %989, %999 : vector<32x128xf32>
      %1003 = arith.addf %990, %1001 : vector<32x128xf32>
      %1004 = vector.broadcast %cst_20 : f32 to vector<32x128xf32>
      %1005 = arith.addf %1004, %1002 : vector<32x128xf32>
      %1006 = arith.mulf %900, %1003 : vector<32x128xf32>
      %cst_97 = arith.constant 0.000000e+00 : f32
      %1007 = vector.broadcast %cst_97 : f32 to vector<32x128xf32>
      %1008 = arith.subf %1007, %1006 : vector<32x128xf32>
      %1009 = arith.mulf %1005, %1005 : vector<32x128xf32>
      %1010 = arith.mulf %1008, %1008 : vector<32x128xf32>
      %1011 = arith.addf %1009, %1010 : vector<32x128xf32>
      %1012 = tpu.reciprocal %1011 {approx = true} : vector<32x128xf32> -> vector<32x128xf32>
      %1013 = arith.mulf %1005, %1012 : vector<32x128xf32>
      %1014 = arith.mulf %1008, %1012 : vector<32x128xf32>
      %cst_98 = arith.constant 0.000000e+00 : f32
      %1015 = vector.broadcast %cst_98 : f32 to vector<32x128xf32>
      %1016 = arith.subf %1015, %1014 : vector<32x128xf32>
      %1017 = arith.addf %895, %1013 : vector<32x128xf32>
      %1018 = vector.broadcast %cst_21 : f32 to vector<32x128xf32>
      %1019 = arith.mulf %1018, %1017 : vector<32x128xf32>
      %1020 = arith.addf %900, %1016 : vector<32x128xf32>
      %1021 = vector.broadcast %cst_21 : f32 to vector<32x128xf32>
      %1022 = arith.mulf %1021, %1020 : vector<32x128xf32>
      %1023 = vector.broadcast %cst_22 : f32 to vector<32x128xf32>
      %1024 = arith.minimumf %1022, %1023 : vector<32x128xf32>
      %1025 = arith.mulf %1024, %1024 : vector<32x128xf32>
      %1026 = vector.broadcast %1 : f32 to vector<32x128xf32>
      %1027 = arith.mulf %0, %1026 : vector<32x128xf32>
      %1028 = arith.subf %1019, %1027 : vector<32x128xf32>
      %1029 = arith.mulf %1028, %1028 : vector<32x128xf32>
      %1030 = arith.addf %1029, %1025 : vector<32x128xf32>
      %1031 = tpu.reciprocal %1030 {approx = true} : vector<32x128xf32> -> vector<32x128xf32>
      %1032 = vector.broadcast %9 : f32 to vector<32x128xf32>
      %1033 = arith.mulf %1032, %1028 : vector<32x128xf32>
      %1034 = arith.mulf %1033, %1031 : vector<32x128xf32>
      %1035 = vector.broadcast %9 : f32 to vector<32x128xf32>
      %1036 = arith.mulf %1035, %1031 : vector<32x128xf32>
      %1037 = vector.broadcast %2 : f32 to vector<32x128xf32>
      %1038 = arith.mulf %0, %1037 : vector<32x128xf32>
      %1039 = arith.subf %1019, %1038 : vector<32x128xf32>
      %1040 = arith.mulf %1039, %1039 : vector<32x128xf32>
      %1041 = arith.addf %1040, %1025 : vector<32x128xf32>
      %1042 = tpu.reciprocal %1041 {approx = true} : vector<32x128xf32> -> vector<32x128xf32>
      %1043 = vector.broadcast %10 : f32 to vector<32x128xf32>
      %1044 = arith.mulf %1043, %1039 : vector<32x128xf32>
      %1045 = arith.mulf %1044, %1042 : vector<32x128xf32>
      %1046 = vector.broadcast %10 : f32 to vector<32x128xf32>
      %1047 = arith.mulf %1046, %1042 : vector<32x128xf32>
      %1048 = arith.addf %1034, %1045 : vector<32x128xf32>
      %1049 = arith.addf %1036, %1047 : vector<32x128xf32>
      %1050 = vector.broadcast %3 : f32 to vector<32x128xf32>
      %1051 = arith.mulf %0, %1050 : vector<32x128xf32>
      %1052 = arith.subf %1019, %1051 : vector<32x128xf32>
      %1053 = arith.mulf %1052, %1052 : vector<32x128xf32>
      %1054 = arith.addf %1053, %1025 : vector<32x128xf32>
      %1055 = tpu.reciprocal %1054 {approx = true} : vector<32x128xf32> -> vector<32x128xf32>
      %1056 = vector.broadcast %11 : f32 to vector<32x128xf32>
      %1057 = arith.mulf %1056, %1052 : vector<32x128xf32>
      %1058 = arith.mulf %1057, %1055 : vector<32x128xf32>
      %1059 = vector.broadcast %11 : f32 to vector<32x128xf32>
      %1060 = arith.mulf %1059, %1055 : vector<32x128xf32>
      %1061 = arith.addf %1048, %1058 : vector<32x128xf32>
      %1062 = arith.addf %1049, %1060 : vector<32x128xf32>
      %1063 = vector.broadcast %4 : f32 to vector<32x128xf32>
      %1064 = arith.mulf %0, %1063 : vector<32x128xf32>
      %1065 = arith.subf %1019, %1064 : vector<32x128xf32>
      %1066 = arith.mulf %1065, %1065 : vector<32x128xf32>
      %1067 = arith.addf %1066, %1025 : vector<32x128xf32>
      %1068 = tpu.reciprocal %1067 {approx = true} : vector<32x128xf32> -> vector<32x128xf32>
      %1069 = vector.broadcast %12 : f32 to vector<32x128xf32>
      %1070 = arith.mulf %1069, %1065 : vector<32x128xf32>
      %1071 = arith.mulf %1070, %1068 : vector<32x128xf32>
      %1072 = vector.broadcast %12 : f32 to vector<32x128xf32>
      %1073 = arith.mulf %1072, %1068 : vector<32x128xf32>
      %1074 = arith.addf %1061, %1071 : vector<32x128xf32>
      %1075 = arith.addf %1062, %1073 : vector<32x128xf32>
      %1076 = vector.broadcast %5 : f32 to vector<32x128xf32>
      %1077 = arith.mulf %0, %1076 : vector<32x128xf32>
      %1078 = arith.subf %1019, %1077 : vector<32x128xf32>
      %1079 = arith.mulf %1078, %1078 : vector<32x128xf32>
      %1080 = arith.addf %1079, %1025 : vector<32x128xf32>
      %1081 = tpu.reciprocal %1080 {approx = true} : vector<32x128xf32> -> vector<32x128xf32>
      %1082 = vector.broadcast %13 : f32 to vector<32x128xf32>
      %1083 = arith.mulf %1082, %1078 : vector<32x128xf32>
      %1084 = arith.mulf %1083, %1081 : vector<32x128xf32>
      %1085 = vector.broadcast %13 : f32 to vector<32x128xf32>
      %1086 = arith.mulf %1085, %1081 : vector<32x128xf32>
      %1087 = arith.addf %1074, %1084 : vector<32x128xf32>
      %1088 = arith.addf %1075, %1086 : vector<32x128xf32>
      %1089 = vector.broadcast %6 : f32 to vector<32x128xf32>
      %1090 = arith.mulf %0, %1089 : vector<32x128xf32>
      %1091 = arith.subf %1019, %1090 : vector<32x128xf32>
      %1092 = arith.mulf %1091, %1091 : vector<32x128xf32>
      %1093 = arith.addf %1092, %1025 : vector<32x128xf32>
      %1094 = tpu.reciprocal %1093 {approx = true} : vector<32x128xf32> -> vector<32x128xf32>
      %1095 = vector.broadcast %14 : f32 to vector<32x128xf32>
      %1096 = arith.mulf %1095, %1091 : vector<32x128xf32>
      %1097 = arith.mulf %1096, %1094 : vector<32x128xf32>
      %1098 = vector.broadcast %14 : f32 to vector<32x128xf32>
      %1099 = arith.mulf %1098, %1094 : vector<32x128xf32>
      %1100 = arith.addf %1087, %1097 : vector<32x128xf32>
      %1101 = arith.addf %1088, %1099 : vector<32x128xf32>
      %1102 = vector.broadcast %7 : f32 to vector<32x128xf32>
      %1103 = arith.mulf %0, %1102 : vector<32x128xf32>
      %1104 = arith.subf %1019, %1103 : vector<32x128xf32>
      %1105 = arith.mulf %1104, %1104 : vector<32x128xf32>
      %1106 = arith.addf %1105, %1025 : vector<32x128xf32>
      %1107 = tpu.reciprocal %1106 {approx = true} : vector<32x128xf32> -> vector<32x128xf32>
      %1108 = vector.broadcast %15 : f32 to vector<32x128xf32>
      %1109 = arith.mulf %1108, %1104 : vector<32x128xf32>
      %1110 = arith.mulf %1109, %1107 : vector<32x128xf32>
      %1111 = vector.broadcast %15 : f32 to vector<32x128xf32>
      %1112 = arith.mulf %1111, %1107 : vector<32x128xf32>
      %1113 = arith.addf %1100, %1110 : vector<32x128xf32>
      %1114 = arith.addf %1101, %1112 : vector<32x128xf32>
      %1115 = vector.broadcast %8 : f32 to vector<32x128xf32>
      %1116 = arith.mulf %0, %1115 : vector<32x128xf32>
      %1117 = arith.subf %1019, %1116 : vector<32x128xf32>
      %1118 = arith.mulf %1117, %1117 : vector<32x128xf32>
      %1119 = arith.addf %1118, %1025 : vector<32x128xf32>
      %1120 = tpu.reciprocal %1119 {approx = true} : vector<32x128xf32> -> vector<32x128xf32>
      %1121 = vector.broadcast %16 : f32 to vector<32x128xf32>
      %1122 = arith.mulf %1121, %1117 : vector<32x128xf32>
      %1123 = arith.mulf %1122, %1120 : vector<32x128xf32>
      %1124 = vector.broadcast %16 : f32 to vector<32x128xf32>
      %1125 = arith.mulf %1124, %1120 : vector<32x128xf32>
      %1126 = arith.addf %1113, %1123 : vector<32x128xf32>
      %1127 = arith.addf %1114, %1125 : vector<32x128xf32>
      %1128 = vector.broadcast %cst_20 : f32 to vector<32x128xf32>
      %1129 = arith.addf %1128, %1126 : vector<32x128xf32>
      %1130 = arith.mulf %1024, %1127 : vector<32x128xf32>
      %cst_99 = arith.constant 0.000000e+00 : f32
      %1131 = vector.broadcast %cst_99 : f32 to vector<32x128xf32>
      %1132 = arith.subf %1131, %1130 : vector<32x128xf32>
      %1133 = arith.mulf %1129, %1129 : vector<32x128xf32>
      %1134 = arith.mulf %1132, %1132 : vector<32x128xf32>
      %1135 = arith.addf %1133, %1134 : vector<32x128xf32>
      %1136 = tpu.reciprocal %1135 {approx = true} : vector<32x128xf32> -> vector<32x128xf32>
      %1137 = arith.mulf %1129, %1136 : vector<32x128xf32>
      %1138 = arith.mulf %1132, %1136 : vector<32x128xf32>
      %cst_100 = arith.constant 0.000000e+00 : f32
      %1139 = vector.broadcast %cst_100 : f32 to vector<32x128xf32>
      %1140 = arith.subf %1139, %1138 : vector<32x128xf32>
      %1141 = arith.addf %1019, %1137 : vector<32x128xf32>
      %1142 = vector.broadcast %cst_21 : f32 to vector<32x128xf32>
      %1143 = arith.mulf %1142, %1141 : vector<32x128xf32>
      %1144 = arith.addf %1024, %1140 : vector<32x128xf32>
      %1145 = vector.broadcast %cst_21 : f32 to vector<32x128xf32>
      %1146 = arith.mulf %1145, %1144 : vector<32x128xf32>
      %1147 = vector.broadcast %cst_22 : f32 to vector<32x128xf32>
      %1148 = arith.minimumf %1146, %1147 : vector<32x128xf32>
      %1149 = arith.mulf %1148, %1148 : vector<32x128xf32>
      %1150 = vector.broadcast %1 : f32 to vector<32x128xf32>
      %1151 = arith.mulf %0, %1150 : vector<32x128xf32>
      %1152 = arith.subf %1143, %1151 : vector<32x128xf32>
      %1153 = arith.mulf %1152, %1152 : vector<32x128xf32>
      %1154 = arith.addf %1153, %1149 : vector<32x128xf32>
      %1155 = tpu.reciprocal %1154 {approx = true} : vector<32x128xf32> -> vector<32x128xf32>
      %1156 = vector.broadcast %9 : f32 to vector<32x128xf32>
      %1157 = arith.mulf %1156, %1152 : vector<32x128xf32>
      %1158 = arith.mulf %1157, %1155 : vector<32x128xf32>
      %1159 = vector.broadcast %9 : f32 to vector<32x128xf32>
      %1160 = arith.mulf %1159, %1155 : vector<32x128xf32>
      %1161 = vector.broadcast %2 : f32 to vector<32x128xf32>
      %1162 = arith.mulf %0, %1161 : vector<32x128xf32>
      %1163 = arith.subf %1143, %1162 : vector<32x128xf32>
      %1164 = arith.mulf %1163, %1163 : vector<32x128xf32>
      %1165 = arith.addf %1164, %1149 : vector<32x128xf32>
      %1166 = tpu.reciprocal %1165 {approx = true} : vector<32x128xf32> -> vector<32x128xf32>
      %1167 = vector.broadcast %10 : f32 to vector<32x128xf32>
      %1168 = arith.mulf %1167, %1163 : vector<32x128xf32>
      %1169 = arith.mulf %1168, %1166 : vector<32x128xf32>
      %1170 = vector.broadcast %10 : f32 to vector<32x128xf32>
      %1171 = arith.mulf %1170, %1166 : vector<32x128xf32>
      %1172 = arith.addf %1158, %1169 : vector<32x128xf32>
      %1173 = arith.addf %1160, %1171 : vector<32x128xf32>
      %1174 = vector.broadcast %3 : f32 to vector<32x128xf32>
      %1175 = arith.mulf %0, %1174 : vector<32x128xf32>
      %1176 = arith.subf %1143, %1175 : vector<32x128xf32>
      %1177 = arith.mulf %1176, %1176 : vector<32x128xf32>
      %1178 = arith.addf %1177, %1149 : vector<32x128xf32>
      %1179 = tpu.reciprocal %1178 {approx = true} : vector<32x128xf32> -> vector<32x128xf32>
      %1180 = vector.broadcast %11 : f32 to vector<32x128xf32>
      %1181 = arith.mulf %1180, %1176 : vector<32x128xf32>
      %1182 = arith.mulf %1181, %1179 : vector<32x128xf32>
      %1183 = vector.broadcast %11 : f32 to vector<32x128xf32>
      %1184 = arith.mulf %1183, %1179 : vector<32x128xf32>
      %1185 = arith.addf %1172, %1182 : vector<32x128xf32>
      %1186 = arith.addf %1173, %1184 : vector<32x128xf32>
      %1187 = vector.broadcast %4 : f32 to vector<32x128xf32>
      %1188 = arith.mulf %0, %1187 : vector<32x128xf32>
      %1189 = arith.subf %1143, %1188 : vector<32x128xf32>
      %1190 = arith.mulf %1189, %1189 : vector<32x128xf32>
      %1191 = arith.addf %1190, %1149 : vector<32x128xf32>
      %1192 = tpu.reciprocal %1191 {approx = true} : vector<32x128xf32> -> vector<32x128xf32>
      %1193 = vector.broadcast %12 : f32 to vector<32x128xf32>
      %1194 = arith.mulf %1193, %1189 : vector<32x128xf32>
      %1195 = arith.mulf %1194, %1192 : vector<32x128xf32>
      %1196 = vector.broadcast %12 : f32 to vector<32x128xf32>
      %1197 = arith.mulf %1196, %1192 : vector<32x128xf32>
      %1198 = arith.addf %1185, %1195 : vector<32x128xf32>
      %1199 = arith.addf %1186, %1197 : vector<32x128xf32>
      %1200 = vector.broadcast %5 : f32 to vector<32x128xf32>
      %1201 = arith.mulf %0, %1200 : vector<32x128xf32>
      %1202 = arith.subf %1143, %1201 : vector<32x128xf32>
      %1203 = arith.mulf %1202, %1202 : vector<32x128xf32>
      %1204 = arith.addf %1203, %1149 : vector<32x128xf32>
      %1205 = tpu.reciprocal %1204 {approx = true} : vector<32x128xf32> -> vector<32x128xf32>
      %1206 = vector.broadcast %13 : f32 to vector<32x128xf32>
      %1207 = arith.mulf %1206, %1202 : vector<32x128xf32>
      %1208 = arith.mulf %1207, %1205 : vector<32x128xf32>
      %1209 = vector.broadcast %13 : f32 to vector<32x128xf32>
      %1210 = arith.mulf %1209, %1205 : vector<32x128xf32>
      %1211 = arith.addf %1198, %1208 : vector<32x128xf32>
      %1212 = arith.addf %1199, %1210 : vector<32x128xf32>
      %1213 = vector.broadcast %6 : f32 to vector<32x128xf32>
      %1214 = arith.mulf %0, %1213 : vector<32x128xf32>
      %1215 = arith.subf %1143, %1214 : vector<32x128xf32>
      %1216 = arith.mulf %1215, %1215 : vector<32x128xf32>
      %1217 = arith.addf %1216, %1149 : vector<32x128xf32>
      %1218 = tpu.reciprocal %1217 {approx = true} : vector<32x128xf32> -> vector<32x128xf32>
      %1219 = vector.broadcast %14 : f32 to vector<32x128xf32>
      %1220 = arith.mulf %1219, %1215 : vector<32x128xf32>
      %1221 = arith.mulf %1220, %1218 : vector<32x128xf32>
      %1222 = vector.broadcast %14 : f32 to vector<32x128xf32>
      %1223 = arith.mulf %1222, %1218 : vector<32x128xf32>
      %1224 = arith.addf %1211, %1221 : vector<32x128xf32>
      %1225 = arith.addf %1212, %1223 : vector<32x128xf32>
      %1226 = vector.broadcast %7 : f32 to vector<32x128xf32>
      %1227 = arith.mulf %0, %1226 : vector<32x128xf32>
      %1228 = arith.subf %1143, %1227 : vector<32x128xf32>
      %1229 = arith.mulf %1228, %1228 : vector<32x128xf32>
      %1230 = arith.addf %1229, %1149 : vector<32x128xf32>
      %1231 = tpu.reciprocal %1230 {approx = true} : vector<32x128xf32> -> vector<32x128xf32>
      %1232 = vector.broadcast %15 : f32 to vector<32x128xf32>
      %1233 = arith.mulf %1232, %1228 : vector<32x128xf32>
      %1234 = arith.mulf %1233, %1231 : vector<32x128xf32>
      %1235 = vector.broadcast %15 : f32 to vector<32x128xf32>
      %1236 = arith.mulf %1235, %1231 : vector<32x128xf32>
      %1237 = arith.addf %1224, %1234 : vector<32x128xf32>
      %1238 = arith.addf %1225, %1236 : vector<32x128xf32>
      %1239 = vector.broadcast %8 : f32 to vector<32x128xf32>
      %1240 = arith.mulf %0, %1239 : vector<32x128xf32>
      %1241 = arith.subf %1143, %1240 : vector<32x128xf32>
      %1242 = arith.mulf %1241, %1241 : vector<32x128xf32>
      %1243 = arith.addf %1242, %1149 : vector<32x128xf32>
      %1244 = tpu.reciprocal %1243 {approx = true} : vector<32x128xf32> -> vector<32x128xf32>
      %1245 = vector.broadcast %16 : f32 to vector<32x128xf32>
      %1246 = arith.mulf %1245, %1241 : vector<32x128xf32>
      %1247 = arith.mulf %1246, %1244 : vector<32x128xf32>
      %1248 = vector.broadcast %16 : f32 to vector<32x128xf32>
      %1249 = arith.mulf %1248, %1244 : vector<32x128xf32>
      %1250 = arith.addf %1237, %1247 : vector<32x128xf32>
      %1251 = arith.addf %1238, %1249 : vector<32x128xf32>
      %1252 = vector.broadcast %cst_20 : f32 to vector<32x128xf32>
      %1253 = arith.addf %1252, %1250 : vector<32x128xf32>
      %1254 = arith.mulf %1148, %1251 : vector<32x128xf32>
      %cst_101 = arith.constant 0.000000e+00 : f32
      %1255 = vector.broadcast %cst_101 : f32 to vector<32x128xf32>
      %1256 = arith.subf %1255, %1254 : vector<32x128xf32>
      %1257 = arith.mulf %1253, %1253 : vector<32x128xf32>
      %1258 = arith.mulf %1256, %1256 : vector<32x128xf32>
      %1259 = arith.addf %1257, %1258 : vector<32x128xf32>
      %1260 = tpu.reciprocal %1259 {approx = true} : vector<32x128xf32> -> vector<32x128xf32>
      %1261 = arith.mulf %1253, %1260 : vector<32x128xf32>
      %1262 = arith.mulf %1256, %1260 : vector<32x128xf32>
      %cst_102 = arith.constant 0.000000e+00 : f32
      %1263 = vector.broadcast %cst_102 : f32 to vector<32x128xf32>
      %1264 = arith.subf %1263, %1262 : vector<32x128xf32>
      %1265 = arith.addf %1143, %1261 : vector<32x128xf32>
      %1266 = vector.broadcast %cst_21 : f32 to vector<32x128xf32>
      %1267 = arith.mulf %1266, %1265 : vector<32x128xf32>
      %1268 = arith.addf %1148, %1264 : vector<32x128xf32>
      %1269 = vector.broadcast %cst_21 : f32 to vector<32x128xf32>
      %1270 = arith.mulf %1269, %1268 : vector<32x128xf32>
      %1271 = vector.broadcast %cst_22 : f32 to vector<32x128xf32>
      %1272 = arith.minimumf %1270, %1271 : vector<32x128xf32>
      %1273 = arith.mulf %1272, %1272 : vector<32x128xf32>
      %1274 = vector.broadcast %1 : f32 to vector<32x128xf32>
      %1275 = arith.mulf %0, %1274 : vector<32x128xf32>
      %1276 = arith.subf %1267, %1275 : vector<32x128xf32>
      %1277 = arith.mulf %1276, %1276 : vector<32x128xf32>
      %1278 = arith.addf %1277, %1273 : vector<32x128xf32>
      %1279 = tpu.reciprocal %1278 {approx = true} : vector<32x128xf32> -> vector<32x128xf32>
      %1280 = vector.broadcast %9 : f32 to vector<32x128xf32>
      %1281 = arith.mulf %1280, %1276 : vector<32x128xf32>
      %1282 = arith.mulf %1281, %1279 : vector<32x128xf32>
      %1283 = vector.broadcast %9 : f32 to vector<32x128xf32>
      %1284 = arith.mulf %1283, %1279 : vector<32x128xf32>
      %1285 = vector.broadcast %2 : f32 to vector<32x128xf32>
      %1286 = arith.mulf %0, %1285 : vector<32x128xf32>
      %1287 = arith.subf %1267, %1286 : vector<32x128xf32>
      %1288 = arith.mulf %1287, %1287 : vector<32x128xf32>
      %1289 = arith.addf %1288, %1273 : vector<32x128xf32>
      %1290 = tpu.reciprocal %1289 {approx = true} : vector<32x128xf32> -> vector<32x128xf32>
      %1291 = vector.broadcast %10 : f32 to vector<32x128xf32>
      %1292 = arith.mulf %1291, %1287 : vector<32x128xf32>
      %1293 = arith.mulf %1292, %1290 : vector<32x128xf32>
      %1294 = vector.broadcast %10 : f32 to vector<32x128xf32>
      %1295 = arith.mulf %1294, %1290 : vector<32x128xf32>
      %1296 = arith.addf %1282, %1293 : vector<32x128xf32>
      %1297 = arith.addf %1284, %1295 : vector<32x128xf32>
      %1298 = vector.broadcast %3 : f32 to vector<32x128xf32>
      %1299 = arith.mulf %0, %1298 : vector<32x128xf32>
      %1300 = arith.subf %1267, %1299 : vector<32x128xf32>
      %1301 = arith.mulf %1300, %1300 : vector<32x128xf32>
      %1302 = arith.addf %1301, %1273 : vector<32x128xf32>
      %1303 = tpu.reciprocal %1302 {approx = true} : vector<32x128xf32> -> vector<32x128xf32>
      %1304 = vector.broadcast %11 : f32 to vector<32x128xf32>
      %1305 = arith.mulf %1304, %1300 : vector<32x128xf32>
      %1306 = arith.mulf %1305, %1303 : vector<32x128xf32>
      %1307 = vector.broadcast %11 : f32 to vector<32x128xf32>
      %1308 = arith.mulf %1307, %1303 : vector<32x128xf32>
      %1309 = arith.addf %1296, %1306 : vector<32x128xf32>
      %1310 = arith.addf %1297, %1308 : vector<32x128xf32>
      %1311 = vector.broadcast %4 : f32 to vector<32x128xf32>
      %1312 = arith.mulf %0, %1311 : vector<32x128xf32>
      %1313 = arith.subf %1267, %1312 : vector<32x128xf32>
      %1314 = arith.mulf %1313, %1313 : vector<32x128xf32>
      %1315 = arith.addf %1314, %1273 : vector<32x128xf32>
      %1316 = tpu.reciprocal %1315 {approx = true} : vector<32x128xf32> -> vector<32x128xf32>
      %1317 = vector.broadcast %12 : f32 to vector<32x128xf32>
      %1318 = arith.mulf %1317, %1313 : vector<32x128xf32>
      %1319 = arith.mulf %1318, %1316 : vector<32x128xf32>
      %1320 = vector.broadcast %12 : f32 to vector<32x128xf32>
      %1321 = arith.mulf %1320, %1316 : vector<32x128xf32>
      %1322 = arith.addf %1309, %1319 : vector<32x128xf32>
      %1323 = arith.addf %1310, %1321 : vector<32x128xf32>
      %1324 = vector.broadcast %5 : f32 to vector<32x128xf32>
      %1325 = arith.mulf %0, %1324 : vector<32x128xf32>
      %1326 = arith.subf %1267, %1325 : vector<32x128xf32>
      %1327 = arith.mulf %1326, %1326 : vector<32x128xf32>
      %1328 = arith.addf %1327, %1273 : vector<32x128xf32>
      %1329 = tpu.reciprocal %1328 {approx = true} : vector<32x128xf32> -> vector<32x128xf32>
      %1330 = vector.broadcast %13 : f32 to vector<32x128xf32>
      %1331 = arith.mulf %1330, %1326 : vector<32x128xf32>
      %1332 = arith.mulf %1331, %1329 : vector<32x128xf32>
      %1333 = vector.broadcast %13 : f32 to vector<32x128xf32>
      %1334 = arith.mulf %1333, %1329 : vector<32x128xf32>
      %1335 = arith.addf %1322, %1332 : vector<32x128xf32>
      %1336 = arith.addf %1323, %1334 : vector<32x128xf32>
      %1337 = vector.broadcast %6 : f32 to vector<32x128xf32>
      %1338 = arith.mulf %0, %1337 : vector<32x128xf32>
      %1339 = arith.subf %1267, %1338 : vector<32x128xf32>
      %1340 = arith.mulf %1339, %1339 : vector<32x128xf32>
      %1341 = arith.addf %1340, %1273 : vector<32x128xf32>
      %1342 = tpu.reciprocal %1341 {approx = true} : vector<32x128xf32> -> vector<32x128xf32>
      %1343 = vector.broadcast %14 : f32 to vector<32x128xf32>
      %1344 = arith.mulf %1343, %1339 : vector<32x128xf32>
      %1345 = arith.mulf %1344, %1342 : vector<32x128xf32>
      %1346 = vector.broadcast %14 : f32 to vector<32x128xf32>
      %1347 = arith.mulf %1346, %1342 : vector<32x128xf32>
      %1348 = arith.addf %1335, %1345 : vector<32x128xf32>
      %1349 = arith.addf %1336, %1347 : vector<32x128xf32>
      %1350 = vector.broadcast %7 : f32 to vector<32x128xf32>
      %1351 = arith.mulf %0, %1350 : vector<32x128xf32>
      %1352 = arith.subf %1267, %1351 : vector<32x128xf32>
      %1353 = arith.mulf %1352, %1352 : vector<32x128xf32>
      %1354 = arith.addf %1353, %1273 : vector<32x128xf32>
      %1355 = tpu.reciprocal %1354 {approx = true} : vector<32x128xf32> -> vector<32x128xf32>
      %1356 = vector.broadcast %15 : f32 to vector<32x128xf32>
      %1357 = arith.mulf %1356, %1352 : vector<32x128xf32>
      %1358 = arith.mulf %1357, %1355 : vector<32x128xf32>
      %1359 = vector.broadcast %15 : f32 to vector<32x128xf32>
      %1360 = arith.mulf %1359, %1355 : vector<32x128xf32>
      %1361 = arith.addf %1348, %1358 : vector<32x128xf32>
      %1362 = arith.addf %1349, %1360 : vector<32x128xf32>
      %1363 = vector.broadcast %8 : f32 to vector<32x128xf32>
      %1364 = arith.mulf %0, %1363 : vector<32x128xf32>
      %1365 = arith.subf %1267, %1364 : vector<32x128xf32>
      %1366 = arith.mulf %1365, %1365 : vector<32x128xf32>
      %1367 = arith.addf %1366, %1273 : vector<32x128xf32>
      %1368 = tpu.reciprocal %1367 {approx = true} : vector<32x128xf32> -> vector<32x128xf32>
      %1369 = vector.broadcast %16 : f32 to vector<32x128xf32>
      %1370 = arith.mulf %1369, %1365 : vector<32x128xf32>
      %1371 = arith.mulf %1370, %1368 : vector<32x128xf32>
      %1372 = vector.broadcast %16 : f32 to vector<32x128xf32>
      %1373 = arith.mulf %1372, %1368 : vector<32x128xf32>
      %1374 = arith.addf %1361, %1371 : vector<32x128xf32>
      %1375 = arith.addf %1362, %1373 : vector<32x128xf32>
      %1376 = vector.broadcast %cst_20 : f32 to vector<32x128xf32>
      %1377 = arith.addf %1376, %1374 : vector<32x128xf32>
      %1378 = arith.mulf %1272, %1375 : vector<32x128xf32>
      %cst_103 = arith.constant 0.000000e+00 : f32
      %1379 = vector.broadcast %cst_103 : f32 to vector<32x128xf32>
      %1380 = arith.subf %1379, %1378 : vector<32x128xf32>
      %1381 = arith.mulf %1377, %1377 : vector<32x128xf32>
      %1382 = arith.mulf %1380, %1380 : vector<32x128xf32>
      %1383 = arith.addf %1381, %1382 : vector<32x128xf32>
      %1384 = tpu.reciprocal %1383 {approx = true} : vector<32x128xf32> -> vector<32x128xf32>
      %1385 = arith.mulf %1377, %1384 : vector<32x128xf32>
      %1386 = arith.mulf %1380, %1384 : vector<32x128xf32>
      %cst_104 = arith.constant 0.000000e+00 : f32
      %1387 = vector.broadcast %cst_104 : f32 to vector<32x128xf32>
      %1388 = arith.subf %1387, %1386 : vector<32x128xf32>
      %1389 = arith.addf %1267, %1385 : vector<32x128xf32>
      %1390 = vector.broadcast %cst_21 : f32 to vector<32x128xf32>
      %1391 = arith.mulf %1390, %1389 : vector<32x128xf32>
      %1392 = arith.addf %1272, %1388 : vector<32x128xf32>
      %1393 = vector.broadcast %cst_21 : f32 to vector<32x128xf32>
      %1394 = arith.mulf %1393, %1392 : vector<32x128xf32>
      %1395 = vector.broadcast %cst_22 : f32 to vector<32x128xf32>
      %1396 = arith.minimumf %1394, %1395 : vector<32x128xf32>
      %1397 = arith.mulf %1396, %1396 : vector<32x128xf32>
      %1398 = vector.broadcast %1 : f32 to vector<32x128xf32>
      %1399 = arith.mulf %0, %1398 : vector<32x128xf32>
      %1400 = arith.subf %1391, %1399 : vector<32x128xf32>
      %1401 = arith.mulf %1400, %1400 : vector<32x128xf32>
      %1402 = arith.addf %1401, %1397 : vector<32x128xf32>
      %1403 = tpu.reciprocal %1402 {approx = true} : vector<32x128xf32> -> vector<32x128xf32>
      %1404 = vector.broadcast %9 : f32 to vector<32x128xf32>
      %1405 = arith.mulf %1404, %1400 : vector<32x128xf32>
      %1406 = arith.mulf %1405, %1403 : vector<32x128xf32>
      %1407 = vector.broadcast %9 : f32 to vector<32x128xf32>
      %1408 = arith.mulf %1407, %1403 : vector<32x128xf32>
      %1409 = vector.broadcast %2 : f32 to vector<32x128xf32>
      %1410 = arith.mulf %0, %1409 : vector<32x128xf32>
      %1411 = arith.subf %1391, %1410 : vector<32x128xf32>
      %1412 = arith.mulf %1411, %1411 : vector<32x128xf32>
      %1413 = arith.addf %1412, %1397 : vector<32x128xf32>
      %1414 = tpu.reciprocal %1413 {approx = true} : vector<32x128xf32> -> vector<32x128xf32>
      %1415 = vector.broadcast %10 : f32 to vector<32x128xf32>
      %1416 = arith.mulf %1415, %1411 : vector<32x128xf32>
      %1417 = arith.mulf %1416, %1414 : vector<32x128xf32>
      %1418 = vector.broadcast %10 : f32 to vector<32x128xf32>
      %1419 = arith.mulf %1418, %1414 : vector<32x128xf32>
      %1420 = arith.addf %1406, %1417 : vector<32x128xf32>
      %1421 = arith.addf %1408, %1419 : vector<32x128xf32>
      %1422 = vector.broadcast %3 : f32 to vector<32x128xf32>
      %1423 = arith.mulf %0, %1422 : vector<32x128xf32>
      %1424 = arith.subf %1391, %1423 : vector<32x128xf32>
      %1425 = arith.mulf %1424, %1424 : vector<32x128xf32>
      %1426 = arith.addf %1425, %1397 : vector<32x128xf32>
      %1427 = tpu.reciprocal %1426 {approx = true} : vector<32x128xf32> -> vector<32x128xf32>
      %1428 = vector.broadcast %11 : f32 to vector<32x128xf32>
      %1429 = arith.mulf %1428, %1424 : vector<32x128xf32>
      %1430 = arith.mulf %1429, %1427 : vector<32x128xf32>
      %1431 = vector.broadcast %11 : f32 to vector<32x128xf32>
      %1432 = arith.mulf %1431, %1427 : vector<32x128xf32>
      %1433 = arith.addf %1420, %1430 : vector<32x128xf32>
      %1434 = arith.addf %1421, %1432 : vector<32x128xf32>
      %1435 = vector.broadcast %4 : f32 to vector<32x128xf32>
      %1436 = arith.mulf %0, %1435 : vector<32x128xf32>
      %1437 = arith.subf %1391, %1436 : vector<32x128xf32>
      %1438 = arith.mulf %1437, %1437 : vector<32x128xf32>
      %1439 = arith.addf %1438, %1397 : vector<32x128xf32>
      %1440 = tpu.reciprocal %1439 {approx = true} : vector<32x128xf32> -> vector<32x128xf32>
      %1441 = vector.broadcast %12 : f32 to vector<32x128xf32>
      %1442 = arith.mulf %1441, %1437 : vector<32x128xf32>
      %1443 = arith.mulf %1442, %1440 : vector<32x128xf32>
      %1444 = vector.broadcast %12 : f32 to vector<32x128xf32>
      %1445 = arith.mulf %1444, %1440 : vector<32x128xf32>
      %1446 = arith.addf %1433, %1443 : vector<32x128xf32>
      %1447 = arith.addf %1434, %1445 : vector<32x128xf32>
      %1448 = vector.broadcast %5 : f32 to vector<32x128xf32>
      %1449 = arith.mulf %0, %1448 : vector<32x128xf32>
      %1450 = arith.subf %1391, %1449 : vector<32x128xf32>
      %1451 = arith.mulf %1450, %1450 : vector<32x128xf32>
      %1452 = arith.addf %1451, %1397 : vector<32x128xf32>
      %1453 = tpu.reciprocal %1452 {approx = true} : vector<32x128xf32> -> vector<32x128xf32>
      %1454 = vector.broadcast %13 : f32 to vector<32x128xf32>
      %1455 = arith.mulf %1454, %1450 : vector<32x128xf32>
      %1456 = arith.mulf %1455, %1453 : vector<32x128xf32>
      %1457 = vector.broadcast %13 : f32 to vector<32x128xf32>
      %1458 = arith.mulf %1457, %1453 : vector<32x128xf32>
      %1459 = arith.addf %1446, %1456 : vector<32x128xf32>
      %1460 = arith.addf %1447, %1458 : vector<32x128xf32>
      %1461 = vector.broadcast %6 : f32 to vector<32x128xf32>
      %1462 = arith.mulf %0, %1461 : vector<32x128xf32>
      %1463 = arith.subf %1391, %1462 : vector<32x128xf32>
      %1464 = arith.mulf %1463, %1463 : vector<32x128xf32>
      %1465 = arith.addf %1464, %1397 : vector<32x128xf32>
      %1466 = tpu.reciprocal %1465 {approx = true} : vector<32x128xf32> -> vector<32x128xf32>
      %1467 = vector.broadcast %14 : f32 to vector<32x128xf32>
      %1468 = arith.mulf %1467, %1463 : vector<32x128xf32>
      %1469 = arith.mulf %1468, %1466 : vector<32x128xf32>
      %1470 = vector.broadcast %14 : f32 to vector<32x128xf32>
      %1471 = arith.mulf %1470, %1466 : vector<32x128xf32>
      %1472 = arith.addf %1459, %1469 : vector<32x128xf32>
      %1473 = arith.addf %1460, %1471 : vector<32x128xf32>
      %1474 = vector.broadcast %7 : f32 to vector<32x128xf32>
      %1475 = arith.mulf %0, %1474 : vector<32x128xf32>
      %1476 = arith.subf %1391, %1475 : vector<32x128xf32>
      %1477 = arith.mulf %1476, %1476 : vector<32x128xf32>
      %1478 = arith.addf %1477, %1397 : vector<32x128xf32>
      %1479 = tpu.reciprocal %1478 {approx = true} : vector<32x128xf32> -> vector<32x128xf32>
      %1480 = vector.broadcast %15 : f32 to vector<32x128xf32>
      %1481 = arith.mulf %1480, %1476 : vector<32x128xf32>
      %1482 = arith.mulf %1481, %1479 : vector<32x128xf32>
      %1483 = vector.broadcast %15 : f32 to vector<32x128xf32>
      %1484 = arith.mulf %1483, %1479 : vector<32x128xf32>
      %1485 = arith.addf %1472, %1482 : vector<32x128xf32>
      %1486 = arith.addf %1473, %1484 : vector<32x128xf32>
      %1487 = vector.broadcast %8 : f32 to vector<32x128xf32>
      %1488 = arith.mulf %0, %1487 : vector<32x128xf32>
      %1489 = arith.subf %1391, %1488 : vector<32x128xf32>
      %1490 = arith.mulf %1489, %1489 : vector<32x128xf32>
      %1491 = arith.addf %1490, %1397 : vector<32x128xf32>
      %1492 = tpu.reciprocal %1491 {approx = true} : vector<32x128xf32> -> vector<32x128xf32>
      %1493 = vector.broadcast %16 : f32 to vector<32x128xf32>
      %1494 = arith.mulf %1493, %1489 : vector<32x128xf32>
      %1495 = arith.mulf %1494, %1492 : vector<32x128xf32>
      %1496 = vector.broadcast %16 : f32 to vector<32x128xf32>
      %1497 = arith.mulf %1496, %1492 : vector<32x128xf32>
      %1498 = arith.addf %1485, %1495 : vector<32x128xf32>
      %1499 = arith.addf %1486, %1497 : vector<32x128xf32>
      %1500 = vector.broadcast %cst_20 : f32 to vector<32x128xf32>
      %1501 = arith.addf %1500, %1498 : vector<32x128xf32>
      %1502 = arith.mulf %1396, %1499 : vector<32x128xf32>
      %cst_105 = arith.constant 0.000000e+00 : f32
      %1503 = vector.broadcast %cst_105 : f32 to vector<32x128xf32>
      %1504 = arith.subf %1503, %1502 : vector<32x128xf32>
      %1505 = arith.mulf %1501, %1501 : vector<32x128xf32>
      %1506 = arith.mulf %1504, %1504 : vector<32x128xf32>
      %1507 = arith.addf %1505, %1506 : vector<32x128xf32>
      %1508 = tpu.reciprocal %1507 {approx = true} : vector<32x128xf32> -> vector<32x128xf32>
      %1509 = arith.mulf %1501, %1508 : vector<32x128xf32>
      %1510 = arith.mulf %1504, %1508 : vector<32x128xf32>
      %cst_106 = arith.constant 0.000000e+00 : f32
      %1511 = vector.broadcast %cst_106 : f32 to vector<32x128xf32>
      %1512 = arith.subf %1511, %1510 : vector<32x128xf32>
      %1513 = arith.addf %1391, %1509 : vector<32x128xf32>
      %1514 = vector.broadcast %cst_21 : f32 to vector<32x128xf32>
      %1515 = arith.mulf %1514, %1513 : vector<32x128xf32>
      %1516 = arith.addf %1396, %1512 : vector<32x128xf32>
      %1517 = vector.broadcast %cst_21 : f32 to vector<32x128xf32>
      %1518 = arith.mulf %1517, %1516 : vector<32x128xf32>
      %1519 = vector.broadcast %cst_22 : f32 to vector<32x128xf32>
      %1520 = arith.minimumf %1518, %1519 : vector<32x128xf32>
      %1521 = arith.mulf %1520, %1520 : vector<32x128xf32>
      %1522 = vector.broadcast %1 : f32 to vector<32x128xf32>
      %1523 = arith.mulf %0, %1522 : vector<32x128xf32>
      %1524 = arith.subf %1515, %1523 : vector<32x128xf32>
      %1525 = arith.mulf %1524, %1524 : vector<32x128xf32>
      %1526 = arith.addf %1525, %1521 : vector<32x128xf32>
      %1527 = tpu.reciprocal %1526 {approx = true} : vector<32x128xf32> -> vector<32x128xf32>
      %1528 = vector.broadcast %9 : f32 to vector<32x128xf32>
      %1529 = arith.mulf %1528, %1524 : vector<32x128xf32>
      %1530 = arith.mulf %1529, %1527 : vector<32x128xf32>
      %1531 = vector.broadcast %9 : f32 to vector<32x128xf32>
      %1532 = arith.mulf %1531, %1527 : vector<32x128xf32>
      %1533 = vector.broadcast %2 : f32 to vector<32x128xf32>
      %1534 = arith.mulf %0, %1533 : vector<32x128xf32>
      %1535 = arith.subf %1515, %1534 : vector<32x128xf32>
      %1536 = arith.mulf %1535, %1535 : vector<32x128xf32>
      %1537 = arith.addf %1536, %1521 : vector<32x128xf32>
      %1538 = tpu.reciprocal %1537 {approx = true} : vector<32x128xf32> -> vector<32x128xf32>
      %1539 = vector.broadcast %10 : f32 to vector<32x128xf32>
      %1540 = arith.mulf %1539, %1535 : vector<32x128xf32>
      %1541 = arith.mulf %1540, %1538 : vector<32x128xf32>
      %1542 = vector.broadcast %10 : f32 to vector<32x128xf32>
      %1543 = arith.mulf %1542, %1538 : vector<32x128xf32>
      %1544 = arith.addf %1530, %1541 : vector<32x128xf32>
      %1545 = arith.addf %1532, %1543 : vector<32x128xf32>
      %1546 = vector.broadcast %3 : f32 to vector<32x128xf32>
      %1547 = arith.mulf %0, %1546 : vector<32x128xf32>
      %1548 = arith.subf %1515, %1547 : vector<32x128xf32>
      %1549 = arith.mulf %1548, %1548 : vector<32x128xf32>
      %1550 = arith.addf %1549, %1521 : vector<32x128xf32>
      %1551 = tpu.reciprocal %1550 {approx = true} : vector<32x128xf32> -> vector<32x128xf32>
      %1552 = vector.broadcast %11 : f32 to vector<32x128xf32>
      %1553 = arith.mulf %1552, %1548 : vector<32x128xf32>
      %1554 = arith.mulf %1553, %1551 : vector<32x128xf32>
      %1555 = vector.broadcast %11 : f32 to vector<32x128xf32>
      %1556 = arith.mulf %1555, %1551 : vector<32x128xf32>
      %1557 = arith.addf %1544, %1554 : vector<32x128xf32>
      %1558 = arith.addf %1545, %1556 : vector<32x128xf32>
      %1559 = vector.broadcast %4 : f32 to vector<32x128xf32>
      %1560 = arith.mulf %0, %1559 : vector<32x128xf32>
      %1561 = arith.subf %1515, %1560 : vector<32x128xf32>
      %1562 = arith.mulf %1561, %1561 : vector<32x128xf32>
      %1563 = arith.addf %1562, %1521 : vector<32x128xf32>
      %1564 = tpu.reciprocal %1563 {approx = true} : vector<32x128xf32> -> vector<32x128xf32>
      %1565 = vector.broadcast %12 : f32 to vector<32x128xf32>
      %1566 = arith.mulf %1565, %1561 : vector<32x128xf32>
      %1567 = arith.mulf %1566, %1564 : vector<32x128xf32>
      %1568 = vector.broadcast %12 : f32 to vector<32x128xf32>
      %1569 = arith.mulf %1568, %1564 : vector<32x128xf32>
      %1570 = arith.addf %1557, %1567 : vector<32x128xf32>
      %1571 = arith.addf %1558, %1569 : vector<32x128xf32>
      %1572 = vector.broadcast %5 : f32 to vector<32x128xf32>
      %1573 = arith.mulf %0, %1572 : vector<32x128xf32>
      %1574 = arith.subf %1515, %1573 : vector<32x128xf32>
      %1575 = arith.mulf %1574, %1574 : vector<32x128xf32>
      %1576 = arith.addf %1575, %1521 : vector<32x128xf32>
      %1577 = tpu.reciprocal %1576 {approx = true} : vector<32x128xf32> -> vector<32x128xf32>
      %1578 = vector.broadcast %13 : f32 to vector<32x128xf32>
      %1579 = arith.mulf %1578, %1574 : vector<32x128xf32>
      %1580 = arith.mulf %1579, %1577 : vector<32x128xf32>
      %1581 = vector.broadcast %13 : f32 to vector<32x128xf32>
      %1582 = arith.mulf %1581, %1577 : vector<32x128xf32>
      %1583 = arith.addf %1570, %1580 : vector<32x128xf32>
      %1584 = arith.addf %1571, %1582 : vector<32x128xf32>
      %1585 = vector.broadcast %6 : f32 to vector<32x128xf32>
      %1586 = arith.mulf %0, %1585 : vector<32x128xf32>
      %1587 = arith.subf %1515, %1586 : vector<32x128xf32>
      %1588 = arith.mulf %1587, %1587 : vector<32x128xf32>
      %1589 = arith.addf %1588, %1521 : vector<32x128xf32>
      %1590 = tpu.reciprocal %1589 {approx = true} : vector<32x128xf32> -> vector<32x128xf32>
      %1591 = vector.broadcast %14 : f32 to vector<32x128xf32>
      %1592 = arith.mulf %1591, %1587 : vector<32x128xf32>
      %1593 = arith.mulf %1592, %1590 : vector<32x128xf32>
      %1594 = vector.broadcast %14 : f32 to vector<32x128xf32>
      %1595 = arith.mulf %1594, %1590 : vector<32x128xf32>
      %1596 = arith.addf %1583, %1593 : vector<32x128xf32>
      %1597 = arith.addf %1584, %1595 : vector<32x128xf32>
      %1598 = vector.broadcast %7 : f32 to vector<32x128xf32>
      %1599 = arith.mulf %0, %1598 : vector<32x128xf32>
      %1600 = arith.subf %1515, %1599 : vector<32x128xf32>
      %1601 = arith.mulf %1600, %1600 : vector<32x128xf32>
      %1602 = arith.addf %1601, %1521 : vector<32x128xf32>
      %1603 = tpu.reciprocal %1602 {approx = true} : vector<32x128xf32> -> vector<32x128xf32>
      %1604 = vector.broadcast %15 : f32 to vector<32x128xf32>
      %1605 = arith.mulf %1604, %1600 : vector<32x128xf32>
      %1606 = arith.mulf %1605, %1603 : vector<32x128xf32>
      %1607 = vector.broadcast %15 : f32 to vector<32x128xf32>
      %1608 = arith.mulf %1607, %1603 : vector<32x128xf32>
      %1609 = arith.addf %1596, %1606 : vector<32x128xf32>
      %1610 = arith.addf %1597, %1608 : vector<32x128xf32>
      %1611 = vector.broadcast %8 : f32 to vector<32x128xf32>
      %1612 = arith.mulf %0, %1611 : vector<32x128xf32>
      %1613 = arith.subf %1515, %1612 : vector<32x128xf32>
      %1614 = arith.mulf %1613, %1613 : vector<32x128xf32>
      %1615 = arith.addf %1614, %1521 : vector<32x128xf32>
      %1616 = tpu.reciprocal %1615 {approx = true} : vector<32x128xf32> -> vector<32x128xf32>
      %1617 = vector.broadcast %16 : f32 to vector<32x128xf32>
      %1618 = arith.mulf %1617, %1613 : vector<32x128xf32>
      %1619 = arith.mulf %1618, %1616 : vector<32x128xf32>
      %1620 = vector.broadcast %16 : f32 to vector<32x128xf32>
      %1621 = arith.mulf %1620, %1616 : vector<32x128xf32>
      %1622 = arith.addf %1609, %1619 : vector<32x128xf32>
      %1623 = arith.addf %1610, %1621 : vector<32x128xf32>
      %1624 = vector.broadcast %cst_20 : f32 to vector<32x128xf32>
      %1625 = arith.addf %1624, %1622 : vector<32x128xf32>
      %1626 = arith.mulf %1520, %1623 : vector<32x128xf32>
      %cst_107 = arith.constant 0.000000e+00 : f32
      %1627 = vector.broadcast %cst_107 : f32 to vector<32x128xf32>
      %1628 = arith.subf %1627, %1626 : vector<32x128xf32>
      %1629 = arith.mulf %1625, %1625 : vector<32x128xf32>
      %1630 = arith.mulf %1628, %1628 : vector<32x128xf32>
      %1631 = arith.addf %1629, %1630 : vector<32x128xf32>
      %1632 = tpu.reciprocal %1631 {approx = true} : vector<32x128xf32> -> vector<32x128xf32>
      %1633 = arith.mulf %1625, %1632 : vector<32x128xf32>
      %1634 = arith.mulf %1628, %1632 : vector<32x128xf32>
      %cst_108 = arith.constant 0.000000e+00 : f32
      %1635 = vector.broadcast %cst_108 : f32 to vector<32x128xf32>
      %1636 = arith.subf %1635, %1634 : vector<32x128xf32>
      %1637 = arith.addf %1515, %1633 : vector<32x128xf32>
      %1638 = vector.broadcast %cst_21 : f32 to vector<32x128xf32>
      %1639 = arith.mulf %1638, %1637 : vector<32x128xf32>
      %1640 = arith.addf %1520, %1636 : vector<32x128xf32>
      %1641 = vector.broadcast %cst_21 : f32 to vector<32x128xf32>
      %1642 = arith.mulf %1641, %1640 : vector<32x128xf32>
      %1643 = vector.broadcast %cst_22 : f32 to vector<32x128xf32>
      %1644 = arith.minimumf %1642, %1643 : vector<32x128xf32>
      %1645 = arith.mulf %1644, %1644 : vector<32x128xf32>
      %1646 = vector.broadcast %1 : f32 to vector<32x128xf32>
      %1647 = arith.mulf %0, %1646 : vector<32x128xf32>
      %1648 = arith.subf %1639, %1647 : vector<32x128xf32>
      %1649 = arith.mulf %1648, %1648 : vector<32x128xf32>
      %1650 = arith.addf %1649, %1645 : vector<32x128xf32>
      %1651 = tpu.reciprocal %1650 {approx = true} : vector<32x128xf32> -> vector<32x128xf32>
      %1652 = vector.broadcast %9 : f32 to vector<32x128xf32>
      %1653 = arith.mulf %1652, %1648 : vector<32x128xf32>
      %1654 = arith.mulf %1653, %1651 : vector<32x128xf32>
      %1655 = vector.broadcast %9 : f32 to vector<32x128xf32>
      %1656 = arith.mulf %1655, %1651 : vector<32x128xf32>
      %1657 = vector.broadcast %2 : f32 to vector<32x128xf32>
      %1658 = arith.mulf %0, %1657 : vector<32x128xf32>
      %1659 = arith.subf %1639, %1658 : vector<32x128xf32>
      %1660 = arith.mulf %1659, %1659 : vector<32x128xf32>
      %1661 = arith.addf %1660, %1645 : vector<32x128xf32>
      %1662 = tpu.reciprocal %1661 {approx = true} : vector<32x128xf32> -> vector<32x128xf32>
      %1663 = vector.broadcast %10 : f32 to vector<32x128xf32>
      %1664 = arith.mulf %1663, %1659 : vector<32x128xf32>
      %1665 = arith.mulf %1664, %1662 : vector<32x128xf32>
      %1666 = vector.broadcast %10 : f32 to vector<32x128xf32>
      %1667 = arith.mulf %1666, %1662 : vector<32x128xf32>
      %1668 = arith.addf %1654, %1665 : vector<32x128xf32>
      %1669 = arith.addf %1656, %1667 : vector<32x128xf32>
      %1670 = vector.broadcast %3 : f32 to vector<32x128xf32>
      %1671 = arith.mulf %0, %1670 : vector<32x128xf32>
      %1672 = arith.subf %1639, %1671 : vector<32x128xf32>
      %1673 = arith.mulf %1672, %1672 : vector<32x128xf32>
      %1674 = arith.addf %1673, %1645 : vector<32x128xf32>
      %1675 = tpu.reciprocal %1674 {approx = true} : vector<32x128xf32> -> vector<32x128xf32>
      %1676 = vector.broadcast %11 : f32 to vector<32x128xf32>
      %1677 = arith.mulf %1676, %1672 : vector<32x128xf32>
      %1678 = arith.mulf %1677, %1675 : vector<32x128xf32>
      %1679 = vector.broadcast %11 : f32 to vector<32x128xf32>
      %1680 = arith.mulf %1679, %1675 : vector<32x128xf32>
      %1681 = arith.addf %1668, %1678 : vector<32x128xf32>
      %1682 = arith.addf %1669, %1680 : vector<32x128xf32>
      %1683 = vector.broadcast %4 : f32 to vector<32x128xf32>
      %1684 = arith.mulf %0, %1683 : vector<32x128xf32>
      %1685 = arith.subf %1639, %1684 : vector<32x128xf32>
      %1686 = arith.mulf %1685, %1685 : vector<32x128xf32>
      %1687 = arith.addf %1686, %1645 : vector<32x128xf32>
      %1688 = tpu.reciprocal %1687 {approx = true} : vector<32x128xf32> -> vector<32x128xf32>
      %1689 = vector.broadcast %12 : f32 to vector<32x128xf32>
      %1690 = arith.mulf %1689, %1685 : vector<32x128xf32>
      %1691 = arith.mulf %1690, %1688 : vector<32x128xf32>
      %1692 = vector.broadcast %12 : f32 to vector<32x128xf32>
      %1693 = arith.mulf %1692, %1688 : vector<32x128xf32>
      %1694 = arith.addf %1681, %1691 : vector<32x128xf32>
      %1695 = arith.addf %1682, %1693 : vector<32x128xf32>
      %1696 = vector.broadcast %5 : f32 to vector<32x128xf32>
      %1697 = arith.mulf %0, %1696 : vector<32x128xf32>
      %1698 = arith.subf %1639, %1697 : vector<32x128xf32>
      %1699 = arith.mulf %1698, %1698 : vector<32x128xf32>
      %1700 = arith.addf %1699, %1645 : vector<32x128xf32>
      %1701 = tpu.reciprocal %1700 {approx = true} : vector<32x128xf32> -> vector<32x128xf32>
      %1702 = vector.broadcast %13 : f32 to vector<32x128xf32>
      %1703 = arith.mulf %1702, %1698 : vector<32x128xf32>
      %1704 = arith.mulf %1703, %1701 : vector<32x128xf32>
      %1705 = vector.broadcast %13 : f32 to vector<32x128xf32>
      %1706 = arith.mulf %1705, %1701 : vector<32x128xf32>
      %1707 = arith.addf %1694, %1704 : vector<32x128xf32>
      %1708 = arith.addf %1695, %1706 : vector<32x128xf32>
      %1709 = vector.broadcast %6 : f32 to vector<32x128xf32>
      %1710 = arith.mulf %0, %1709 : vector<32x128xf32>
      %1711 = arith.subf %1639, %1710 : vector<32x128xf32>
      %1712 = arith.mulf %1711, %1711 : vector<32x128xf32>
      %1713 = arith.addf %1712, %1645 : vector<32x128xf32>
      %1714 = tpu.reciprocal %1713 {approx = true} : vector<32x128xf32> -> vector<32x128xf32>
      %1715 = vector.broadcast %14 : f32 to vector<32x128xf32>
      %1716 = arith.mulf %1715, %1711 : vector<32x128xf32>
      %1717 = arith.mulf %1716, %1714 : vector<32x128xf32>
      %1718 = vector.broadcast %14 : f32 to vector<32x128xf32>
      %1719 = arith.mulf %1718, %1714 : vector<32x128xf32>
      %1720 = arith.addf %1707, %1717 : vector<32x128xf32>
      %1721 = arith.addf %1708, %1719 : vector<32x128xf32>
      %1722 = vector.broadcast %7 : f32 to vector<32x128xf32>
      %1723 = arith.mulf %0, %1722 : vector<32x128xf32>
      %1724 = arith.subf %1639, %1723 : vector<32x128xf32>
      %1725 = arith.mulf %1724, %1724 : vector<32x128xf32>
      %1726 = arith.addf %1725, %1645 : vector<32x128xf32>
      %1727 = tpu.reciprocal %1726 {approx = true} : vector<32x128xf32> -> vector<32x128xf32>
      %1728 = vector.broadcast %15 : f32 to vector<32x128xf32>
      %1729 = arith.mulf %1728, %1724 : vector<32x128xf32>
      %1730 = arith.mulf %1729, %1727 : vector<32x128xf32>
      %1731 = vector.broadcast %15 : f32 to vector<32x128xf32>
      %1732 = arith.mulf %1731, %1727 : vector<32x128xf32>
      %1733 = arith.addf %1720, %1730 : vector<32x128xf32>
      %1734 = arith.addf %1721, %1732 : vector<32x128xf32>
      %1735 = vector.broadcast %8 : f32 to vector<32x128xf32>
      %1736 = arith.mulf %0, %1735 : vector<32x128xf32>
      %1737 = arith.subf %1639, %1736 : vector<32x128xf32>
      %1738 = arith.mulf %1737, %1737 : vector<32x128xf32>
      %1739 = arith.addf %1738, %1645 : vector<32x128xf32>
      %1740 = tpu.reciprocal %1739 {approx = true} : vector<32x128xf32> -> vector<32x128xf32>
      %1741 = vector.broadcast %16 : f32 to vector<32x128xf32>
      %1742 = arith.mulf %1741, %1737 : vector<32x128xf32>
      %1743 = arith.mulf %1742, %1740 : vector<32x128xf32>
      %1744 = vector.broadcast %16 : f32 to vector<32x128xf32>
      %1745 = arith.mulf %1744, %1740 : vector<32x128xf32>
      %1746 = arith.addf %1733, %1743 : vector<32x128xf32>
      %1747 = arith.addf %1734, %1745 : vector<32x128xf32>
      %1748 = vector.broadcast %cst_20 : f32 to vector<32x128xf32>
      %1749 = arith.addf %1748, %1746 : vector<32x128xf32>
      %1750 = arith.mulf %1644, %1747 : vector<32x128xf32>
      %cst_109 = arith.constant 0.000000e+00 : f32
      %1751 = vector.broadcast %cst_109 : f32 to vector<32x128xf32>
      %1752 = arith.subf %1751, %1750 : vector<32x128xf32>
      %1753 = arith.mulf %1749, %1749 : vector<32x128xf32>
      %1754 = arith.mulf %1752, %1752 : vector<32x128xf32>
      %1755 = arith.addf %1753, %1754 : vector<32x128xf32>
      %1756 = tpu.reciprocal %1755 {approx = true} : vector<32x128xf32> -> vector<32x128xf32>
      %1757 = arith.mulf %1749, %1756 : vector<32x128xf32>
      %1758 = arith.mulf %1752, %1756 : vector<32x128xf32>
      %cst_110 = arith.constant 0.000000e+00 : f32
      %1759 = vector.broadcast %cst_110 : f32 to vector<32x128xf32>
      %1760 = arith.subf %1759, %1758 : vector<32x128xf32>
      %1761 = arith.addf %1639, %1757 : vector<32x128xf32>
      %1762 = vector.broadcast %cst_21 : f32 to vector<32x128xf32>
      %1763 = arith.mulf %1762, %1761 : vector<32x128xf32>
      %1764 = arith.addf %1644, %1760 : vector<32x128xf32>
      %1765 = vector.broadcast %cst_21 : f32 to vector<32x128xf32>
      %1766 = arith.mulf %1765, %1764 : vector<32x128xf32>
      %1767 = vector.broadcast %cst_22 : f32 to vector<32x128xf32>
      %1768 = arith.minimumf %1766, %1767 : vector<32x128xf32>
      %1769 = arith.subf %1763, %arg7 : vector<32x128xf32>
      %1770 = math.absf %1769 : vector<32x128xf32>
      %1771 = vector.shape_cast %1770 : vector<32x128xf32> to vector<1x32x128xf32>
      %cst_111 = arith.constant dense<0xFF800000> : vector<1xf32>
      %1772 = vector.multi_reduction <maximumf>, %1771, %cst_111 [1, 2] : vector<1x32x128xf32> to vector<1xf32>
      %1773 = vector.shape_cast %1772 : vector<1xf32> to vector<1x1x1xf32>
      %1774 = vector.extract %1773[0, 0, 0] : f32 from vector<1x1x1xf32>
      %1775 = arith.subf %1768, %arg8 : vector<32x128xf32>
      %1776 = math.absf %1775 : vector<32x128xf32>
      %1777 = vector.shape_cast %1776 : vector<32x128xf32> to vector<1x32x128xf32>
      %cst_112 = arith.constant dense<0xFF800000> : vector<1xf32>
      %1778 = vector.multi_reduction <maximumf>, %1777, %cst_112 [1, 2] : vector<1x32x128xf32> to vector<1xf32>
      %1779 = vector.shape_cast %1778 : vector<1xf32> to vector<1x1x1xf32>
      %1780 = vector.extract %1779[0, 0, 0] : f32 from vector<1x1x1xf32>
      %1781 = arith.maximumf %1774, %1780 : f32
      %c1_i32 = arith.constant 1 : i32
      %1782 = arith.addi %arg6, %c1_i32 : i32
      scf.yield %1782, %1763, %1768, %1781 : i32, vector<32x128xf32>, vector<32x128xf32>, f32
    }
    %28 = arith.mulf %27#2, %27#2 : vector<32x128xf32>
    %29 = vector.broadcast %1 : f32 to vector<32x128xf32>
    %30 = arith.mulf %0, %29 : vector<32x128xf32>
    %31 = arith.subf %27#1, %30 : vector<32x128xf32>
    %32 = arith.mulf %31, %31 : vector<32x128xf32>
    %33 = arith.addf %32, %28 : vector<32x128xf32>
    %34 = tpu.reciprocal %33 {approx = true} : vector<32x128xf32> -> vector<32x128xf32>
    %35 = arith.mulf %33, %34 : vector<32x128xf32>
    %cst_24 = arith.constant 2.000000e+00 : f32
    %36 = vector.broadcast %cst_24 : f32 to vector<32x128xf32>
    %37 = arith.subf %36, %35 : vector<32x128xf32>
    %38 = arith.mulf %34, %37 : vector<32x128xf32>
    %39 = vector.broadcast %9 : f32 to vector<32x128xf32>
    %40 = arith.mulf %39, %31 : vector<32x128xf32>
    %41 = arith.mulf %40, %38 : vector<32x128xf32>
    %42 = vector.broadcast %9 : f32 to vector<32x128xf32>
    %43 = arith.mulf %42, %38 : vector<32x128xf32>
    %44 = vector.broadcast %2 : f32 to vector<32x128xf32>
    %45 = arith.mulf %0, %44 : vector<32x128xf32>
    %46 = arith.subf %27#1, %45 : vector<32x128xf32>
    %47 = arith.mulf %46, %46 : vector<32x128xf32>
    %48 = arith.addf %47, %28 : vector<32x128xf32>
    %49 = tpu.reciprocal %48 {approx = true} : vector<32x128xf32> -> vector<32x128xf32>
    %50 = arith.mulf %48, %49 : vector<32x128xf32>
    %cst_25 = arith.constant 2.000000e+00 : f32
    %51 = vector.broadcast %cst_25 : f32 to vector<32x128xf32>
    %52 = arith.subf %51, %50 : vector<32x128xf32>
    %53 = arith.mulf %49, %52 : vector<32x128xf32>
    %54 = vector.broadcast %10 : f32 to vector<32x128xf32>
    %55 = arith.mulf %54, %46 : vector<32x128xf32>
    %56 = arith.mulf %55, %53 : vector<32x128xf32>
    %57 = vector.broadcast %10 : f32 to vector<32x128xf32>
    %58 = arith.mulf %57, %53 : vector<32x128xf32>
    %59 = arith.addf %41, %56 : vector<32x128xf32>
    %60 = arith.addf %43, %58 : vector<32x128xf32>
    %61 = vector.broadcast %3 : f32 to vector<32x128xf32>
    %62 = arith.mulf %0, %61 : vector<32x128xf32>
    %63 = arith.subf %27#1, %62 : vector<32x128xf32>
    %64 = arith.mulf %63, %63 : vector<32x128xf32>
    %65 = arith.addf %64, %28 : vector<32x128xf32>
    %66 = tpu.reciprocal %65 {approx = true} : vector<32x128xf32> -> vector<32x128xf32>
    %67 = arith.mulf %65, %66 : vector<32x128xf32>
    %cst_26 = arith.constant 2.000000e+00 : f32
    %68 = vector.broadcast %cst_26 : f32 to vector<32x128xf32>
    %69 = arith.subf %68, %67 : vector<32x128xf32>
    %70 = arith.mulf %66, %69 : vector<32x128xf32>
    %71 = vector.broadcast %11 : f32 to vector<32x128xf32>
    %72 = arith.mulf %71, %63 : vector<32x128xf32>
    %73 = arith.mulf %72, %70 : vector<32x128xf32>
    %74 = vector.broadcast %11 : f32 to vector<32x128xf32>
    %75 = arith.mulf %74, %70 : vector<32x128xf32>
    %76 = arith.addf %59, %73 : vector<32x128xf32>
    %77 = arith.addf %60, %75 : vector<32x128xf32>
    %78 = vector.broadcast %4 : f32 to vector<32x128xf32>
    %79 = arith.mulf %0, %78 : vector<32x128xf32>
    %80 = arith.subf %27#1, %79 : vector<32x128xf32>
    %81 = arith.mulf %80, %80 : vector<32x128xf32>
    %82 = arith.addf %81, %28 : vector<32x128xf32>
    %83 = tpu.reciprocal %82 {approx = true} : vector<32x128xf32> -> vector<32x128xf32>
    %84 = arith.mulf %82, %83 : vector<32x128xf32>
    %cst_27 = arith.constant 2.000000e+00 : f32
    %85 = vector.broadcast %cst_27 : f32 to vector<32x128xf32>
    %86 = arith.subf %85, %84 : vector<32x128xf32>
    %87 = arith.mulf %83, %86 : vector<32x128xf32>
    %88 = vector.broadcast %12 : f32 to vector<32x128xf32>
    %89 = arith.mulf %88, %80 : vector<32x128xf32>
    %90 = arith.mulf %89, %87 : vector<32x128xf32>
    %91 = vector.broadcast %12 : f32 to vector<32x128xf32>
    %92 = arith.mulf %91, %87 : vector<32x128xf32>
    %93 = arith.addf %76, %90 : vector<32x128xf32>
    %94 = arith.addf %77, %92 : vector<32x128xf32>
    %95 = vector.broadcast %5 : f32 to vector<32x128xf32>
    %96 = arith.mulf %0, %95 : vector<32x128xf32>
    %97 = arith.subf %27#1, %96 : vector<32x128xf32>
    %98 = arith.mulf %97, %97 : vector<32x128xf32>
    %99 = arith.addf %98, %28 : vector<32x128xf32>
    %100 = tpu.reciprocal %99 {approx = true} : vector<32x128xf32> -> vector<32x128xf32>
    %101 = arith.mulf %99, %100 : vector<32x128xf32>
    %cst_28 = arith.constant 2.000000e+00 : f32
    %102 = vector.broadcast %cst_28 : f32 to vector<32x128xf32>
    %103 = arith.subf %102, %101 : vector<32x128xf32>
    %104 = arith.mulf %100, %103 : vector<32x128xf32>
    %105 = vector.broadcast %13 : f32 to vector<32x128xf32>
    %106 = arith.mulf %105, %97 : vector<32x128xf32>
    %107 = arith.mulf %106, %104 : vector<32x128xf32>
    %108 = vector.broadcast %13 : f32 to vector<32x128xf32>
    %109 = arith.mulf %108, %104 : vector<32x128xf32>
    %110 = arith.addf %93, %107 : vector<32x128xf32>
    %111 = arith.addf %94, %109 : vector<32x128xf32>
    %112 = vector.broadcast %6 : f32 to vector<32x128xf32>
    %113 = arith.mulf %0, %112 : vector<32x128xf32>
    %114 = arith.subf %27#1, %113 : vector<32x128xf32>
    %115 = arith.mulf %114, %114 : vector<32x128xf32>
    %116 = arith.addf %115, %28 : vector<32x128xf32>
    %117 = tpu.reciprocal %116 {approx = true} : vector<32x128xf32> -> vector<32x128xf32>
    %118 = arith.mulf %116, %117 : vector<32x128xf32>
    %cst_29 = arith.constant 2.000000e+00 : f32
    %119 = vector.broadcast %cst_29 : f32 to vector<32x128xf32>
    %120 = arith.subf %119, %118 : vector<32x128xf32>
    %121 = arith.mulf %117, %120 : vector<32x128xf32>
    %122 = vector.broadcast %14 : f32 to vector<32x128xf32>
    %123 = arith.mulf %122, %114 : vector<32x128xf32>
    %124 = arith.mulf %123, %121 : vector<32x128xf32>
    %125 = vector.broadcast %14 : f32 to vector<32x128xf32>
    %126 = arith.mulf %125, %121 : vector<32x128xf32>
    %127 = arith.addf %110, %124 : vector<32x128xf32>
    %128 = arith.addf %111, %126 : vector<32x128xf32>
    %129 = vector.broadcast %7 : f32 to vector<32x128xf32>
    %130 = arith.mulf %0, %129 : vector<32x128xf32>
    %131 = arith.subf %27#1, %130 : vector<32x128xf32>
    %132 = arith.mulf %131, %131 : vector<32x128xf32>
    %133 = arith.addf %132, %28 : vector<32x128xf32>
    %134 = tpu.reciprocal %133 {approx = true} : vector<32x128xf32> -> vector<32x128xf32>
    %135 = arith.mulf %133, %134 : vector<32x128xf32>
    %cst_30 = arith.constant 2.000000e+00 : f32
    %136 = vector.broadcast %cst_30 : f32 to vector<32x128xf32>
    %137 = arith.subf %136, %135 : vector<32x128xf32>
    %138 = arith.mulf %134, %137 : vector<32x128xf32>
    %139 = vector.broadcast %15 : f32 to vector<32x128xf32>
    %140 = arith.mulf %139, %131 : vector<32x128xf32>
    %141 = arith.mulf %140, %138 : vector<32x128xf32>
    %142 = vector.broadcast %15 : f32 to vector<32x128xf32>
    %143 = arith.mulf %142, %138 : vector<32x128xf32>
    %144 = arith.addf %127, %141 : vector<32x128xf32>
    %145 = arith.addf %128, %143 : vector<32x128xf32>
    %146 = vector.broadcast %8 : f32 to vector<32x128xf32>
    %147 = arith.mulf %0, %146 : vector<32x128xf32>
    %148 = arith.subf %27#1, %147 : vector<32x128xf32>
    %149 = arith.mulf %148, %148 : vector<32x128xf32>
    %150 = arith.addf %149, %28 : vector<32x128xf32>
    %151 = tpu.reciprocal %150 {approx = true} : vector<32x128xf32> -> vector<32x128xf32>
    %152 = arith.mulf %150, %151 : vector<32x128xf32>
    %cst_31 = arith.constant 2.000000e+00 : f32
    %153 = vector.broadcast %cst_31 : f32 to vector<32x128xf32>
    %154 = arith.subf %153, %152 : vector<32x128xf32>
    %155 = arith.mulf %151, %154 : vector<32x128xf32>
    %156 = vector.broadcast %16 : f32 to vector<32x128xf32>
    %157 = arith.mulf %156, %148 : vector<32x128xf32>
    %158 = arith.mulf %157, %155 : vector<32x128xf32>
    %159 = vector.broadcast %16 : f32 to vector<32x128xf32>
    %160 = arith.mulf %159, %155 : vector<32x128xf32>
    %161 = arith.addf %144, %158 : vector<32x128xf32>
    %162 = arith.addf %145, %160 : vector<32x128xf32>
    %cst_32 = arith.constant 1.000000e+00 : f32
    %163 = vector.broadcast %cst_32 : f32 to vector<32x128xf32>
    %164 = arith.addf %163, %161 : vector<32x128xf32>
    %165 = arith.mulf %27#2, %162 : vector<32x128xf32>
    %cst_33 = arith.constant 0.000000e+00 : f32
    %166 = vector.broadcast %cst_33 : f32 to vector<32x128xf32>
    %167 = arith.subf %166, %165 : vector<32x128xf32>
    %168 = arith.mulf %164, %164 : vector<32x128xf32>
    %169 = arith.mulf %167, %167 : vector<32x128xf32>
    %170 = arith.addf %168, %169 : vector<32x128xf32>
    %171 = tpu.reciprocal %170 {approx = true} : vector<32x128xf32> -> vector<32x128xf32>
    %172 = arith.mulf %170, %171 : vector<32x128xf32>
    %cst_34 = arith.constant 2.000000e+00 : f32
    %173 = vector.broadcast %cst_34 : f32 to vector<32x128xf32>
    %174 = arith.subf %173, %172 : vector<32x128xf32>
    %175 = arith.mulf %171, %174 : vector<32x128xf32>
    %176 = arith.mulf %164, %175 : vector<32x128xf32>
    %177 = arith.mulf %167, %175 : vector<32x128xf32>
    %cst_35 = arith.constant 0.000000e+00 : f32
    %178 = vector.broadcast %cst_35 : f32 to vector<32x128xf32>
    %179 = arith.subf %178, %177 : vector<32x128xf32>
    %180 = arith.addf %27#1, %176 : vector<32x128xf32>
    %cst_36 = arith.constant 5.000000e-01 : f32
    %181 = vector.broadcast %cst_36 : f32 to vector<32x128xf32>
    %182 = arith.mulf %181, %180 : vector<32x128xf32>
    %183 = arith.addf %27#2, %179 : vector<32x128xf32>
    %cst_37 = arith.constant 5.000000e-01 : f32
    %184 = vector.broadcast %cst_37 : f32 to vector<32x128xf32>
    %185 = arith.mulf %184, %183 : vector<32x128xf32>
    %cst_38 = arith.constant -9.99999971E-10 : f32
    %186 = vector.broadcast %cst_38 : f32 to vector<32x128xf32>
    %187 = arith.minimumf %185, %186 : vector<32x128xf32>
    %188 = arith.mulf %187, %187 : vector<32x128xf32>
    %189 = vector.broadcast %1 : f32 to vector<32x128xf32>
    %190 = arith.mulf %0, %189 : vector<32x128xf32>
    %191 = arith.subf %182, %190 : vector<32x128xf32>
    %192 = arith.mulf %191, %191 : vector<32x128xf32>
    %193 = arith.addf %192, %188 : vector<32x128xf32>
    %194 = tpu.reciprocal %193 {approx = true} : vector<32x128xf32> -> vector<32x128xf32>
    %195 = arith.mulf %193, %194 : vector<32x128xf32>
    %cst_39 = arith.constant 2.000000e+00 : f32
    %196 = vector.broadcast %cst_39 : f32 to vector<32x128xf32>
    %197 = arith.subf %196, %195 : vector<32x128xf32>
    %198 = arith.mulf %194, %197 : vector<32x128xf32>
    %199 = vector.broadcast %9 : f32 to vector<32x128xf32>
    %200 = arith.mulf %199, %191 : vector<32x128xf32>
    %201 = arith.mulf %200, %198 : vector<32x128xf32>
    %202 = vector.broadcast %9 : f32 to vector<32x128xf32>
    %203 = arith.mulf %202, %198 : vector<32x128xf32>
    %204 = vector.broadcast %2 : f32 to vector<32x128xf32>
    %205 = arith.mulf %0, %204 : vector<32x128xf32>
    %206 = arith.subf %182, %205 : vector<32x128xf32>
    %207 = arith.mulf %206, %206 : vector<32x128xf32>
    %208 = arith.addf %207, %188 : vector<32x128xf32>
    %209 = tpu.reciprocal %208 {approx = true} : vector<32x128xf32> -> vector<32x128xf32>
    %210 = arith.mulf %208, %209 : vector<32x128xf32>
    %cst_40 = arith.constant 2.000000e+00 : f32
    %211 = vector.broadcast %cst_40 : f32 to vector<32x128xf32>
    %212 = arith.subf %211, %210 : vector<32x128xf32>
    %213 = arith.mulf %209, %212 : vector<32x128xf32>
    %214 = vector.broadcast %10 : f32 to vector<32x128xf32>
    %215 = arith.mulf %214, %206 : vector<32x128xf32>
    %216 = arith.mulf %215, %213 : vector<32x128xf32>
    %217 = vector.broadcast %10 : f32 to vector<32x128xf32>
    %218 = arith.mulf %217, %213 : vector<32x128xf32>
    %219 = arith.addf %201, %216 : vector<32x128xf32>
    %220 = arith.addf %203, %218 : vector<32x128xf32>
    %221 = vector.broadcast %3 : f32 to vector<32x128xf32>
    %222 = arith.mulf %0, %221 : vector<32x128xf32>
    %223 = arith.subf %182, %222 : vector<32x128xf32>
    %224 = arith.mulf %223, %223 : vector<32x128xf32>
    %225 = arith.addf %224, %188 : vector<32x128xf32>
    %226 = tpu.reciprocal %225 {approx = true} : vector<32x128xf32> -> vector<32x128xf32>
    %227 = arith.mulf %225, %226 : vector<32x128xf32>
    %cst_41 = arith.constant 2.000000e+00 : f32
    %228 = vector.broadcast %cst_41 : f32 to vector<32x128xf32>
    %229 = arith.subf %228, %227 : vector<32x128xf32>
    %230 = arith.mulf %226, %229 : vector<32x128xf32>
    %231 = vector.broadcast %11 : f32 to vector<32x128xf32>
    %232 = arith.mulf %231, %223 : vector<32x128xf32>
    %233 = arith.mulf %232, %230 : vector<32x128xf32>
    %234 = vector.broadcast %11 : f32 to vector<32x128xf32>
    %235 = arith.mulf %234, %230 : vector<32x128xf32>
    %236 = arith.addf %219, %233 : vector<32x128xf32>
    %237 = arith.addf %220, %235 : vector<32x128xf32>
    %238 = vector.broadcast %4 : f32 to vector<32x128xf32>
    %239 = arith.mulf %0, %238 : vector<32x128xf32>
    %240 = arith.subf %182, %239 : vector<32x128xf32>
    %241 = arith.mulf %240, %240 : vector<32x128xf32>
    %242 = arith.addf %241, %188 : vector<32x128xf32>
    %243 = tpu.reciprocal %242 {approx = true} : vector<32x128xf32> -> vector<32x128xf32>
    %244 = arith.mulf %242, %243 : vector<32x128xf32>
    %cst_42 = arith.constant 2.000000e+00 : f32
    %245 = vector.broadcast %cst_42 : f32 to vector<32x128xf32>
    %246 = arith.subf %245, %244 : vector<32x128xf32>
    %247 = arith.mulf %243, %246 : vector<32x128xf32>
    %248 = vector.broadcast %12 : f32 to vector<32x128xf32>
    %249 = arith.mulf %248, %240 : vector<32x128xf32>
    %250 = arith.mulf %249, %247 : vector<32x128xf32>
    %251 = vector.broadcast %12 : f32 to vector<32x128xf32>
    %252 = arith.mulf %251, %247 : vector<32x128xf32>
    %253 = arith.addf %236, %250 : vector<32x128xf32>
    %254 = arith.addf %237, %252 : vector<32x128xf32>
    %255 = vector.broadcast %5 : f32 to vector<32x128xf32>
    %256 = arith.mulf %0, %255 : vector<32x128xf32>
    %257 = arith.subf %182, %256 : vector<32x128xf32>
    %258 = arith.mulf %257, %257 : vector<32x128xf32>
    %259 = arith.addf %258, %188 : vector<32x128xf32>
    %260 = tpu.reciprocal %259 {approx = true} : vector<32x128xf32> -> vector<32x128xf32>
    %261 = arith.mulf %259, %260 : vector<32x128xf32>
    %cst_43 = arith.constant 2.000000e+00 : f32
    %262 = vector.broadcast %cst_43 : f32 to vector<32x128xf32>
    %263 = arith.subf %262, %261 : vector<32x128xf32>
    %264 = arith.mulf %260, %263 : vector<32x128xf32>
    %265 = vector.broadcast %13 : f32 to vector<32x128xf32>
    %266 = arith.mulf %265, %257 : vector<32x128xf32>
    %267 = arith.mulf %266, %264 : vector<32x128xf32>
    %268 = vector.broadcast %13 : f32 to vector<32x128xf32>
    %269 = arith.mulf %268, %264 : vector<32x128xf32>
    %270 = arith.addf %253, %267 : vector<32x128xf32>
    %271 = arith.addf %254, %269 : vector<32x128xf32>
    %272 = vector.broadcast %6 : f32 to vector<32x128xf32>
    %273 = arith.mulf %0, %272 : vector<32x128xf32>
    %274 = arith.subf %182, %273 : vector<32x128xf32>
    %275 = arith.mulf %274, %274 : vector<32x128xf32>
    %276 = arith.addf %275, %188 : vector<32x128xf32>
    %277 = tpu.reciprocal %276 {approx = true} : vector<32x128xf32> -> vector<32x128xf32>
    %278 = arith.mulf %276, %277 : vector<32x128xf32>
    %cst_44 = arith.constant 2.000000e+00 : f32
    %279 = vector.broadcast %cst_44 : f32 to vector<32x128xf32>
    %280 = arith.subf %279, %278 : vector<32x128xf32>
    %281 = arith.mulf %277, %280 : vector<32x128xf32>
    %282 = vector.broadcast %14 : f32 to vector<32x128xf32>
    %283 = arith.mulf %282, %274 : vector<32x128xf32>
    %284 = arith.mulf %283, %281 : vector<32x128xf32>
    %285 = vector.broadcast %14 : f32 to vector<32x128xf32>
    %286 = arith.mulf %285, %281 : vector<32x128xf32>
    %287 = arith.addf %270, %284 : vector<32x128xf32>
    %288 = arith.addf %271, %286 : vector<32x128xf32>
    %289 = vector.broadcast %7 : f32 to vector<32x128xf32>
    %290 = arith.mulf %0, %289 : vector<32x128xf32>
    %291 = arith.subf %182, %290 : vector<32x128xf32>
    %292 = arith.mulf %291, %291 : vector<32x128xf32>
    %293 = arith.addf %292, %188 : vector<32x128xf32>
    %294 = tpu.reciprocal %293 {approx = true} : vector<32x128xf32> -> vector<32x128xf32>
    %295 = arith.mulf %293, %294 : vector<32x128xf32>
    %cst_45 = arith.constant 2.000000e+00 : f32
    %296 = vector.broadcast %cst_45 : f32 to vector<32x128xf32>
    %297 = arith.subf %296, %295 : vector<32x128xf32>
    %298 = arith.mulf %294, %297 : vector<32x128xf32>
    %299 = vector.broadcast %15 : f32 to vector<32x128xf32>
    %300 = arith.mulf %299, %291 : vector<32x128xf32>
    %301 = arith.mulf %300, %298 : vector<32x128xf32>
    %302 = vector.broadcast %15 : f32 to vector<32x128xf32>
    %303 = arith.mulf %302, %298 : vector<32x128xf32>
    %304 = arith.addf %287, %301 : vector<32x128xf32>
    %305 = arith.addf %288, %303 : vector<32x128xf32>
    %306 = vector.broadcast %8 : f32 to vector<32x128xf32>
    %307 = arith.mulf %0, %306 : vector<32x128xf32>
    %308 = arith.subf %182, %307 : vector<32x128xf32>
    %309 = arith.mulf %308, %308 : vector<32x128xf32>
    %310 = arith.addf %309, %188 : vector<32x128xf32>
    %311 = tpu.reciprocal %310 {approx = true} : vector<32x128xf32> -> vector<32x128xf32>
    %312 = arith.mulf %310, %311 : vector<32x128xf32>
    %cst_46 = arith.constant 2.000000e+00 : f32
    %313 = vector.broadcast %cst_46 : f32 to vector<32x128xf32>
    %314 = arith.subf %313, %312 : vector<32x128xf32>
    %315 = arith.mulf %311, %314 : vector<32x128xf32>
    %316 = vector.broadcast %16 : f32 to vector<32x128xf32>
    %317 = arith.mulf %316, %308 : vector<32x128xf32>
    %318 = arith.mulf %317, %315 : vector<32x128xf32>
    %319 = vector.broadcast %16 : f32 to vector<32x128xf32>
    %320 = arith.mulf %319, %315 : vector<32x128xf32>
    %321 = arith.addf %304, %318 : vector<32x128xf32>
    %322 = arith.addf %305, %320 : vector<32x128xf32>
    %cst_47 = arith.constant 1.000000e+00 : f32
    %323 = vector.broadcast %cst_47 : f32 to vector<32x128xf32>
    %324 = arith.addf %323, %321 : vector<32x128xf32>
    %325 = arith.mulf %187, %322 : vector<32x128xf32>
    %cst_48 = arith.constant 0.000000e+00 : f32
    %326 = vector.broadcast %cst_48 : f32 to vector<32x128xf32>
    %327 = arith.subf %326, %325 : vector<32x128xf32>
    %328 = arith.mulf %324, %324 : vector<32x128xf32>
    %329 = arith.mulf %327, %327 : vector<32x128xf32>
    %330 = arith.addf %328, %329 : vector<32x128xf32>
    %331 = tpu.reciprocal %330 {approx = true} : vector<32x128xf32> -> vector<32x128xf32>
    %332 = arith.mulf %330, %331 : vector<32x128xf32>
    %cst_49 = arith.constant 2.000000e+00 : f32
    %333 = vector.broadcast %cst_49 : f32 to vector<32x128xf32>
    %334 = arith.subf %333, %332 : vector<32x128xf32>
    %335 = arith.mulf %331, %334 : vector<32x128xf32>
    %336 = arith.mulf %324, %335 : vector<32x128xf32>
    %337 = arith.mulf %327, %335 : vector<32x128xf32>
    %cst_50 = arith.constant 0.000000e+00 : f32
    %338 = vector.broadcast %cst_50 : f32 to vector<32x128xf32>
    %339 = arith.subf %338, %337 : vector<32x128xf32>
    %340 = arith.addf %182, %336 : vector<32x128xf32>
    %cst_51 = arith.constant 5.000000e-01 : f32
    %341 = vector.broadcast %cst_51 : f32 to vector<32x128xf32>
    %342 = arith.mulf %341, %340 : vector<32x128xf32>
    %343 = arith.addf %187, %339 : vector<32x128xf32>
    %cst_52 = arith.constant 5.000000e-01 : f32
    %344 = vector.broadcast %cst_52 : f32 to vector<32x128xf32>
    %345 = arith.mulf %344, %343 : vector<32x128xf32>
    %cst_53 = arith.constant -9.99999971E-10 : f32
    %346 = vector.broadcast %cst_53 : f32 to vector<32x128xf32>
    %347 = arith.minimumf %345, %346 : vector<32x128xf32>
    %348 = arith.mulf %347, %347 : vector<32x128xf32>
    %349 = vector.broadcast %1 : f32 to vector<32x128xf32>
    %350 = arith.mulf %0, %349 : vector<32x128xf32>
    %351 = arith.subf %342, %350 : vector<32x128xf32>
    %352 = arith.mulf %351, %351 : vector<32x128xf32>
    %353 = arith.addf %352, %348 : vector<32x128xf32>
    %354 = tpu.reciprocal %353 {approx = true} : vector<32x128xf32> -> vector<32x128xf32>
    %355 = arith.mulf %353, %354 : vector<32x128xf32>
    %cst_54 = arith.constant 2.000000e+00 : f32
    %356 = vector.broadcast %cst_54 : f32 to vector<32x128xf32>
    %357 = arith.subf %356, %355 : vector<32x128xf32>
    %358 = arith.mulf %354, %357 : vector<32x128xf32>
    %359 = vector.broadcast %9 : f32 to vector<32x128xf32>
    %360 = arith.mulf %359, %351 : vector<32x128xf32>
    %361 = arith.mulf %360, %358 : vector<32x128xf32>
    %362 = vector.broadcast %9 : f32 to vector<32x128xf32>
    %363 = arith.mulf %362, %358 : vector<32x128xf32>
    %364 = vector.broadcast %2 : f32 to vector<32x128xf32>
    %365 = arith.mulf %0, %364 : vector<32x128xf32>
    %366 = arith.subf %342, %365 : vector<32x128xf32>
    %367 = arith.mulf %366, %366 : vector<32x128xf32>
    %368 = arith.addf %367, %348 : vector<32x128xf32>
    %369 = tpu.reciprocal %368 {approx = true} : vector<32x128xf32> -> vector<32x128xf32>
    %370 = arith.mulf %368, %369 : vector<32x128xf32>
    %cst_55 = arith.constant 2.000000e+00 : f32
    %371 = vector.broadcast %cst_55 : f32 to vector<32x128xf32>
    %372 = arith.subf %371, %370 : vector<32x128xf32>
    %373 = arith.mulf %369, %372 : vector<32x128xf32>
    %374 = vector.broadcast %10 : f32 to vector<32x128xf32>
    %375 = arith.mulf %374, %366 : vector<32x128xf32>
    %376 = arith.mulf %375, %373 : vector<32x128xf32>
    %377 = vector.broadcast %10 : f32 to vector<32x128xf32>
    %378 = arith.mulf %377, %373 : vector<32x128xf32>
    %379 = arith.addf %361, %376 : vector<32x128xf32>
    %380 = arith.addf %363, %378 : vector<32x128xf32>
    %381 = vector.broadcast %3 : f32 to vector<32x128xf32>
    %382 = arith.mulf %0, %381 : vector<32x128xf32>
    %383 = arith.subf %342, %382 : vector<32x128xf32>
    %384 = arith.mulf %383, %383 : vector<32x128xf32>
    %385 = arith.addf %384, %348 : vector<32x128xf32>
    %386 = tpu.reciprocal %385 {approx = true} : vector<32x128xf32> -> vector<32x128xf32>
    %387 = arith.mulf %385, %386 : vector<32x128xf32>
    %cst_56 = arith.constant 2.000000e+00 : f32
    %388 = vector.broadcast %cst_56 : f32 to vector<32x128xf32>
    %389 = arith.subf %388, %387 : vector<32x128xf32>
    %390 = arith.mulf %386, %389 : vector<32x128xf32>
    %391 = vector.broadcast %11 : f32 to vector<32x128xf32>
    %392 = arith.mulf %391, %383 : vector<32x128xf32>
    %393 = arith.mulf %392, %390 : vector<32x128xf32>
    %394 = vector.broadcast %11 : f32 to vector<32x128xf32>
    %395 = arith.mulf %394, %390 : vector<32x128xf32>
    %396 = arith.addf %379, %393 : vector<32x128xf32>
    %397 = arith.addf %380, %395 : vector<32x128xf32>
    %398 = vector.broadcast %4 : f32 to vector<32x128xf32>
    %399 = arith.mulf %0, %398 : vector<32x128xf32>
    %400 = arith.subf %342, %399 : vector<32x128xf32>
    %401 = arith.mulf %400, %400 : vector<32x128xf32>
    %402 = arith.addf %401, %348 : vector<32x128xf32>
    %403 = tpu.reciprocal %402 {approx = true} : vector<32x128xf32> -> vector<32x128xf32>
    %404 = arith.mulf %402, %403 : vector<32x128xf32>
    %cst_57 = arith.constant 2.000000e+00 : f32
    %405 = vector.broadcast %cst_57 : f32 to vector<32x128xf32>
    %406 = arith.subf %405, %404 : vector<32x128xf32>
    %407 = arith.mulf %403, %406 : vector<32x128xf32>
    %408 = vector.broadcast %12 : f32 to vector<32x128xf32>
    %409 = arith.mulf %408, %400 : vector<32x128xf32>
    %410 = arith.mulf %409, %407 : vector<32x128xf32>
    %411 = vector.broadcast %12 : f32 to vector<32x128xf32>
    %412 = arith.mulf %411, %407 : vector<32x128xf32>
    %413 = arith.addf %396, %410 : vector<32x128xf32>
    %414 = arith.addf %397, %412 : vector<32x128xf32>
    %415 = vector.broadcast %5 : f32 to vector<32x128xf32>
    %416 = arith.mulf %0, %415 : vector<32x128xf32>
    %417 = arith.subf %342, %416 : vector<32x128xf32>
    %418 = arith.mulf %417, %417 : vector<32x128xf32>
    %419 = arith.addf %418, %348 : vector<32x128xf32>
    %420 = tpu.reciprocal %419 {approx = true} : vector<32x128xf32> -> vector<32x128xf32>
    %421 = arith.mulf %419, %420 : vector<32x128xf32>
    %cst_58 = arith.constant 2.000000e+00 : f32
    %422 = vector.broadcast %cst_58 : f32 to vector<32x128xf32>
    %423 = arith.subf %422, %421 : vector<32x128xf32>
    %424 = arith.mulf %420, %423 : vector<32x128xf32>
    %425 = vector.broadcast %13 : f32 to vector<32x128xf32>
    %426 = arith.mulf %425, %417 : vector<32x128xf32>
    %427 = arith.mulf %426, %424 : vector<32x128xf32>
    %428 = vector.broadcast %13 : f32 to vector<32x128xf32>
    %429 = arith.mulf %428, %424 : vector<32x128xf32>
    %430 = arith.addf %413, %427 : vector<32x128xf32>
    %431 = arith.addf %414, %429 : vector<32x128xf32>
    %432 = vector.broadcast %6 : f32 to vector<32x128xf32>
    %433 = arith.mulf %0, %432 : vector<32x128xf32>
    %434 = arith.subf %342, %433 : vector<32x128xf32>
    %435 = arith.mulf %434, %434 : vector<32x128xf32>
    %436 = arith.addf %435, %348 : vector<32x128xf32>
    %437 = tpu.reciprocal %436 {approx = true} : vector<32x128xf32> -> vector<32x128xf32>
    %438 = arith.mulf %436, %437 : vector<32x128xf32>
    %cst_59 = arith.constant 2.000000e+00 : f32
    %439 = vector.broadcast %cst_59 : f32 to vector<32x128xf32>
    %440 = arith.subf %439, %438 : vector<32x128xf32>
    %441 = arith.mulf %437, %440 : vector<32x128xf32>
    %442 = vector.broadcast %14 : f32 to vector<32x128xf32>
    %443 = arith.mulf %442, %434 : vector<32x128xf32>
    %444 = arith.mulf %443, %441 : vector<32x128xf32>
    %445 = vector.broadcast %14 : f32 to vector<32x128xf32>
    %446 = arith.mulf %445, %441 : vector<32x128xf32>
    %447 = arith.addf %430, %444 : vector<32x128xf32>
    %448 = arith.addf %431, %446 : vector<32x128xf32>
    %449 = vector.broadcast %7 : f32 to vector<32x128xf32>
    %450 = arith.mulf %0, %449 : vector<32x128xf32>
    %451 = arith.subf %342, %450 : vector<32x128xf32>
    %452 = arith.mulf %451, %451 : vector<32x128xf32>
    %453 = arith.addf %452, %348 : vector<32x128xf32>
    %454 = tpu.reciprocal %453 {approx = true} : vector<32x128xf32> -> vector<32x128xf32>
    %455 = arith.mulf %453, %454 : vector<32x128xf32>
    %cst_60 = arith.constant 2.000000e+00 : f32
    %456 = vector.broadcast %cst_60 : f32 to vector<32x128xf32>
    %457 = arith.subf %456, %455 : vector<32x128xf32>
    %458 = arith.mulf %454, %457 : vector<32x128xf32>
    %459 = vector.broadcast %15 : f32 to vector<32x128xf32>
    %460 = arith.mulf %459, %451 : vector<32x128xf32>
    %461 = arith.mulf %460, %458 : vector<32x128xf32>
    %462 = vector.broadcast %15 : f32 to vector<32x128xf32>
    %463 = arith.mulf %462, %458 : vector<32x128xf32>
    %464 = arith.addf %447, %461 : vector<32x128xf32>
    %465 = arith.addf %448, %463 : vector<32x128xf32>
    %466 = vector.broadcast %8 : f32 to vector<32x128xf32>
    %467 = arith.mulf %0, %466 : vector<32x128xf32>
    %468 = arith.subf %342, %467 : vector<32x128xf32>
    %469 = arith.mulf %468, %468 : vector<32x128xf32>
    %470 = arith.addf %469, %348 : vector<32x128xf32>
    %471 = tpu.reciprocal %470 {approx = true} : vector<32x128xf32> -> vector<32x128xf32>
    %472 = arith.mulf %470, %471 : vector<32x128xf32>
    %cst_61 = arith.constant 2.000000e+00 : f32
    %473 = vector.broadcast %cst_61 : f32 to vector<32x128xf32>
    %474 = arith.subf %473, %472 : vector<32x128xf32>
    %475 = arith.mulf %471, %474 : vector<32x128xf32>
    %476 = vector.broadcast %16 : f32 to vector<32x128xf32>
    %477 = arith.mulf %476, %468 : vector<32x128xf32>
    %478 = arith.mulf %477, %475 : vector<32x128xf32>
    %479 = vector.broadcast %16 : f32 to vector<32x128xf32>
    %480 = arith.mulf %479, %475 : vector<32x128xf32>
    %481 = arith.addf %464, %478 : vector<32x128xf32>
    %482 = arith.addf %465, %480 : vector<32x128xf32>
    %cst_62 = arith.constant 1.000000e+00 : f32
    %483 = vector.broadcast %cst_62 : f32 to vector<32x128xf32>
    %484 = arith.addf %483, %481 : vector<32x128xf32>
    %485 = arith.mulf %347, %482 : vector<32x128xf32>
    %cst_63 = arith.constant 0.000000e+00 : f32
    %486 = vector.broadcast %cst_63 : f32 to vector<32x128xf32>
    %487 = arith.subf %486, %485 : vector<32x128xf32>
    %488 = arith.mulf %484, %484 : vector<32x128xf32>
    %489 = arith.mulf %487, %487 : vector<32x128xf32>
    %490 = arith.addf %488, %489 : vector<32x128xf32>
    %491 = tpu.reciprocal %490 {approx = true} : vector<32x128xf32> -> vector<32x128xf32>
    %492 = arith.mulf %490, %491 : vector<32x128xf32>
    %cst_64 = arith.constant 2.000000e+00 : f32
    %493 = vector.broadcast %cst_64 : f32 to vector<32x128xf32>
    %494 = arith.subf %493, %492 : vector<32x128xf32>
    %495 = arith.mulf %491, %494 : vector<32x128xf32>
    %496 = arith.mulf %484, %495 : vector<32x128xf32>
    %497 = arith.mulf %487, %495 : vector<32x128xf32>
    %cst_65 = arith.constant 0.000000e+00 : f32
    %498 = vector.broadcast %cst_65 : f32 to vector<32x128xf32>
    %499 = arith.subf %498, %497 : vector<32x128xf32>
    %500 = arith.addf %342, %496 : vector<32x128xf32>
    %cst_66 = arith.constant 5.000000e-01 : f32
    %501 = vector.broadcast %cst_66 : f32 to vector<32x128xf32>
    %502 = arith.mulf %501, %500 : vector<32x128xf32>
    %503 = arith.addf %347, %499 : vector<32x128xf32>
    %cst_67 = arith.constant 5.000000e-01 : f32
    %504 = vector.broadcast %cst_67 : f32 to vector<32x128xf32>
    %505 = arith.mulf %504, %503 : vector<32x128xf32>
    %cst_68 = arith.constant -9.99999971E-10 : f32
    %506 = vector.broadcast %cst_68 : f32 to vector<32x128xf32>
    %507 = arith.minimumf %505, %506 : vector<32x128xf32>
    %508 = arith.mulf %507, %507 : vector<32x128xf32>
    %509 = vector.broadcast %1 : f32 to vector<32x128xf32>
    %510 = arith.mulf %0, %509 : vector<32x128xf32>
    %511 = arith.subf %502, %510 : vector<32x128xf32>
    %512 = arith.mulf %511, %511 : vector<32x128xf32>
    %513 = arith.addf %512, %508 : vector<32x128xf32>
    %514 = tpu.reciprocal %513 {approx = true} : vector<32x128xf32> -> vector<32x128xf32>
    %515 = arith.mulf %513, %514 : vector<32x128xf32>
    %cst_69 = arith.constant 2.000000e+00 : f32
    %516 = vector.broadcast %cst_69 : f32 to vector<32x128xf32>
    %517 = arith.subf %516, %515 : vector<32x128xf32>
    %518 = arith.mulf %514, %517 : vector<32x128xf32>
    %519 = vector.broadcast %9 : f32 to vector<32x128xf32>
    %520 = arith.mulf %519, %511 : vector<32x128xf32>
    %521 = arith.mulf %520, %518 : vector<32x128xf32>
    %522 = vector.broadcast %9 : f32 to vector<32x128xf32>
    %523 = arith.mulf %522, %518 : vector<32x128xf32>
    %524 = vector.broadcast %2 : f32 to vector<32x128xf32>
    %525 = arith.mulf %0, %524 : vector<32x128xf32>
    %526 = arith.subf %502, %525 : vector<32x128xf32>
    %527 = arith.mulf %526, %526 : vector<32x128xf32>
    %528 = arith.addf %527, %508 : vector<32x128xf32>
    %529 = tpu.reciprocal %528 {approx = true} : vector<32x128xf32> -> vector<32x128xf32>
    %530 = arith.mulf %528, %529 : vector<32x128xf32>
    %cst_70 = arith.constant 2.000000e+00 : f32
    %531 = vector.broadcast %cst_70 : f32 to vector<32x128xf32>
    %532 = arith.subf %531, %530 : vector<32x128xf32>
    %533 = arith.mulf %529, %532 : vector<32x128xf32>
    %534 = vector.broadcast %10 : f32 to vector<32x128xf32>
    %535 = arith.mulf %534, %526 : vector<32x128xf32>
    %536 = arith.mulf %535, %533 : vector<32x128xf32>
    %537 = vector.broadcast %10 : f32 to vector<32x128xf32>
    %538 = arith.mulf %537, %533 : vector<32x128xf32>
    %539 = arith.addf %521, %536 : vector<32x128xf32>
    %540 = arith.addf %523, %538 : vector<32x128xf32>
    %541 = vector.broadcast %3 : f32 to vector<32x128xf32>
    %542 = arith.mulf %0, %541 : vector<32x128xf32>
    %543 = arith.subf %502, %542 : vector<32x128xf32>
    %544 = arith.mulf %543, %543 : vector<32x128xf32>
    %545 = arith.addf %544, %508 : vector<32x128xf32>
    %546 = tpu.reciprocal %545 {approx = true} : vector<32x128xf32> -> vector<32x128xf32>
    %547 = arith.mulf %545, %546 : vector<32x128xf32>
    %cst_71 = arith.constant 2.000000e+00 : f32
    %548 = vector.broadcast %cst_71 : f32 to vector<32x128xf32>
    %549 = arith.subf %548, %547 : vector<32x128xf32>
    %550 = arith.mulf %546, %549 : vector<32x128xf32>
    %551 = vector.broadcast %11 : f32 to vector<32x128xf32>
    %552 = arith.mulf %551, %543 : vector<32x128xf32>
    %553 = arith.mulf %552, %550 : vector<32x128xf32>
    %554 = vector.broadcast %11 : f32 to vector<32x128xf32>
    %555 = arith.mulf %554, %550 : vector<32x128xf32>
    %556 = arith.addf %539, %553 : vector<32x128xf32>
    %557 = arith.addf %540, %555 : vector<32x128xf32>
    %558 = vector.broadcast %4 : f32 to vector<32x128xf32>
    %559 = arith.mulf %0, %558 : vector<32x128xf32>
    %560 = arith.subf %502, %559 : vector<32x128xf32>
    %561 = arith.mulf %560, %560 : vector<32x128xf32>
    %562 = arith.addf %561, %508 : vector<32x128xf32>
    %563 = tpu.reciprocal %562 {approx = true} : vector<32x128xf32> -> vector<32x128xf32>
    %564 = arith.mulf %562, %563 : vector<32x128xf32>
    %cst_72 = arith.constant 2.000000e+00 : f32
    %565 = vector.broadcast %cst_72 : f32 to vector<32x128xf32>
    %566 = arith.subf %565, %564 : vector<32x128xf32>
    %567 = arith.mulf %563, %566 : vector<32x128xf32>
    %568 = vector.broadcast %12 : f32 to vector<32x128xf32>
    %569 = arith.mulf %568, %560 : vector<32x128xf32>
    %570 = arith.mulf %569, %567 : vector<32x128xf32>
    %571 = vector.broadcast %12 : f32 to vector<32x128xf32>
    %572 = arith.mulf %571, %567 : vector<32x128xf32>
    %573 = arith.addf %556, %570 : vector<32x128xf32>
    %574 = arith.addf %557, %572 : vector<32x128xf32>
    %575 = vector.broadcast %5 : f32 to vector<32x128xf32>
    %576 = arith.mulf %0, %575 : vector<32x128xf32>
    %577 = arith.subf %502, %576 : vector<32x128xf32>
    %578 = arith.mulf %577, %577 : vector<32x128xf32>
    %579 = arith.addf %578, %508 : vector<32x128xf32>
    %580 = tpu.reciprocal %579 {approx = true} : vector<32x128xf32> -> vector<32x128xf32>
    %581 = arith.mulf %579, %580 : vector<32x128xf32>
    %cst_73 = arith.constant 2.000000e+00 : f32
    %582 = vector.broadcast %cst_73 : f32 to vector<32x128xf32>
    %583 = arith.subf %582, %581 : vector<32x128xf32>
    %584 = arith.mulf %580, %583 : vector<32x128xf32>
    %585 = vector.broadcast %13 : f32 to vector<32x128xf32>
    %586 = arith.mulf %585, %577 : vector<32x128xf32>
    %587 = arith.mulf %586, %584 : vector<32x128xf32>
    %588 = vector.broadcast %13 : f32 to vector<32x128xf32>
    %589 = arith.mulf %588, %584 : vector<32x128xf32>
    %590 = arith.addf %573, %587 : vector<32x128xf32>
    %591 = arith.addf %574, %589 : vector<32x128xf32>
    %592 = vector.broadcast %6 : f32 to vector<32x128xf32>
    %593 = arith.mulf %0, %592 : vector<32x128xf32>
    %594 = arith.subf %502, %593 : vector<32x128xf32>
    %595 = arith.mulf %594, %594 : vector<32x128xf32>
    %596 = arith.addf %595, %508 : vector<32x128xf32>
    %597 = tpu.reciprocal %596 {approx = true} : vector<32x128xf32> -> vector<32x128xf32>
    %598 = arith.mulf %596, %597 : vector<32x128xf32>
    %cst_74 = arith.constant 2.000000e+00 : f32
    %599 = vector.broadcast %cst_74 : f32 to vector<32x128xf32>
    %600 = arith.subf %599, %598 : vector<32x128xf32>
    %601 = arith.mulf %597, %600 : vector<32x128xf32>
    %602 = vector.broadcast %14 : f32 to vector<32x128xf32>
    %603 = arith.mulf %602, %594 : vector<32x128xf32>
    %604 = arith.mulf %603, %601 : vector<32x128xf32>
    %605 = vector.broadcast %14 : f32 to vector<32x128xf32>
    %606 = arith.mulf %605, %601 : vector<32x128xf32>
    %607 = arith.addf %590, %604 : vector<32x128xf32>
    %608 = arith.addf %591, %606 : vector<32x128xf32>
    %609 = vector.broadcast %7 : f32 to vector<32x128xf32>
    %610 = arith.mulf %0, %609 : vector<32x128xf32>
    %611 = arith.subf %502, %610 : vector<32x128xf32>
    %612 = arith.mulf %611, %611 : vector<32x128xf32>
    %613 = arith.addf %612, %508 : vector<32x128xf32>
    %614 = tpu.reciprocal %613 {approx = true} : vector<32x128xf32> -> vector<32x128xf32>
    %615 = arith.mulf %613, %614 : vector<32x128xf32>
    %cst_75 = arith.constant 2.000000e+00 : f32
    %616 = vector.broadcast %cst_75 : f32 to vector<32x128xf32>
    %617 = arith.subf %616, %615 : vector<32x128xf32>
    %618 = arith.mulf %614, %617 : vector<32x128xf32>
    %619 = vector.broadcast %15 : f32 to vector<32x128xf32>
    %620 = arith.mulf %619, %611 : vector<32x128xf32>
    %621 = arith.mulf %620, %618 : vector<32x128xf32>
    %622 = vector.broadcast %15 : f32 to vector<32x128xf32>
    %623 = arith.mulf %622, %618 : vector<32x128xf32>
    %624 = arith.addf %607, %621 : vector<32x128xf32>
    %625 = arith.addf %608, %623 : vector<32x128xf32>
    %626 = vector.broadcast %8 : f32 to vector<32x128xf32>
    %627 = arith.mulf %0, %626 : vector<32x128xf32>
    %628 = arith.subf %502, %627 : vector<32x128xf32>
    %629 = arith.mulf %628, %628 : vector<32x128xf32>
    %630 = arith.addf %629, %508 : vector<32x128xf32>
    %631 = tpu.reciprocal %630 {approx = true} : vector<32x128xf32> -> vector<32x128xf32>
    %632 = arith.mulf %630, %631 : vector<32x128xf32>
    %cst_76 = arith.constant 2.000000e+00 : f32
    %633 = vector.broadcast %cst_76 : f32 to vector<32x128xf32>
    %634 = arith.subf %633, %632 : vector<32x128xf32>
    %635 = arith.mulf %631, %634 : vector<32x128xf32>
    %636 = vector.broadcast %16 : f32 to vector<32x128xf32>
    %637 = arith.mulf %636, %628 : vector<32x128xf32>
    %638 = arith.mulf %637, %635 : vector<32x128xf32>
    %639 = vector.broadcast %16 : f32 to vector<32x128xf32>
    %640 = arith.mulf %639, %635 : vector<32x128xf32>
    %641 = arith.addf %624, %638 : vector<32x128xf32>
    %642 = arith.addf %625, %640 : vector<32x128xf32>
    %cst_77 = arith.constant 1.000000e+00 : f32
    %643 = vector.broadcast %cst_77 : f32 to vector<32x128xf32>
    %644 = arith.addf %643, %641 : vector<32x128xf32>
    %645 = arith.mulf %507, %642 : vector<32x128xf32>
    %cst_78 = arith.constant 0.000000e+00 : f32
    %646 = vector.broadcast %cst_78 : f32 to vector<32x128xf32>
    %647 = arith.subf %646, %645 : vector<32x128xf32>
    %648 = arith.mulf %644, %644 : vector<32x128xf32>
    %649 = arith.mulf %647, %647 : vector<32x128xf32>
    %650 = arith.addf %648, %649 : vector<32x128xf32>
    %651 = tpu.reciprocal %650 {approx = true} : vector<32x128xf32> -> vector<32x128xf32>
    %652 = arith.mulf %650, %651 : vector<32x128xf32>
    %cst_79 = arith.constant 2.000000e+00 : f32
    %653 = vector.broadcast %cst_79 : f32 to vector<32x128xf32>
    %654 = arith.subf %653, %652 : vector<32x128xf32>
    %655 = arith.mulf %651, %654 : vector<32x128xf32>
    %656 = arith.mulf %644, %655 : vector<32x128xf32>
    %657 = arith.mulf %647, %655 : vector<32x128xf32>
    %cst_80 = arith.constant 0.000000e+00 : f32
    %658 = vector.broadcast %cst_80 : f32 to vector<32x128xf32>
    %659 = arith.subf %658, %657 : vector<32x128xf32>
    %660 = arith.addf %502, %656 : vector<32x128xf32>
    %cst_81 = arith.constant 5.000000e-01 : f32
    %661 = vector.broadcast %cst_81 : f32 to vector<32x128xf32>
    %662 = arith.mulf %661, %660 : vector<32x128xf32>
    %663 = arith.addf %507, %659 : vector<32x128xf32>
    %cst_82 = arith.constant 5.000000e-01 : f32
    %664 = vector.broadcast %cst_82 : f32 to vector<32x128xf32>
    %665 = arith.mulf %664, %663 : vector<32x128xf32>
    %cst_83 = arith.constant -9.99999971E-10 : f32
    %666 = vector.broadcast %cst_83 : f32 to vector<32x128xf32>
    %667 = arith.minimumf %665, %666 : vector<32x128xf32>
    %668 = arith.mulf %667, %667 : vector<32x128xf32>
    %669 = vector.broadcast %1 : f32 to vector<32x128xf32>
    %670 = arith.mulf %0, %669 : vector<32x128xf32>
    %671 = arith.subf %662, %670 : vector<32x128xf32>
    %672 = arith.mulf %671, %671 : vector<32x128xf32>
    %673 = arith.addf %672, %668 : vector<32x128xf32>
    %674 = tpu.reciprocal %673 {approx = true} : vector<32x128xf32> -> vector<32x128xf32>
    %675 = arith.mulf %673, %674 : vector<32x128xf32>
    %cst_84 = arith.constant 2.000000e+00 : f32
    %676 = vector.broadcast %cst_84 : f32 to vector<32x128xf32>
    %677 = arith.subf %676, %675 : vector<32x128xf32>
    %678 = arith.mulf %674, %677 : vector<32x128xf32>
    %679 = vector.broadcast %17 : f32 to vector<32x128xf32>
    %680 = arith.mulf %679, %678 : vector<32x128xf32>
    %681 = vector.broadcast %2 : f32 to vector<32x128xf32>
    %682 = arith.mulf %0, %681 : vector<32x128xf32>
    %683 = arith.subf %662, %682 : vector<32x128xf32>
    %684 = arith.mulf %683, %683 : vector<32x128xf32>
    %685 = arith.addf %684, %668 : vector<32x128xf32>
    %686 = tpu.reciprocal %685 {approx = true} : vector<32x128xf32> -> vector<32x128xf32>
    %687 = arith.mulf %685, %686 : vector<32x128xf32>
    %cst_85 = arith.constant 2.000000e+00 : f32
    %688 = vector.broadcast %cst_85 : f32 to vector<32x128xf32>
    %689 = arith.subf %688, %687 : vector<32x128xf32>
    %690 = arith.mulf %686, %689 : vector<32x128xf32>
    %691 = vector.broadcast %18 : f32 to vector<32x128xf32>
    %692 = arith.mulf %691, %690 : vector<32x128xf32>
    %693 = arith.addf %680, %692 : vector<32x128xf32>
    %694 = vector.broadcast %3 : f32 to vector<32x128xf32>
    %695 = arith.mulf %0, %694 : vector<32x128xf32>
    %696 = arith.subf %662, %695 : vector<32x128xf32>
    %697 = arith.mulf %696, %696 : vector<32x128xf32>
    %698 = arith.addf %697, %668 : vector<32x128xf32>
    %699 = tpu.reciprocal %698 {approx = true} : vector<32x128xf32> -> vector<32x128xf32>
    %700 = arith.mulf %698, %699 : vector<32x128xf32>
    %cst_86 = arith.constant 2.000000e+00 : f32
    %701 = vector.broadcast %cst_86 : f32 to vector<32x128xf32>
    %702 = arith.subf %701, %700 : vector<32x128xf32>
    %703 = arith.mulf %699, %702 : vector<32x128xf32>
    %704 = vector.broadcast %19 : f32 to vector<32x128xf32>
    %705 = arith.mulf %704, %703 : vector<32x128xf32>
    %706 = arith.addf %693, %705 : vector<32x128xf32>
    %707 = vector.broadcast %4 : f32 to vector<32x128xf32>
    %708 = arith.mulf %0, %707 : vector<32x128xf32>
    %709 = arith.subf %662, %708 : vector<32x128xf32>
    %710 = arith.mulf %709, %709 : vector<32x128xf32>
    %711 = arith.addf %710, %668 : vector<32x128xf32>
    %712 = tpu.reciprocal %711 {approx = true} : vector<32x128xf32> -> vector<32x128xf32>
    %713 = arith.mulf %711, %712 : vector<32x128xf32>
    %cst_87 = arith.constant 2.000000e+00 : f32
    %714 = vector.broadcast %cst_87 : f32 to vector<32x128xf32>
    %715 = arith.subf %714, %713 : vector<32x128xf32>
    %716 = arith.mulf %712, %715 : vector<32x128xf32>
    %717 = vector.broadcast %20 : f32 to vector<32x128xf32>
    %718 = arith.mulf %717, %716 : vector<32x128xf32>
    %719 = arith.addf %706, %718 : vector<32x128xf32>
    %720 = vector.broadcast %5 : f32 to vector<32x128xf32>
    %721 = arith.mulf %0, %720 : vector<32x128xf32>
    %722 = arith.subf %662, %721 : vector<32x128xf32>
    %723 = arith.mulf %722, %722 : vector<32x128xf32>
    %724 = arith.addf %723, %668 : vector<32x128xf32>
    %725 = tpu.reciprocal %724 {approx = true} : vector<32x128xf32> -> vector<32x128xf32>
    %726 = arith.mulf %724, %725 : vector<32x128xf32>
    %cst_88 = arith.constant 2.000000e+00 : f32
    %727 = vector.broadcast %cst_88 : f32 to vector<32x128xf32>
    %728 = arith.subf %727, %726 : vector<32x128xf32>
    %729 = arith.mulf %725, %728 : vector<32x128xf32>
    %730 = vector.broadcast %21 : f32 to vector<32x128xf32>
    %731 = arith.mulf %730, %729 : vector<32x128xf32>
    %732 = arith.addf %719, %731 : vector<32x128xf32>
    %733 = vector.broadcast %6 : f32 to vector<32x128xf32>
    %734 = arith.mulf %0, %733 : vector<32x128xf32>
    %735 = arith.subf %662, %734 : vector<32x128xf32>
    %736 = arith.mulf %735, %735 : vector<32x128xf32>
    %737 = arith.addf %736, %668 : vector<32x128xf32>
    %738 = tpu.reciprocal %737 {approx = true} : vector<32x128xf32> -> vector<32x128xf32>
    %739 = arith.mulf %737, %738 : vector<32x128xf32>
    %cst_89 = arith.constant 2.000000e+00 : f32
    %740 = vector.broadcast %cst_89 : f32 to vector<32x128xf32>
    %741 = arith.subf %740, %739 : vector<32x128xf32>
    %742 = arith.mulf %738, %741 : vector<32x128xf32>
    %743 = vector.broadcast %22 : f32 to vector<32x128xf32>
    %744 = arith.mulf %743, %742 : vector<32x128xf32>
    %745 = arith.addf %732, %744 : vector<32x128xf32>
    %746 = vector.broadcast %7 : f32 to vector<32x128xf32>
    %747 = arith.mulf %0, %746 : vector<32x128xf32>
    %748 = arith.subf %662, %747 : vector<32x128xf32>
    %749 = arith.mulf %748, %748 : vector<32x128xf32>
    %750 = arith.addf %749, %668 : vector<32x128xf32>
    %751 = tpu.reciprocal %750 {approx = true} : vector<32x128xf32> -> vector<32x128xf32>
    %752 = arith.mulf %750, %751 : vector<32x128xf32>
    %cst_90 = arith.constant 2.000000e+00 : f32
    %753 = vector.broadcast %cst_90 : f32 to vector<32x128xf32>
    %754 = arith.subf %753, %752 : vector<32x128xf32>
    %755 = arith.mulf %751, %754 : vector<32x128xf32>
    %756 = vector.broadcast %23 : f32 to vector<32x128xf32>
    %757 = arith.mulf %756, %755 : vector<32x128xf32>
    %758 = arith.addf %745, %757 : vector<32x128xf32>
    %759 = vector.broadcast %8 : f32 to vector<32x128xf32>
    %760 = arith.mulf %0, %759 : vector<32x128xf32>
    %761 = arith.subf %662, %760 : vector<32x128xf32>
    %762 = arith.mulf %761, %761 : vector<32x128xf32>
    %763 = arith.addf %762, %668 : vector<32x128xf32>
    %764 = tpu.reciprocal %763 {approx = true} : vector<32x128xf32> -> vector<32x128xf32>
    %765 = arith.mulf %763, %764 : vector<32x128xf32>
    %cst_91 = arith.constant 2.000000e+00 : f32
    %766 = vector.broadcast %cst_91 : f32 to vector<32x128xf32>
    %767 = arith.subf %766, %765 : vector<32x128xf32>
    %768 = arith.mulf %764, %767 : vector<32x128xf32>
    %769 = vector.broadcast %24 : f32 to vector<32x128xf32>
    %770 = arith.mulf %769, %768 : vector<32x128xf32>
    %771 = arith.addf %758, %770 : vector<32x128xf32>
    %772 = arith.mulf %667, %771 : vector<32x128xf32>
    %773 = math.absf %772 : vector<32x128xf32>
    %cst_92 = arith.constant 0.318309873 : f32
    %774 = vector.broadcast %cst_92 : f32 to vector<32x128xf32>
    %775 = arith.mulf %773, %774 : vector<32x128xf32>
    %c0_93 = arith.constant 0 : index
    %c0_94 = arith.constant 0 : index
    %776 = vector.load %arg5[%c0_93, %c0_94] : memref<32x128xf32, #tpu.memory_space<vmem>>, vector<32x128xf32>
    tpu.vector_store %arg5[%c0_93, %c0_94], %775 {strides = array<i32>} : memref<32x128xf32, #tpu.memory_space<vmem>>, vector<32x128xf32>,
    return
  }
  func.func @transform_0(%arg0: i32) -> i32 {
    %c0_i32 = arith.constant 0 : i32
    %c0_i32_0 = arith.constant 0 : i32
    return %c0_i32 : i32
  }
  func.func @transform_1(%arg0: i32) -> i32 {
    %c0_i32 = arith.constant 0 : i32
    %c0_i32_0 = arith.constant 0 : i32
    return %c0_i32 : i32
  }
  func.func @transform_2(%arg0: i32) -> i32 {
    %c0_i32 = arith.constant 0 : i32
    %c0_i32_0 = arith.constant 0 : i32
    return %c0_i32 : i32
  }
  func.func @transform_3(%arg0: i32) -> (i32, i32) {
    %c0_i32 = arith.constant 0 : i32
    %c0_i32_0 = arith.constant 0 : i32
    return %arg0, %c0_i32 : i32, i32
  }
  func.func @transform_4(%arg0: i32) -> (i32, i32) {
    %c0_i32 = arith.constant 0 : i32
    %c0_i32_0 = arith.constant 0 : i32
    return %arg0, %c0_i32 : i32, i32
  }
}

</mosaic_0001>

<bundles_post_ra>
// kernel: tpu_custom_call.1
= control target key start
LH: loop header
LB: loop body
LE: loop exit
PB: predicated region body
PF: predicated region fallthrough
CT: control target
= control target key end

     0   :  { %s12054_s0 = inlined_call_operand.hbm [shape: f32[8], index: 0, kind: input, shape index: {}]   ;;  %s12055_s1 = inlined_call_operand.vmem [shape: f32[8], index: 1, kind: input, shape index: {}]   ;;  %s12056_s2 = inlined_call_operand.vmem [shape: f32[8], index: 2, kind: input, shape index: {}]   ;;  %s12057_s3 = inlined_call_operand.hbm [shape: f32[64,128], index: 3, kind: input, shape index: {}]   ;;  %s12058_s4 = inlined_call_operand.hbm [shape: f32[64,128], index: 4, kind: output, shape index: {}]  }
   0x1   :  { %12414 = sst [smem:[#allocation98_spill]] %s12054_s0 }
   0x2   :  { %12415 = sst [smem:[#allocation99_spill]] %s12055_s1 }
   0x3   :  { %12416 = sst [smem:[#allocation100_spill]] %s12056_s2 }
   0x4   :  { %12417 = sst [smem:[#allocation101_spill]] %s12057_s3 }
   0x5   :  { %9 = vsyncpa [#allocation5], 0 }
   0x6   :  { %10 = vsyncpa [#allocation6], 0 }
   0x7   :  { %11 = vsyncpa [#allocation9], 0 }
   0x8   :  { %12 = vsyncpa [#allocation3], 0 }
   0x9   :  { %14 = vsyncpa [#allocation3 + $0x1], 0 }
   0xa   :  { %15 = vsyncpa [#allocation4], 0 }
   0xb   :  { %17 = vsyncpa [#allocation4 + $0x1], 0  ;;  %s6845_s15 = smov 0   ;;  %s6847_s16 = smov 0  }
   0xc   :  { %s6849_s17 = smov 0   ;;  %s6851_s18 = smov 0  }
   0xd LB: > { %12418 = sst [smem:[#allocation17_spill]] %s6761_s15  ;;  %s6866_s19 = sadd.s32 4294967295, %s6773_s18   ;;  %s6773_s18 = sphi %s6851_s18, %s13139_s18   ;;  %s6769_s17 = sphi %s6849_s17, %s13142_s17   ;;  %s6765_s16 = sphi %s6847_s16, %s13141_s16   ;;  %s6761_s15 = sphi %s6845_s15, %s13140_s15  }
   0xe   : > { %12419 = sst [smem:[#allocation18_spill]] %s6765_s16  ;;  %s5464_s20 = sadd.s32 4294967294, %s6773_s18  }
   0xf   : > { %12420 = sst [smem:[#allocation19_spill]] %s6769_s17  ;;  %p106_p0 = scmp.ne.s32.totalorder %s6765_s16, %s6761_s15 }
  0x10   : > { %12421 = sst [smem:[#allocation20_spill]] %s6773_s18  ;;  %p12059_p1 = scmp.eq.s32.totalorder %s6866_s19, 0 }
  0x11   : > { %p136_p3 = scmp.eq.s32.totalorder %s5464_s20, 1  ;;  %p5465_p5 = scmp.ge.s32.totalorder %s6773_s18, 1 }
  0x12   : > { %p6875_p4 = por %p12059_p1, %p106_p0  ;;  %p143_p7 = scmp.lt.s32.totalorder %s6773_s18, 3 }
  0x13   : > { %p6880_p6 = por %p136_p3, %p106_p0  ;;  %s12426_s1 = sld [smem:[#allocation99_spill]] }
  0x14   : > { %s12422_s21 = scalar_select %p6875_p4, 1, 0 }
  0x15   : > { %s12423_s22 = scalar_select %p6880_p6, 1, 0 }
  0x16   : > { %p6885_p8 = pnand %p5465_p5, %p143_p7  ;;  %s12427_s2 = sld [smem:[#allocation100_spill]] }
  0x17   : > { %12424 = sst [smem:[#allocation21_spill]] %s12423_s22  ;;  %s6905_s5 = sadd.s32 1, %s6773_s18  }
  0x18   : > { %s12425_s23 = scalar_select %p6885_p8, 1, 0 }
  0x19   : > { %s165_s26 = sshll.u32 %s12426_s1, 4  ;;  %p5527_p10 = pneg %p6885_p8  ;;  %s166_s26 = int_to_ptr.vmem [resolvable:$true] %s165_s26 }
  0x1a   : > { %12429 = sst [smem:[#allocation22_spill]] %s6905_s5  ;;  %s6811_s6 = smov [#allocation2]  }
  0x1b   : > { %p6900_p11 = pnand %p5527_p10, %p12059_p1  ;;  %s12430_s0 = sld [smem:[#allocation98_spill]] }
  0x1c   : > { %s176_s29 = sshll.u32 %s12427_s2, 4  ;;  %s6603_s9 = scalar_lea.vmem %s166_s26, 16  ;;  %s177_s29 = int_to_ptr.vmem [resolvable:$true] %s176_s29 }
  0x1d   : > { %p6604_p12 = scmp.ne.s32.totalorder %s166_s26, %s6603_s9  ;;  %p6605_p13 = pneg %p6900_p11 }
  0x1e   : > { %p6611_p5 = scmp.lt.s32.totalorder %s166_s26, %s166_s26  ;;  %p6612_p7 = scmp.lt.s32.totalorder %s6603_s9, %s6603_s9 }
  0x1f   : > { %p6606_p0 = pnand %p6605_p13, %p6604_p12 }
  0x20   : > { %p6613_p10 = por %p6612_p7, %p6611_p5 }
  0x21   : > { %5530 = dma.hbm_to_smem (!%p6900_p11), %s12430_s0, 16, %s6811_s6, [#allocation5]  }
  0x22   : > { %p6607_p3 = pneg %p6606_p0 }
  0x24   : > { %p6614_p9 = pnand %p6613_p10, %p6607_p3 }
  0x26   : > { %6617 = shalt.err (!%p6614_p9)
}
  0x27   : > { %s6812_s10 = smov [#allocation7]   ;;  %s6618_s11 = scalar_lea.vmem %s177_s29, 16 }
  0x28   : > { %5533 = dma.vmem_to_smem (!%p6900_p11), %s166_s26, 16, %s6812_s10, [#allocation6]  }
  0x29   : > { %p6619_p1 = scmp.ne.s32.totalorder %s177_s29, %s6618_s11  ;;  %p6626_p4 = scmp.lt.s32.totalorder %s177_s29, %s177_s29 }
  0x2a   : > { %p6627_p8 = scmp.lt.s32.totalorder %s6618_s11, %s6618_s11 }
  0x2b   : > { %p6621_p2 = pnand %p6619_p1, %p6605_p13 }
  0x2c   : > { %p6628_p12 = por %p6627_p8, %p6626_p4 }
  0x2d   : > { %p6622_p6 = pneg %p6621_p2 }
  0x2f   : > { %p6629_p0 = pnand %p6628_p12, %p6622_p6 }
  0x31   : > { %6632 = shalt.err (!%p6629_p0)
}
  0x32   : > { %s6813_s12 = smov [#allocation8]   ;;  %s90_s13 = ssub.s32 %s6773_s18, %s6905_s5 }
  0x33   : > { %5536 = dma.vmem_to_smem (!%p6900_p11), %s177_s29, 16, %s6813_s12, [#allocation9]  }
  0x34   : > { %s93_s14 = sadd.s32 1, %s6769_s17  ;;  %p91_p1 = scmp.eq.s32.totalorder %s90_s13, 0 }
  0x35   : > { %p100_p2 = scmp.ne.s32.totalorder %s6769_s17, %s6765_s16  ;;  %p101_p4 = scmp.eq.s32.totalorder %s6773_s18, 0 }
  0x36   : > { %p5548_p6 = scmp.lt.s32.totalorder %s6773_s18, 2  ;;  %p12432_p9 = scmp.eq.s32.totalorder %s6866_s19, 1 }
  0x37   : > { %s6926_s20 = scalar_select %p91_p1, %s6769_s17, %s93_s14  }
  0x38   : > { %p102_p8 = por %p101_p4, %p100_p2  ;;  %p6930_p13 = por %p12432_p9, %p100_p2 }
  0x39   : > { %12431 = sst [smem:[#allocation23_spill]] %s6926_s20  ;;  %s187_s25 = sand.u32 1, %s6769_s17  }
  0x3a   : > { %s12433_s24 = scalar_select %p6930_p13, 1, 0 }
  0x3b   : > { %s5505_s26 = sshll.u32 %s6773_s18, 9  ;;  %s5470_s27 = sshll.u32 %s187_s25, 5 }
  0x3c   : > { %s12434_s3 = sld [smem:[#allocation101_spill]]  ;;  %s191_s6 = scalar_lea.vmem [#allocation10], %s5470_s27 }
  0x3d   : > { %s198_s7 = sshll.u32 %s191_s6, 4  ;;  %p6941_p11 = pnand %p5548_p6, %p102_p8  ;;  %s6945_s7 = int_to_ptr.vmem [resolvable:$true] %s198_s7 }
  0x3e   : > { %s6947_s9 = scalar_lea.sflag [#allocation3], %s187_s25 }
  0x3f   : > { %p6635_p5 = pneg %p6941_p11 }
  0x42   : > { %s6939_s29 = scalar_lea.hbm %s12434_s3, %s5505_s26  ;;  %s6638_s13 = scalar_lea.hbm %s12434_s3, 1024 }
  0x43   : > { %s6633_s10 = scalar_lea.hbm %s6939_s29, 512  ;;  %p6639_p12 = scmp.lt.s32.totalorder %s6939_s29, %s12434_s3 }
  0x44   : > { %p6634_p3 = scmp.ne.s32.totalorder %s6939_s29, %s6633_s10  ;;  %p6640_p0 = scmp.lt.s32.totalorder %s6638_s13, %s6633_s10 }
  0x46   : > { %p6636_p7 = pnand %p6635_p5, %p6634_p3  ;;  %p6641_p1 = por %p6640_p0, %p6639_p12 }
  0x48   : > { %p6637_p10 = pneg %p6636_p7 }
  0x4a   : > { %p6642_p2 = pnand %p6641_p1, %p6637_p10 }
  0x4c   : > { %6645 = shalt.err (!%p6642_p2)
}
  0x4d   : > { %s6646_s25 = scalar_lea.vmem %s6945_s7, 512  ;;  %s6814_s27 = smov [#allocation10]  }
  0x4e   : > { %p6647_p4 = scmp.ne.s32.totalorder %s6945_s7, %s6646_s25  ;;  %s6651_s28 = sshll.u32 %s6814_s27, 4  ;;  %s6652_s28 = int_to_ptr.vmem [resolvable:$false] %s6651_s28 }
  0x4f   : > { %s6653_s30 = scalar_lea.vmem %s6652_s28, 1024  ;;  %p6654_p9 = scmp.lt.s32.totalorder %s6945_s7, %s6652_s28 }
  0x50   : > { %p6649_p6 = pnand %p6647_p4, %p6635_p5  ;;  %p6655_p3 = scmp.lt.s32.totalorder %s6653_s30, %s6646_s25 }
  0x52   : > { %p6650_p8 = pneg %p6649_p6  ;;  %p6656_p7 = por %p6655_p3, %p6654_p9 }
  0x54   : > { %p6657_p13 = pnand %p6656_p7, %p6650_p8 }
  0x56   : > { %6660 = shalt.err (!%p6657_p13)
}
  0x57   : > { %s6815_s6 = smov 128   ;;  %s6816_s10 = smov 8  }
  0x58   : > { %5540 = dma.hbm_to_vmem [thread:$0]  (!%p6941_p11), %s6939_s29, 512, %s6945_s7, %s6947_s9, %s6815_s6, %s6815_s6, %s6816_s10  }
  0x59   : > { %p12436_p5 = scmp.ne.s32.totalorder %s12425_s23, 0 }
  0x5b   : > { %210 = sbr.rel (%p12436_p5) target bundleno = 1823 (0x71f), region = 36 }
  0x60   : > { %p12437_p10 = scmp.eq.s32.totalorder %s6866_s19, 0 }
  0x62   : > { %6740 = dma.done.wait (%p12437_p10), [#allocation5], 16   ;;  %p12438_p12 = pmov %p12437_p10 }
  0x63   : > { %p12439_p0 = pmov %p12437_p10 }
  0x64   : > { %6742 = vsyncadd (%p12438_p12), [#allocation5], 4294967280 }
  0x65   : > { %6744 = dma.done.wait (%p12439_p0), [#allocation6], 16   ;;  %p12440_p13 = pmov %p12439_p0 }
  0x66   : > { %p12441_p1 = pmov %p12439_p0 }
  0x67   : > { %6746 = vsyncadd (%p12440_p13), [#allocation6], 4294967280 }
  0x68   : > { %6748 = dma.done.wait (%p12441_p1), [#allocation9], 16   ;;  %p12442_p11 = pmov %p12439_p0 }
  0x69   : > { %s6983_s23 = sand.u32 1, %s6765_s16   ;;  %p12443_p2 = scmp.ne.s32.totalorder %s12422_s21, 0 }
  0x6a   : > { %6750 = vsyncadd (%p12442_p11), [#allocation9], 4294967280  ;;  %s12063_s29 = sshll.u32 %s6983_s23, 5  ;;  %s225_s7 = scalar_lea.sflag [#allocation3], %s6983_s23 }
  0x6b   : > { %s228_s8 = scalar_lea.vmem [#allocation10], %s12063_s29 }
  0x6c   : > { %6752 = dma.done.wait (%p12443_p2), %s225_s7, 512  }
  0x6d   : > { %6754 = vsyncadd (%p12443_p2), %s225_s7, 4294966784 }
  0x6e   : > { %233 = sfence }
  0x6f   : > { %v6993_v0 = vld [vmem:[%s228_s8] sm:$0xff]  ;;  %v6995_v1 = vld [vmem:[%s228_s8 + $0x8] sm:$0xff]  ;;  %v6997_v2 = vld [vmem:[%s228_s8 + $0x10] sm:$0xff]  ;;  %s6999_s9 = sld [smem:[#allocation2]]  ;;  %s12451_s18 = sshll.u32 %s6983_s23, 5  ;;  %v7053_v4 = vmov -0.5  }
  0x70   : > { %12444 = vst [vmem:[#allocation24_spill] sm:$0xff] %v6993_v0  ;;  %12445 = vst [vmem:[#allocation25_spill] sm:$0xff] %v6995_v1  ;;  %v7001_v3 = vld [vmem:[%s228_s8 + $0x18] sm:$0xff]  ;;  %s7003_s11 = sld [smem:[#allocation2 + $0x1]]  ;;  %s7051_s22 = scalar_lea.vmem [#allocation11], %s12451_s18  ;;  %v7055_v5 = vmov -0.5  }
  0x71   : > { %12446 = vst [vmem:[#allocation26_spill] sm:$0xff] %v6997_v2  ;;  %12447 = vst [vmem:[#allocation27_spill] sm:$0xff] %v7001_v3  ;;  %s7005_s12 = sld [smem:[#allocation2 + $0x2]]  ;;  %v7057_v6 = vmov -0.5   ;;  %v7059_v7 = vmov -0.5   ;;  %s7069_s15 = smov 0  }
  0x72   : > { %s7007_s13 = sld [smem:[#allocation2 + $0x3]]  ;;  %v7061_v8 = vmov 0.90909094   ;;  %v7063_v9 = vmov 0.90909094  }
  0x73   : > { %s7009_s14 = sld [smem:[#allocation2 + $0x4]]  ;;  %v7065_v10 = vmov 0.90909094   ;;  %v7067_v11 = vmov 0.90909094  }
  0x74   : > { %s7011_s21 = sld [smem:[#allocation2 + $0x5]] }
  0x75   : > { %s7013_s26 = sld [smem:[#allocation2 + $0x6]] }
  0x76   : > { %s7015_s25 = sld [smem:[#allocation2 + $0x7]] }
  0x77   : > { %s7017_s27 = sld [smem:[#allocation7]] }
  0x78   : > { %s7019_s28 = sld [smem:[#allocation7 + $0x1]] }
  0x79   : > { %s7021_s30 = sld [smem:[#allocation7 + $0x2]] }
  0x7a   : > { %s7023_s6 = sld [smem:[#allocation7 + $0x3]] }
  0x7b   : > { %s7025_s10 = sld [smem:[#allocation7 + $0x4]] }
  0x7c   : > { %s7027_s7 = sld [smem:[#allocation7 + $0x5]] }
  0x7d   : > { %s7029_s8 = sld [smem:[#allocation7 + $0x6]] }
  0x7e   : > { %s7031_s29 = sld [smem:[#allocation7 + $0x7]] }
  0x7f   : > { %s7033_s0 = sld [smem:[#allocation8]] }
  0x80   : > { %12448 = sst [smem:[#allocation28_spill]] %s7023_s6 }
  0x81   : > { %s7035_s1 = sld [smem:[#allocation8 + $0x1]] }
  0x82   : > { %12449 = sst [smem:[#allocation29_spill]] %s7027_s7 }
  0x83   : > { %12450 = sst [smem:[#allocation30_spill]] %s7029_s8 }
  0x84   : > { %s7037_s2 = sld [smem:[#allocation8 + $0x2]] }
  0x85   : > { %s7039_s3 = sld [smem:[#allocation8 + $0x3]] }
  0x86   : > { %s7041_s20 = sld [smem:[#allocation8 + $0x4]] }
  0x87   : > { %s7043_s17 = sld [smem:[#allocation8 + $0x5]] }
  0x88   : > { %s7045_s16 = sld [smem:[#allocation8 + $0x6]] }
  0x89   : > { %s7047_s5 = sld [smem:[#allocation8 + $0x7]] }
  0x8a LB: >> { %v12452_v3 = vld [vmem:[#allocation27_spill] sm:$0xff]  ;;  %v12453_v2 = vld [vmem:[#allocation26_spill] sm:$0xff]  ;;  %v12454_v1 = vld [vmem:[#allocation25_spill] sm:$0xff]  ;;  %12456 = vst [vmem:[#allocation31_spill] sm:$0xff] %v6777_v4  ;;  %v305_v12 = vstv %s6999_s9  ;;  %v339_v15 = vstv %s7003_s11  ;;  %v7142_v26 = vmul.f32 %v6789_v7, %v6789_v7  ;;  %v7150_v29 = vmul.f32 %v6785_v6, %v6785_v6  ;;  %s12481_s6 = sld [smem:[#allocation28_spill]]  ;;  %s3142_s18 = sadd.s32 1, %s6809_s15   ;;  %v6789_v7 = vphi %v7059_v7, %v12819_v7   ;;  %v6785_v6 = vphi %v7057_v6, %v12818_v6   ;;  %v6781_v5 = vphi %v7055_v5, %v12817_v5   ;;  %v6777_v4 = vphi %v7053_v4, %v12816_v4   ;;  %s6809_s15 = sphi %s7069_s15, %s12824_s15   ;;  %v6805_v11 = vphi %v7067_v11, %v12823_v11   ;;  %v6801_v10 = vphi %v7065_v10, %v12822_v10   ;;  %v6797_v9 = vphi %v7063_v9, %v12821_v9   ;;  %v6793_v8 = vphi %v7061_v8, %v12820_v8  }
  0x8b   : >> { %v12455_v0 = vld [vmem:[#allocation24_spill] sm:$0xff]  ;;  %12457 = vst [vmem:[#allocation32_spill] sm:$0xff] %v6781_v5  ;;  %12458 = vst [vmem:[#allocation33_spill] sm:$0xff] %v6785_v6  ;;  %v7103_v14 = vmul.f32 %v305_v12, %v12454_v1  ;;  %v7107_v16 = vmul.f32 %v305_v12, %v12453_v2  ;;  %v7110_v17 = vmul.f32 %v305_v12, %v12452_v3  ;;  %v381_v38 = vstv %s7005_s12  ;;  %s12498_s7 = sld [smem:[#allocation29_spill]]  ;;  %p295_p4 = scmp.lt.s32.totalorder %s3142_s18, 25 }
  0x8c   : >> { %12459 = vst [vmem:[#allocation34_spill] sm:$0xff] %v6789_v7  ;;  %12460 = vst [vmem:[#allocation35_spill] sm:$0xff] %v6793_v8  ;;  %v7100_v13 = vmul.f32 %v305_v12, %v12455_v0  ;;  %v7117_v19 = vmul.f32 %v339_v15, %v12455_v0  ;;  %v7124_v21 = vmul.f32 %v339_v15, %v12454_v1  ;;  %v423_v56 = vstv %s7007_s13  ;;  %s12504_s8 = sld [smem:[#allocation30_spill]]  ;;  %s12824_s15 = smov %s3142_s18 }
  0x8d   : >> { %12461 = vst [vmem:[#allocation36_spill] sm:$0xff] %v6797_v9  ;;  %12462 = vst [vmem:[#allocation37_spill] sm:$0xff] %v6801_v10  ;;  %v7121_v20 = vsub.f32 %v6801_v10, %v7103_v14  ;;  %v7128_v22 = vsub.f32 %v6797_v9, %v7107_v16  ;;  %v7131_v23 = vmul.f32 %v339_v15, %v12453_v2 }
  0x8e   : >> { %12463 = vst [vmem:[#allocation38_spill] sm:$0xff] %v6805_v11  ;;  %12464 = vst [vmem:[#allocation39_spill] sm:$0xff] %v7100_v13  ;;  %v7114_v18 = vsub.f32 %v6805_v11, %v7100_v13  ;;  %v7135_v24 = vsub.f32 %v6793_v8, %v7110_v17  ;;  %v7138_v25 = vmul.f32 %v339_v15, %v12452_v3 }
  0x8f   : >> { %12465 = vst [vmem:[#allocation40_spill] sm:$0xff] %v7103_v14  ;;  %12466 = vst [vmem:[#allocation41_spill] sm:$0xff] %v7107_v16  ;;  %v344_v28 = vsub.f32 %v6805_v11, %v7117_v19  ;;  %v315_v30 = vmul.f32 %v7121_v20, %v7121_v20  ;;  %v7156_v31 = vsub.f32 %v6801_v10, %v7124_v21 }
  0x90   : >> { %12467 = vst [vmem:[#allocation42_spill] sm:$0xff] %v7110_v17  ;;  %12468 = vst [vmem:[#allocation43_spill] sm:$0xff] %v7117_v19  ;;  %v314_v27 = vmul.f32 %v7114_v18, %v7114_v18  ;;  %v7160_v32 = vmul.f32 %v6781_v5, %v6781_v5  ;;  %v316_v33 = vmul.f32 %v7128_v22, %v7128_v22 }
  0x91   : >> { %12469 = vst [vmem:[#allocation44_spill] sm:$0xff] %v7124_v21  ;;  %12470 = vst [vmem:[#allocation45_spill] sm:$0xff] %v7131_v23  ;;  %v7166_v34 = vsub.f32 %v6797_v9, %v7131_v23  ;;  %v7170_v35 = vmul.f32 %v6777_v4, %v6777_v4  ;;  %v317_v36 = vmul.f32 %v7135_v24, %v7135_v24 }
  0x92   : >> { %12471 = vst [vmem:[#allocation46_spill] sm:$0xff] %v7138_v25  ;;  %v7176_v37 = vsub.f32 %v6793_v8, %v7138_v25  ;;  %v318_v39 = vadd.f32 %v314_v27, %v7142_v26  ;;  %v348_v40 = vmul.f32 %v344_v28, %v344_v28  ;;  %v7181_v41 = vmul.f32 %v381_v38, %v12455_v0 }
  0x93   : >> { %v7184_v42 = vmul.f32 %v381_v38, %v12454_v1  ;;  %v319_v43 = vadd.f32 %v315_v30, %v7150_v29  ;;  %v349_v44 = vmul.f32 %v7156_v31, %v7156_v31  ;;  %v7190_v45 = vmul.f32 %v381_v38, %v12453_v2 }
  0x94   : >> { %12472 = vst [vmem:[#allocation47_spill] sm:$0xff] %v7181_v41  ;;  %v320_v46 = vadd.f32 %v316_v33, %v7160_v32  ;;  %v350_v47 = vmul.f32 %v7166_v34, %v7166_v34  ;;  %v386_v48 = vsub.f32 %v6805_v11, %v7181_v41  ;;  %v321_v49 = vadd.f32 %v317_v36, %v7170_v35 }
  0x95   : >> { %12473 = vst [vmem:[#allocation48_spill] sm:$0xff] %v7184_v42  ;;  %12474 = vst [vmem:[#allocation49_spill] sm:$0xff] %v7190_v45  ;;  %v351_v50 = vmul.f32 %v7176_v37, %v7176_v37  ;;  %v7201_v51 = vmul.f32 %v381_v38, %v12452_v3  ;;  %5664 = vrcp.f32 %v318_v39  ;;  %v352_v52 = vadd.f32 %v348_v40, %v7142_v26 }
  0x96   : >> { %v387_v53 = vsub.f32 %v6801_v10, %v7184_v42  ;;  %5666 = vrcp.f32 %v319_v43  ;;  %v353_v54 = vadd.f32 %v349_v44, %v7150_v29  ;;  %v388_v55 = vsub.f32 %v6797_v9, %v7190_v45 }
  0x97   : >> { %12475 = vst [vmem:[#allocation50_spill] sm:$0xff] %v7201_v51  ;;  %5668 = vrcp.f32 %v320_v46  ;;  %v354_v57 = vadd.f32 %v350_v47, %v7160_v32  ;;  %v390_v58 = vmul.f32 %v386_v48, %v386_v48  ;;  %v355_v59 = vadd.f32 %v351_v50, %v7170_v35 }
  0x98   : >> { %5670 = vrcp.f32 %v321_v49  ;;  %v389_v60 = vsub.f32 %v6793_v8, %v7201_v51  ;;  %v391_v61 = vmul.f32 %v387_v53, %v387_v53  ;;  %v7215_v62 = vmul.f32 %v423_v56, %v12455_v0 }
  0x99   : >> { %5672 = vrcp.f32 %v352_v52  ;;  %v392_v63 = vmul.f32 %v388_v55, %v388_v55  ;;  %v7218_v12 = vmul.f32 %v423_v56, %v12454_v1  ;;  %v394_v15 = vadd.f32 %v390_v58, %v7142_v26 }
  0x9a   : >> { %12476 = vst [vmem:[#allocation51_spill] sm:$0xff] %v7215_v62  ;;  %5674 = vrcp.f32 %v353_v54  ;;  %v7222_v27 = vmul.f32 %v423_v56, %v12453_v2  ;;  %v7225_v30 = vstv %s7017_s27  ;;  %v393_v33 = vmul.f32 %v389_v60, %v389_v60 }
  0x9b   : >> { %12477 = vst [vmem:[#allocation52_spill] sm:$0xff] %v7218_v12  ;;  %5676 = vrcp.f32 %v354_v57  ;;  %12479 = vst [vmem:[#allocation54_spill] sm:$0xff] %v7225_v30  ;;  %v395_v36 = vadd.f32 %v391_v61, %v7150_v29  ;;  %v428_v38 = vsub.f32 %v6805_v11, %v7215_v62  ;;  %v7231_v39 = vstv %s7019_s28 }
  0x9c   : >> { %12478 = vst [vmem:[#allocation53_spill] sm:$0xff] %v7222_v27  ;;  %5678 = vrcp.f32 %v355_v59  ;;  %12480 = vst [vmem:[#allocation55_spill] sm:$0xff] %v7231_v39  ;;  %v396_v40 = vadd.f32 %v392_v63, %v7160_v32  ;;  %v429_v43 = vsub.f32 %v6801_v10, %v7218_v12  ;;  %v327_v44 = vmul.f32 %v7225_v30, %v7114_v18 }
  0x9d   : >> { %5680 = vrcp.f32 %v394_v15  ;;  %v7239_v46 = vmul.f32 %v423_v56, %v12452_v3  ;;  %v430_v47 = vsub.f32 %v6797_v9, %v7222_v27  ;;  %v328_v49 = vmul.f32 %v7225_v30, %v7121_v20 }
  0x9e   : >> { %v329_v50 = vmul.f32 %v7225_v30, %v7128_v22  ;;  %v330_v52 = vmul.f32 %v7225_v30, %v7135_v24  ;;  %v397_v54 = vadd.f32 %v393_v33, %v7170_v35  ;;  %v361_v18 = vmul.f32 %v7231_v39, %v344_v28 }
  0x9f   : >> { %12482 = vst [vmem:[#allocation56_spill] sm:$0xff] %v7239_v46  ;;  %5682 = vrcp.f32 %v395_v36  ;;  %v7252_v57 = vstv %s7021_s30  ;;  %v432_v56 = vmul.f32 %v428_v38, %v428_v38  ;;  %v362_v59 = vmul.f32 %v7231_v39, %v7156_v31 }
  0xa0   : >> { %12483 = vst [vmem:[#allocation57_spill] sm:$0xff] %v7252_v57  ;;  %5684 = vrcp.f32 %v396_v40  ;;  %v433_v20 = vmul.f32 %v429_v43, %v429_v43  ;;  %v7257_v61 = vstv %s12481_s6  ;;  %v363_v24 = vmul.f32 %v7231_v39, %v7166_v34 }
  0xa1   : >> { %12484 = vst [vmem:[#allocation58_spill] sm:$0xff] %v7257_v61  ;;  %v364_v28 = vmul.f32 %v7231_v39, %v7176_v37  ;;  %v431_v63 = vsub.f32 %v6793_v8, %v7239_v46  ;;  %v434_v15 = vmul.f32 %v430_v47, %v430_v47  ;;  %5686 = vrcp.f32 %v397_v54 }
  0xa2   : >> { %v5665_v58 = vpop.eup %5664  ;;  %v403_v31 = vmul.f32 %v7252_v57, %v386_v48  ;;  %v404_v36 = vmul.f32 %v7252_v57, %v387_v53  ;;  %v405_v40 = vmul.f32 %v7252_v57, %v388_v55  ;;  %v7269_v12 = vmul.f32 %v7252_v57, %v389_v60 }
  0xa3   : >> { %v5667_v22 = vpop.eup %5666  ;;  %v436_v34 = vadd.f32 %v432_v56, %v7142_v26  ;;  %v7273_v37 = vmul.f32 %v7257_v61, %v428_v38  ;;  %v465_v62 = vstv %s7009_s14  ;;  %v331_v51 = vmul.f32 %v5665_v58, %v327_v44 }
  0xa4   : >> { %v5669_v33 = vpop.eup %5668  ;;  %v335_v54 = vmul.f32 %v5665_v58, %v7225_v30  ;;  %v437_v48 = vadd.f32 %v433_v20, %v7150_v29  ;;  %v7279_v53 = vmul.f32 %v7257_v61, %v429_v43  ;;  %v332_v45 = vmul.f32 %v5667_v22, %v328_v49 }
  0xa5   : >> { %v5671_v27 = vpop.eup %5670  ;;  %v336_v60 = vmul.f32 %v5667_v22, %v7225_v30  ;;  %v435_v42 = vmul.f32 %v431_v63, %v431_v63  ;;  %v438_v56 = vadd.f32 %v434_v15, %v7160_v32  ;;  %v333_v38 = vmul.f32 %v5669_v33, %v329_v50 }
  0xa6   : >> { %v5673_v46 = vpop.eup %5672  ;;  %v334_v25 = vmul.f32 %v5671_v27, %v330_v52  ;;  %v337_v23 = vmul.f32 %v5669_v33, %v7225_v30  ;;  %v338_v44 = vmul.f32 %v5671_v27, %v7225_v30  ;;  %5688 = vrcp.f32 %v436_v34 }
  0xa7   : >> { %v5675_v55 = vpop.eup %5674  ;;  %v365_v21 = vmul.f32 %v5673_v46, %v361_v18  ;;  %v369_v43 = vmul.f32 %v5673_v46, %v7231_v39  ;;  %5690 = vrcp.f32 %v437_v48  ;;  %v7288_v22 = vmul.f32 %v465_v62, %v12455_v0 }
  0xa8   : >> { %v5677_v41 = vpop.eup %5676  ;;  %v366_v20 = vmul.f32 %v5675_v55, %v362_v59  ;;  %v370_v49 = vmul.f32 %v5675_v55, %v7231_v39  ;;  %v439_v52 = vadd.f32 %v435_v42, %v7170_v35  ;;  %5692 = vrcp.f32 %v438_v56 }
  0xa9   : >> { %v5679_v58 = vpop.eup %5678  ;;  %v367_v19 = vmul.f32 %v5677_v41, %v363_v24  ;;  %12485 = vst [vmem:[#allocation59_spill] sm:$0xff] %v7288_v22  ;;  %v371_v50 = vmul.f32 %v5677_v41, %v7231_v39  ;;  %v7293_v27 = vmul.f32 %v7257_v61, %v430_v47  ;;  %v7297_v24 = vmul.f32 %v7257_v61, %v431_v63 }
  0xaa   : >> { %v5681_v18 = vpop.eup %5680  ;;  %v368_v59 = vmul.f32 %v5679_v58, %v364_v28  ;;  %v372_v46 = vmul.f32 %v5679_v58, %v7231_v39  ;;  %v7300_v15 = vmul.f32 %v465_v62, %v12454_v1  ;;  %v373_v33 = vadd.f32 %v365_v21, %v331_v51 }
  0xab   : >> { %v374_v34 = vadd.f32 %v366_v20, %v332_v45  ;;  %v377_v41 = vadd.f32 %v369_v43, %v335_v54  ;;  %v7303_v42 = vmul.f32 %v465_v62, %v12453_v2  ;;  %v375_v47 = vadd.f32 %v367_v19, %v333_v38 }
  0xac   : >> { %12486 = vst [vmem:[#allocation60_spill] sm:$0xff] %v7300_v15  ;;  %v5683_v48 = vpop.eup %5682  ;;  %v378_v55 = vadd.f32 %v370_v49, %v336_v60  ;;  %v7306_v28 = vmul.f32 %v465_v62, %v12452_v3  ;;  %v7310_v63 = vsub.f32 %v6805_v11, %v7288_v22  ;;  %v379_v58 = vadd.f32 %v371_v50, %v337_v23 }
  0xad   : >> { %12487 = vst [vmem:[#allocation61_spill] sm:$0xff] %v7303_v42  ;;  %v5685_v56 = vpop.eup %5684  ;;  %v407_v21 = vmul.f32 %v5681_v18, %v403_v31  ;;  %v411_v45 = vmul.f32 %v5681_v18, %v7252_v57  ;;  %5694 = vrcp.f32 %v439_v52  ;;  %v376_v51 = vadd.f32 %v368_v59, %v334_v25 }
  0xae   : >> { %12488 = vst [vmem:[#allocation62_spill] sm:$0xff] %v7306_v28  ;;  %v380_v54 = vadd.f32 %v372_v46, %v338_v44  ;;  %v7315_v19 = vsub.f32 %v6801_v10, %v7300_v15  ;;  %v507_v60 = vstv %s7011_s21  ;;  %v5687_v38 = vpop.eup %5686  ;;  %v408_v62 = vmul.f32 %v5683_v48, %v404_v36 }
  0xaf   : >> { %v412_v20 = vmul.f32 %v5683_v48, %v7252_v57  ;;  %v7321_v43 = vsub.f32 %v6797_v9, %v7303_v42  ;;  %v7324_v23 = vstv %s7025_s10  ;;  %v409_v31 = vmul.f32 %v5685_v56, %v405_v40 }
  0xb0   : >> { %12489 = vst [vmem:[#allocation63_spill] sm:$0xff] %v7324_v23  ;;  %v413_v25 = vmul.f32 %v5685_v56, %v7252_v57  ;;  %v7329_v44 = vsub.f32 %v6793_v8, %v7306_v28  ;;  %v474_v49 = vmul.f32 %v7310_v63, %v7310_v63  ;;  %v415_v36 = vadd.f32 %v407_v21, %v373_v33 }
  0xb1   : >> { %v419_v50 = vadd.f32 %v411_v45, %v377_v41  ;;  %v7334_v52 = vmul.f32 %v507_v60, %v12455_v0  ;;  %v7337_v18 = vmul.f32 %v507_v60, %v12454_v1  ;;  %v410_v59 = vmul.f32 %v5687_v38, %v7269_v12 }
  0xb2   : >> { %v414_v40 = vmul.f32 %v5687_v38, %v7252_v57  ;;  %v475_v46 = vmul.f32 %v7315_v19, %v7315_v19  ;;  %v7344_v48 = vmul.f32 %v507_v60, %v12453_v2  ;;  %v416_v56 = vadd.f32 %v408_v62, %v374_v34 }
  0xb3   : >> { %12490 = vst [vmem:[#allocation64_spill] sm:$0xff] %v7334_v52  ;;  %12491 = vst [vmem:[#allocation65_spill] sm:$0xff] %v7337_v18  ;;  %v476_v33 = vmul.f32 %v7321_v43, %v7321_v43  ;;  %v7349_v41 = vmul.f32 %v507_v60, %v12452_v3  ;;  %v549_v21 = vstv %s7013_s26  ;;  %v5689_v45 = vpop.eup %5688  ;;  %v7352_v28 = vadd.f32 %v409_v31, %v375_v47 }
  0xb4   : >> { %12492 = vst [vmem:[#allocation66_spill] sm:$0xff] %v7344_v48  ;;  %v420_v12 = vadd.f32 %v412_v20, %v378_v55  ;;  %v7356_v38 = vsub.f32 %v6805_v11, %v7334_v52  ;;  %v7359_v42 = vmul.f32 %v549_v21, %v12455_v0  ;;  %v5691_v15 = vpop.eup %5690  ;;  %v477_v34 = vmul.f32 %v7329_v44, %v7329_v44 }
  0xb5   : >> { %12493 = vst [vmem:[#allocation67_spill] sm:$0xff] %v7349_v41  ;;  %v478_v62 = vadd.f32 %v474_v49, %v7142_v26  ;;  %v7366_v60 = vsub.f32 %v6801_v10, %v7337_v18  ;;  %v7369_v47 = vmul.f32 %v549_v21, %v12454_v1  ;;  %v5693_v55 = vpop.eup %5692  ;;  %v7371_v20 = vadd.f32 %v413_v25, %v379_v58 }
  0xb6   : >> { %12494 = vst [vmem:[#allocation68_spill] sm:$0xff] %v7359_v42  ;;  %v479_v31 = vadd.f32 %v475_v46, %v7150_v29  ;;  %v7376_v52 = vsub.f32 %v6797_v9, %v7344_v48  ;;  %v7379_v22 = vmul.f32 %v549_v21, %v12453_v2  ;;  %v7381_v49 = vadd.f32 %v410_v59, %v376_v51 }
  0xb7   : >> { %12495 = vst [vmem:[#allocation69_spill] sm:$0xff] %v7369_v47  ;;  %v480_v18 = vadd.f32 %v476_v33, %v7160_v32  ;;  %v7386_v57 = vsub.f32 %v6793_v8, %v7349_v41  ;;  %v7389_v58 = vmul.f32 %v549_v21, %v12452_v3  ;;  %v7391_v25 = vadd.f32 %v414_v40, %v380_v54 }
  0xb8   : >> { %12496 = vst [vmem:[#allocation70_spill] sm:$0xff] %v7379_v22  ;;  %v449_v46 = vmul.f32 %v5689_v45, %v7273_v37  ;;  %v516_v48 = vmul.f32 %v7356_v38, %v7356_v38  ;;  %v7398_v51 = vsub.f32 %v6805_v11, %v7359_v42  ;;  %v481_v59 = vadd.f32 %v477_v34, %v7170_v35 }
  0xb9   : >> { %12497 = vst [vmem:[#allocation71_spill] sm:$0xff] %v7389_v58  ;;  %5696 = vrcp.f32 %v478_v62  ;;  %v517_v33 = vmul.f32 %v7366_v60, %v7366_v60  ;;  %v7405_v21 = vsub.f32 %v6801_v10, %v7369_v47  ;;  %v453_v37 = vmul.f32 %v5689_v45, %v7257_v61 }
  0xba   : >> { %v5695_v54 = vpop.eup %5694  ;;  %5698 = vrcp.f32 %v479_v31  ;;  %v518_v40 = vmul.f32 %v7376_v52, %v7376_v52  ;;  %v7412_v42 = vsub.f32 %v6797_v9, %v7379_v22  ;;  %v450_v34 = vmul.f32 %v5691_v15, %v7279_v53 }
  0xbb   : >> { %5700 = vrcp.f32 %v480_v18  ;;  %v519_v62 = vmul.f32 %v7386_v57, %v7386_v57  ;;  %v7419_v47 = vsub.f32 %v6793_v8, %v7389_v58  ;;  %v451_v45 = vmul.f32 %v5693_v55, %v7293_v27 }
  0xbc   : >> { %v454_v31 = vmul.f32 %v5691_v15, %v7257_v61  ;;  %v520_v41 = vadd.f32 %v516_v48, %v7142_v26  ;;  %v558_v22 = vmul.f32 %v7398_v51, %v7398_v51  ;;  %v455_v53 = vmul.f32 %v5693_v55, %v7257_v61 }
  0xbd   : >> { %5702 = vrcp.f32 %v481_v59  ;;  %v521_v18 = vadd.f32 %v517_v33, %v7150_v29  ;;  %v559_v39 = vmul.f32 %v7405_v21, %v7405_v21  ;;  %v7430_v58 = vadd.f32 %v449_v46, %v415_v36 }
  0xbe   : >> { %v7432_v30 = vadd.f32 %v453_v37, %v419_v50  ;;  %v522_v27 = vadd.f32 %v518_v40, %v7160_v32  ;;  %v560_v15 = vmul.f32 %v7412_v42, %v7412_v42  ;;  %v7437_v48 = vadd.f32 %v450_v34, %v416_v56 }
  0xbf   : >> { %v523_v17 = vadd.f32 %v519_v62, %v7170_v35  ;;  %v561_v55 = vmul.f32 %v7419_v47, %v7419_v47  ;;  %v591_v59 = vstv %s7015_s25  ;;  %v7443_v33 = vadd.f32 %v454_v31, %v420_v12 }
  0xc0   : >> { %v487_v36 = vmul.f32 %v7324_v23, %v7310_v63  ;;  %5704 = vrcp.f32 %v520_v41  ;;  %v562_v50 = vadd.f32 %v558_v22, %v7142_v26  ;;  %v452_v46 = vmul.f32 %v5695_v54, %v7297_v24 }
  0xc1   : >> { %v488_v56 = vmul.f32 %v7324_v23, %v7315_v19  ;;  %5706 = vrcp.f32 %v521_v18  ;;  %v563_v37 = vadd.f32 %v559_v39, %v7150_v29  ;;  %v564_v40 = vadd.f32 %v560_v15, %v7160_v32 }
  0xc2   : >> { %5708 = vrcp.f32 %v522_v27  ;;  %v7454_v12 = vmul.f32 %v591_v59, %v12455_v0  ;;  %v7457_v63 = vmul.f32 %v591_v59, %v12454_v1  ;;  %v565_v22 = vadd.f32 %v561_v55, %v7170_v35 }
  0xc3   : >> { %5710 = vrcp.f32 %v523_v17  ;;  %v7461_v24 = vmul.f32 %v591_v59, %v12453_v2  ;;  %v7464_v19 = vmul.f32 %v591_v59, %v12452_v3  ;;  %v456_v39 = vmul.f32 %v5695_v54, %v7257_v61 }
  0xc4   : >> { %12499 = vst [vmem:[#allocation72_spill] sm:$0xff] %v7454_v12  ;;  %12500 = vst [vmem:[#allocation73_spill] sm:$0xff] %v7457_v63  ;;  %5712 = vrcp.f32 %v562_v50  ;;  %v7469_v41 = vsub.f32 %v6805_v11, %v7454_v12  ;;  %v7473_v34 = vsub.f32 %v6801_v10, %v7457_v63  ;;  %v489_v17 = vmul.f32 %v7324_v23, %v7321_v43 }
  0xc5   : >> { %12501 = vst [vmem:[#allocation74_spill] sm:$0xff] %v7461_v24  ;;  %12502 = vst [vmem:[#allocation75_spill] sm:$0xff] %v7464_v19  ;;  %5714 = vrcp.f32 %v563_v37  ;;  %v7479_v62 = vsub.f32 %v6797_v9, %v7461_v24  ;;  %v7483_v54 = vsub.f32 %v6793_v8, %v7464_v19  ;;  %v7486_v18 = vstv %s12498_s7 }
  0xc6   : >> { %v5697_v31 = vpop.eup %5696  ;;  %12503 = vst [vmem:[#allocation76_spill] sm:$0xff] %v7486_v18  ;;  %5716 = vrcp.f32 %v564_v40  ;;  %v600_v27 = vmul.f32 %v7469_v41, %v7469_v41  ;;  %v601_v15 = vmul.f32 %v7473_v34, %v7473_v34  ;;  %v490_v55 = vmul.f32 %v7324_v23, %v7329_v44 }
  0xc7   : >> { %v5699_v43 = vpop.eup %5698  ;;  %5718 = vrcp.f32 %v565_v22  ;;  %v602_v59 = vmul.f32 %v7479_v62, %v7479_v62  ;;  %v603_v50 = vmul.f32 %v7483_v54, %v7483_v54  ;;  %v459_v40 = vadd.f32 %v451_v45, %v7352_v28 }
  0xc8   : >> { %v5701_v37 = vpop.eup %5700  ;;  %v460_v0 = vadd.f32 %v452_v46, %v7381_v49  ;;  %v463_v1 = vadd.f32 %v455_v53, %v7371_v20  ;;  %v604_v2 = vadd.f32 %v600_v27, %v7142_v26  ;;  %v464_v3 = vadd.f32 %v456_v39, %v7391_v25 }
  0xc9   : >> { %v491_v19 = vmul.f32 %v5697_v31, %v487_v36  ;;  %v529_v44 = vmul.f32 %v7486_v18, %v7356_v38  ;;  %v605_v22 = vadd.f32 %v601_v15, %v7150_v29  ;;  %v492_v63 = vmul.f32 %v5699_v43, %v488_v56 }
  0xca   : >> { %v5703_v24 = vpop.eup %5702  ;;  %v495_v12 = vmul.f32 %v5697_v31, %v7324_v23  ;;  %v496_v28 = vmul.f32 %v5699_v43, %v7324_v23  ;;  %v606_v49 = vadd.f32 %v602_v59, %v7160_v32  ;;  %v493_v20 = vmul.f32 %v5701_v37, %v489_v17 }
  0xcb   : >> { %v494_v45 = vmul.f32 %v5703_v24, %v490_v55  ;;  %v497_v26 = vmul.f32 %v5701_v37, %v7324_v23  ;;  %v607_v25 = vadd.f32 %v603_v50, %v7170_v35  ;;  %v530_v38 = vmul.f32 %v7486_v18, %v7366_v60 }
  0xcc   : >> { %v531_v29 = vmul.f32 %v7486_v18, %v7376_v52  ;;  %v532_v53 = vmul.f32 %v7486_v18, %v7386_v57  ;;  %5720 = vrcp.f32 %v604_v2  ;;  %v498_v46 = vmul.f32 %v5703_v24, %v7324_v23 }
  0xcd   : >> { %v5705_v36 = vpop.eup %5704  ;;  %v499_v32 = vadd.f32 %v491_v19, %v7430_v58  ;;  %v7520_v56 = vstv %s12504_s8  ;;  %5722 = vrcp.f32 %v605_v22  ;;  %v500_v39 = vadd.f32 %v492_v63, %v7437_v48 }
  0xce   : >> { %12505 = vst [vmem:[#allocation77_spill] sm:$0xff] %v7520_v56  ;;  %v5707_v35 = vpop.eup %5706  ;;  %v503_v60 = vadd.f32 %v495_v12, %v7432_v30  ;;  %v504_v52 = vadd.f32 %v496_v28, %v7443_v33  ;;  %5724 = vrcp.f32 %v606_v49  ;;  %v501_v57 = vadd.f32 %v493_v20, %v459_v40 }
  0xcf   : >> { %v5709_v17 = vpop.eup %5708  ;;  %v502_v2 = vadd.f32 %v494_v45, %v460_v0  ;;  %v505_v31 = vadd.f32 %v497_v26, %v463_v1  ;;  %5726 = vrcp.f32 %v607_v25  ;;  %v533_v27 = vmul.f32 %v5705_v36, %v529_v44 }
  0xd0   : >> { %v5711_v24 = vpop.eup %5710  ;;  %v537_v58 = vmul.f32 %v5705_v36, %v7486_v18  ;;  %v571_v19 = vmul.f32 %v7520_v56, %v7398_v51  ;;  %v7529_v15 = vstv %s7031_s29  ;;  %v506_v63 = vadd.f32 %v498_v46, %v464_v3 }
  0xd1   : >> { %12506 = vst [vmem:[#allocation78_spill] sm:$0xff] %v7529_v15  ;;  %v5713_v48 = vpop.eup %5712  ;;  %v534_v30 = vmul.f32 %v5707_v35, %v530_v38  ;;  %v538_v33 = vmul.f32 %v5707_v35, %v7486_v18  ;;  %v572_v12 = vmul.f32 %v7520_v56, %v7405_v21  ;;  %v535_v1 = vmul.f32 %v5709_v17, %v531_v29 }
  0xd2   : >> { %v5715_v0 = vpop.eup %5714  ;;  %v539_v43 = vmul.f32 %v5709_v17, %v7486_v18  ;;  %v573_v55 = vmul.f32 %v7520_v56, %v7412_v42  ;;  %v574_v51 = vmul.f32 %v7520_v56, %v7419_v47  ;;  %v536_v50 = vmul.f32 %v5711_v24, %v532_v53 }
  0xd3   : >> { %v5717_v59 = vpop.eup %5716  ;;  %v540_v3 = vmul.f32 %v5711_v24, %v7486_v18  ;;  %v613_v37 = vmul.f32 %v7529_v15, %v7469_v41  ;;  %v614_v21 = vmul.f32 %v7529_v15, %v7473_v34  ;;  %v541_v44 = vadd.f32 %v533_v27, %v499_v32 }
  0xd4   : >> { %v5719_v40 = vpop.eup %5718  ;;  %v545_v22 = vadd.f32 %v537_v58, %v503_v60  ;;  %v575_v28 = vmul.f32 %v5713_v48, %v571_v19  ;;  %v579_v49 = vmul.f32 %v5713_v48, %v7520_v56  ;;  %v542_v42 = vadd.f32 %v534_v30, %v500_v39 }
  0xd5   : >> { %v546_v20 = vadd.f32 %v538_v33, %v504_v52  ;;  %v576_v45 = vmul.f32 %v5715_v0, %v572_v12  ;;  %v580_v47 = vmul.f32 %v5715_v0, %v7520_v56  ;;  %v543_v26 = vadd.f32 %v535_v1, %v501_v57 }
  0xd6   : >> { %v547_v25 = vadd.f32 %v539_v43, %v505_v31  ;;  %v577_v38 = vmul.f32 %v5717_v59, %v573_v55  ;;  %v581_v29 = vmul.f32 %v5717_v59, %v7520_v56  ;;  %v544_v41 = vadd.f32 %v536_v50, %v502_v2 }
  0xd7   : >> { %v548_v53 = vadd.f32 %v540_v3, %v506_v63  ;;  %v578_v36 = vmul.f32 %v5719_v40, %v574_v51  ;;  %v582_v34 = vmul.f32 %v5719_v40, %v7520_v56  ;;  %v583_v46 = vadd.f32 %v575_v28, %v541_v44 }
  0xd8   : >> { %v587_v32 = vadd.f32 %v579_v49, %v545_v22  ;;  %v615_v35 = vmul.f32 %v7529_v15, %v7479_v62  ;;  %v584_v60 = vadd.f32 %v576_v45, %v542_v42  ;;  %v588_v52 = vadd.f32 %v580_v47, %v546_v20 }
  0xd9   : >> { %v5721_v39 = vpop.eup %5720  ;;  %v616_v17 = vmul.f32 %v7529_v15, %v7483_v54  ;;  %v585_v31 = vadd.f32 %v577_v38, %v543_v26  ;;  %v589_v24 = vadd.f32 %v581_v29, %v547_v25  ;;  %v586_v19 = vadd.f32 %v578_v36, %v544_v41 }
  0xda   : >> { %v5723_v57 = vpop.eup %5722  ;;  %v617_v27 = vmul.f32 %v5721_v39, %v613_v37  ;;  %v621_v2 = vmul.f32 %v5721_v39, %v7529_v15  ;;  %v590_v48 = vadd.f32 %v582_v34, %v548_v53 }
  0xdb   : >> { %v5725_v58 = vpop.eup %5724  ;;  %v618_v63 = vmul.f32 %v5723_v57, %v614_v21  ;;  %v622_v30 = vmul.f32 %v5723_v57, %v7529_v15 }
  0xdc   : >> { %v5727_v33 = vpop.eup %5726  ;;  %v619_v62 = vmul.f32 %v5725_v58, %v615_v35  ;;  %v623_v12 = vmul.f32 %v5725_v58, %v7529_v15  ;;  %v625_v0 = vadd.f32 %v617_v27, %v583_v46  ;;  %v629_v1 = vadd.f32 %v621_v2, %v587_v32 }
  0xdd   : >> { %v620_v43 = vmul.f32 %v5727_v33, %v616_v17  ;;  %v624_v54 = vmul.f32 %v5727_v33, %v7529_v15  ;;  %v626_v55 = vadd.f32 %v618_v63, %v584_v60  ;;  %v630_v51 = vadd.f32 %v622_v30, %v588_v52 }
  0xde   : >> { %v627_v59 = vadd.f32 %v619_v62, %v585_v31  ;;  %v631_v50 = vadd.f32 %v623_v12, %v589_v24  ;;  %v633_v3 = vadd.f32 1.0, %v625_v0  ;;  %v637_v37 = vmul.f32 %v6789_v7, %v629_v1 }
  0xdf   : >> { %v628_v40 = vadd.f32 %v620_v43, %v586_v19  ;;  %v632_v21 = vadd.f32 %v624_v54, %v590_v48  ;;  %v634_v44 = vadd.f32 1.0, %v626_v55  ;;  %v638_v22 = vmul.f32 %v6785_v6, %v630_v51 }
  0xe0   : >> { %v635_v28 = vadd.f32 1.0, %v627_v59  ;;  %v639_v49 = vmul.f32 %v6781_v5, %v631_v50  ;;  %v641_v42 = vsub.f32 0.0, %v637_v37  ;;  %v645_v20 = vmul.f32 %v633_v3, %v633_v3 }
  0xe1   : >> { %v636_v45 = vadd.f32 1.0, %v628_v40  ;;  %v640_v47 = vmul.f32 %v6777_v4, %v632_v21  ;;  %v642_v26 = vsub.f32 0.0, %v638_v22  ;;  %v646_v25 = vmul.f32 %v634_v44, %v634_v44 }
  0xe2   : >> { %v643_v38 = vsub.f32 0.0, %v639_v49  ;;  %v647_v29 = vmul.f32 %v635_v28, %v635_v28  ;;  %v649_v41 = vmul.f32 %v641_v42, %v641_v42 }
  0xe3   : >> { %v644_v53 = vsub.f32 0.0, %v640_v47  ;;  %v648_v36 = vmul.f32 %v636_v45, %v636_v45  ;;  %v650_v34 = vmul.f32 %v642_v26, %v642_v26 }
  0xe4   : >> { %v651_v46 = vmul.f32 %v643_v38, %v643_v38  ;;  %v653_v32 = vadd.f32 %v649_v41, %v645_v20 }
  0xe5   : >> { %v652_v35 = vmul.f32 %v644_v53, %v644_v53  ;;  %v654_v39 = vadd.f32 %v650_v34, %v646_v25 }
  0xe6   : >> { %v655_v60 = vadd.f32 %v651_v46, %v647_v29  ;;  %5728 = vrcp.f32 %v653_v32  ;;  %v12508_v46 = vld [vmem:[#allocation42_spill] sm:$0xff] }
  0xe7   : >> { %v656_v52 = vadd.f32 %v652_v35, %v648_v36  ;;  %5730 = vrcp.f32 %v654_v39 }
  0xe8   : >> { %5732 = vrcp.f32 %v655_v60 }
  0xe9   : >> { %5734 = vrcp.f32 %v656_v52 }
  0xf3   : >> { %v5729_v17 = vpop.eup %5728 }
  0xf4   : >> { %v5731_v57 = vpop.eup %5730  ;;  %v661_v31 = vmul.f32 %v5729_v17, %v633_v3  ;;  %v665_v24 = vmul.f32 %v5729_v17, %v641_v42  ;;  %v12510_v17 = vld [vmem:[#allocation43_spill] sm:$0xff] }
  0xf5   : >> { %v5733_v27 = vpop.eup %5732  ;;  %v662_v2 = vmul.f32 %v5731_v57, %v634_v44  ;;  %v666_v58 = vmul.f32 %v5731_v57, %v642_v26 }
  0xf6   : >> { %v5735_v19 = vpop.eup %5734  ;;  %v663_v48 = vmul.f32 %v5733_v27, %v635_v28  ;;  %v667_v63 = vmul.f32 %v5733_v27, %v643_v38  ;;  %v669_v30 = vsub.f32 0.0, %v665_v24  ;;  %v673_v33 = vadd.f32 %v6805_v11, %v661_v31  ;;  %v12511_v31 = vld [vmem:[#allocation44_spill] sm:$0xff] }
  0xf7   : >> { %v664_v62 = vmul.f32 %v5735_v19, %v636_v45  ;;  %v668_v12 = vmul.f32 %v5735_v19, %v644_v53  ;;  %v670_v0 = vsub.f32 0.0, %v666_v58  ;;  %v674_v1 = vadd.f32 %v6801_v10, %v662_v2  ;;  %v12512_v2 = vld [vmem:[#allocation45_spill] sm:$0xff]  ;;  %v12513_v19 = vld [vmem:[#allocation46_spill] sm:$0xff] }
  0xf8   : >> { %v671_v43 = vsub.f32 0.0, %v667_v63  ;;  %v675_v54 = vadd.f32 %v6797_v9, %v663_v48  ;;  %v7563_v55 = vmul.f32 0.5, %v673_v33  ;;  %v681_v51 = vadd.f32 %v6789_v7, %v669_v30  ;;  %v12522_v7 = vld [vmem:[#allocation54_spill] sm:$0xff] }
  0xf9   : >> { %v672_v59 = vsub.f32 0.0, %v668_v12  ;;  %v676_v50 = vadd.f32 %v6793_v8, %v664_v62  ;;  %v7567_v3 = vmul.f32 0.5, %v674_v1  ;;  %v682_v37 = vadd.f32 %v6785_v6, %v670_v0  ;;  %v12521_v6 = vld [vmem:[#allocation56_spill] sm:$0xff] }
  0xfa   : >> { %v7570_v40 = vmul.f32 0.5, %v675_v54  ;;  %v683_v21 = vadd.f32 %v6781_v5, %v671_v43  ;;  %v685_v44 = vmul.f32 0.5, %v681_v51  ;;  %v7575_v22 = vsub.f32 %v7563_v55, %v7100_v13  ;;  %v12520_v5 = vld [vmem:[#allocation53_spill] sm:$0xff] }
  0xfb   : >> { %v7577_v28 = vmul.f32 0.5, %v676_v50  ;;  %v684_v49 = vadd.f32 %v6777_v4, %v672_v59  ;;  %v686_v42 = vmul.f32 0.5, %v682_v37  ;;  %v698_v20 = vsub.f32 %v7567_v3, %v7103_v14  ;;  %v12514_v59 = vld [vmem:[#allocation47_spill] sm:$0xff]  ;;  %v12515_v37 = vld [vmem:[#allocation48_spill] sm:$0xff] }
  0xfc   : >> { %v687_v45 = vmul.f32 0.5, %v683_v21  ;;  %v7582_v47 = vmin.f32 %v685_v44, -1e-09  ;;  %v699_v26 = vsub.f32 %v7570_v40, %v7107_v16  ;;  %v701_v29 = vmul.f32 %v7575_v22, %v7575_v22  ;;  %v12516_v44 = vld [vmem:[#allocation49_spill] sm:$0xff] }
  0xfd   : >> { %v688_v25 = vmul.f32 0.5, %v684_v49  ;;  %v7586_v38 = vmin.f32 %v686_v42, -1e-09  ;;  %v702_v36 = vmul.f32 %v698_v20, %v698_v20  ;;  %v700_v32 = vsub.f32 %v7577_v28, %v12508_v46 }
  0xfe   : >> { %v7590_v41 = vmin.f32 %v687_v45, -1e-09  ;;  %v7594_v53 = vmul.f32 %v7582_v47, %v7582_v47  ;;  %v703_v60 = vmul.f32 %v699_v26, %v699_v26  ;;  %v725_v57 = vsub.f32 %v7563_v55, %v12510_v17 }
  0xff   : >> { %v7598_v34 = vmul.f32 %v7586_v38, %v7586_v38  ;;  %v7602_v35 = vmin.f32 %v688_v25, -1e-09  ;;  %v726_v24 = vsub.f32 %v7567_v3, %v12511_v31  ;;  %v727_v58 = vsub.f32 %v7570_v40, %v12512_v2  ;;  %v12517_v25 = vld [vmem:[#allocation50_spill] sm:$0xff] }
 0x100   : >> { %12507 = vst [vmem:[#allocation79_spill] sm:$0xff] %v7590_v41  ;;  %v7606_v39 = vmul.f32 %v7590_v41, %v7590_v41  ;;  %v705_v52 = vadd.f32 %v701_v29, %v7594_v53  ;;  %v728_v48 = vsub.f32 %v7577_v28, %v12513_v19  ;;  %v704_v63 = vmul.f32 %v700_v32, %v700_v32 }
 0x101   : >> { %12509 = vst [vmem:[#allocation80_spill] sm:$0xff] %v7602_v35  ;;  %v706_v27 = vadd.f32 %v702_v36, %v7598_v34  ;;  %v729_v30 = vmul.f32 %v725_v57, %v725_v57  ;;  %v730_v33 = vmul.f32 %v726_v24, %v726_v24  ;;  %v7620_v62 = vmul.f32 %v7602_v35, %v7602_v35 }
 0x102   : >> { %v707_v12 = vadd.f32 %v703_v60, %v7606_v39  ;;  %v731_v0 = vmul.f32 %v727_v58, %v727_v58  ;;  %v732_v1 = vmul.f32 %v728_v48, %v728_v48  ;;  %5736 = vrcp.f32 %v705_v52 }
 0x103   : >> { %v733_v43 = vadd.f32 %v729_v30, %v7594_v53  ;;  %5738 = vrcp.f32 %v706_v27  ;;  %v734_v54 = vadd.f32 %v730_v33, %v7598_v34  ;;  %v761_v50 = vsub.f32 %v7563_v55, %v12514_v59  ;;  %v12518_v27 = vld [vmem:[#allocation51_spill] sm:$0xff] }
 0x104   : >> { %v735_v51 = vadd.f32 %v731_v0, %v7606_v39  ;;  %v762_v21 = vsub.f32 %v7567_v3, %v12515_v37  ;;  %v763_v49 = vsub.f32 %v7570_v40, %v12516_v44  ;;  %v708_v42 = vadd.f32 %v704_v63, %v7620_v62 }
 0x105   : >> { %5740 = vrcp.f32 %v707_v12  ;;  %v736_v45 = vadd.f32 %v732_v1, %v7620_v62  ;;  %v764_v29 = vsub.f32 %v7577_v28, %v12517_v25  ;;  %v765_v36 = vmul.f32 %v761_v50, %v761_v50  ;;  %v12519_v1 = vld [vmem:[#allocation52_spill] sm:$0xff] }
 0x106   : >> { %5742 = vrcp.f32 %v733_v43  ;;  %v766_v60 = vmul.f32 %v762_v21, %v762_v21  ;;  %v767_v52 = vmul.f32 %v763_v49, %v763_v49  ;;  %v797_v30 = vsub.f32 %v7563_v55, %v12518_v27  ;;  %v12526_v25 = vld [vmem:[#allocation60_spill] sm:$0xff] }
 0x107   : >> { %5744 = vrcp.f32 %v734_v54  ;;  %v768_v33 = vmul.f32 %v764_v29, %v764_v29  ;;  %v769_v0 = vadd.f32 %v765_v36, %v7594_v53  ;;  %v798_v43 = vsub.f32 %v7567_v3, %v12519_v1 }
 0x108   : >> { %5746 = vrcp.f32 %v735_v51  ;;  %v770_v63 = vadd.f32 %v766_v60, %v7598_v34  ;;  %v771_v12 = vadd.f32 %v767_v52, %v7606_v39  ;;  %v801_v4 = vmul.f32 %v797_v30, %v797_v30 }
 0x109   : >> { %5748 = vrcp.f32 %v708_v42  ;;  %v772_v54 = vadd.f32 %v768_v33, %v7620_v62  ;;  %v799_v51 = vsub.f32 %v7570_v40, %v12520_v5  ;;  %v800_v36 = vsub.f32 %v7577_v28, %v12521_v6 }
 0x10a   : >> { %5750 = vrcp.f32 %v736_v45  ;;  %v713_v42 = vmul.f32 %v7575_v22, %v12522_v7  ;;  %v714_v60 = vmul.f32 %v698_v20, %v12522_v7  ;;  %v715_v45 = vmul.f32 %v699_v26, %v12522_v7  ;;  %v12524_v20 = vld [vmem:[#allocation57_spill] sm:$0xff] }
 0x10b   : >> { %5752 = vrcp.f32 %v769_v0  ;;  %v716_v52 = vmul.f32 %v700_v32, %v12522_v7  ;;  %v12523_v0 = vld [vmem:[#allocation55_spill] sm:$0xff]  ;;  %v802_v33 = vmul.f32 %v798_v43, %v798_v43  ;;  %v805_v6 = vadd.f32 %v801_v4, %v7594_v53 }
 0x10c   : >> { %5754 = vrcp.f32 %v770_v63  ;;  %v741_v8 = vmul.f32 %v725_v57, %v12523_v0  ;;  %v742_v9 = vmul.f32 %v726_v24, %v12523_v0  ;;  %v743_v10 = vmul.f32 %v727_v58, %v12523_v0 }
 0x10d   : >> { %5756 = vrcp.f32 %v771_v12  ;;  %v744_v11 = vmul.f32 %v728_v48, %v12523_v0  ;;  %v777_v12 = vmul.f32 %v761_v50, %v12524_v20  ;;  %v803_v5 = vmul.f32 %v799_v51, %v799_v51 }
 0x10e   : >> { %5758 = vrcp.f32 %v772_v54  ;;  %v804_v26 = vmul.f32 %v800_v36, %v800_v36  ;;  %v778_v32 = vmul.f32 %v762_v21, %v12524_v20  ;;  %v779_v57 = vmul.f32 %v763_v49, %v12524_v20  ;;  %v12525_v54 = vld [vmem:[#allocation59_spill] sm:$0xff] }
 0x10f   : >> { %v5737_v63 = vpop.eup %5736  ;;  %v7662_v1 = vmul.f32 %v764_v29, %v12524_v20  ;;  %v7665_v24 = vmul.f32 %v797_v30, %v7257_v61  ;;  %v806_v48 = vadd.f32 %v802_v33, %v7598_v34  ;;  %v7669_v4 = vmul.f32 %v798_v43, %v7257_v61 }
 0x110   : >> { %v5739_v22 = vpop.eup %5738  ;;  %v7672_v50 = vmul.f32 %v799_v51, %v7257_v61  ;;  %v833_v21 = vsub.f32 %v7563_v55, %v12525_v54  ;;  %v717_v49 = vmul.f32 %v5737_v63, %v713_v42  ;;  %v721_v29 = vmul.f32 %v5737_v63, %v12522_v7  ;;  %v12527_v42 = vld [vmem:[#allocation61_spill] sm:$0xff] }
 0x111   : >> { %5760 = vrcp.f32 %v805_v6  ;;  %v834_v30 = vsub.f32 %v7567_v3, %v12526_v25  ;;  %v718_v37 = vmul.f32 %v5739_v22, %v714_v60  ;;  %v722_v33 = vmul.f32 %v5739_v22, %v12522_v7 }
 0x112   : >> { %v5741_v58 = vpop.eup %5740  ;;  %v807_v43 = vadd.f32 %v803_v5, %v7606_v39  ;;  %v808_v51 = vadd.f32 %v804_v26, %v7620_v62  ;;  %v7685_v63 = vsub.f32 %v7570_v40, %v12527_v42  ;;  %5762 = vrcp.f32 %v806_v48 }
 0x113   : >> { %v5743_v27 = vpop.eup %5742  ;;  %v719_v19 = vmul.f32 %v5741_v58, %v715_v45  ;;  %v723_v54 = vmul.f32 %v5741_v58, %v12522_v7  ;;  %v7689_v60 = vmul.f32 %v800_v36, %v7257_v61  ;;  %v837_v22 = vmul.f32 %v833_v21, %v833_v21  ;;  %v12528_v45 = vld [vmem:[#allocation62_spill] sm:$0xff] }
 0x114   : >> { %v5745_v44 = vpop.eup %5744  ;;  %v745_v2 = vmul.f32 %v5743_v27, %v741_v8  ;;  %v749_v25 = vmul.f32 %v5743_v27, %v12523_v0  ;;  %v7694_v58 = vsub.f32 %v7577_v28, %v12528_v45  ;;  %v838_v8 = vmul.f32 %v834_v30, %v834_v30 }
 0x115   : >> { %v5747_v59 = vpop.eup %5746  ;;  %v746_v31 = vmul.f32 %v5745_v44, %v742_v9  ;;  %v750_v26 = vmul.f32 %v5745_v44, %v12523_v0  ;;  %5764 = vrcp.f32 %v807_v43  ;;  %v839_v9 = vmul.f32 %v7685_v63, %v7685_v63 }
 0x116   : >> { %v5749_v6 = vpop.eup %5748  ;;  %v747_v46 = vmul.f32 %v5747_v59, %v743_v10  ;;  %v751_v16 = vmul.f32 %v5747_v59, %v12523_v0  ;;  %v753_v48 = vadd.f32 %v745_v2, %v717_v49  ;;  %5766 = vrcp.f32 %v808_v51 }
 0x117   : >> { %v5751_v5 = vpop.eup %5750  ;;  %v720_v42 = vmul.f32 %v5749_v6, %v716_v52  ;;  %v724_v36 = vmul.f32 %v5749_v6, %v12522_v7  ;;  %v757_v13 = vadd.f32 %v749_v25, %v721_v29  ;;  %v841_v35 = vadd.f32 %v837_v22, %v7594_v53 }
 0x118   : >> { %v5753_v17 = vpop.eup %5752  ;;  %v748_v14 = vmul.f32 %v5751_v5, %v744_v11  ;;  %v752_v45 = vmul.f32 %v5751_v5, %v12523_v0  ;;  %v754_v52 = vadd.f32 %v746_v31, %v718_v37  ;;  %v758_v10 = vadd.f32 %v750_v26, %v722_v33  ;;  %v12530_v26 = vld [vmem:[#allocation65_spill] sm:$0xff] }
 0x119   : >> { %v5755_v27 = vpop.eup %5754  ;;  %v840_v59 = vmul.f32 %v7694_v58, %v7694_v58  ;;  %v842_v43 = vadd.f32 %v838_v8, %v7598_v34  ;;  %v755_v6 = vadd.f32 %v747_v46, %v719_v19  ;;  %v759_v2 = vadd.f32 %v751_v16, %v723_v54 }
 0x11a   : >> { %v5757_v44 = vpop.eup %5756  ;;  %v781_v49 = vmul.f32 %v5753_v17, %v777_v12  ;;  %v785_v51 = vmul.f32 %v5753_v17, %v12524_v20  ;;  %v782_v41 = vmul.f32 %v5755_v27, %v778_v32  ;;  %v786_v5 = vmul.f32 %v5755_v27, %v12524_v20 }
 0x11b   : >> { %v5759_v7 = vpop.eup %5758  ;;  %v783_v11 = vmul.f32 %v5757_v44, %v779_v57  ;;  %v787_v25 = vmul.f32 %v5757_v44, %v12524_v20  ;;  %v756_v29 = vadd.f32 %v748_v14, %v720_v42  ;;  %v760_v31 = vadd.f32 %v752_v45, %v724_v36  ;;  %v12529_v42 = vld [vmem:[#allocation64_spill] sm:$0xff] }
 0x11c   : >> { %5768 = vrcp.f32 %v841_v35  ;;  %v7709_v37 = vmul.f32 %v833_v21, %v7324_v23  ;;  %v843_v33 = vadd.f32 %v839_v9, %v7606_v39  ;;  %v844_v16 = vadd.f32 %v840_v59, %v7620_v62  ;;  %v12533_v36 = vld [vmem:[#allocation68_spill] sm:$0xff] }
 0x11d   : >> { %5770 = vrcp.f32 %v842_v43  ;;  %v7714_v46 = vmul.f32 %v834_v30, %v7324_v23  ;;  %v784_v19 = vmul.f32 %v5759_v7, %v7662_v1  ;;  %v788_v12 = vmul.f32 %v5759_v7, %v12524_v20  ;;  %v12531_v30 = vld [vmem:[#allocation66_spill] sm:$0xff]  ;;  %v12532_v1 = vld [vmem:[#allocation67_spill] sm:$0xff] }
 0x11e   : >> { %v5761_v17 = vpop.eup %5760  ;;  %v789_v32 = vadd.f32 %v781_v49, %v753_v48  ;;  %v793_v14 = vadd.f32 %v785_v51, %v757_v13  ;;  %v790_v57 = vadd.f32 %v782_v41, %v754_v52  ;;  %v791_v35 = vadd.f32 %v783_v11, %v755_v6  ;;  %v12534_v6 = vld [vmem:[#allocation69_spill] sm:$0xff] }
 0x11f   : >> { %v794_v54 = vadd.f32 %v786_v5, %v758_v10  ;;  %v795_v21 = vadd.f32 %v787_v25, %v759_v2  ;;  %v7720_v22 = vsub.f32 %v7563_v55, %v12529_v42  ;;  %v7724_v45 = vsub.f32 %v7567_v3, %v12530_v26  ;;  %v5763_v13 = vpop.eup %5762  ;;  %v12535_v5 = vld [vmem:[#allocation70_spill] sm:$0xff] }
 0x120   : >> { %v7728_v8 = vsub.f32 %v7570_v40, %v12531_v30  ;;  %v7732_v7 = vsub.f32 %v7577_v28, %v12532_v1  ;;  %v817_v41 = vmul.f32 %v5761_v17, %v7665_v24  ;;  %v821_v27 = vmul.f32 %v5761_v17, %v7257_v61 }
 0x121   : >> { %5772 = vrcp.f32 %v843_v33  ;;  %v7738_v48 = vsub.f32 %v7563_v55, %v12533_v36  ;;  %v873_v9 = vmul.f32 %v7720_v22, %v7720_v22  ;;  %v874_v44 = vmul.f32 %v7724_v45, %v7724_v45  ;;  %v12536_v33 = vld [vmem:[#allocation71_spill] sm:$0xff]  ;;  %v12538_v36 = vld [vmem:[#allocation73_spill] sm:$0xff] }
 0x122   : >> { %v875_v52 = vmul.f32 %v7728_v8, %v7728_v8  ;;  %v876_v10 = vmul.f32 %v7732_v7, %v7732_v7  ;;  %v5765_v24 = vpop.eup %5764  ;;  %v792_v59 = vadd.f32 %v784_v19, %v756_v29  ;;  %v796_v43 = vadd.f32 %v788_v12, %v760_v31 }
 0x123   : >> { %5774 = vrcp.f32 %v844_v16  ;;  %v7750_v2 = vsub.f32 %v7567_v3, %v12534_v6  ;;  %v5767_v49 = vpop.eup %5766  ;;  %v877_v51 = vadd.f32 %v873_v9, %v7594_v53  ;;  %v878_v11 = vadd.f32 %v874_v44, %v7598_v34 }
 0x124   : >> { %v7756_v25 = vsub.f32 %v7570_v40, %v12535_v5  ;;  %v7760_v17 = vsub.f32 %v7577_v28, %v12536_v33  ;;  %v818_v29 = vmul.f32 %v5763_v13, %v7669_v4  ;;  %v822_v31 = vmul.f32 %v5763_v13, %v7257_v61  ;;  %v12537_v33 = vld [vmem:[#allocation72_spill] sm:$0xff] }
 0x125   : >> { %v879_v16 = vadd.f32 %v875_v52, %v7606_v39  ;;  %v880_v19 = vadd.f32 %v876_v10, %v7620_v62  ;;  %v819_v12 = vmul.f32 %v5765_v24, %v7672_v50  ;;  %v823_v9 = vmul.f32 %v5765_v24, %v7257_v61 }
 0x126   : >> { %5776 = vrcp.f32 %v877_v51  ;;  %v909_v44 = vmul.f32 %v7738_v48, %v7738_v48  ;;  %v825_v5 = vadd.f32 %v817_v41, %v789_v32  ;;  %v829_v6 = vadd.f32 %v821_v27, %v793_v14 }
 0x127   : >> { %5778 = vrcp.f32 %v878_v11  ;;  %v910_v4 = vmul.f32 %v7750_v2, %v7750_v2  ;;  %v911_v13 = vmul.f32 %v7756_v25, %v7756_v25  ;;  %v912_v52 = vmul.f32 %v7760_v17, %v7760_v17 }
 0x128   : >> { %5780 = vrcp.f32 %v879_v16  ;;  %v913_v50 = vadd.f32 %v909_v44, %v7594_v53  ;;  %v820_v24 = vmul.f32 %v5767_v49, %v7689_v60  ;;  %v824_v51 = vmul.f32 %v5767_v49, %v7257_v61 }
 0x129   : >> { %v5769_v10 = vpop.eup %5768  ;;  %5782 = vrcp.f32 %v880_v19  ;;  %v914_v32 = vadd.f32 %v910_v4, %v7598_v34  ;;  %v826_v41 = vadd.f32 %v818_v29, %v790_v57  ;;  %v915_v27 = vadd.f32 %v911_v13, %v7606_v39  ;;  %v12539_v4 = vld [vmem:[#allocation74_spill] sm:$0xff] }
 0x12a   : >> { %v5771_v14 = vpop.eup %5770  ;;  %v916_v11 = vadd.f32 %v912_v52, %v7620_v62  ;;  %5784 = vrcp.f32 %v913_v50  ;;  %v830_v16 = vadd.f32 %v822_v31, %v794_v54  ;;  %v7784_v44 = vsub.f32 %v7563_v55, %v12537_v33  ;;  %v12540_v31 = vld [vmem:[#allocation75_spill] sm:$0xff] }
 0x12b   : >> { %5786 = vrcp.f32 %v914_v32  ;;  %v7788_v60 = vsub.f32 %v7567_v3, %v12538_v36  ;;  %v827_v49 = vadd.f32 %v819_v12, %v791_v35  ;;  %v831_v19 = vadd.f32 %v823_v9, %v795_v21 }
 0x12c   : >> { %5788 = vrcp.f32 %v915_v27  ;;  %v7792_v57 = vsub.f32 %v7570_v40, %v12539_v4  ;;  %v828_v29 = vadd.f32 %v820_v24, %v792_v59  ;;  %v851_v54 = vmul.f32 %v7685_v63, %v7324_v23 }
 0x12d   : >> { %5790 = vrcp.f32 %v916_v11  ;;  %v7798_v13 = vsub.f32 %v7577_v28, %v12540_v31  ;;  %v832_v50 = vadd.f32 %v824_v51, %v796_v43  ;;  %v853_v32 = vmul.f32 %v5769_v10, %v7709_v37 }
 0x12e   : >> { %v5773_v52 = vpop.eup %5772  ;;  %v945_v35 = vmul.f32 %v7784_v44, %v7784_v44  ;;  %v946_v21 = vmul.f32 %v7788_v60, %v7788_v60  ;;  %v852_v59 = vmul.f32 %v7694_v58, %v7324_v23  ;;  %v857_v63 = vmul.f32 %v5769_v10, %v7324_v23 }
 0x12f   : >> { %v947_v12 = vmul.f32 %v7792_v57, %v7792_v57  ;;  %v948_v9 = vmul.f32 %v7798_v13, %v7798_v13  ;;  %v854_v37 = vmul.f32 %v5771_v14, %v7714_v46  ;;  %v885_v24 = vmul.f32 %v7720_v22, %v7486_v18 }
 0x130   : >> { %v5775_v43 = vpop.eup %5774  ;;  %v949_v51 = vadd.f32 %v945_v35, %v7594_v53  ;;  %v950_v27 = vadd.f32 %v946_v21, %v7598_v34  ;;  %v858_v58 = vmul.f32 %v5771_v14, %v7324_v23  ;;  %v886_v10 = vmul.f32 %v7724_v45, %v7486_v18 }
 0x131   : >> { %v951_v11 = vadd.f32 %v947_v12, %v7606_v39  ;;  %v952_v31 = vadd.f32 %v948_v9, %v7620_v62  ;;  %v861_v4 = vadd.f32 %v853_v32, %v825_v5  ;;  %v887_v46 = vmul.f32 %v7728_v8, %v7486_v18 }
 0x132   : >> { %v888_v22 = vmul.f32 %v7732_v7, %v7486_v18  ;;  %5792 = vrcp.f32 %v949_v51  ;;  %v855_v35 = vmul.f32 %v5773_v52, %v851_v54  ;;  %v859_v34 = vmul.f32 %v5773_v52, %v7324_v23 }
 0x133   : >> { %v5777_v53 = vpop.eup %5776  ;;  %v865_v14 = vadd.f32 %v857_v63, %v829_v6  ;;  %5794 = vrcp.f32 %v950_v27  ;;  %v856_v45 = vmul.f32 %v5775_v43, %v852_v59  ;;  %v860_v39 = vmul.f32 %v5775_v43, %v7324_v23 }
 0x134   : >> { %v5779_v21 = vpop.eup %5778  ;;  %v862_v12 = vadd.f32 %v854_v37, %v826_v41  ;;  %5796 = vrcp.f32 %v951_v11  ;;  %v866_v5 = vadd.f32 %v858_v58, %v830_v16  ;;  %v921_v8 = vmul.f32 %v7738_v48, %v7520_v56 }
 0x135   : >> { %v5781_v62 = vpop.eup %5780  ;;  %v922_v7 = vmul.f32 %v7750_v2, %v7520_v56  ;;  %5798 = vrcp.f32 %v952_v31  ;;  %v889_v32 = vmul.f32 %v5777_v53, %v885_v24  ;;  %v893_v6 = vmul.f32 %v5777_v53, %v7486_v18 }
 0x136   : >> { %v5783_v54 = vpop.eup %5782  ;;  %v923_v52 = vmul.f32 %v7756_v25, %v7520_v56  ;;  %v924_v41 = vmul.f32 %v7760_v17, %v7520_v56  ;;  %v863_v63 = vadd.f32 %v855_v35, %v827_v49  ;;  %v867_v16 = vadd.f32 %v859_v34, %v831_v19 }
 0x137   : >> { %v5785_v59 = vpop.eup %5784  ;;  %v890_v9 = vmul.f32 %v5779_v21, %v886_v10  ;;  %v894_v48 = vmul.f32 %v5779_v21, %v7486_v18  ;;  %v864_v37 = vadd.f32 %v856_v45, %v828_v29  ;;  %v868_v2 = vadd.f32 %v860_v39, %v832_v50 }
 0x138   : >> { %v5787_v43 = vpop.eup %5786  ;;  %v891_v31 = vmul.f32 %v5781_v62, %v887_v46  ;;  %v895_v24 = vmul.f32 %v5781_v62, %v7486_v18  ;;  %v892_v27 = vmul.f32 %v5783_v54, %v888_v22  ;;  %v896_v58 = vmul.f32 %v5783_v54, %v7486_v18 }
 0x139   : >> { %v5789_v51 = vpop.eup %5788  ;;  %v957_v25 = vmul.f32 %v7784_v44, %v7529_v15  ;;  %v958_v17 = vmul.f32 %v7788_v60, %v7529_v15  ;;  %v897_v19 = vadd.f32 %v889_v32, %v861_v4  ;;  %v901_v10 = vadd.f32 %v893_v6, %v865_v14 }
 0x13a   : >> { %v5791_v49 = vpop.eup %5790  ;;  %v925_v11 = vmul.f32 %v5785_v59, %v921_v8  ;;  %v929_v29 = vmul.f32 %v5785_v59, %v7520_v56  ;;  %v898_v50 = vadd.f32 %v890_v9, %v862_v12  ;;  %v902_v46 = vadd.f32 %v894_v48, %v866_v5 }
 0x13b   : >> { %v926_v53 = vmul.f32 %v5787_v43, %v922_v7  ;;  %v930_v35 = vmul.f32 %v5787_v43, %v7520_v56  ;;  %v899_v22 = vadd.f32 %v891_v31, %v863_v63  ;;  %v903_v34 = vadd.f32 %v895_v24, %v867_v16 }
 0x13c   : >> { %v927_v21 = vmul.f32 %v5789_v51, %v923_v52  ;;  %v931_v45 = vmul.f32 %v5789_v51, %v7520_v56  ;;  %v900_v44 = vadd.f32 %v892_v27, %v864_v37  ;;  %v904_v39 = vadd.f32 %v896_v58, %v868_v2 }
 0x13d   : >> { %v928_v62 = vmul.f32 %v5791_v49, %v924_v41  ;;  %v932_v60 = vmul.f32 %v5791_v49, %v7520_v56  ;;  %v933_v4 = vadd.f32 %v925_v11, %v897_v19  ;;  %v937_v14 = vadd.f32 %v929_v29, %v901_v10 }
 0x13e   : >> { %v959_v8 = vmul.f32 %v7792_v57, %v7529_v15  ;;  %v934_v5 = vadd.f32 %v926_v53, %v898_v50  ;;  %v938_v7 = vadd.f32 %v930_v35, %v902_v46  ;;  %v960_v54 = vmul.f32 %v7798_v13, %v7529_v15  ;;  %v12541_v53 = vld [vmem:[#allocation79_spill] sm:$0xff] }
 0x13f   : >> { %v5793_v12 = vpop.eup %5792  ;;  %v935_v6 = vadd.f32 %v927_v21, %v899_v22  ;;  %v939_v52 = vadd.f32 %v931_v45, %v903_v34  ;;  %v936_v16 = vadd.f32 %v928_v62, %v900_v44  ;;  %v940_v9 = vadd.f32 %v932_v60, %v904_v39  ;;  %v12542_v45 = vld [vmem:[#allocation80_spill] sm:$0xff] }
 0x140   : >> { %v5795_v32 = vpop.eup %5794  ;;  %v961_v59 = vmul.f32 %v5793_v12, %v957_v25  ;;  %v965_v63 = vmul.f32 %v5793_v12, %v7529_v15 }
 0x141   : >> { %v5797_v41 = vpop.eup %5796  ;;  %v962_v48 = vmul.f32 %v5795_v32, %v958_v17  ;;  %v966_v43 = vmul.f32 %v5795_v32, %v7529_v15 }
 0x142   : >> { %v5799_v37 = vpop.eup %5798  ;;  %v963_v57 = vmul.f32 %v5797_v41, %v959_v8  ;;  %v967_v2 = vmul.f32 %v5797_v41, %v7529_v15  ;;  %v969_v31 = vadd.f32 %v961_v59, %v933_v4  ;;  %v973_v24 = vadd.f32 %v965_v63, %v937_v14 }
 0x143   : >> { %v964_v51 = vmul.f32 %v5799_v37, %v960_v54  ;;  %v968_v13 = vmul.f32 %v5799_v37, %v7529_v15  ;;  %v970_v27 = vadd.f32 %v962_v48, %v934_v5  ;;  %v974_v58 = vadd.f32 %v966_v43, %v938_v7 }
 0x144   : >> { %v971_v25 = vadd.f32 %v963_v57, %v935_v6  ;;  %v975_v49 = vadd.f32 %v967_v2, %v939_v52  ;;  %v977_v19 = vadd.f32 1.0, %v969_v31  ;;  %v981_v10 = vmul.f32 %v973_v24, %v7582_v47 }
 0x145   : >> { %v972_v11 = vadd.f32 %v964_v51, %v936_v16  ;;  %v976_v17 = vadd.f32 %v968_v13, %v940_v9  ;;  %v978_v29 = vadd.f32 1.0, %v970_v27  ;;  %v982_v50 = vmul.f32 %v974_v58, %v7586_v38 }
 0x146   : >> { %v979_v46 = vadd.f32 1.0, %v971_v25  ;;  %v983_v35 = vmul.f32 %v975_v49, %v12541_v53  ;;  %v985_v22 = vsub.f32 0.0, %v981_v10  ;;  %v989_v34 = vmul.f32 %v977_v19, %v977_v19 }
 0x147   : >> { %v980_v21 = vadd.f32 1.0, %v972_v11  ;;  %v984_v44 = vmul.f32 %v976_v17, %v12542_v45  ;;  %v986_v39 = vsub.f32 0.0, %v982_v50  ;;  %v990_v62 = vmul.f32 %v978_v29, %v978_v29 }
 0x148   : >> { %v987_v60 = vsub.f32 0.0, %v983_v35  ;;  %v991_v4 = vmul.f32 %v979_v46, %v979_v46  ;;  %v993_v14 = vmul.f32 %v985_v22, %v985_v22 }
 0x149   : >> { %v988_v8 = vsub.f32 0.0, %v984_v44  ;;  %v992_v12 = vmul.f32 %v980_v21, %v980_v21  ;;  %v994_v5 = vmul.f32 %v986_v39, %v986_v39  ;;  %v12544_v44 = vld [vmem:[#allocation40_spill] sm:$0xff] }
 0x14a   : >> { %v995_v7 = vmul.f32 %v987_v60, %v987_v60  ;;  %v997_v54 = vadd.f32 %v993_v14, %v989_v34 }
 0x14b   : >> { %v996_v32 = vmul.f32 %v988_v8, %v988_v8  ;;  %v998_v6 = vadd.f32 %v994_v5, %v990_v62 }
 0x14c   : >> { %v999_v52 = vadd.f32 %v995_v7, %v991_v4  ;;  %5800 = vrcp.f32 %v997_v54  ;;  %v12549_v7 = vld [vmem:[#allocation42_spill] sm:$0xff] }
 0x14d   : >> { %v1000_v59 = vadd.f32 %v996_v32, %v992_v12  ;;  %5802 = vrcp.f32 %v998_v6 }
 0x14e   : >> { %5804 = vrcp.f32 %v999_v52 }
 0x14f   : >> { %5806 = vrcp.f32 %v1000_v59 }
 0x159   : >> { %v5801_v63 = vpop.eup %5800 }
 0x15a   : >> { %v5803_v41 = vpop.eup %5802  ;;  %v1005_v16 = vmul.f32 %v5801_v63, %v977_v19  ;;  %v1009_v9 = vmul.f32 %v5801_v63, %v985_v22  ;;  %v12551_v63 = vld [vmem:[#allocation43_spill] sm:$0xff] }
 0x15b   : >> { %v5805_v48 = vpop.eup %5804  ;;  %v1006_v43 = vmul.f32 %v5803_v41, %v978_v29  ;;  %v1010_v37 = vmul.f32 %v5803_v41, %v986_v39 }
 0x15c   : >> { %v5807_v57 = vpop.eup %5806  ;;  %v1007_v2 = vmul.f32 %v5805_v48, %v979_v46  ;;  %v1011_v31 = vmul.f32 %v5805_v48, %v987_v60  ;;  %v1013_v24 = vsub.f32 0.0, %v1009_v9  ;;  %v1017_v51 = vadd.f32 %v1005_v16, %v7563_v55  ;;  %v12552_v16 = vld [vmem:[#allocation44_spill] sm:$0xff] }
 0x15d   : >> { %v1008_v13 = vmul.f32 %v5807_v57, %v980_v21  ;;  %v1012_v27 = vmul.f32 %v5807_v57, %v988_v8  ;;  %v1014_v58 = vsub.f32 0.0, %v1010_v37  ;;  %v1018_v25 = vadd.f32 %v1006_v43, %v7567_v3  ;;  %v12543_v3 = vld [vmem:[#allocation39_spill] sm:$0xff]  ;;  %v12553_v43 = vld [vmem:[#allocation45_spill] sm:$0xff]  ;;  %v12554_v57 = vld [vmem:[#allocation46_spill] sm:$0xff] }
 0x15e   : >> { %v1015_v49 = vsub.f32 0.0, %v1011_v31  ;;  %v1019_v10 = vadd.f32 %v1007_v2, %v7570_v40  ;;  %v7863_v11 = vmul.f32 0.5, %v1017_v51  ;;  %v1025_v19 = vadd.f32 %v1013_v24, %v7582_v47 }
 0x15f   : >> { %v1016_v17 = vsub.f32 0.0, %v1012_v27  ;;  %v1020_v29 = vadd.f32 %v1008_v13, %v7577_v28  ;;  %v7867_v50 = vmul.f32 0.5, %v1018_v25  ;;  %v1026_v46 = vadd.f32 %v1014_v58, %v7586_v38  ;;  %v12546_v38 = vld [vmem:[#allocation41_spill] sm:$0xff] }
 0x160   : >> { %v7870_v55 = vmul.f32 0.5, %v1019_v10  ;;  %v1027_v35 = vadd.f32 %v1015_v49, %v12541_v53  ;;  %v1029_v22 = vmul.f32 0.5, %v1025_v19  ;;  %v7875_v34 = vsub.f32 %v7863_v11, %v12543_v3 }
 0x161   : >> { %v7877_v40 = vmul.f32 0.5, %v1020_v29  ;;  %v1028_v47 = vadd.f32 %v1016_v17, %v12542_v45  ;;  %v1030_v21 = vmul.f32 0.5, %v1026_v46  ;;  %v1042_v28 = vsub.f32 %v7867_v50, %v12544_v44  ;;  %v12555_v17 = vld [vmem:[#allocation47_spill] sm:$0xff]  ;;  %v12556_v46 = vld [vmem:[#allocation48_spill] sm:$0xff] }
 0x162   : >> { %v1031_v39 = vmul.f32 0.5, %v1027_v35  ;;  %v7882_v62 = vmin.f32 %v1029_v22, -1e-09  ;;  %v1043_v60 = vsub.f32 %v7870_v55, %v12546_v38  ;;  %v1045_v14 = vmul.f32 %v7875_v34, %v7875_v34  ;;  %v12557_v22 = vld [vmem:[#allocation49_spill] sm:$0xff] }
 0x163   : >> { %v1032_v53 = vmul.f32 0.5, %v1028_v47  ;;  %v7886_v4 = vmin.f32 %v1030_v21, -1e-09  ;;  %v1046_v12 = vmul.f32 %v1042_v28, %v1042_v28  ;;  %v1044_v54 = vsub.f32 %v7877_v40, %v12549_v7 }
 0x164   : >> { %12545 = vst [vmem:[#allocation79_spill] sm:$0xff] %v7882_v62  ;;  %v7890_v8 = vmin.f32 %v1031_v39, -1e-09  ;;  %v7894_v45 = vmul.f32 %v7882_v62, %v7882_v62  ;;  %v1047_v52 = vmul.f32 %v1043_v60, %v1043_v60  ;;  %v1069_v41 = vsub.f32 %v7863_v11, %v12551_v63 }
 0x165   : >> { %12547 = vst [vmem:[#allocation80_spill] sm:$0xff] %v7886_v4  ;;  %v7898_v5 = vmul.f32 %v7886_v4, %v7886_v4  ;;  %v7902_v32 = vmin.f32 %v1032_v53, -1e-09  ;;  %v1070_v9 = vsub.f32 %v7867_v50, %v12552_v16  ;;  %v1071_v37 = vsub.f32 %v7870_v55, %v12553_v43  ;;  %v12558_v53 = vld [vmem:[#allocation50_spill] sm:$0xff]  ;;  %v12565_v16 = vld [vmem:[#allocation60_spill] sm:$0xff] }
 0x166   : >> { %12548 = vst [vmem:[#allocation81_spill] sm:$0xff] %v7890_v8  ;;  %v7906_v6 = vmul.f32 %v7890_v8, %v7890_v8  ;;  %v1049_v59 = vadd.f32 %v1045_v14, %v7894_v45  ;;  %v1072_v2 = vsub.f32 %v7877_v40, %v12554_v57  ;;  %v1048_v31 = vmul.f32 %v1044_v54, %v1044_v54 }
 0x167   : >> { %12550 = vst [vmem:[#allocation82_spill] sm:$0xff] %v7902_v32  ;;  %v1050_v48 = vadd.f32 %v1046_v12, %v7898_v5  ;;  %v1073_v24 = vmul.f32 %v1069_v41, %v1069_v41  ;;  %v1074_v51 = vmul.f32 %v1070_v9, %v1070_v9  ;;  %v7920_v13 = vmul.f32 %v7902_v32, %v7902_v32 }
 0x168   : >> { %v1051_v27 = vadd.f32 %v1047_v52, %v7906_v6  ;;  %v1075_v58 = vmul.f32 %v1071_v37, %v1071_v37  ;;  %v1076_v25 = vmul.f32 %v1072_v2, %v1072_v2  ;;  %5808 = vrcp.f32 %v1049_v59 }
 0x169   : >> { %v1077_v49 = vadd.f32 %v1073_v24, %v7894_v45  ;;  %5810 = vrcp.f32 %v1050_v48  ;;  %v1078_v10 = vadd.f32 %v1074_v51, %v7898_v5  ;;  %v1105_v29 = vsub.f32 %v7863_v11, %v12555_v17  ;;  %v12559_v48 = vld [vmem:[#allocation51_spill] sm:$0xff] }
 0x16a   : >> { %v1079_v19 = vadd.f32 %v1075_v58, %v7906_v6  ;;  %v1106_v35 = vsub.f32 %v7867_v50, %v12556_v46  ;;  %v1107_v47 = vsub.f32 %v7870_v55, %v12557_v22  ;;  %v1052_v21 = vadd.f32 %v1048_v31, %v7920_v13  ;;  %v12561_v22 = vld [vmem:[#allocation53_spill] sm:$0xff]  ;;  %v12563_v46 = vld [vmem:[#allocation54_spill] sm:$0xff] }
 0x16b   : >> { %5812 = vrcp.f32 %v1051_v27  ;;  %v1080_v39 = vadd.f32 %v1076_v25, %v7920_v13  ;;  %v1108_v14 = vsub.f32 %v7877_v40, %v12558_v53  ;;  %v1109_v12 = vmul.f32 %v1105_v29, %v1105_v29  ;;  %v12560_v25 = vld [vmem:[#allocation52_spill] sm:$0xff] }
 0x16c   : >> { %5814 = vrcp.f32 %v1077_v49  ;;  %v1110_v52 = vmul.f32 %v1106_v35, %v1106_v35  ;;  %v1111_v59 = vmul.f32 %v1107_v47, %v1107_v47  ;;  %v1141_v24 = vsub.f32 %v7863_v11, %v12559_v48  ;;  %v12562_v48 = vld [vmem:[#allocation56_spill] sm:$0xff] }
 0x16d   : >> { %5816 = vrcp.f32 %v1078_v10  ;;  %v1112_v51 = vmul.f32 %v1108_v14, %v1108_v14  ;;  %v1113_v58 = vadd.f32 %v1109_v12, %v7894_v45  ;;  %v1142_v49 = vsub.f32 %v7867_v50, %v12560_v25 }
 0x16e   : >> { %5818 = vrcp.f32 %v1079_v19  ;;  %v1114_v31 = vadd.f32 %v1110_v52, %v7898_v5  ;;  %v1115_v27 = vadd.f32 %v1111_v59, %v7906_v6  ;;  %v1145_v53 = vmul.f32 %v1141_v24, %v1141_v24 }
 0x16f   : >> { %5820 = vrcp.f32 %v1052_v21  ;;  %v1116_v10 = vadd.f32 %v1112_v51, %v7920_v13  ;;  %v1143_v19 = vsub.f32 %v7870_v55, %v12561_v22  ;;  %v1144_v12 = vsub.f32 %v7877_v40, %v12562_v48 }
 0x170   : >> { %5822 = vrcp.f32 %v1080_v39  ;;  %v1057_v21 = vmul.f32 %v7875_v34, %v12563_v46  ;;  %v1058_v52 = vmul.f32 %v1042_v28, %v12563_v46  ;;  %v1059_v39 = vmul.f32 %v1043_v60, %v12563_v46 }
 0x171   : >> { %5824 = vrcp.f32 %v1113_v58  ;;  %v1060_v59 = vmul.f32 %v1044_v54, %v12563_v46  ;;  %v1085_v58 = vmul.f32 %v1069_v41, %v12523_v0  ;;  %v1146_v51 = vmul.f32 %v1142_v49, %v1142_v49 }
 0x172   : >> { %5826 = vrcp.f32 %v1114_v31  ;;  %v1086_v25 = vmul.f32 %v1070_v9, %v12523_v0  ;;  %v1087_v22 = vmul.f32 %v1071_v37, %v12523_v0  ;;  %v1088_v48 = vmul.f32 %v1072_v2, %v12523_v0 }
 0x173   : >> { %5828 = vrcp.f32 %v1115_v27  ;;  %v1149_v17 = vadd.f32 %v1145_v53, %v7894_v45  ;;  %v1121_v28 = vmul.f32 %v1105_v29, %v12524_v20  ;;  %v1147_v27 = vmul.f32 %v1143_v19, %v1143_v19 }
 0x174   : >> { %5830 = vrcp.f32 %v1116_v10  ;;  %v1148_v60 = vmul.f32 %v1144_v12, %v1144_v12  ;;  %v1122_v54 = vmul.f32 %v1106_v35, %v12524_v20  ;;  %v1123_v41 = vmul.f32 %v1107_v47, %v12524_v20  ;;  %v12564_v10 = vld [vmem:[#allocation59_spill] sm:$0xff] }
 0x175   : >> { %v5809_v31 = vpop.eup %5808  ;;  %v7962_v57 = vmul.f32 %v1108_v14, %v12524_v20  ;;  %v7965_v9 = vmul.f32 %v1141_v24, %v7257_v61  ;;  %v1150_v2 = vadd.f32 %v1146_v51, %v7898_v5  ;;  %v7969_v53 = vmul.f32 %v1142_v49, %v7257_v61 }
 0x176   : >> { %v5811_v34 = vpop.eup %5810  ;;  %v7972_v29 = vmul.f32 %v1143_v19, %v7257_v61  ;;  %v1177_v35 = vsub.f32 %v7863_v11, %v12564_v10  ;;  %v1061_v47 = vmul.f32 %v5809_v31, %v1057_v21  ;;  %v1065_v14 = vmul.f32 %v5809_v31, %v12563_v46  ;;  %v12566_v21 = vld [vmem:[#allocation61_spill] sm:$0xff] }
 0x177   : >> { %5832 = vrcp.f32 %v1149_v17  ;;  %v1178_v24 = vsub.f32 %v7867_v50, %v12565_v16  ;;  %v1062_v7 = vmul.f32 %v5811_v34, %v1058_v52  ;;  %v1066_v51 = vmul.f32 %v5811_v34, %v12563_v46 }
 0x178   : >> { %v5813_v37 = vpop.eup %5812  ;;  %v1151_v49 = vadd.f32 %v1147_v27, %v7906_v6  ;;  %v1152_v19 = vadd.f32 %v1148_v60, %v7920_v13  ;;  %v7985_v31 = vsub.f32 %v7870_v55, %v12566_v21  ;;  %5834 = vrcp.f32 %v1150_v2 }
 0x179   : >> { %v5815_v43 = vpop.eup %5814  ;;  %v1063_v44 = vmul.f32 %v5813_v37, %v1059_v39  ;;  %v1067_v10 = vmul.f32 %v5813_v37, %v12563_v46  ;;  %v7989_v52 = vmul.f32 %v1144_v12, %v7257_v61  ;;  %v1181_v34 = vmul.f32 %v1177_v35, %v1177_v35  ;;  %v12568_v39 = vld [vmem:[#allocation62_spill] sm:$0xff] }
 0x17a   : >> { %v5817_v63 = vpop.eup %5816  ;;  %v1089_v3 = vmul.f32 %v5815_v43, %v1085_v58  ;;  %12567 = vst [vmem:[#allocation83_spill] sm:$0xff] %v7985_v31  ;;  %v1093_v16 = vmul.f32 %v5815_v43, %v12523_v0  ;;  %v7994_v37 = vsub.f32 %v7877_v40, %v12568_v39  ;;  %v1182_v58 = vmul.f32 %v1178_v24, %v1178_v24 }
 0x17b   : >> { %v5819_v38 = vpop.eup %5818  ;;  %v1090_v32 = vmul.f32 %v5817_v63, %v1086_v25  ;;  %v1094_v60 = vmul.f32 %v5817_v63, %v12523_v0  ;;  %5836 = vrcp.f32 %v1151_v49  ;;  %v1183_v25 = vmul.f32 %v7985_v31, %v7985_v31 }
 0x17c   : >> { %v5821_v17 = vpop.eup %5820  ;;  %v1091_v4 = vmul.f32 %v5819_v38, %v1087_v22  ;;  %v1095_v62 = vmul.f32 %v5819_v38, %v12523_v0  ;;  %v1097_v2 = vadd.f32 %v1089_v3, %v1061_v47  ;;  %5838 = vrcp.f32 %v1152_v19 }
 0x17d   : >> { %v5823_v27 = vpop.eup %5822  ;;  %v1064_v21 = vmul.f32 %v5821_v17, %v1060_v59  ;;  %v1068_v12 = vmul.f32 %v5821_v17, %v12563_v46  ;;  %v1101_v56 = vadd.f32 %v1093_v16, %v1065_v14  ;;  %v1185_v18 = vadd.f32 %v1181_v34, %v7894_v45 }
 0x17e   : >> { %v5825_v8 = vpop.eup %5824  ;;  %v1092_v15 = vmul.f32 %v5823_v27, %v1088_v48  ;;  %v1096_v39 = vmul.f32 %v5823_v27, %v12523_v0  ;;  %v1098_v59 = vadd.f32 %v1090_v32, %v1062_v7  ;;  %v1102_v22 = vadd.f32 %v1094_v60, %v1066_v51  ;;  %v12569_v60 = vld [vmem:[#allocation68_spill] sm:$0xff] }
 0x17f   : >> { %v5827_v43 = vpop.eup %5826  ;;  %v1184_v38 = vmul.f32 %v7994_v37, %v7994_v37  ;;  %v1186_v49 = vadd.f32 %v1182_v58, %v7898_v5  ;;  %v1099_v17 = vadd.f32 %v1091_v4, %v1063_v44  ;;  %v1103_v3 = vadd.f32 %v1095_v62, %v1067_v10 }
 0x180   : >> { %v5829_v63 = vpop.eup %5828  ;;  %v1125_v47 = vmul.f32 %v5825_v8, %v1121_v28  ;;  %v1129_v19 = vmul.f32 %v5825_v8, %v12524_v20  ;;  %v1126_v31 = vmul.f32 %v5827_v43, %v1122_v54  ;;  %v1130_v27 = vmul.f32 %v5827_v43, %v12524_v20 }
 0x181   : >> { %v5831_v46 = vpop.eup %5830  ;;  %v1127_v48 = vmul.f32 %v5829_v63, %v1123_v41  ;;  %v1131_v16 = vmul.f32 %v5829_v63, %v12524_v20  ;;  %v1100_v14 = vadd.f32 %v1092_v15, %v1064_v21  ;;  %v1104_v7 = vadd.f32 %v1096_v39, %v1068_v12 }
 0x182   : >> { %5840 = vrcp.f32 %v1185_v18  ;;  %v8009_v32 = vmul.f32 %v1177_v35, %v7324_v23  ;;  %v1187_v51 = vadd.f32 %v1183_v25, %v7906_v6  ;;  %v1188_v44 = vadd.f32 %v1184_v38, %v7920_v13 }
 0x183   : >> { %5842 = vrcp.f32 %v1186_v49  ;;  %v8014_v62 = vmul.f32 %v1178_v24, %v7324_v23  ;;  %v1128_v8 = vmul.f32 %v5831_v46, %v7962_v57  ;;  %v1132_v28 = vmul.f32 %v5831_v46, %v12524_v20 }
 0x184   : >> { %v5833_v4 = vpop.eup %5832  ;;  %v1133_v54 = vadd.f32 %v1125_v47, %v1097_v2  ;;  %v1137_v15 = vadd.f32 %v1129_v19, %v1101_v56  ;;  %v1134_v41 = vadd.f32 %v1126_v31, %v1098_v59  ;;  %v1135_v18 = vadd.f32 %v1127_v48, %v1099_v17  ;;  %v12570_v59 = vld [vmem:[#allocation69_spill] sm:$0xff]  ;;  %v12572_v19 = vld [vmem:[#allocation71_spill] sm:$0xff] }
 0x185   : >> { %v1138_v10 = vadd.f32 %v1130_v27, %v1102_v22  ;;  %v1139_v35 = vadd.f32 %v1131_v16, %v1103_v3  ;;  %v8020_v21 = vsub.f32 %v7863_v11, %v12529_v42  ;;  %v8024_v34 = vsub.f32 %v7867_v50, %v12530_v26  ;;  %v5835_v56 = vpop.eup %5834  ;;  %v12571_v3 = vld [vmem:[#allocation70_spill] sm:$0xff] }
 0x186   : >> { %v8028_v24 = vsub.f32 %v7870_v55, %v12531_v30  ;;  %v8032_v57 = vsub.f32 %v7877_v40, %v12532_v1  ;;  %v1161_v46 = vmul.f32 %v5833_v4, %v7965_v9  ;;  %v1165_v31 = vmul.f32 %v5833_v4, %v7257_v61 }
 0x187   : >> { %5844 = vrcp.f32 %v1187_v51  ;;  %v8038_v39 = vsub.f32 %v7863_v11, %v12569_v60  ;;  %v1217_v58 = vmul.f32 %v8020_v21, %v8020_v21  ;;  %v1218_v43 = vmul.f32 %v8024_v34, %v8024_v34 }
 0x188   : >> { %v1219_v12 = vmul.f32 %v8028_v24, %v8028_v24  ;;  %v1220_v2 = vmul.f32 %v8032_v57, %v8032_v57  ;;  %v5837_v9 = vpop.eup %5836  ;;  %v1136_v25 = vadd.f32 %v1128_v8, %v1100_v14  ;;  %v1140_v63 = vadd.f32 %v1132_v28, %v1104_v7 }
 0x189   : >> { %5846 = vrcp.f32 %v1188_v44  ;;  %v8050_v22 = vsub.f32 %v7867_v50, %v12570_v59  ;;  %v5839_v38 = vpop.eup %5838  ;;  %v1221_v49 = vadd.f32 %v1217_v58, %v7894_v45  ;;  %v1222_v17 = vadd.f32 %v1218_v43, %v7898_v5 }
 0x18a   : >> { %v8056_v47 = vsub.f32 %v7870_v55, %v12571_v3  ;;  %v8060_v48 = vsub.f32 %v7877_v40, %v12572_v19  ;;  %v1162_v27 = vmul.f32 %v5835_v56, %v7969_v53  ;;  %v1166_v16 = vmul.f32 %v5835_v56, %v7257_v61 }
 0x18b   : >> { %v1223_v14 = vadd.f32 %v1219_v12, %v7906_v6  ;;  %v1224_v7 = vadd.f32 %v1220_v2, %v7920_v13  ;;  %v1163_v51 = vmul.f32 %v5837_v9, %v7972_v29  ;;  %v1167_v44 = vmul.f32 %v5837_v9, %v7257_v61 }
 0x18c   : >> { %5848 = vrcp.f32 %v1221_v49  ;;  %v1253_v4 = vmul.f32 %v8038_v39, %v8038_v39  ;;  %v1169_v8 = vadd.f32 %v1161_v46, %v1133_v54  ;;  %v1173_v28 = vadd.f32 %v1165_v31, %v1137_v15 }
 0x18d   : >> { %5850 = vrcp.f32 %v1222_v17  ;;  %v1254_v53 = vmul.f32 %v8050_v22, %v8050_v22  ;;  %v1255_v56 = vmul.f32 %v8056_v47, %v8056_v47  ;;  %v1256_v58 = vmul.f32 %v8060_v48, %v8060_v48 }
 0x18e   : >> { %5852 = vrcp.f32 %v1223_v14  ;;  %v1257_v29 = vadd.f32 %v1253_v4, %v7894_v45  ;;  %v1164_v12 = vmul.f32 %v5839_v38, %v7989_v52  ;;  %v1168_v2 = vmul.f32 %v5839_v38, %v7257_v61  ;;  %v12574_v4 = vld [vmem:[#allocation83_spill] sm:$0xff] }
 0x18f   : >> { %v5841_v43 = vpop.eup %5840  ;;  %5854 = vrcp.f32 %v1224_v7  ;;  %v1258_v54 = vadd.f32 %v1254_v53, %v7898_v5  ;;  %v1170_v46 = vadd.f32 %v1162_v27, %v1134_v41  ;;  %v1259_v31 = vadd.f32 %v1255_v56, %v7906_v6  ;;  %v12573_v7 = vld [vmem:[#allocation74_spill] sm:$0xff] }
 0x190   : >> { %v5843_v15 = vpop.eup %5842  ;;  %v1260_v9 = vadd.f32 %v1256_v58, %v7920_v13  ;;  %5856 = vrcp.f32 %v1257_v29  ;;  %v1174_v49 = vadd.f32 %v1166_v16, %v1138_v10  ;;  %v8084_v17 = vsub.f32 %v7863_v11, %v12537_v33  ;;  %v12575_v16 = vld [vmem:[#allocation75_spill] sm:$0xff] }
 0x191   : >> { %5858 = vrcp.f32 %v1258_v54  ;;  %v8088_v52 = vsub.f32 %v7867_v50, %v12538_v36  ;;  %v1171_v38 = vadd.f32 %v1163_v51, %v1135_v18  ;;  %v1175_v14 = vadd.f32 %v1167_v44, %v1139_v35 }
 0x192   : >> { %5860 = vrcp.f32 %v1259_v31  ;;  %v8092_v41 = vsub.f32 %v7870_v55, %v12573_v7  ;;  %v1172_v27 = vadd.f32 %v1164_v12, %v1136_v25  ;;  %v1195_v10 = vmul.f32 %v12574_v4, %v7324_v23 }
 0x193   : >> { %5862 = vrcp.f32 %v1260_v9  ;;  %v8098_v53 = vsub.f32 %v7877_v40, %v12575_v16  ;;  %v1176_v58 = vadd.f32 %v1168_v2, %v1140_v63  ;;  %v1197_v29 = vmul.f32 %v5841_v43, %v8009_v32  ;;  %v12576_v2 = vld [vmem:[#allocation76_spill] sm:$0xff] }
 0x194   : >> { %v5845_v56 = vpop.eup %5844  ;;  %v1289_v18 = vmul.f32 %v8084_v17, %v8084_v17  ;;  %v1290_v35 = vmul.f32 %v8088_v52, %v8088_v52  ;;  %v1196_v25 = vmul.f32 %v7994_v37, %v7324_v23  ;;  %v1201_v51 = vmul.f32 %v5841_v43, %v7324_v23 }
 0x195   : >> { %v1291_v44 = vmul.f32 %v8092_v41, %v8092_v41  ;;  %v1292_v12 = vmul.f32 %v8098_v53, %v8098_v53  ;;  %v1198_v32 = vmul.f32 %v5843_v15, %v8014_v62  ;;  %v1229_v54 = vmul.f32 %v8020_v21, %v12576_v2 }
 0x196   : >> { %v5847_v63 = vpop.eup %5846  ;;  %v1293_v31 = vadd.f32 %v1289_v18, %v7894_v45  ;;  %v1294_v9 = vadd.f32 %v1290_v35, %v7898_v5  ;;  %v1202_v37 = vmul.f32 %v5843_v15, %v7324_v23  ;;  %v1230_v43 = vmul.f32 %v8024_v34, %v12576_v2 }
 0x197   : >> { %v1295_v4 = vadd.f32 %v1291_v44, %v7906_v6  ;;  %v1296_v16 = vadd.f32 %v1292_v12, %v7920_v13  ;;  %v1205_v7 = vadd.f32 %v1197_v29, %v1169_v8  ;;  %v1231_v62 = vmul.f32 %v8028_v24, %v12576_v2  ;;  %v12577_v29 = vld [vmem:[#allocation77_spill] sm:$0xff] }
 0x198   : >> { %v1232_v21 = vmul.f32 %v8032_v57, %v12576_v2  ;;  %5864 = vrcp.f32 %v1293_v31  ;;  %v1199_v18 = vmul.f32 %v5845_v56, %v1195_v10  ;;  %v1203_v5 = vmul.f32 %v5845_v56, %v7324_v23 }
 0x199   : >> { %v5849_v45 = vpop.eup %5848  ;;  %v1209_v15 = vadd.f32 %v1201_v51, %v1173_v28  ;;  %5866 = vrcp.f32 %v1294_v9  ;;  %v1200_v34 = vmul.f32 %v5847_v63, %v1196_v25  ;;  %v1204_v6 = vmul.f32 %v5847_v63, %v7324_v23 }
 0x19a   : >> { %v5851_v35 = vpop.eup %5850  ;;  %v1206_v44 = vadd.f32 %v1198_v32, %v1170_v46  ;;  %5868 = vrcp.f32 %v1295_v4  ;;  %v1210_v8 = vadd.f32 %v1202_v37, %v1174_v49  ;;  %v1265_v24 = vmul.f32 %v8038_v39, %v12577_v29 }
 0x19b   : >> { %v5853_v13 = vpop.eup %5852  ;;  %v1266_v57 = vmul.f32 %v8050_v22, %v12577_v29  ;;  %5870 = vrcp.f32 %v1296_v16  ;;  %v1233_v12 = vmul.f32 %v5849_v45, %v1229_v54  ;;  %v1237_v28 = vmul.f32 %v5849_v45, %v12576_v2 }
 0x19c   : >> { %v5855_v10 = vpop.eup %5854  ;;  %v1267_v56 = vmul.f32 %v8056_v47, %v12577_v29  ;;  %v1268_v46 = vmul.f32 %v8060_v48, %v12577_v29  ;;  %v1207_v51 = vadd.f32 %v1199_v18, %v1171_v38  ;;  %v1211_v49 = vadd.f32 %v1203_v5, %v1175_v14  ;;  %v12578_v47 = vld [vmem:[#allocation78_spill] sm:$0xff] }
 0x19d   : >> { %v5857_v25 = vpop.eup %5856  ;;  %v1234_v63 = vmul.f32 %v5851_v35, %v1230_v43  ;;  %v1238_v39 = vmul.f32 %v5851_v35, %v12576_v2  ;;  %v1208_v31 = vadd.f32 %v1200_v34, %v1172_v27  ;;  %v1212_v22 = vadd.f32 %v1204_v6, %v1176_v58 }
 0x19e   : >> { %v5859_v32 = vpop.eup %5858  ;;  %v1235_v16 = vmul.f32 %v5853_v13, %v1231_v62  ;;  %v1239_v54 = vmul.f32 %v5853_v13, %v12576_v2  ;;  %v1236_v37 = vmul.f32 %v5855_v10, %v1232_v21  ;;  %v1240_v4 = vmul.f32 %v5855_v10, %v12576_v2 }
 0x19f   : >> { %v5861_v9 = vpop.eup %5860  ;;  %v1301_v45 = vmul.f32 %v8084_v17, %v12578_v47  ;;  %v1302_v48 = vmul.f32 %v8088_v52, %v12578_v47  ;;  %v1241_v14 = vadd.f32 %v1233_v12, %v1205_v7  ;;  %v1245_v43 = vadd.f32 %v1237_v28, %v1209_v15 }
 0x1a0   : >> { %v5863_v38 = vpop.eup %5862  ;;  %v1269_v18 = vmul.f32 %v5857_v25, %v1265_v24  ;;  %v1273_v27 = vmul.f32 %v5857_v25, %v12577_v29  ;;  %v1242_v58 = vadd.f32 %v1234_v63, %v1206_v44  ;;  %v1246_v62 = vadd.f32 %v1238_v39, %v1210_v8 }
 0x1a1   : >> { %v1270_v5 = vmul.f32 %v5859_v32, %v1266_v57  ;;  %v1274_v35 = vmul.f32 %v5859_v32, %v12577_v29  ;;  %v1243_v21 = vadd.f32 %v1235_v16, %v1207_v51  ;;  %v1247_v34 = vadd.f32 %v1239_v54, %v1211_v49 }
 0x1a2   : >> { %v1271_v6 = vmul.f32 %v5861_v9, %v1267_v56  ;;  %v1275_v13 = vmul.f32 %v5861_v9, %v12577_v29  ;;  %v1244_v17 = vadd.f32 %v1236_v37, %v1208_v31  ;;  %v1248_v10 = vadd.f32 %v1240_v4, %v1212_v22 }
 0x1a3   : >> { %v1272_v2 = vmul.f32 %v5863_v38, %v1268_v46  ;;  %v1276_v52 = vmul.f32 %v5863_v38, %v12577_v29  ;;  %v1277_v7 = vadd.f32 %v1269_v18, %v1241_v14  ;;  %v1281_v15 = vadd.f32 %v1273_v27, %v1245_v43  ;;  %v12579_v18 = vld [vmem:[#allocation79_spill] sm:$0xff] }
 0x1a4   : >> { %v1303_v24 = vmul.f32 %v8092_v41, %v12578_v47  ;;  %v1278_v8 = vadd.f32 %v1270_v5, %v1242_v58  ;;  %v1282_v57 = vadd.f32 %v1274_v35, %v1246_v62  ;;  %v1304_v12 = vmul.f32 %v8098_v53, %v12578_v47  ;;  %v12580_v62 = vld [vmem:[#allocation80_spill] sm:$0xff] }
 0x1a5   : >> { %v5865_v44 = vpop.eup %5864  ;;  %v1279_v56 = vadd.f32 %v1271_v6, %v1243_v21  ;;  %v1283_v25 = vadd.f32 %v1275_v13, %v1247_v34  ;;  %v1280_v63 = vadd.f32 %v1272_v2, %v1244_v17  ;;  %v1284_v39 = vadd.f32 %v1276_v52, %v1248_v10  ;;  %v12581_v21 = vld [vmem:[#allocation81_spill] sm:$0xff]  ;;  %v12582_v10 = vld [vmem:[#allocation82_spill] sm:$0xff] }
 0x1a6   : >> { %v5867_v28 = vpop.eup %5866  ;;  %v1305_v51 = vmul.f32 %v5865_v44, %v1301_v45  ;;  %v1309_v49 = vmul.f32 %v5865_v44, %v12578_v47 }
 0x1a7   : >> { %v5869_v46 = vpop.eup %5868  ;;  %v1306_v32 = vmul.f32 %v5867_v28, %v1302_v48  ;;  %v1310_v31 = vmul.f32 %v5867_v28, %v12578_v47 }
 0x1a8   : >> { %v5871_v22 = vpop.eup %5870  ;;  %v1307_v41 = vmul.f32 %v5869_v46, %v1303_v24  ;;  %v1311_v16 = vmul.f32 %v5869_v46, %v12578_v47  ;;  %v1313_v54 = vadd.f32 %v1305_v51, %v1277_v7  ;;  %v1317_v9 = vadd.f32 %v1309_v49, %v1281_v15 }
 0x1a9   : >> { %v1308_v37 = vmul.f32 %v5871_v22, %v1304_v12  ;;  %v1312_v53 = vmul.f32 %v5871_v22, %v12578_v47  ;;  %v1314_v4 = vadd.f32 %v1306_v32, %v1278_v8  ;;  %v1318_v38 = vadd.f32 %v1310_v31, %v1282_v57 }
 0x1aa   : >> { %v1315_v45 = vadd.f32 %v1307_v41, %v1279_v56  ;;  %v1319_v14 = vadd.f32 %v1311_v16, %v1283_v25  ;;  %v1321_v43 = vadd.f32 1.0, %v1313_v54  ;;  %v1325_v2 = vmul.f32 %v1317_v9, %v12579_v18 }
 0x1ab   : >> { %v1316_v27 = vadd.f32 %v1308_v37, %v1280_v63  ;;  %v1320_v48 = vadd.f32 %v1312_v53, %v1284_v39  ;;  %v1322_v58 = vadd.f32 1.0, %v1314_v4  ;;  %v1326_v5 = vmul.f32 %v1318_v38, %v12580_v62 }
 0x1ac   : >> { %v1323_v35 = vadd.f32 1.0, %v1315_v45  ;;  %v1327_v34 = vmul.f32 %v1319_v14, %v12581_v21  ;;  %v1329_v6 = vsub.f32 0.0, %v1325_v2  ;;  %v1333_v13 = vmul.f32 %v1321_v43, %v1321_v43 }
 0x1ad   : >> { %v1324_v17 = vadd.f32 1.0, %v1316_v27  ;;  %v1328_v52 = vmul.f32 %v1320_v48, %v12582_v10  ;;  %v1330_v7 = vsub.f32 0.0, %v1326_v5  ;;  %v1334_v15 = vmul.f32 %v1322_v58, %v1322_v58 }
 0x1ae   : >> { %v1331_v24 = vsub.f32 0.0, %v1327_v34  ;;  %v1335_v44 = vmul.f32 %v1323_v35, %v1323_v35  ;;  %v1337_v8 = vmul.f32 %v1329_v6, %v1329_v6 }
 0x1af   : >> { %v1332_v57 = vsub.f32 0.0, %v1328_v52  ;;  %v1336_v12 = vmul.f32 %v1324_v17, %v1324_v17  ;;  %v1338_v28 = vmul.f32 %v1330_v7, %v1330_v7 }
 0x1b0   : >> { %v1339_v56 = vmul.f32 %v1331_v24, %v1331_v24  ;;  %v1341_v25 = vadd.f32 %v1337_v8, %v1333_v13 }
 0x1b1   : >> { %v1340_v51 = vmul.f32 %v1332_v57, %v1332_v57  ;;  %v1342_v49 = vadd.f32 %v1338_v28, %v1334_v15 }
 0x1b2   : >> { %v1343_v46 = vadd.f32 %v1339_v56, %v1335_v44  ;;  %5872 = vrcp.f32 %v1341_v25 }
 0x1b3   : >> { %v1344_v63 = vadd.f32 %v1340_v51, %v1336_v12  ;;  %5874 = vrcp.f32 %v1342_v49  ;;  %v12589_v49 = vld [vmem:[#allocation42_spill] sm:$0xff] }
 0x1b4   : >> { %5876 = vrcp.f32 %v1343_v46 }
 0x1b5   : >> { %5878 = vrcp.f32 %v1344_v63 }
 0x1bf   : >> { %v5873_v39 = vpop.eup %5872 }
 0x1c0   : >> { %v5875_v32 = vpop.eup %5874  ;;  %v1349_v31 = vmul.f32 %v5873_v39, %v1321_v43  ;;  %v1353_v22 = vmul.f32 %v5873_v39, %v1329_v6 }
 0x1c1   : >> { %v5877_v41 = vpop.eup %5876  ;;  %v1350_v16 = vmul.f32 %v5875_v32, %v1322_v58  ;;  %v1354_v54 = vmul.f32 %v5875_v32, %v1330_v7 }
 0x1c2   : >> { %v5879_v9 = vpop.eup %5878  ;;  %v1351_v37 = vmul.f32 %v5877_v41, %v1323_v35  ;;  %v1355_v53 = vmul.f32 %v5877_v41, %v1331_v24  ;;  %v1357_v4 = vsub.f32 0.0, %v1353_v22  ;;  %v1361_v38 = vadd.f32 %v1349_v31, %v7863_v11  ;;  %v12584_v24 = vld [vmem:[#allocation40_spill] sm:$0xff]  ;;  %v12591_v22 = vld [vmem:[#allocation43_spill] sm:$0xff] }
 0x1c3   : >> { %v1352_v45 = vmul.f32 %v5879_v9, %v1324_v17  ;;  %v1356_v14 = vmul.f32 %v5879_v9, %v1332_v57  ;;  %v1358_v2 = vsub.f32 0.0, %v1354_v54  ;;  %v1362_v27 = vadd.f32 %v1350_v16, %v7867_v50  ;;  %v12583_v50 = vld [vmem:[#allocation39_spill] sm:$0xff]  ;;  %v12592_v16 = vld [vmem:[#allocation44_spill] sm:$0xff] }
 0x1c4   : >> { %v1359_v48 = vsub.f32 0.0, %v1355_v53  ;;  %v1363_v5 = vadd.f32 %v1351_v37, %v7870_v55  ;;  %v8163_v34 = vmul.f32 0.5, %v1361_v38  ;;  %v1369_v43 = vadd.f32 %v1357_v4, %v12579_v18  ;;  %v12593_v37 = vld [vmem:[#allocation45_spill] sm:$0xff]  ;;  %v12594_v4 = vld [vmem:[#allocation46_spill] sm:$0xff] }
 0x1c5   : >> { %v1360_v58 = vsub.f32 0.0, %v1356_v14  ;;  %v1364_v6 = vadd.f32 %v1352_v45, %v7877_v40  ;;  %v8167_v35 = vmul.f32 0.5, %v1362_v27  ;;  %v1370_v13 = vadd.f32 %v1358_v2, %v12580_v62  ;;  %v12586_v62 = vld [vmem:[#allocation41_spill] sm:$0xff] }
 0x1c6   : >> { %v8170_v11 = vmul.f32 0.5, %v1363_v5  ;;  %v1371_v17 = vadd.f32 %v1359_v48, %v12581_v21  ;;  %v1373_v52 = vmul.f32 0.5, %v1369_v43  ;;  %v8175_v7 = vsub.f32 %v8163_v34, %v12583_v50 }
 0x1c7   : >> { %v8177_v55 = vmul.f32 0.5, %v1364_v6  ;;  %v1372_v18 = vadd.f32 %v1360_v58, %v12582_v10  ;;  %v1374_v15 = vmul.f32 0.5, %v1370_v13  ;;  %v1386_v40 = vsub.f32 %v8167_v35, %v12584_v24 }
 0x1c8   : >> { %v1375_v44 = vmul.f32 0.5, %v1371_v17  ;;  %v8182_v8 = vmin.f32 %v1373_v52, -1e-09  ;;  %v1387_v57 = vsub.f32 %v8170_v11, %v12586_v62  ;;  %v1389_v28 = vmul.f32 %v8175_v7, %v8175_v7  ;;  %v12595_v17 = vld [vmem:[#allocation47_spill] sm:$0xff]  ;;  %v12606_v62 = vld [vmem:[#allocation60_spill] sm:$0xff] }
 0x1c9   : >> { %v1376_v21 = vmul.f32 0.5, %v1372_v18  ;;  %v8186_v12 = vmin.f32 %v1374_v15, -1e-09  ;;  %v1390_v25 = vmul.f32 %v1386_v40, %v1386_v40  ;;  %v1388_v46 = vsub.f32 %v8177_v55, %v12589_v49  ;;  %v12596_v18 = vld [vmem:[#allocation48_spill] sm:$0xff] }
 0x1ca   : >> { %12585 = vst [vmem:[#allocation83_spill] sm:$0xff] %v8182_v8  ;;  %v8190_v56 = vmin.f32 %v1375_v44, -1e-09  ;;  %v8194_v10 = vmul.f32 %v8182_v8, %v8182_v8  ;;  %v1391_v32 = vmul.f32 %v1387_v57, %v1387_v57  ;;  %v1413_v41 = vsub.f32 %v8163_v34, %v12591_v22  ;;  %v12597_v44 = vld [vmem:[#allocation49_spill] sm:$0xff] }
 0x1cb   : >> { %12587 = vst [vmem:[#allocation79_spill] sm:$0xff] %v8186_v12  ;;  %v8198_v51 = vmul.f32 %v8186_v12, %v8186_v12  ;;  %v8202_v63 = vmin.f32 %v1376_v21, -1e-09  ;;  %v1414_v54 = vsub.f32 %v8167_v35, %v12592_v16  ;;  %v1415_v53 = vsub.f32 %v8170_v11, %v12593_v37  ;;  %v12603_v37 = vld [vmem:[#allocation54_spill] sm:$0xff] }
 0x1cc   : >> { %12588 = vst [vmem:[#allocation80_spill] sm:$0xff] %v8190_v56  ;;  %v8206_v39 = vmul.f32 %v8190_v56, %v8190_v56  ;;  %v1393_v31 = vadd.f32 %v1389_v28, %v8194_v10  ;;  %v1416_v38 = vsub.f32 %v8177_v55, %v12594_v4  ;;  %v1392_v45 = vmul.f32 %v1388_v46, %v1388_v46  ;;  %v12601_v4 = vld [vmem:[#allocation53_spill] sm:$0xff] }
 0x1cd   : >> { %12590 = vst [vmem:[#allocation81_spill] sm:$0xff] %v8202_v63  ;;  %v1394_v9 = vadd.f32 %v1390_v25, %v8198_v51  ;;  %v1417_v14 = vmul.f32 %v1413_v41, %v1413_v41  ;;  %v1418_v2 = vmul.f32 %v1414_v54, %v1414_v54  ;;  %v8220_v27 = vmul.f32 %v8202_v63, %v8202_v63 }
 0x1ce   : >> { %v1395_v48 = vadd.f32 %v1391_v32, %v8206_v39  ;;  %v1419_v5 = vmul.f32 %v1415_v53, %v1415_v53  ;;  %v1420_v43 = vmul.f32 %v1416_v38, %v1416_v38  ;;  %5880 = vrcp.f32 %v1393_v31  ;;  %v12598_v32 = vld [vmem:[#allocation50_spill] sm:$0xff] }
 0x1cf   : >> { %v1421_v58 = vadd.f32 %v1417_v14, %v8194_v10  ;;  %5882 = vrcp.f32 %v1394_v9  ;;  %v1422_v6 = vadd.f32 %v1418_v2, %v8198_v51  ;;  %v1449_v52 = vsub.f32 %v8163_v34, %v12595_v17 }
 0x1d0   : >> { %v1423_v13 = vadd.f32 %v1419_v5, %v8206_v39  ;;  %v1450_v15 = vsub.f32 %v8167_v35, %v12596_v18  ;;  %v1451_v21 = vsub.f32 %v8170_v11, %v12597_v44  ;;  %v1396_v28 = vadd.f32 %v1392_v45, %v8220_v27  ;;  %v12599_v5 = vld [vmem:[#allocation51_spill] sm:$0xff] }
 0x1d1   : >> { %5884 = vrcp.f32 %v1395_v48  ;;  %v1424_v25 = vadd.f32 %v1420_v43, %v8220_v27  ;;  %v1452_v31 = vsub.f32 %v8177_v55, %v12598_v32  ;;  %v1453_v9 = vmul.f32 %v1449_v52, %v1449_v52  ;;  %v12600_v43 = vld [vmem:[#allocation52_spill] sm:$0xff] }
 0x1d2   : >> { %5886 = vrcp.f32 %v1421_v58  ;;  %v1454_v14 = vmul.f32 %v1450_v15, %v1450_v15  ;;  %v1455_v2 = vmul.f32 %v1451_v21, %v1451_v21  ;;  %v1485_v17 = vsub.f32 %v8163_v34, %v12599_v5  ;;  %v12602_v5 = vld [vmem:[#allocation56_spill] sm:$0xff] }
 0x1d3   : >> { %5888 = vrcp.f32 %v1422_v6  ;;  %v1456_v18 = vmul.f32 %v1452_v31, %v1452_v31  ;;  %v1457_v44 = vadd.f32 %v1453_v9, %v8194_v10  ;;  %v1486_v58 = vsub.f32 %v8167_v35, %v12600_v43 }
 0x1d4   : >> { %5890 = vrcp.f32 %v1423_v13  ;;  %v1458_v45 = vadd.f32 %v1454_v14, %v8198_v51  ;;  %v1459_v48 = vadd.f32 %v1455_v2, %v8206_v39  ;;  %v1489_v32 = vmul.f32 %v1485_v17, %v1485_v17 }
 0x1d5   : >> { %5892 = vrcp.f32 %v1396_v28  ;;  %v1460_v6 = vadd.f32 %v1456_v18, %v8220_v27  ;;  %v1487_v13 = vsub.f32 %v8170_v11, %v12601_v4  ;;  %v1488_v9 = vsub.f32 %v8177_v55, %v12602_v5 }
 0x1d6   : >> { %5894 = vrcp.f32 %v1424_v25  ;;  %v1401_v28 = vmul.f32 %v8175_v7, %v12603_v37  ;;  %v1402_v14 = vmul.f32 %v1386_v40, %v12603_v37  ;;  %v1403_v25 = vmul.f32 %v1387_v57, %v12603_v37 }
 0x1d7   : >> { %5896 = vrcp.f32 %v1457_v44  ;;  %v1404_v44 = vmul.f32 %v1388_v46, %v12603_v37  ;;  %v1429_v2 = vmul.f32 %v1413_v41, %v12523_v0  ;;  %v1490_v18 = vmul.f32 %v1486_v58, %v1486_v58 }
 0x1d8   : >> { %5898 = vrcp.f32 %v1458_v45  ;;  %v1430_v43 = vmul.f32 %v1414_v54, %v12523_v0  ;;  %v1431_v4 = vmul.f32 %v1415_v53, %v12523_v0  ;;  %v1432_v5 = vmul.f32 %v1416_v38, %v12523_v0 }
 0x1d9   : >> { %5900 = vrcp.f32 %v1459_v48  ;;  %v1493_v16 = vadd.f32 %v1489_v32, %v8194_v10  ;;  %v1465_v40 = vmul.f32 %v1449_v52, %v12524_v20  ;;  %v1491_v48 = vmul.f32 %v1487_v13, %v1487_v13 }
 0x1da   : >> { %5902 = vrcp.f32 %v1460_v6  ;;  %v1492_v57 = vmul.f32 %v1488_v9, %v1488_v9  ;;  %v1466_v46 = vmul.f32 %v1450_v15, %v12524_v20  ;;  %v1467_v41 = vmul.f32 %v1451_v21, %v12524_v20  ;;  %v12605_v6 = vld [vmem:[#allocation59_spill] sm:$0xff] }
 0x1db   : >> { %v5881_v45 = vpop.eup %5880  ;;  %v8262_v22 = vmul.f32 %v1452_v31, %v12524_v20  ;;  %v8265_v54 = vmul.f32 %v1485_v17, %v7257_v61  ;;  %v1494_v38 = vadd.f32 %v1490_v18, %v8198_v51  ;;  %v8269_v32 = vmul.f32 %v1486_v58, %v7257_v61 }
 0x1dc   : >> { %v5883_v7 = vpop.eup %5882  ;;  %v8272_v52 = vmul.f32 %v1487_v13, %v7257_v61  ;;  %v1521_v15 = vsub.f32 %v8163_v34, %v12605_v6  ;;  %v1405_v21 = vmul.f32 %v5881_v45, %v1401_v28  ;;  %v1409_v31 = vmul.f32 %v5881_v45, %v12603_v37  ;;  %v12607_v28 = vld [vmem:[#allocation61_spill] sm:$0xff] }
 0x1dd   : >> { %5904 = vrcp.f32 %v1493_v16  ;;  %v1522_v17 = vsub.f32 %v8167_v35, %v12606_v62  ;;  %v1406_v50 = vmul.f32 %v5883_v7, %v1402_v14  ;;  %v1410_v18 = vmul.f32 %v5883_v7, %v12603_v37 }
 0x1de   : >> { %v5885_v53 = vpop.eup %5884  ;;  %12604 = vst [vmem:[#allocation82_spill] sm:$0xff] %v8272_v52  ;;  %v1495_v58 = vadd.f32 %v1491_v48, %v8206_v39  ;;  %v1496_v13 = vadd.f32 %v1492_v57, %v8220_v27  ;;  %v8285_v45 = vsub.f32 %v8170_v11, %v12607_v28  ;;  %5906 = vrcp.f32 %v1494_v38 }
 0x1df   : >> { %v5887_v49 = vpop.eup %5886  ;;  %v1407_v56 = vmul.f32 %v5885_v53, %v1403_v25  ;;  %v1411_v6 = vmul.f32 %v5885_v53, %v12603_v37  ;;  %v8289_v14 = vmul.f32 %v1488_v9, %v7257_v61  ;;  %v1525_v7 = vmul.f32 %v1521_v15, %v1521_v15  ;;  %v12610_v25 = vld [vmem:[#allocation62_spill] sm:$0xff] }
 0x1e0   : >> { %v5889_v24 = vpop.eup %5888  ;;  %v1433_v12 = vmul.f32 %v5887_v49, %v1429_v2  ;;  %12608 = vst [vmem:[#allocation84_spill] sm:$0xff] %v8285_v45  ;;  %v1437_v62 = vmul.f32 %v5887_v49, %v12523_v0  ;;  %v8294_v53 = vsub.f32 %v8177_v55, %v12610_v25  ;;  %v1526_v2 = vmul.f32 %v1522_v17, %v1522_v17 }
 0x1e1   : >> { %v5891_v63 = vpop.eup %5890  ;;  %12609 = vst [vmem:[#allocation85_spill] sm:$0xff] %v8289_v14  ;;  %v1434_v8 = vmul.f32 %v5889_v24, %v1430_v43  ;;  %v1438_v57 = vmul.f32 %v5889_v24, %v12523_v0  ;;  %5908 = vrcp.f32 %v1495_v58  ;;  %v1527_v43 = vmul.f32 %v8285_v45, %v8285_v45 }
 0x1e2   : >> { %v5893_v16 = vpop.eup %5892  ;;  %v1435_v29 = vmul.f32 %v5891_v63, %v1431_v4  ;;  %v1439_v36 = vmul.f32 %v5891_v63, %v12523_v0  ;;  %v1441_v38 = vadd.f32 %v1433_v12, %v1405_v21  ;;  %5910 = vrcp.f32 %v1496_v13 }
 0x1e3   : >> { %v5895_v48 = vpop.eup %5894  ;;  %v1408_v28 = vmul.f32 %v5893_v16, %v1404_v44  ;;  %v1412_v9 = vmul.f32 %v5893_v16, %v12603_v37  ;;  %v1445_v14 = vadd.f32 %v1437_v62, %v1409_v31  ;;  %v1529_v52 = vadd.f32 %v1525_v7, %v8194_v10 }
 0x1e4   : >> { %v5897_v47 = vpop.eup %5896  ;;  %v1436_v33 = vmul.f32 %v5895_v48, %v1432_v5  ;;  %v1440_v25 = vmul.f32 %v5895_v48, %v12523_v0  ;;  %v1442_v44 = vadd.f32 %v1434_v8, %v1406_v50  ;;  %v1446_v4 = vadd.f32 %v1438_v57, %v1410_v18 }
 0x1e5   : >> { %v5899_v49 = vpop.eup %5898  ;;  %v1528_v63 = vmul.f32 %v8294_v53, %v8294_v53  ;;  %v1530_v58 = vadd.f32 %v1526_v2, %v8198_v51  ;;  %v1443_v16 = vadd.f32 %v1435_v29, %v1407_v56  ;;  %v1447_v12 = vadd.f32 %v1439_v36, %v1411_v6 }
 0x1e6   : >> { %v5901_v24 = vpop.eup %5900  ;;  %v1469_v21 = vmul.f32 %v5897_v47, %v1465_v40  ;;  %v1473_v13 = vmul.f32 %v5897_v47, %v12524_v20  ;;  %v1470_v45 = vmul.f32 %v5899_v49, %v1466_v46  ;;  %v1474_v48 = vmul.f32 %v5899_v49, %v12524_v20 }
 0x1e7   : >> { %v5903_v37 = vpop.eup %5902  ;;  %v1471_v5 = vmul.f32 %v5901_v24, %v1467_v41  ;;  %v1475_v62 = vmul.f32 %v5901_v24, %v12524_v20  ;;  %v1444_v31 = vadd.f32 %v1436_v33, %v1408_v28  ;;  %v1448_v50 = vadd.f32 %v1440_v25, %v1412_v9 }
 0x1e8   : >> { %5912 = vrcp.f32 %v1529_v52  ;;  %v8309_v8 = vmul.f32 %v1521_v15, %v7324_v23  ;;  %v1531_v18 = vadd.f32 %v1527_v43, %v8206_v39  ;;  %v1532_v36 = vadd.f32 %v1528_v63, %v8220_v27 }
 0x1e9   : >> { %5914 = vrcp.f32 %v1530_v58  ;;  %v8314_v29 = vmul.f32 %v1522_v17, %v7324_v23  ;;  %v1472_v56 = vmul.f32 %v5903_v37, %v8262_v22  ;;  %v1476_v40 = vmul.f32 %v5903_v37, %v12524_v20 }
 0x1ea   : >> { %v5905_v47 = vpop.eup %5904  ;;  %v1477_v46 = vadd.f32 %v1469_v21, %v1441_v38  ;;  %v1481_v33 = vadd.f32 %v1473_v13, %v1445_v14  ;;  %v1478_v41 = vadd.f32 %v1470_v45, %v1442_v44  ;;  %v1479_v52 = vadd.f32 %v1471_v5, %v1443_v16 }
 0x1eb   : >> { %v1482_v6 = vadd.f32 %v1474_v48, %v1446_v4  ;;  %v1483_v15 = vadd.f32 %v1475_v62, %v1447_v12  ;;  %v8320_v28 = vsub.f32 %v8163_v34, %v12529_v42  ;;  %v8324_v7 = vsub.f32 %v8167_v35, %v12530_v26  ;;  %v5907_v37 = vpop.eup %5906  ;;  %v12611_v48 = vld [vmem:[#allocation82_spill] sm:$0xff] }
 0x1ec   : >> { %v8328_v17 = vsub.f32 %v8170_v11, %v12531_v30  ;;  %v8332_v22 = vsub.f32 %v8177_v55, %v12532_v1  ;;  %v1505_v45 = vmul.f32 %v5905_v47, %v8265_v54  ;;  %v1509_v14 = vmul.f32 %v5905_v47, %v7257_v61 }
 0x1ed   : >> { %5916 = vrcp.f32 %v1531_v18  ;;  %v8338_v57 = vsub.f32 %v8163_v34, %v12569_v60  ;;  %v1561_v25 = vmul.f32 %v8320_v28, %v8320_v28  ;;  %v1562_v2 = vmul.f32 %v8324_v7, %v8324_v7 }
 0x1ee   : >> { %v1563_v49 = vmul.f32 %v8328_v17, %v8328_v17  ;;  %v1564_v9 = vmul.f32 %v8332_v22, %v8332_v22  ;;  %v5909_v54 = vpop.eup %5908  ;;  %v1480_v38 = vadd.f32 %v1472_v56, %v1444_v31  ;;  %v1484_v43 = vadd.f32 %v1476_v40, %v1448_v50 }
 0x1ef   : >> { %5918 = vrcp.f32 %v1532_v36  ;;  %v8350_v24 = vsub.f32 %v8167_v35, %v12570_v59  ;;  %v5911_v44 = vpop.eup %5910  ;;  %v1565_v4 = vadd.f32 %v1561_v25, %v8194_v10  ;;  %v1566_v63 = vadd.f32 %v1562_v2, %v8198_v51  ;;  %v12612_v25 = vld [vmem:[#allocation85_spill] sm:$0xff] }
 0x1f0   : >> { %v8356_v58 = vsub.f32 %v8170_v11, %v12571_v3  ;;  %v8360_v16 = vsub.f32 %v8177_v55, %v12572_v19  ;;  %v1506_v12 = vmul.f32 %v5907_v37, %v8269_v32  ;;  %v1510_v21 = vmul.f32 %v5907_v37, %v7257_v61 }
 0x1f1   : >> { %v1567_v13 = vadd.f32 %v1563_v49, %v8206_v39  ;;  %v1568_v5 = vadd.f32 %v1564_v9, %v8220_v27  ;;  %v1507_v62 = vmul.f32 %v5909_v54, %v12611_v48  ;;  %v1511_v31 = vmul.f32 %v5909_v54, %v7257_v61 }
 0x1f2   : >> { %5920 = vrcp.f32 %v1565_v4  ;;  %v1597_v50 = vmul.f32 %v8338_v57, %v8338_v57  ;;  %v1513_v18 = vadd.f32 %v1505_v45, %v1477_v46  ;;  %v1517_v36 = vadd.f32 %v1509_v14, %v1481_v33  ;;  %v12613_v4 = vld [vmem:[#allocation72_spill] sm:$0xff] }
 0x1f3   : >> { %5922 = vrcp.f32 %v1566_v63  ;;  %v1598_v32 = vmul.f32 %v8350_v24, %v8350_v24  ;;  %v1599_v47 = vmul.f32 %v8356_v58, %v8356_v58  ;;  %v1600_v56 = vmul.f32 %v8360_v16, %v8360_v16 }
 0x1f4   : >> { %5924 = vrcp.f32 %v1567_v13  ;;  %v1601_v40 = vadd.f32 %v1597_v50, %v8194_v10  ;;  %v1508_v2 = vmul.f32 %v5911_v44, %v12612_v25  ;;  %v1512_v49 = vmul.f32 %v5911_v44, %v7257_v61  ;;  %v12614_v13 = vld [vmem:[#allocation73_spill] sm:$0xff]  ;;  %v12615_v50 = vld [vmem:[#allocation74_spill] sm:$0xff] }
 0x1f5   : >> { %v5913_v37 = vpop.eup %5912  ;;  %5926 = vrcp.f32 %v1568_v5  ;;  %v1602_v46 = vadd.f32 %v1598_v32, %v8198_v51  ;;  %v1514_v45 = vadd.f32 %v1506_v12, %v1478_v41  ;;  %v1603_v14 = vadd.f32 %v1599_v47, %v8206_v39  ;;  %v12616_v32 = vld [vmem:[#allocation84_spill] sm:$0xff] }
 0x1f6   : >> { %v5915_v33 = vpop.eup %5914  ;;  %v1604_v9 = vadd.f32 %v1600_v56, %v8220_v27  ;;  %5928 = vrcp.f32 %v1601_v40  ;;  %v1518_v54 = vadd.f32 %v1510_v21, %v1482_v6  ;;  %v8384_v63 = vsub.f32 %v8163_v34, %v12613_v4  ;;  %v12617_v21 = vld [vmem:[#allocation75_spill] sm:$0xff] }
 0x1f7   : >> { %5930 = vrcp.f32 %v1602_v46  ;;  %v8388_v48 = vsub.f32 %v8167_v35, %v12614_v13  ;;  %v1515_v44 = vadd.f32 %v1507_v62, %v1479_v52  ;;  %v1519_v5 = vadd.f32 %v1511_v31, %v1483_v15 }
 0x1f8   : >> { %5932 = vrcp.f32 %v1603_v14  ;;  %v8392_v41 = vsub.f32 %v8170_v11, %v12615_v50  ;;  %v1516_v12 = vadd.f32 %v1508_v2, %v1480_v38  ;;  %v1539_v6 = vmul.f32 %v12616_v32, %v7324_v23 }
 0x1f9   : >> { %5934 = vrcp.f32 %v1604_v9  ;;  %v8398_v47 = vsub.f32 %v8177_v55, %v12617_v21  ;;  %v1520_v40 = vadd.f32 %v1512_v49, %v1484_v43  ;;  %v1541_v25 = vmul.f32 %v5913_v37, %v8309_v8  ;;  %v12618_v49 = vld [vmem:[#allocation76_spill] sm:$0xff] }
 0x1fa   : >> { %v5917_v56 = vpop.eup %5916  ;;  %v1633_v52 = vmul.f32 %v8384_v63, %v8384_v63  ;;  %v1634_v15 = vmul.f32 %v8388_v48, %v8388_v48  ;;  %v1540_v38 = vmul.f32 %v8294_v53, %v7324_v23  ;;  %v1545_v62 = vmul.f32 %v5913_v37, %v7324_v23 }
 0x1fb   : >> { %v1635_v31 = vmul.f32 %v8392_v41, %v8392_v41  ;;  %v1636_v2 = vmul.f32 %v8398_v47, %v8398_v47  ;;  %v1542_v8 = vmul.f32 %v5915_v33, %v8314_v29  ;;  %v1573_v46 = vmul.f32 %v8320_v28, %v12618_v49 }
 0x1fc   : >> { %v5919_v43 = vpop.eup %5918  ;;  %v1637_v14 = vadd.f32 %v1633_v52, %v8194_v10  ;;  %v1638_v9 = vadd.f32 %v1634_v15, %v8198_v51  ;;  %v1546_v53 = vmul.f32 %v5915_v33, %v7324_v23  ;;  %v1574_v37 = vmul.f32 %v8324_v7, %v12618_v49 }
 0x1fd   : >> { %v1639_v32 = vadd.f32 %v1635_v31, %v8206_v39  ;;  %v1640_v21 = vadd.f32 %v1636_v2, %v8220_v27  ;;  %v1549_v50 = vadd.f32 %v1541_v25, %v1513_v18  ;;  %v1575_v29 = vmul.f32 %v8328_v17, %v12618_v49  ;;  %v12619_v25 = vld [vmem:[#allocation77_spill] sm:$0xff] }
 0x1fe   : >> { %v1576_v28 = vmul.f32 %v8332_v22, %v12618_v49  ;;  %5936 = vrcp.f32 %v1637_v14  ;;  %v1543_v52 = vmul.f32 %v5917_v56, %v1539_v6  ;;  %v1547_v51 = vmul.f32 %v5917_v56, %v7324_v23 }
 0x1ff   : >> { %v5921_v10 = vpop.eup %5920  ;;  %v1553_v33 = vadd.f32 %v1545_v62, %v1517_v36  ;;  %5938 = vrcp.f32 %v1638_v9  ;;  %v1544_v7 = vmul.f32 %v5919_v43, %v1540_v38  ;;  %v1548_v39 = vmul.f32 %v5919_v43, %v7324_v23 }
 0x200   : >> { %v5923_v15 = vpop.eup %5922  ;;  %v1550_v31 = vadd.f32 %v1542_v8, %v1514_v45  ;;  %5940 = vrcp.f32 %v1639_v32  ;;  %v1554_v18 = vadd.f32 %v1546_v53, %v1518_v54  ;;  %v1609_v17 = vmul.f32 %v8338_v57, %v12619_v25 }
 0x201   : >> { %v5925_v27 = vpop.eup %5924  ;;  %v1610_v22 = vmul.f32 %v8350_v24, %v12619_v25  ;;  %5942 = vrcp.f32 %v1640_v21  ;;  %v1577_v2 = vmul.f32 %v5921_v10, %v1573_v46  ;;  %v1581_v36 = vmul.f32 %v5921_v10, %v12618_v49 }
 0x202   : >> { %v5927_v6 = vpop.eup %5926  ;;  %v1611_v56 = vmul.f32 %v8356_v58, %v12619_v25  ;;  %v1612_v45 = vmul.f32 %v8360_v16, %v12619_v25  ;;  %v1551_v62 = vadd.f32 %v1543_v52, %v1515_v44  ;;  %v1555_v54 = vadd.f32 %v1547_v51, %v1519_v5  ;;  %v12620_v58 = vld [vmem:[#allocation78_spill] sm:$0xff] }
 0x203   : >> { %v5929_v38 = vpop.eup %5928  ;;  %v1578_v43 = vmul.f32 %v5923_v15, %v1574_v37  ;;  %v1582_v57 = vmul.f32 %v5923_v15, %v12618_v49  ;;  %v1552_v14 = vadd.f32 %v1544_v7, %v1516_v12  ;;  %v1556_v24 = vadd.f32 %v1548_v39, %v1520_v40 }
 0x204   : >> { %v5931_v8 = vpop.eup %5930  ;;  %v1579_v21 = vmul.f32 %v5925_v27, %v1575_v29  ;;  %v1583_v46 = vmul.f32 %v5925_v27, %v12618_v49  ;;  %v1580_v53 = vmul.f32 %v5927_v6, %v1576_v28  ;;  %v1584_v32 = vmul.f32 %v5927_v6, %v12618_v49 }
 0x205   : >> { %v5933_v9 = vpop.eup %5932  ;;  %v1645_v10 = vmul.f32 %v8384_v63, %v12620_v58  ;;  %v1646_v16 = vmul.f32 %v8388_v48, %v12620_v58  ;;  %v1585_v5 = vadd.f32 %v1577_v2, %v1549_v50  ;;  %v1589_v37 = vadd.f32 %v1581_v36, %v1553_v33 }
 0x206   : >> { %v5935_v44 = vpop.eup %5934  ;;  %v1613_v52 = vmul.f32 %v5929_v38, %v1609_v17  ;;  %v1617_v12 = vmul.f32 %v5929_v38, %v12619_v25  ;;  %v1586_v40 = vadd.f32 %v1578_v43, %v1550_v31  ;;  %v1590_v29 = vadd.f32 %v1582_v57, %v1554_v18 }
 0x207   : >> { %v1614_v51 = vmul.f32 %v5931_v8, %v1610_v22  ;;  %v1618_v15 = vmul.f32 %v5931_v8, %v12619_v25  ;;  %v1587_v28 = vadd.f32 %v1579_v21, %v1551_v62  ;;  %v1591_v7 = vadd.f32 %v1583_v46, %v1555_v54 }
 0x208   : >> { %v1615_v39 = vmul.f32 %v5933_v9, %v1611_v56  ;;  %v1619_v27 = vmul.f32 %v5933_v9, %v12619_v25  ;;  %v1588_v63 = vadd.f32 %v1580_v53, %v1552_v14  ;;  %v1592_v6 = vadd.f32 %v1584_v32, %v1556_v24 }
 0x209   : >> { %v1616_v49 = vmul.f32 %v5935_v44, %v1612_v45  ;;  %v1620_v48 = vmul.f32 %v5935_v44, %v12619_v25  ;;  %v1621_v50 = vadd.f32 %v1613_v52, %v1585_v5  ;;  %v1625_v33 = vadd.f32 %v1617_v12, %v1589_v37  ;;  %v12621_v52 = vld [vmem:[#allocation83_spill] sm:$0xff] }
 0x20a   : >> { %v1647_v17 = vmul.f32 %v8392_v41, %v12620_v58  ;;  %v1622_v18 = vadd.f32 %v1614_v51, %v1586_v40  ;;  %v1626_v22 = vadd.f32 %v1618_v15, %v1590_v29  ;;  %v1648_v2 = vmul.f32 %v8398_v47, %v12620_v58  ;;  %v12622_v29 = vld [vmem:[#allocation79_spill] sm:$0xff] }
 0x20b   : >> { %v5937_v31 = vpop.eup %5936  ;;  %v1623_v56 = vadd.f32 %v1615_v39, %v1587_v28  ;;  %v1627_v38 = vadd.f32 %v1619_v27, %v1591_v7  ;;  %v1624_v43 = vadd.f32 %v1616_v49, %v1588_v63  ;;  %v1628_v57 = vadd.f32 %v1620_v48, %v1592_v6  ;;  %v12623_v28 = vld [vmem:[#allocation80_spill] sm:$0xff]  ;;  %v12624_v6 = vld [vmem:[#allocation81_spill] sm:$0xff] }
 0x20c   : >> { %v5939_v36 = vpop.eup %5938  ;;  %v1649_v62 = vmul.f32 %v5937_v31, %v1645_v10  ;;  %v1653_v54 = vmul.f32 %v5937_v31, %v12620_v58 }
 0x20d   : >> { %v5941_v45 = vpop.eup %5940  ;;  %v1650_v8 = vmul.f32 %v5939_v36, %v1646_v16  ;;  %v1654_v14 = vmul.f32 %v5939_v36, %v12620_v58 }
 0x20e   : >> { %v5943_v24 = vpop.eup %5942  ;;  %v1651_v41 = vmul.f32 %v5941_v45, %v1647_v17  ;;  %v1655_v21 = vmul.f32 %v5941_v45, %v12620_v58  ;;  %v1657_v46 = vadd.f32 %v1649_v62, %v1621_v50  ;;  %v1661_v9 = vadd.f32 %v1653_v54, %v1625_v33 }
 0x20f   : >> { %v1652_v53 = vmul.f32 %v5943_v24, %v1648_v2  ;;  %v1656_v47 = vmul.f32 %v5943_v24, %v12620_v58  ;;  %v1658_v32 = vadd.f32 %v1650_v8, %v1622_v18  ;;  %v1662_v44 = vadd.f32 %v1654_v14, %v1626_v22 }
 0x210   : >> { %v1659_v10 = vadd.f32 %v1651_v41, %v1623_v56  ;;  %v1663_v5 = vadd.f32 %v1655_v21, %v1627_v38  ;;  %v1665_v37 = vadd.f32 1.0, %v1657_v46  ;;  %v1669_v49 = vmul.f32 %v1661_v9, %v12621_v52 }
 0x211   : >> { %v1660_v12 = vadd.f32 %v1652_v53, %v1624_v43  ;;  %v1664_v16 = vadd.f32 %v1656_v47, %v1628_v57  ;;  %v1666_v40 = vadd.f32 1.0, %v1658_v32  ;;  %v1670_v51 = vmul.f32 %v1662_v44, %v12622_v29 }
 0x212   : >> { %v1667_v15 = vadd.f32 1.0, %v1659_v10  ;;  %v1671_v7 = vmul.f32 %v1663_v5, %v12623_v28  ;;  %v1673_v39 = vsub.f32 0.0, %v1669_v49  ;;  %v1677_v27 = vmul.f32 %v1665_v37, %v1665_v37 }
 0x213   : >> { %v1668_v63 = vadd.f32 1.0, %v1660_v12  ;;  %v1672_v48 = vmul.f32 %v1664_v16, %v12624_v6  ;;  %v1674_v50 = vsub.f32 0.0, %v1670_v51  ;;  %v1678_v33 = vmul.f32 %v1666_v40, %v1666_v40 }
 0x214   : >> { %v1675_v17 = vsub.f32 0.0, %v1671_v7  ;;  %v1679_v31 = vmul.f32 %v1667_v15, %v1667_v15  ;;  %v1681_v18 = vmul.f32 %v1673_v39, %v1673_v39 }
 0x215   : >> { %v1676_v22 = vsub.f32 0.0, %v1672_v48  ;;  %v1680_v2 = vmul.f32 %v1668_v63, %v1668_v63  ;;  %v1682_v36 = vmul.f32 %v1674_v50, %v1674_v50 }
 0x216   : >> { %v1683_v56 = vmul.f32 %v1675_v17, %v1675_v17  ;;  %v1685_v38 = vadd.f32 %v1681_v18, %v1677_v27 }
 0x217   : >> { %v1684_v62 = vmul.f32 %v1676_v22, %v1676_v22  ;;  %v1686_v54 = vadd.f32 %v1682_v36, %v1678_v33 }
 0x218   : >> { %v1687_v45 = vadd.f32 %v1683_v56, %v1679_v31  ;;  %5944 = vrcp.f32 %v1685_v38 }
 0x219   : >> { %v1688_v43 = vadd.f32 %v1684_v62, %v1680_v2  ;;  %5946 = vrcp.f32 %v1686_v54  ;;  %v12631_v54 = vld [vmem:[#allocation42_spill] sm:$0xff] }
 0x21a   : >> { %5948 = vrcp.f32 %v1687_v45 }
 0x21b   : >> { %5950 = vrcp.f32 %v1688_v43 }
 0x225   : >> { %v5945_v57 = vpop.eup %5944 }
 0x226   : >> { %v5947_v8 = vpop.eup %5946  ;;  %v1693_v14 = vmul.f32 %v5945_v57, %v1665_v37  ;;  %v1697_v24 = vmul.f32 %v5945_v57, %v1673_v39 }
 0x227   : >> { %v5949_v41 = vpop.eup %5948  ;;  %v1694_v21 = vmul.f32 %v5947_v8, %v1666_v40  ;;  %v1698_v46 = vmul.f32 %v5947_v8, %v1674_v50 }
 0x228   : >> { %v5951_v9 = vpop.eup %5950  ;;  %v1695_v53 = vmul.f32 %v5949_v41, %v1667_v15  ;;  %v1699_v47 = vmul.f32 %v5949_v41, %v1675_v17  ;;  %v1701_v32 = vsub.f32 0.0, %v1697_v24  ;;  %v1705_v44 = vadd.f32 %v1693_v14, %v8163_v34  ;;  %v12626_v17 = vld [vmem:[#allocation40_spill] sm:$0xff]  ;;  %v12633_v24 = vld [vmem:[#allocation43_spill] sm:$0xff] }
 0x229   : >> { %v1696_v10 = vmul.f32 %v5951_v9, %v1668_v63  ;;  %v1700_v5 = vmul.f32 %v5951_v9, %v1676_v22  ;;  %v1702_v49 = vsub.f32 0.0, %v1698_v46  ;;  %v1706_v12 = vadd.f32 %v1694_v21, %v8167_v35  ;;  %v12625_v35 = vld [vmem:[#allocation39_spill] sm:$0xff]  ;;  %v12634_v21 = vld [vmem:[#allocation44_spill] sm:$0xff] }
 0x22a   : >> { %v1703_v16 = vsub.f32 0.0, %v1699_v47  ;;  %v1707_v51 = vadd.f32 %v1695_v53, %v8170_v11  ;;  %v8463_v7 = vmul.f32 0.5, %v1705_v44  ;;  %v1713_v37 = vadd.f32 %v1701_v32, %v12621_v52  ;;  %v12635_v53 = vld [vmem:[#allocation45_spill] sm:$0xff]  ;;  %v12636_v32 = vld [vmem:[#allocation46_spill] sm:$0xff] }
 0x22b   : >> { %v1704_v40 = vsub.f32 0.0, %v1700_v5  ;;  %v1708_v39 = vadd.f32 %v1696_v10, %v8177_v55  ;;  %v8467_v15 = vmul.f32 0.5, %v1706_v12  ;;  %v1714_v27 = vadd.f32 %v1702_v49, %v12622_v29  ;;  %v12628_v29 = vld [vmem:[#allocation41_spill] sm:$0xff] }
 0x22c   : >> { %v8470_v34 = vmul.f32 0.5, %v1707_v51  ;;  %v1715_v63 = vadd.f32 %v1703_v16, %v12623_v28  ;;  %v1717_v48 = vmul.f32 0.5, %v1713_v37  ;;  %v8475_v50 = vsub.f32 %v8463_v7, %v12625_v35 }
 0x22d   : >> { %v8477_v11 = vmul.f32 0.5, %v1708_v39  ;;  %v1716_v52 = vadd.f32 %v1704_v40, %v12624_v6  ;;  %v1718_v33 = vmul.f32 0.5, %v1714_v27  ;;  %v1730_v55 = vsub.f32 %v8467_v15, %v12626_v17 }
 0x22e   : >> { %v1719_v31 = vmul.f32 0.5, %v1715_v63  ;;  %v8482_v18 = vmin.f32 %v1717_v48, -1e-09  ;;  %v1731_v22 = vsub.f32 %v8470_v34, %v12628_v29  ;;  %v1733_v36 = vmul.f32 %v8475_v50, %v8475_v50  ;;  %v12637_v63 = vld [vmem:[#allocation47_spill] sm:$0xff]  ;;  %v12648_v29 = vld [vmem:[#allocation60_spill] sm:$0xff] }
 0x22f   : >> { %v1720_v28 = vmul.f32 0.5, %v1716_v52  ;;  %v8486_v2 = vmin.f32 %v1718_v33, -1e-09  ;;  %v1734_v38 = vmul.f32 %v1730_v55, %v1730_v55  ;;  %v1732_v45 = vsub.f32 %v8477_v11, %v12631_v54  ;;  %v12638_v52 = vld [vmem:[#allocation48_spill] sm:$0xff] }
 0x230   : >> { %12627 = vst [vmem:[#allocation82_spill] sm:$0xff] %v8482_v18  ;;  %v8490_v56 = vmin.f32 %v1719_v31, -1e-09  ;;  %v8494_v6 = vmul.f32 %v8482_v18, %v8482_v18  ;;  %v1735_v8 = vmul.f32 %v1731_v22, %v1731_v22  ;;  %v1757_v41 = vsub.f32 %v8463_v7, %v12633_v24  ;;  %v12639_v31 = vld [vmem:[#allocation49_spill] sm:$0xff] }
 0x231   : >> { %12629 = vst [vmem:[#allocation85_spill] sm:$0xff] %v8486_v2  ;;  %v8498_v62 = vmul.f32 %v8486_v2, %v8486_v2  ;;  %v8502_v43 = vmin.f32 %v1720_v28, -1e-09  ;;  %v1758_v46 = vsub.f32 %v8467_v15, %v12634_v21  ;;  %v1759_v47 = vsub.f32 %v8470_v34, %v12635_v53  ;;  %v12645_v53 = vld [vmem:[#allocation54_spill] sm:$0xff] }
 0x232   : >> { %12630 = vst [vmem:[#allocation84_spill] sm:$0xff] %v8490_v56  ;;  %v8506_v57 = vmul.f32 %v8490_v56, %v8490_v56  ;;  %v1737_v14 = vadd.f32 %v1733_v36, %v8494_v6  ;;  %v1760_v44 = vsub.f32 %v8477_v11, %v12636_v32  ;;  %v1736_v10 = vmul.f32 %v1732_v45, %v1732_v45  ;;  %v12643_v32 = vld [vmem:[#allocation53_spill] sm:$0xff] }
 0x233   : >> { %12632 = vst [vmem:[#allocation83_spill] sm:$0xff] %v8502_v43  ;;  %v1738_v9 = vadd.f32 %v1734_v38, %v8498_v62  ;;  %v1761_v5 = vmul.f32 %v1757_v41, %v1757_v41  ;;  %v1762_v49 = vmul.f32 %v1758_v46, %v1758_v46  ;;  %v8520_v12 = vmul.f32 %v8502_v43, %v8502_v43 }
 0x234   : >> { %v1739_v16 = vadd.f32 %v1735_v8, %v8506_v57  ;;  %v1763_v51 = vmul.f32 %v1759_v47, %v1759_v47  ;;  %v1764_v37 = vmul.f32 %v1760_v44, %v1760_v44  ;;  %5952 = vrcp.f32 %v1737_v14  ;;  %v12640_v8 = vld [vmem:[#allocation50_spill] sm:$0xff] }
 0x235   : >> { %v1765_v40 = vadd.f32 %v1761_v5, %v8494_v6  ;;  %5954 = vrcp.f32 %v1738_v9  ;;  %v1766_v39 = vadd.f32 %v1762_v49, %v8498_v62  ;;  %v1793_v48 = vsub.f32 %v8463_v7, %v12637_v63 }
 0x236   : >> { %v1767_v27 = vadd.f32 %v1763_v51, %v8506_v57  ;;  %v1794_v33 = vsub.f32 %v8467_v15, %v12638_v52  ;;  %v1795_v28 = vsub.f32 %v8470_v34, %v12639_v31  ;;  %v1740_v36 = vadd.f32 %v1736_v10, %v8520_v12  ;;  %v12641_v51 = vld [vmem:[#allocation51_spill] sm:$0xff] }
 0x237   : >> { %5956 = vrcp.f32 %v1739_v16  ;;  %v1768_v38 = vadd.f32 %v1764_v37, %v8520_v12  ;;  %v1796_v14 = vsub.f32 %v8477_v11, %v12640_v8  ;;  %v1797_v9 = vmul.f32 %v1793_v48, %v1793_v48  ;;  %v12642_v37 = vld [vmem:[#allocation52_spill] sm:$0xff] }
 0x238   : >> { %5958 = vrcp.f32 %v1765_v40  ;;  %v1798_v5 = vmul.f32 %v1794_v33, %v1794_v33  ;;  %v1799_v49 = vmul.f32 %v1795_v28, %v1795_v28  ;;  %v1829_v63 = vsub.f32 %v8463_v7, %v12641_v51  ;;  %v12644_v51 = vld [vmem:[#allocation56_spill] sm:$0xff] }
 0x239   : >> { %5960 = vrcp.f32 %v1766_v39  ;;  %v1800_v52 = vmul.f32 %v1796_v14, %v1796_v14  ;;  %v1801_v31 = vadd.f32 %v1797_v9, %v8494_v6  ;;  %v1830_v40 = vsub.f32 %v8467_v15, %v12642_v37 }
 0x23a   : >> { %5962 = vrcp.f32 %v1767_v27  ;;  %v1802_v10 = vadd.f32 %v1798_v5, %v8498_v62  ;;  %v1803_v16 = vadd.f32 %v1799_v49, %v8506_v57  ;;  %v1833_v8 = vmul.f32 %v1829_v63, %v1829_v63 }
 0x23b   : >> { %5964 = vrcp.f32 %v1740_v36  ;;  %v1804_v39 = vadd.f32 %v1800_v52, %v8520_v12  ;;  %v1831_v27 = vsub.f32 %v8470_v34, %v12643_v32  ;;  %v1832_v9 = vsub.f32 %v8477_v11, %v12644_v51 }
 0x23c   : >> { %5966 = vrcp.f32 %v1768_v38  ;;  %v1745_v36 = vmul.f32 %v8475_v50, %v12645_v53  ;;  %v1746_v5 = vmul.f32 %v1730_v55, %v12645_v53  ;;  %v1747_v38 = vmul.f32 %v1731_v22, %v12645_v53 }
 0x23d   : >> { %5968 = vrcp.f32 %v1801_v31  ;;  %v1748_v31 = vmul.f32 %v1732_v45, %v12645_v53  ;;  %v1773_v49 = vmul.f32 %v1757_v41, %v12523_v0  ;;  %v1834_v52 = vmul.f32 %v1830_v40, %v1830_v40 }
 0x23e   : >> { %5970 = vrcp.f32 %v1802_v10  ;;  %v1774_v37 = vmul.f32 %v1758_v46, %v12523_v0  ;;  %v1775_v32 = vmul.f32 %v1759_v47, %v12523_v0  ;;  %v1776_v51 = vmul.f32 %v1760_v44, %v12523_v0 }
 0x23f   : >> { %5972 = vrcp.f32 %v1803_v16  ;;  %v1837_v21 = vadd.f32 %v1833_v8, %v8494_v6  ;;  %v1809_v55 = vmul.f32 %v1793_v48, %v12524_v20  ;;  %v1835_v16 = vmul.f32 %v1831_v27, %v1831_v27 }
 0x240   : >> { %5974 = vrcp.f32 %v1804_v39  ;;  %v1836_v22 = vmul.f32 %v1832_v9, %v1832_v9  ;;  %v1810_v45 = vmul.f32 %v1794_v33, %v12524_v20  ;;  %v1811_v41 = vmul.f32 %v1795_v28, %v12524_v20  ;;  %v12647_v39 = vld [vmem:[#allocation59_spill] sm:$0xff] }
 0x241   : >> { %v5953_v10 = vpop.eup %5952  ;;  %v8562_v24 = vmul.f32 %v1796_v14, %v12524_v20  ;;  %v8565_v46 = vmul.f32 %v1829_v63, %v7257_v61  ;;  %v1838_v44 = vadd.f32 %v1834_v52, %v8498_v62  ;;  %v8569_v8 = vmul.f32 %v1830_v40, %v7257_v61 }
 0x242   : >> { %v5955_v50 = vpop.eup %5954  ;;  %v8572_v48 = vmul.f32 %v1831_v27, %v7257_v61  ;;  %v1865_v33 = vsub.f32 %v8463_v7, %v12647_v39  ;;  %v1749_v28 = vmul.f32 %v5953_v10, %v1745_v36  ;;  %v1753_v14 = vmul.f32 %v5953_v10, %v12645_v53  ;;  %v12649_v36 = vld [vmem:[#allocation61_spill] sm:$0xff] }
 0x243   : >> { %5976 = vrcp.f32 %v1837_v21  ;;  %v1866_v63 = vsub.f32 %v8467_v15, %v12648_v29  ;;  %v1750_v35 = vmul.f32 %v5955_v50, %v1746_v5  ;;  %v1754_v52 = vmul.f32 %v5955_v50, %v12645_v53 }
 0x244   : >> { %v5957_v47 = vpop.eup %5956  ;;  %12646 = vst [vmem:[#allocation79_spill] sm:$0xff] %v8572_v48  ;;  %v1839_v40 = vadd.f32 %v1835_v16, %v8506_v57  ;;  %v1840_v27 = vadd.f32 %v1836_v22, %v8520_v12  ;;  %v8585_v10 = vsub.f32 %v8470_v34, %v12649_v36  ;;  %5978 = vrcp.f32 %v1838_v44 }
 0x245   : >> { %v5959_v54 = vpop.eup %5958  ;;  %v1751_v56 = vmul.f32 %v5957_v47, %v1747_v38  ;;  %v1755_v39 = vmul.f32 %v5957_v47, %v12645_v53  ;;  %v8589_v5 = vmul.f32 %v1832_v9, %v7257_v61  ;;  %v1869_v50 = vmul.f32 %v1865_v33, %v1865_v33  ;;  %v12652_v38 = vld [vmem:[#allocation62_spill] sm:$0xff] }
 0x246   : >> { %v5961_v17 = vpop.eup %5960  ;;  %v1777_v2 = vmul.f32 %v5959_v54, %v1773_v49  ;;  %12650 = vst [vmem:[#allocation80_spill] sm:$0xff] %v8585_v10  ;;  %v1781_v29 = vmul.f32 %v5959_v54, %v12523_v0  ;;  %v8594_v47 = vsub.f32 %v8477_v11, %v12652_v38  ;;  %v1870_v49 = vmul.f32 %v1866_v63, %v1866_v63 }
 0x247   : >> { %v5963_v43 = vpop.eup %5962  ;;  %12651 = vst [vmem:[#allocation81_spill] sm:$0xff] %v8589_v5  ;;  %v1778_v18 = vmul.f32 %v5961_v17, %v1774_v37  ;;  %v1782_v22 = vmul.f32 %v5961_v17, %v12523_v0  ;;  %5980 = vrcp.f32 %v1839_v40  ;;  %v1871_v37 = vmul.f32 %v8585_v10, %v8585_v10 }
 0x248   : >> { %v5965_v21 = vpop.eup %5964  ;;  %v1779_v25 = vmul.f32 %v5963_v43, %v1775_v32  ;;  %v1783_v13 = vmul.f32 %v5963_v43, %v12523_v0  ;;  %v1785_v44 = vadd.f32 %v1777_v2, %v1749_v28  ;;  %5982 = vrcp.f32 %v1840_v27 }
 0x249   : >> { %v5967_v16 = vpop.eup %5966  ;;  %v1752_v36 = vmul.f32 %v5965_v21, %v1748_v31  ;;  %v1756_v9 = vmul.f32 %v5965_v21, %v12645_v53  ;;  %v1789_v5 = vadd.f32 %v1781_v29, %v1753_v14  ;;  %v1873_v48 = vadd.f32 %v1869_v50, %v8494_v6 }
 0x24a   : >> { %v5969_v58 = vpop.eup %5968  ;;  %v1780_v4 = vmul.f32 %v5967_v16, %v1776_v51  ;;  %v1784_v38 = vmul.f32 %v5967_v16, %v12523_v0  ;;  %v1786_v31 = vadd.f32 %v1778_v18, %v1750_v35  ;;  %v1790_v32 = vadd.f32 %v1782_v22, %v1754_v52 }
 0x24b   : >> { %v5971_v54 = vpop.eup %5970  ;;  %v1872_v43 = vmul.f32 %v8594_v47, %v8594_v47  ;;  %v1874_v40 = vadd.f32 %v1870_v49, %v8498_v62  ;;  %v1787_v21 = vadd.f32 %v1779_v25, %v1751_v56  ;;  %v1791_v2 = vadd.f32 %v1783_v13, %v1755_v39 }
 0x24c   : >> { %v5973_v17 = vpop.eup %5972  ;;  %v1813_v28 = vmul.f32 %v5969_v58, %v1809_v55  ;;  %v1817_v27 = vmul.f32 %v5969_v58, %v12524_v20  ;;  %v1814_v10 = vmul.f32 %v5971_v54, %v1810_v45  ;;  %v1818_v16 = vmul.f32 %v5971_v54, %v12524_v20 }
 0x24d   : >> { %v5975_v53 = vpop.eup %5974  ;;  %v1815_v51 = vmul.f32 %v5973_v17, %v1811_v41  ;;  %v1819_v29 = vmul.f32 %v5973_v17, %v12524_v20  ;;  %v1788_v14 = vadd.f32 %v1780_v4, %v1752_v36  ;;  %v1792_v35 = vadd.f32 %v1784_v38, %v1756_v9 }
 0x24e   : >> { %5984 = vrcp.f32 %v1873_v48  ;;  %v8609_v18 = vmul.f32 %v1865_v33, %v7324_v23  ;;  %v1875_v52 = vadd.f32 %v1871_v37, %v8506_v57  ;;  %v1876_v13 = vadd.f32 %v1872_v43, %v8520_v12 }
 0x24f   : >> { %5986 = vrcp.f32 %v1874_v40  ;;  %v8614_v25 = vmul.f32 %v1866_v63, %v7324_v23  ;;  %v1816_v56 = vmul.f32 %v5975_v53, %v8562_v24  ;;  %v1820_v55 = vmul.f32 %v5975_v53, %v12524_v20 }
 0x250   : >> { %v5977_v58 = vpop.eup %5976  ;;  %v1821_v45 = vadd.f32 %v1813_v28, %v1785_v44  ;;  %v1825_v4 = vadd.f32 %v1817_v27, %v1789_v5  ;;  %v1822_v41 = vadd.f32 %v1814_v10, %v1786_v31  ;;  %v1823_v48 = vadd.f32 %v1815_v51, %v1787_v21 }
 0x251   : >> { %v1826_v39 = vadd.f32 %v1818_v16, %v1790_v32  ;;  %v1827_v33 = vadd.f32 %v1819_v29, %v1791_v2  ;;  %v8620_v36 = vsub.f32 %v8463_v7, %v12529_v42  ;;  %v8624_v50 = vsub.f32 %v8467_v15, %v12530_v26  ;;  %v5979_v53 = vpop.eup %5978  ;;  %v12653_v16 = vld [vmem:[#allocation79_spill] sm:$0xff] }
 0x252   : >> { %v8628_v63 = vsub.f32 %v8470_v34, %v12531_v30  ;;  %v8632_v24 = vsub.f32 %v8477_v11, %v12532_v1  ;;  %v1849_v10 = vmul.f32 %v5977_v58, %v8565_v46  ;;  %v1853_v5 = vmul.f32 %v5977_v58, %v7257_v61 }
 0x253   : >> { %5988 = vrcp.f32 %v1875_v52  ;;  %v8638_v22 = vsub.f32 %v8463_v7, %v12569_v60  ;;  %v1905_v38 = vmul.f32 %v8620_v36, %v8620_v36  ;;  %v1906_v49 = vmul.f32 %v8624_v50, %v8624_v50 }
 0x254   : >> { %v1907_v54 = vmul.f32 %v8628_v63, %v8628_v63  ;;  %v1908_v9 = vmul.f32 %v8632_v24, %v8632_v24  ;;  %v5981_v46 = vpop.eup %5980  ;;  %v1824_v44 = vadd.f32 %v1816_v56, %v1788_v14  ;;  %v1828_v37 = vadd.f32 %v1820_v55, %v1792_v35 }
 0x255   : >> { %5990 = vrcp.f32 %v1876_v13  ;;  %v8650_v17 = vsub.f32 %v8467_v15, %v12570_v59  ;;  %v5983_v31 = vpop.eup %5982  ;;  %v1909_v32 = vadd.f32 %v1905_v38, %v8494_v6  ;;  %v1910_v43 = vadd.f32 %v1906_v49, %v8498_v62  ;;  %v12654_v38 = vld [vmem:[#allocation81_spill] sm:$0xff] }
 0x256   : >> { %v8656_v40 = vsub.f32 %v8470_v34, %v12571_v3  ;;  %v8660_v21 = vsub.f32 %v8477_v11, %v12572_v19  ;;  %v1850_v2 = vmul.f32 %v5979_v53, %v8569_v8  ;;  %v1854_v28 = vmul.f32 %v5979_v53, %v7257_v61 }
 0x257   : >> { %v1911_v27 = vadd.f32 %v1907_v54, %v8506_v57  ;;  %v1912_v51 = vadd.f32 %v1908_v9, %v8520_v12  ;;  %v1851_v29 = vmul.f32 %v5981_v46, %v12653_v16  ;;  %v1855_v14 = vmul.f32 %v5981_v46, %v7257_v61 }
 0x258   : >> { %5992 = vrcp.f32 %v1909_v32  ;;  %v1941_v35 = vmul.f32 %v8638_v22, %v8638_v22  ;;  %v1857_v52 = vadd.f32 %v1849_v10, %v1821_v45  ;;  %v1861_v13 = vadd.f32 %v1853_v5, %v1825_v4  ;;  %v12655_v32 = vld [vmem:[#allocation72_spill] sm:$0xff] }
 0x259   : >> { %5994 = vrcp.f32 %v1910_v43  ;;  %v1942_v8 = vmul.f32 %v8650_v17, %v8650_v17  ;;  %v1943_v58 = vmul.f32 %v8656_v40, %v8656_v40  ;;  %v1944_v56 = vmul.f32 %v8660_v21, %v8660_v21 }
 0x25a   : >> { %5996 = vrcp.f32 %v1911_v27  ;;  %v1945_v55 = vadd.f32 %v1941_v35, %v8494_v6  ;;  %v1852_v49 = vmul.f32 %v5983_v31, %v12654_v38  ;;  %v1856_v54 = vmul.f32 %v5983_v31, %v7257_v61  ;;  %v12656_v27 = vld [vmem:[#allocation73_spill] sm:$0xff]  ;;  %v12657_v35 = vld [vmem:[#allocation74_spill] sm:$0xff] }
 0x25b   : >> { %v5985_v53 = vpop.eup %5984  ;;  %5998 = vrcp.f32 %v1912_v51  ;;  %v1946_v45 = vadd.f32 %v1942_v8, %v8498_v62  ;;  %v1858_v10 = vadd.f32 %v1850_v2, %v1822_v41  ;;  %v1947_v5 = vadd.f32 %v1943_v58, %v8506_v57  ;;  %v12658_v8 = vld [vmem:[#allocation80_spill] sm:$0xff] }
 0x25c   : >> { %v5987_v4 = vpop.eup %5986  ;;  %v1948_v9 = vadd.f32 %v1944_v56, %v8520_v12  ;;  %6000 = vrcp.f32 %v1945_v55  ;;  %v1862_v46 = vadd.f32 %v1854_v28, %v1826_v39  ;;  %v8684_v43 = vsub.f32 %v8463_v7, %v12655_v32  ;;  %v12659_v28 = vld [vmem:[#allocation75_spill] sm:$0xff] }
 0x25d   : >> { %6002 = vrcp.f32 %v1946_v45  ;;  %v8688_v16 = vsub.f32 %v8467_v15, %v12656_v27  ;;  %v1859_v31 = vadd.f32 %v1851_v29, %v1823_v48  ;;  %v1863_v51 = vadd.f32 %v1855_v14, %v1827_v33 }
 0x25e   : >> { %6004 = vrcp.f32 %v1947_v5  ;;  %v8692_v41 = vsub.f32 %v8470_v34, %v12657_v35  ;;  %v1860_v2 = vadd.f32 %v1852_v49, %v1824_v44  ;;  %v1883_v39 = vmul.f32 %v12658_v8, %v7324_v23 }
 0x25f   : >> { %6006 = vrcp.f32 %v1948_v9  ;;  %v8698_v58 = vsub.f32 %v8477_v11, %v12659_v28  ;;  %v1864_v55 = vadd.f32 %v1856_v54, %v1828_v37  ;;  %v1885_v38 = vmul.f32 %v5985_v53, %v8609_v18  ;;  %v12660_v54 = vld [vmem:[#allocation76_spill] sm:$0xff] }
 0x260   : >> { %v5989_v56 = vpop.eup %5988  ;;  %v1977_v48 = vmul.f32 %v8684_v43, %v8684_v43  ;;  %v1978_v33 = vmul.f32 %v8688_v16, %v8688_v16  ;;  %v1884_v44 = vmul.f32 %v8594_v47, %v7324_v23  ;;  %v1889_v29 = vmul.f32 %v5985_v53, %v7324_v23 }
 0x261   : >> { %v1979_v14 = vmul.f32 %v8692_v41, %v8692_v41  ;;  %v1980_v49 = vmul.f32 %v8698_v58, %v8698_v58  ;;  %v1886_v18 = vmul.f32 %v5987_v4, %v8614_v25  ;;  %v1917_v45 = vmul.f32 %v8620_v36, %v12660_v54 }
 0x262   : >> { %v5991_v37 = vpop.eup %5990  ;;  %v1981_v5 = vadd.f32 %v1977_v48, %v8494_v6  ;;  %v1982_v9 = vadd.f32 %v1978_v33, %v8498_v62  ;;  %v1890_v47 = vmul.f32 %v5987_v4, %v7324_v23  ;;  %v1918_v53 = vmul.f32 %v8624_v50, %v12660_v54 }
 0x263   : >> { %v1983_v8 = vadd.f32 %v1979_v14, %v8506_v57  ;;  %v1984_v28 = vadd.f32 %v1980_v49, %v8520_v12  ;;  %v1893_v35 = vadd.f32 %v1885_v38, %v1857_v52  ;;  %v1919_v25 = vmul.f32 %v8628_v63, %v12660_v54  ;;  %v12661_v38 = vld [vmem:[#allocation77_spill] sm:$0xff] }
 0x264   : >> { %v1920_v36 = vmul.f32 %v8632_v24, %v12660_v54  ;;  %6008 = vrcp.f32 %v1981_v5  ;;  %v1887_v48 = vmul.f32 %v5989_v56, %v1883_v39  ;;  %v1891_v62 = vmul.f32 %v5989_v56, %v7324_v23 }
 0x265   : >> { %v5993_v6 = vpop.eup %5992  ;;  %v1897_v4 = vadd.f32 %v1889_v29, %v1861_v13  ;;  %6010 = vrcp.f32 %v1982_v9  ;;  %v1888_v50 = vmul.f32 %v5991_v37, %v1884_v44  ;;  %v1892_v57 = vmul.f32 %v5991_v37, %v7324_v23 }
 0x266   : >> { %v5995_v33 = vpop.eup %5994  ;;  %v1894_v14 = vadd.f32 %v1886_v18, %v1858_v10  ;;  %6012 = vrcp.f32 %v1983_v8  ;;  %v1898_v52 = vadd.f32 %v1890_v47, %v1862_v46  ;;  %v1953_v63 = vmul.f32 %v8638_v22, %v12661_v38 }
 0x267   : >> { %v5997_v12 = vpop.eup %5996  ;;  %v1954_v24 = vmul.f32 %v8650_v17, %v12661_v38  ;;  %6014 = vrcp.f32 %v1984_v28  ;;  %v1921_v49 = vmul.f32 %v5993_v6, %v1917_v45  ;;  %v1925_v13 = vmul.f32 %v5993_v6, %v12660_v54 }
 0x268   : >> { %v5999_v39 = vpop.eup %5998  ;;  %v1955_v56 = vmul.f32 %v8656_v40, %v12661_v38  ;;  %v1956_v10 = vmul.f32 %v8660_v21, %v12661_v38  ;;  %v1895_v29 = vadd.f32 %v1887_v48, %v1859_v31  ;;  %v1899_v46 = vadd.f32 %v1891_v62, %v1863_v51  ;;  %v12662_v40 = vld [vmem:[#allocation78_spill] sm:$0xff] }
 0x269   : >> { %v6001_v44 = vpop.eup %6000  ;;  %v1922_v37 = vmul.f32 %v5995_v33, %v1918_v53  ;;  %v1926_v22 = vmul.f32 %v5995_v33, %v12660_v54  ;;  %v1896_v5 = vadd.f32 %v1888_v50, %v1860_v2  ;;  %v1900_v17 = vadd.f32 %v1892_v57, %v1864_v55 }
 0x26a   : >> { %v6003_v18 = vpop.eup %6002  ;;  %v1923_v28 = vmul.f32 %v5997_v12, %v1919_v25  ;;  %v1927_v45 = vmul.f32 %v5997_v12, %v12660_v54  ;;  %v1924_v47 = vmul.f32 %v5999_v39, %v1920_v36  ;;  %v1928_v8 = vmul.f32 %v5999_v39, %v12660_v54 }
 0x26b   : >> { %v6005_v9 = vpop.eup %6004  ;;  %v1989_v6 = vmul.f32 %v8684_v43, %v12662_v40  ;;  %v1990_v21 = vmul.f32 %v8688_v16, %v12662_v40  ;;  %v1929_v51 = vadd.f32 %v1921_v49, %v1893_v35  ;;  %v1933_v53 = vadd.f32 %v1925_v13, %v1897_v4 }
 0x26c   : >> { %v6007_v31 = vpop.eup %6006  ;;  %v1957_v48 = vmul.f32 %v6001_v44, %v1953_v63  ;;  %v1961_v2 = vmul.f32 %v6001_v44, %v12661_v38  ;;  %v1930_v55 = vadd.f32 %v1922_v37, %v1894_v14  ;;  %v1934_v25 = vadd.f32 %v1926_v22, %v1898_v52 }
 0x26d   : >> { %v1958_v62 = vmul.f32 %v6003_v18, %v1954_v24  ;;  %v1962_v33 = vmul.f32 %v6003_v18, %v12661_v38  ;;  %v1931_v36 = vadd.f32 %v1923_v28, %v1895_v29  ;;  %v1935_v50 = vadd.f32 %v1927_v45, %v1899_v46 }
 0x26e   : >> { %v1959_v57 = vmul.f32 %v6005_v9, %v1955_v56  ;;  %v1963_v12 = vmul.f32 %v6005_v9, %v12661_v38  ;;  %v1932_v43 = vadd.f32 %v1924_v47, %v1896_v5  ;;  %v1936_v39 = vadd.f32 %v1928_v8, %v1900_v17 }
 0x26f   : >> { %v1960_v54 = vmul.f32 %v6007_v31, %v1956_v10  ;;  %v1964_v16 = vmul.f32 %v6007_v31, %v12661_v38  ;;  %v1965_v35 = vadd.f32 %v1957_v48, %v1929_v51  ;;  %v1969_v4 = vadd.f32 %v1961_v2, %v1933_v53  ;;  %v12663_v48 = vld [vmem:[#allocation82_spill] sm:$0xff] }
 0x270   : >> { %v1991_v63 = vmul.f32 %v8692_v41, %v12662_v40  ;;  %v1966_v52 = vadd.f32 %v1958_v62, %v1930_v55  ;;  %v1970_v24 = vadd.f32 %v1962_v33, %v1934_v25  ;;  %v1992_v49 = vmul.f32 %v8698_v58, %v12662_v40  ;;  %v12664_v25 = vld [vmem:[#allocation85_spill] sm:$0xff] }
 0x271   : >> { %v6009_v14 = vpop.eup %6008  ;;  %v1967_v56 = vadd.f32 %v1959_v57, %v1931_v36  ;;  %v1971_v44 = vadd.f32 %v1963_v12, %v1935_v50  ;;  %v1968_v37 = vadd.f32 %v1960_v54, %v1932_v43  ;;  %v1972_v22 = vadd.f32 %v1964_v16, %v1936_v39  ;;  %v12665_v36 = vld [vmem:[#allocation84_spill] sm:$0xff]  ;;  %v12666_v39 = vld [vmem:[#allocation83_spill] sm:$0xff] }
 0x272   : >> { %v6011_v13 = vpop.eup %6010  ;;  %v1993_v29 = vmul.f32 %v6009_v14, %v1989_v6  ;;  %v1997_v46 = vmul.f32 %v6009_v14, %v12662_v40 }
 0x273   : >> { %v6013_v10 = vpop.eup %6012  ;;  %v1994_v18 = vmul.f32 %v6011_v13, %v1990_v21  ;;  %v1998_v5 = vmul.f32 %v6011_v13, %v12662_v40 }
 0x274   : >> { %v6015_v17 = vpop.eup %6014  ;;  %v1995_v41 = vmul.f32 %v6013_v10, %v1991_v63  ;;  %v1999_v28 = vmul.f32 %v6013_v10, %v12662_v40  ;;  %v2001_v45 = vadd.f32 %v1993_v29, %v1965_v35  ;;  %v2005_v9 = vadd.f32 %v1997_v46, %v1969_v4 }
 0x275   : >> { %v1996_v47 = vmul.f32 %v6015_v17, %v1992_v49  ;;  %v2000_v58 = vmul.f32 %v6015_v17, %v12662_v40  ;;  %v2002_v8 = vadd.f32 %v1994_v18, %v1966_v52  ;;  %v2006_v31 = vadd.f32 %v1998_v5, %v1970_v24 }
 0x276   : >> { %v2003_v6 = vadd.f32 %v1995_v41, %v1967_v56  ;;  %v2007_v51 = vadd.f32 %v1999_v28, %v1971_v44  ;;  %v2009_v53 = vadd.f32 1.0, %v2001_v45  ;;  %v2013_v54 = vmul.f32 %v2005_v9, %v12663_v48 }
 0x277   : >> { %v2004_v2 = vadd.f32 %v1996_v47, %v1968_v37  ;;  %v2008_v21 = vadd.f32 %v2000_v58, %v1972_v22  ;;  %v2010_v55 = vadd.f32 1.0, %v2002_v8  ;;  %v2014_v62 = vmul.f32 %v2006_v31, %v12664_v25 }
 0x278   : >> { %v2011_v33 = vadd.f32 1.0, %v2003_v6  ;;  %v2015_v50 = vmul.f32 %v2007_v51, %v12665_v36  ;;  %v2017_v57 = vsub.f32 0.0, %v2013_v54  ;;  %v2021_v12 = vmul.f32 %v2009_v53, %v2009_v53 }
 0x279   : >> { %v2012_v43 = vadd.f32 1.0, %v2004_v2  ;;  %v2016_v16 = vmul.f32 %v2008_v21, %v12666_v39  ;;  %v2018_v35 = vsub.f32 0.0, %v2014_v62  ;;  %v2022_v4 = vmul.f32 %v2010_v55, %v2010_v55 }
 0x27a   : >> { %v2019_v63 = vsub.f32 0.0, %v2015_v50  ;;  %v2023_v14 = vmul.f32 %v2011_v33, %v2011_v33  ;;  %v2025_v52 = vmul.f32 %v2017_v57, %v2017_v57 }
 0x27b   : >> { %v2020_v24 = vsub.f32 0.0, %v2016_v16  ;;  %v2024_v49 = vmul.f32 %v2012_v43, %v2012_v43  ;;  %v2026_v13 = vmul.f32 %v2018_v35, %v2018_v35 }
 0x27c   : >> { %v2027_v56 = vmul.f32 %v2019_v63, %v2019_v63  ;;  %v2029_v44 = vadd.f32 %v2025_v52, %v2021_v12 }
 0x27d   : >> { %v2028_v29 = vmul.f32 %v2020_v24, %v2020_v24  ;;  %v2030_v46 = vadd.f32 %v2026_v13, %v2022_v4 }
 0x27e   : >> { %v2031_v10 = vadd.f32 %v2027_v56, %v2023_v14  ;;  %6016 = vrcp.f32 %v2029_v44 }
 0x27f   : >> { %v2032_v37 = vadd.f32 %v2028_v29, %v2024_v49  ;;  %6018 = vrcp.f32 %v2030_v46  ;;  %v12673_v46 = vld [vmem:[#allocation42_spill] sm:$0xff] }
 0x280   : >> { %6020 = vrcp.f32 %v2031_v10 }
 0x281   : >> { %6022 = vrcp.f32 %v2032_v37 }
 0x28b   : >> { %v6017_v22 = vpop.eup %6016 }
 0x28c   : >> { %v6019_v18 = vpop.eup %6018  ;;  %v2037_v5 = vmul.f32 %v6017_v22, %v2009_v53  ;;  %v2041_v17 = vmul.f32 %v6017_v22, %v2017_v57 }
 0x28d   : >> { %v6021_v41 = vpop.eup %6020  ;;  %v2038_v28 = vmul.f32 %v6019_v18, %v2010_v55  ;;  %v2042_v45 = vmul.f32 %v6019_v18, %v2018_v35 }
 0x28e   : >> { %v6023_v9 = vpop.eup %6022  ;;  %v2039_v47 = vmul.f32 %v6021_v41, %v2011_v33  ;;  %v2043_v58 = vmul.f32 %v6021_v41, %v2019_v63  ;;  %v2045_v8 = vsub.f32 0.0, %v2041_v17  ;;  %v2049_v31 = vadd.f32 %v2037_v5, %v8463_v7  ;;  %v12668_v63 = vld [vmem:[#allocation40_spill] sm:$0xff]  ;;  %v12675_v17 = vld [vmem:[#allocation43_spill] sm:$0xff] }
 0x28f   : >> { %v2040_v6 = vmul.f32 %v6023_v9, %v2012_v43  ;;  %v2044_v51 = vmul.f32 %v6023_v9, %v2020_v24  ;;  %v2046_v54 = vsub.f32 0.0, %v2042_v45  ;;  %v2050_v2 = vadd.f32 %v2038_v28, %v8467_v15  ;;  %v12667_v15 = vld [vmem:[#allocation39_spill] sm:$0xff]  ;;  %v12676_v28 = vld [vmem:[#allocation44_spill] sm:$0xff] }
 0x290   : >> { %v2047_v21 = vsub.f32 0.0, %v2043_v58  ;;  %v2051_v62 = vadd.f32 %v2039_v47, %v8470_v34  ;;  %v8763_v50 = vmul.f32 0.5, %v2049_v31  ;;  %v2057_v53 = vadd.f32 %v2045_v8, %v12663_v48  ;;  %v12677_v47 = vld [vmem:[#allocation45_spill] sm:$0xff]  ;;  %v12678_v8 = vld [vmem:[#allocation46_spill] sm:$0xff] }
 0x291   : >> { %v2048_v55 = vsub.f32 0.0, %v2044_v51  ;;  %v2052_v57 = vadd.f32 %v2040_v6, %v8477_v11  ;;  %v8767_v33 = vmul.f32 0.5, %v2050_v2  ;;  %v2058_v12 = vadd.f32 %v2046_v54, %v12664_v25  ;;  %v12670_v25 = vld [vmem:[#allocation41_spill] sm:$0xff] }
 0x292   : >> { %v8770_v7 = vmul.f32 0.5, %v2051_v62  ;;  %v2059_v43 = vadd.f32 %v2047_v21, %v12665_v36  ;;  %v2061_v16 = vmul.f32 0.5, %v2057_v53  ;;  %v8775_v35 = vsub.f32 %v8763_v50, %v12667_v15 }
 0x293   : >> { %v8777_v34 = vmul.f32 0.5, %v2052_v57  ;;  %v2060_v48 = vadd.f32 %v2048_v55, %v12666_v39  ;;  %v2062_v4 = vmul.f32 0.5, %v2058_v12  ;;  %v2074_v11 = vsub.f32 %v8767_v33, %v12668_v63 }
 0x294   : >> { %v2063_v14 = vmul.f32 0.5, %v2059_v43  ;;  %v8782_v52 = vmin.f32 %v2061_v16, -1e-09  ;;  %v2075_v24 = vsub.f32 %v8770_v7, %v12670_v25  ;;  %v2077_v13 = vmul.f32 %v8775_v35, %v8775_v35  ;;  %v12679_v43 = vld [vmem:[#allocation47_spill] sm:$0xff]  ;;  %v12690_v25 = vld [vmem:[#allocation60_spill] sm:$0xff] }
 0x295   : >> { %v2064_v36 = vmul.f32 0.5, %v2060_v48  ;;  %v8786_v49 = vmin.f32 %v2062_v4, -1e-09  ;;  %v2078_v44 = vmul.f32 %v2074_v11, %v2074_v11  ;;  %v2076_v10 = vsub.f32 %v8777_v34, %v12673_v46  ;;  %v12680_v48 = vld [vmem:[#allocation48_spill] sm:$0xff] }
 0x296   : >> { %12669 = vst [vmem:[#allocation79_spill] sm:$0xff] %v8782_v52  ;;  %v8790_v56 = vmin.f32 %v2063_v14, -1e-09  ;;  %v8794_v39 = vmul.f32 %v8782_v52, %v8782_v52  ;;  %v2079_v18 = vmul.f32 %v2075_v24, %v2075_v24  ;;  %v2101_v41 = vsub.f32 %v8763_v50, %v12675_v17  ;;  %v12681_v14 = vld [vmem:[#allocation49_spill] sm:$0xff] }
 0x297   : >> { %12671 = vst [vmem:[#allocation81_spill] sm:$0xff] %v8786_v49  ;;  %v8798_v29 = vmul.f32 %v8786_v49, %v8786_v49  ;;  %v8802_v37 = vmin.f32 %v2064_v36, -1e-09  ;;  %v2102_v45 = vsub.f32 %v8767_v33, %v12676_v28  ;;  %v2103_v58 = vsub.f32 %v8770_v7, %v12677_v47  ;;  %v12687_v47 = vld [vmem:[#allocation54_spill] sm:$0xff] }
 0x298   : >> { %12672 = vst [vmem:[#allocation80_spill] sm:$0xff] %v8790_v56  ;;  %v8806_v22 = vmul.f32 %v8790_v56, %v8790_v56  ;;  %v2081_v5 = vadd.f32 %v2077_v13, %v8794_v39  ;;  %v2104_v31 = vsub.f32 %v8777_v34, %v12678_v8  ;;  %v2080_v6 = vmul.f32 %v2076_v10, %v2076_v10  ;;  %v12685_v8 = vld [vmem:[#allocation53_spill] sm:$0xff] }
 0x299   : >> { %12674 = vst [vmem:[#allocation82_spill] sm:$0xff] %v8802_v37  ;;  %v2082_v9 = vadd.f32 %v2078_v44, %v8798_v29  ;;  %v2105_v51 = vmul.f32 %v2101_v41, %v2101_v41  ;;  %v2106_v54 = vmul.f32 %v2102_v45, %v2102_v45  ;;  %v8820_v2 = vmul.f32 %v8802_v37, %v8802_v37 }
 0x29a   : >> { %v2083_v21 = vadd.f32 %v2079_v18, %v8806_v22  ;;  %v2107_v62 = vmul.f32 %v2103_v58, %v2103_v58  ;;  %v2108_v53 = vmul.f32 %v2104_v31, %v2104_v31  ;;  %6024 = vrcp.f32 %v2081_v5  ;;  %v12682_v18 = vld [vmem:[#allocation50_spill] sm:$0xff] }
 0x29b   : >> { %v2109_v55 = vadd.f32 %v2105_v51, %v8794_v39  ;;  %6026 = vrcp.f32 %v2082_v9  ;;  %v2110_v57 = vadd.f32 %v2106_v54, %v8798_v29  ;;  %v2137_v16 = vsub.f32 %v8763_v50, %v12679_v43 }
 0x29c   : >> { %v2111_v12 = vadd.f32 %v2107_v62, %v8806_v22  ;;  %v2138_v4 = vsub.f32 %v8767_v33, %v12680_v48  ;;  %v2139_v36 = vsub.f32 %v8770_v7, %v12681_v14  ;;  %v2084_v13 = vadd.f32 %v2080_v6, %v8820_v2  ;;  %v12683_v62 = vld [vmem:[#allocation51_spill] sm:$0xff] }
 0x29d   : >> { %6028 = vrcp.f32 %v2083_v21  ;;  %v2112_v44 = vadd.f32 %v2108_v53, %v8820_v2  ;;  %v2140_v5 = vsub.f32 %v8777_v34, %v12682_v18  ;;  %v2141_v9 = vmul.f32 %v2137_v16, %v2137_v16  ;;  %v12684_v53 = vld [vmem:[#allocation52_spill] sm:$0xff] }
 0x29e   : >> { %6030 = vrcp.f32 %v2109_v55  ;;  %v2142_v51 = vmul.f32 %v2138_v4, %v2138_v4  ;;  %v2143_v54 = vmul.f32 %v2139_v36, %v2139_v36  ;;  %v2173_v43 = vsub.f32 %v8763_v50, %v12683_v62  ;;  %v12686_v62 = vld [vmem:[#allocation56_spill] sm:$0xff] }
 0x29f   : >> { %6032 = vrcp.f32 %v2110_v57  ;;  %v2144_v48 = vmul.f32 %v2140_v5, %v2140_v5  ;;  %v2145_v14 = vadd.f32 %v2141_v9, %v8794_v39  ;;  %v2174_v55 = vsub.f32 %v8767_v33, %v12684_v53 }
 0x2a0   : >> { %6034 = vrcp.f32 %v2111_v12  ;;  %v2146_v6 = vadd.f32 %v2142_v51, %v8798_v29  ;;  %v2147_v21 = vadd.f32 %v2143_v54, %v8806_v22  ;;  %v2177_v18 = vmul.f32 %v2173_v43, %v2173_v43 }
 0x2a1   : >> { %6036 = vrcp.f32 %v2084_v13  ;;  %v2148_v57 = vadd.f32 %v2144_v48, %v8820_v2  ;;  %v2175_v12 = vsub.f32 %v8770_v7, %v12685_v8  ;;  %v2176_v9 = vsub.f32 %v8777_v34, %v12686_v62 }
 0x2a2   : >> { %6038 = vrcp.f32 %v2112_v44  ;;  %v2089_v13 = vmul.f32 %v8775_v35, %v12687_v47  ;;  %v2090_v51 = vmul.f32 %v2074_v11, %v12687_v47  ;;  %v2091_v44 = vmul.f32 %v2075_v24, %v12687_v47 }
 0x2a3   : >> { %6040 = vrcp.f32 %v2145_v14  ;;  %v2092_v14 = vmul.f32 %v2076_v10, %v12687_v47  ;;  %v2117_v54 = vmul.f32 %v2101_v41, %v12523_v0  ;;  %v2178_v48 = vmul.f32 %v2174_v55, %v2174_v55 }
 0x2a4   : >> { %6042 = vrcp.f32 %v2146_v6  ;;  %v2118_v53 = vmul.f32 %v2102_v45, %v12523_v0  ;;  %v2119_v8 = vmul.f32 %v2103_v58, %v12523_v0  ;;  %v2120_v62 = vmul.f32 %v2104_v31, %v12523_v0 }
 0x2a5   : >> { %6044 = vrcp.f32 %v2147_v21  ;;  %v2181_v28 = vadd.f32 %v2177_v18, %v8794_v39  ;;  %v2153_v11 = vmul.f32 %v2137_v16, %v12524_v20  ;;  %v2179_v21 = vmul.f32 %v2175_v12, %v2175_v12 }
 0x2a6   : >> { %6046 = vrcp.f32 %v2148_v57  ;;  %v2180_v24 = vmul.f32 %v2176_v9, %v2176_v9  ;;  %v2154_v10 = vmul.f32 %v2138_v4, %v12524_v20  ;;  %v2155_v41 = vmul.f32 %v2139_v36, %v12524_v20  ;;  %v12689_v57 = vld [vmem:[#allocation59_spill] sm:$0xff] }
 0x2a7   : >> { %v6025_v6 = vpop.eup %6024  ;;  %v8862_v17 = vmul.f32 %v2140_v5, %v12524_v20  ;;  %v8865_v45 = vmul.f32 %v2173_v43, %v7257_v61  ;;  %v2182_v31 = vadd.f32 %v2178_v48, %v8798_v29  ;;  %v8869_v18 = vmul.f32 %v2174_v55, %v7257_v61 }
 0x2a8   : >> { %v6027_v35 = vpop.eup %6026  ;;  %v8872_v16 = vmul.f32 %v2175_v12, %v7257_v61  ;;  %v2209_v4 = vsub.f32 %v8763_v50, %v12689_v57  ;;  %v2093_v36 = vmul.f32 %v6025_v6, %v2089_v13  ;;  %v2097_v5 = vmul.f32 %v6025_v6, %v12687_v47  ;;  %v12691_v13 = vld [vmem:[#allocation61_spill] sm:$0xff] }
 0x2a9   : >> { %6048 = vrcp.f32 %v2181_v28  ;;  %v2210_v43 = vsub.f32 %v8767_v33, %v12690_v25  ;;  %v2094_v15 = vmul.f32 %v6027_v35, %v2090_v51  ;;  %v2098_v48 = vmul.f32 %v6027_v35, %v12687_v47 }
 0x2aa   : >> { %v6029_v58 = vpop.eup %6028  ;;  %12688 = vst [vmem:[#allocation85_spill] sm:$0xff] %v8872_v16  ;;  %v2183_v55 = vadd.f32 %v2179_v21, %v8806_v22  ;;  %v2184_v12 = vadd.f32 %v2180_v24, %v8820_v2  ;;  %v8885_v6 = vsub.f32 %v8770_v7, %v12691_v13  ;;  %6050 = vrcp.f32 %v2182_v31 }
 0x2ab   : >> { %v6031_v46 = vpop.eup %6030  ;;  %v2095_v56 = vmul.f32 %v6029_v58, %v2091_v44  ;;  %v2099_v57 = vmul.f32 %v6029_v58, %v12687_v47  ;;  %v8889_v51 = vmul.f32 %v2176_v9, %v7257_v61  ;;  %v2213_v35 = vmul.f32 %v2209_v4, %v2209_v4  ;;  %v12694_v44 = vld [vmem:[#allocation62_spill] sm:$0xff] }
 0x2ac   : >> { %v6033_v63 = vpop.eup %6032  ;;  %v2121_v49 = vmul.f32 %v6031_v46, %v2117_v54  ;;  %12692 = vst [vmem:[#allocation84_spill] sm:$0xff] %v8885_v6  ;;  %v2125_v25 = vmul.f32 %v6031_v46, %v12523_v0  ;;  %v8894_v58 = vsub.f32 %v8777_v34, %v12694_v44  ;;  %v2214_v54 = vmul.f32 %v2210_v43, %v2210_v43 }
 0x2ad   : >> { %v6035_v37 = vpop.eup %6034  ;;  %12693 = vst [vmem:[#allocation83_spill] sm:$0xff] %v8889_v51  ;;  %v2122_v52 = vmul.f32 %v6033_v63, %v2118_v53  ;;  %v2126_v24 = vmul.f32 %v6033_v63, %v12523_v0  ;;  %6052 = vrcp.f32 %v2183_v55  ;;  %v2215_v53 = vmul.f32 %v8885_v6, %v8885_v6 }
 0x2ae   : >> { %v6037_v28 = vpop.eup %6036  ;;  %v2123_v38 = vmul.f32 %v6035_v37, %v2119_v8  ;;  %v2127_v27 = vmul.f32 %v6035_v37, %v12523_v0  ;;  %v2129_v31 = vadd.f32 %v2121_v49, %v2093_v36  ;;  %6054 = vrcp.f32 %v2184_v12 }
 0x2af   : >> { %v6039_v21 = vpop.eup %6038  ;;  %v2096_v13 = vmul.f32 %v6037_v28, %v2092_v14  ;;  %v2100_v9 = vmul.f32 %v6037_v28, %v12687_v47  ;;  %v2133_v51 = vadd.f32 %v2125_v25, %v2097_v5  ;;  %v2217_v16 = vadd.f32 %v2213_v35, %v8794_v39 }
 0x2b0   : >> { %v6041_v40 = vpop.eup %6040  ;;  %v2124_v32 = vmul.f32 %v6039_v21, %v2120_v62  ;;  %v2128_v44 = vmul.f32 %v6039_v21, %v12523_v0  ;;  %v2130_v14 = vadd.f32 %v2122_v52, %v2094_v15  ;;  %v2134_v8 = vadd.f32 %v2126_v24, %v2098_v48 }
 0x2b1   : >> { %v6043_v46 = vpop.eup %6042  ;;  %v2216_v37 = vmul.f32 %v8894_v58, %v8894_v58  ;;  %v2218_v55 = vadd.f32 %v2214_v54, %v8798_v29  ;;  %v2131_v28 = vadd.f32 %v2123_v38, %v2095_v56  ;;  %v2135_v49 = vadd.f32 %v2127_v27, %v2099_v57 }
 0x2b2   : >> { %v6045_v63 = vpop.eup %6044  ;;  %v2157_v36 = vmul.f32 %v6041_v40, %v2153_v11  ;;  %v2161_v12 = vmul.f32 %v6041_v40, %v12524_v20  ;;  %v2158_v6 = vmul.f32 %v6043_v46, %v2154_v10  ;;  %v2162_v21 = vmul.f32 %v6043_v46, %v12524_v20 }
 0x2b3   : >> { %v6047_v47 = vpop.eup %6046  ;;  %v2159_v62 = vmul.f32 %v6045_v63, %v2155_v41  ;;  %v2163_v25 = vmul.f32 %v6045_v63, %v12524_v20  ;;  %v2132_v5 = vadd.f32 %v2124_v32, %v2096_v13  ;;  %v2136_v15 = vadd.f32 %v2128_v44, %v2100_v9 }
 0x2b4   : >> { %6056 = vrcp.f32 %v2217_v16  ;;  %v8909_v52 = vmul.f32 %v2209_v4, %v7324_v23  ;;  %v2219_v48 = vadd.f32 %v2215_v53, %v8806_v22  ;;  %v2220_v27 = vadd.f32 %v2216_v37, %v8820_v2 }
 0x2b5   : >> { %6058 = vrcp.f32 %v2218_v55  ;;  %v8914_v38 = vmul.f32 %v2210_v43, %v7324_v23  ;;  %v2160_v56 = vmul.f32 %v6047_v47, %v8862_v17  ;;  %v2164_v11 = vmul.f32 %v6047_v47, %v12524_v20 }
 0x2b6   : >> { %v6049_v40 = vpop.eup %6048  ;;  %v2165_v10 = vadd.f32 %v2157_v36, %v2129_v31  ;;  %v2169_v32 = vadd.f32 %v2161_v12, %v2133_v51  ;;  %v2166_v41 = vadd.f32 %v2158_v6, %v2130_v14  ;;  %v2167_v16 = vadd.f32 %v2159_v62, %v2131_v28 }
 0x2b7   : >> { %v2170_v57 = vadd.f32 %v2162_v21, %v2134_v8  ;;  %v2171_v4 = vadd.f32 %v2163_v25, %v2135_v49  ;;  %v8920_v13 = vsub.f32 %v8763_v50, %v12529_v42  ;;  %v8924_v35 = vsub.f32 %v8767_v33, %v12530_v26  ;;  %v6051_v47 = vpop.eup %6050  ;;  %v12695_v21 = vld [vmem:[#allocation85_spill] sm:$0xff] }
 0x2b8   : >> { %v8928_v43 = vsub.f32 %v8770_v7, %v12531_v30  ;;  %v8932_v17 = vsub.f32 %v8777_v34, %v12532_v1  ;;  %v2193_v6 = vmul.f32 %v6049_v40, %v8865_v45  ;;  %v2197_v51 = vmul.f32 %v6049_v40, %v7257_v61 }
 0x2b9   : >> { %6060 = vrcp.f32 %v2219_v48  ;;  %v8938_v24 = vsub.f32 %v8763_v50, %v12569_v60  ;;  %v2249_v44 = vmul.f32 %v8920_v13, %v8920_v13  ;;  %v2250_v54 = vmul.f32 %v8924_v35, %v8924_v35 }
 0x2ba   : >> { %v2251_v46 = vmul.f32 %v8928_v43, %v8928_v43  ;;  %v2252_v9 = vmul.f32 %v8932_v17, %v8932_v17  ;;  %v6053_v45 = vpop.eup %6052  ;;  %v2168_v31 = vadd.f32 %v2160_v56, %v2132_v5  ;;  %v2172_v53 = vadd.f32 %v2164_v11, %v2136_v15 }
 0x2bb   : >> { %6062 = vrcp.f32 %v2220_v27  ;;  %v8950_v63 = vsub.f32 %v8767_v33, %v12570_v59  ;;  %v6055_v14 = vpop.eup %6054  ;;  %v2253_v8 = vadd.f32 %v2249_v44, %v8794_v39  ;;  %v2254_v37 = vadd.f32 %v2250_v54, %v8798_v29  ;;  %v12696_v44 = vld [vmem:[#allocation83_spill] sm:$0xff] }
 0x2bc   : >> { %v8956_v55 = vsub.f32 %v8770_v7, %v12571_v3  ;;  %v8960_v28 = vsub.f32 %v8777_v34, %v12572_v19  ;;  %v2194_v49 = vmul.f32 %v6051_v47, %v8869_v18  ;;  %v2198_v36 = vmul.f32 %v6051_v47, %v7257_v61 }
 0x2bd   : >> { %v2255_v12 = vadd.f32 %v2251_v46, %v8806_v22  ;;  %v2256_v62 = vadd.f32 %v2252_v9, %v8820_v2  ;;  %v2195_v25 = vmul.f32 %v6053_v45, %v12695_v21  ;;  %v2199_v5 = vmul.f32 %v6053_v45, %v7257_v61 }
 0x2be   : >> { %6064 = vrcp.f32 %v2253_v8  ;;  %v2285_v15 = vmul.f32 %v8938_v24, %v8938_v24  ;;  %v2201_v48 = vadd.f32 %v2193_v6, %v2165_v10  ;;  %v2205_v27 = vadd.f32 %v2197_v51, %v2169_v32  ;;  %v12697_v8 = vld [vmem:[#allocation72_spill] sm:$0xff] }
 0x2bf   : >> { %6066 = vrcp.f32 %v2254_v37  ;;  %v2286_v18 = vmul.f32 %v8950_v63, %v8950_v63  ;;  %v2287_v40 = vmul.f32 %v8956_v55, %v8956_v55  ;;  %v2288_v56 = vmul.f32 %v8960_v28, %v8960_v28 }
 0x2c0   : >> { %6068 = vrcp.f32 %v2255_v12  ;;  %v2289_v11 = vadd.f32 %v2285_v15, %v8794_v39  ;;  %v2196_v54 = vmul.f32 %v6055_v14, %v12696_v44  ;;  %v2200_v46 = vmul.f32 %v6055_v14, %v7257_v61  ;;  %v12698_v12 = vld [vmem:[#allocation73_spill] sm:$0xff]  ;;  %v12699_v15 = vld [vmem:[#allocation74_spill] sm:$0xff] }
 0x2c1   : >> { %v6057_v47 = vpop.eup %6056  ;;  %6070 = vrcp.f32 %v2256_v62  ;;  %v2290_v10 = vadd.f32 %v2286_v18, %v8798_v29  ;;  %v2202_v6 = vadd.f32 %v2194_v49, %v2166_v41  ;;  %v2291_v51 = vadd.f32 %v2287_v40, %v8806_v22  ;;  %v12700_v18 = vld [vmem:[#allocation84_spill] sm:$0xff] }
 0x2c2   : >> { %v6059_v32 = vpop.eup %6058  ;;  %v2292_v9 = vadd.f32 %v2288_v56, %v8820_v2  ;;  %6072 = vrcp.f32 %v2289_v11  ;;  %v2206_v45 = vadd.f32 %v2198_v36, %v2170_v57  ;;  %v8984_v37 = vsub.f32 %v8763_v50, %v12697_v8  ;;  %v12701_v36 = vld [vmem:[#allocation75_spill] sm:$0xff] }
 0x2c3   : >> { %6074 = vrcp.f32 %v2290_v10  ;;  %v8988_v21 = vsub.f32 %v8767_v33, %v12698_v12  ;;  %v2203_v14 = vadd.f32 %v2195_v25, %v2167_v16  ;;  %v2207_v62 = vadd.f32 %v2199_v5, %v2171_v4 }
 0x2c4   : >> { %6076 = vrcp.f32 %v2291_v51  ;;  %v8992_v41 = vsub.f32 %v8770_v7, %v12699_v15  ;;  %v2204_v49 = vadd.f32 %v2196_v54, %v2168_v31  ;;  %v2227_v57 = vmul.f32 %v12700_v18, %v7324_v23 }
 0x2c5   : >> { %6078 = vrcp.f32 %v2292_v9  ;;  %v8998_v40 = vsub.f32 %v8777_v34, %v12701_v36  ;;  %v2208_v11 = vadd.f32 %v2200_v46, %v2172_v53  ;;  %v2229_v44 = vmul.f32 %v6057_v47, %v8909_v52  ;;  %v12702_v46 = vld [vmem:[#allocation76_spill] sm:$0xff] }
 0x2c6   : >> { %v6061_v56 = vpop.eup %6060  ;;  %v2321_v16 = vmul.f32 %v8984_v37, %v8984_v37  ;;  %v2322_v4 = vmul.f32 %v8988_v21, %v8988_v21  ;;  %v2228_v31 = vmul.f32 %v8894_v58, %v7324_v23  ;;  %v2233_v25 = vmul.f32 %v6057_v47, %v7324_v23 }
 0x2c7   : >> { %v2323_v5 = vmul.f32 %v8992_v41, %v8992_v41  ;;  %v2324_v54 = vmul.f32 %v8998_v40, %v8998_v40  ;;  %v2230_v52 = vmul.f32 %v6059_v32, %v8914_v38  ;;  %v2261_v10 = vmul.f32 %v8920_v13, %v12702_v46 }
 0x2c8   : >> { %v6063_v53 = vpop.eup %6062  ;;  %v2325_v51 = vadd.f32 %v2321_v16, %v8794_v39  ;;  %v2326_v9 = vadd.f32 %v2322_v4, %v8798_v29  ;;  %v2234_v58 = vmul.f32 %v6059_v32, %v7324_v23  ;;  %v2262_v47 = vmul.f32 %v8924_v35, %v12702_v46 }
 0x2c9   : >> { %v2327_v18 = vadd.f32 %v2323_v5, %v8806_v22  ;;  %v2328_v36 = vadd.f32 %v2324_v54, %v8820_v2  ;;  %v2237_v15 = vadd.f32 %v2229_v44, %v2201_v48  ;;  %v2263_v38 = vmul.f32 %v8928_v43, %v12702_v46  ;;  %v12703_v44 = vld [vmem:[#allocation77_spill] sm:$0xff] }
 0x2ca   : >> { %v2264_v13 = vmul.f32 %v8932_v17, %v12702_v46  ;;  %6080 = vrcp.f32 %v2325_v51  ;;  %v2231_v16 = vmul.f32 %v6061_v56, %v2227_v57  ;;  %v2235_v29 = vmul.f32 %v6061_v56, %v7324_v23 }
 0x2cb   : >> { %v6065_v39 = vpop.eup %6064  ;;  %v2241_v32 = vadd.f32 %v2233_v25, %v2205_v27  ;;  %6082 = vrcp.f32 %v2326_v9  ;;  %v2232_v35 = vmul.f32 %v6063_v53, %v2228_v31  ;;  %v2236_v22 = vmul.f32 %v6063_v53, %v7324_v23 }
 0x2cc   : >> { %v6067_v4 = vpop.eup %6066  ;;  %v2238_v5 = vadd.f32 %v2230_v52, %v2202_v6  ;;  %6084 = vrcp.f32 %v2327_v18  ;;  %v2242_v48 = vadd.f32 %v2234_v58, %v2206_v45  ;;  %v2297_v43 = vmul.f32 %v8938_v24, %v12703_v44 }
 0x2cd   : >> { %v6069_v2 = vpop.eup %6068  ;;  %v2298_v17 = vmul.f32 %v8950_v63, %v12703_v44  ;;  %6086 = vrcp.f32 %v2328_v36  ;;  %v2265_v54 = vmul.f32 %v6065_v39, %v2261_v10  ;;  %v2269_v27 = vmul.f32 %v6065_v39, %v12702_v46 }
 0x2ce   : >> { %v6071_v57 = vpop.eup %6070  ;;  %v2299_v56 = vmul.f32 %v8956_v55, %v12703_v44  ;;  %v2300_v6 = vmul.f32 %v8960_v28, %v12703_v44  ;;  %v2239_v25 = vadd.f32 %v2231_v16, %v2203_v14  ;;  %v2243_v45 = vadd.f32 %v2235_v29, %v2207_v62  ;;  %v12704_v55 = vld [vmem:[#allocation78_spill] sm:$0xff] }
 0x2cf   : >> { %v6073_v31 = vpop.eup %6072  ;;  %v2266_v53 = vmul.f32 %v6067_v4, %v2262_v47  ;;  %v2270_v24 = vmul.f32 %v6067_v4, %v12702_v46  ;;  %v2240_v51 = vadd.f32 %v2232_v35, %v2204_v49  ;;  %v2244_v63 = vadd.f32 %v2236_v22, %v2208_v11 }
 0x2d0   : >> { %v6075_v52 = vpop.eup %6074  ;;  %v2267_v36 = vmul.f32 %v6069_v2, %v2263_v38  ;;  %v2271_v10 = vmul.f32 %v6069_v2, %v12702_v46  ;;  %v2268_v58 = vmul.f32 %v6071_v57, %v2264_v13  ;;  %v2272_v18 = vmul.f32 %v6071_v57, %v12702_v46 }
 0x2d1   : >> { %v6077_v9 = vpop.eup %6076  ;;  %v2333_v39 = vmul.f32 %v8984_v37, %v12704_v55  ;;  %v2334_v28 = vmul.f32 %v8988_v21, %v12704_v55  ;;  %v2273_v62 = vadd.f32 %v2265_v54, %v2237_v15  ;;  %v2277_v47 = vadd.f32 %v2269_v27, %v2241_v32 }
 0x2d2   : >> { %v6079_v14 = vpop.eup %6078  ;;  %v2301_v16 = vmul.f32 %v6073_v31, %v2297_v43  ;;  %v2305_v49 = vmul.f32 %v6073_v31, %v12703_v44  ;;  %v2274_v11 = vadd.f32 %v2266_v53, %v2238_v5  ;;  %v2278_v38 = vadd.f32 %v2270_v24, %v2242_v48 }
 0x2d3   : >> { %v2302_v29 = vmul.f32 %v6075_v52, %v2298_v17  ;;  %v2306_v4 = vmul.f32 %v6075_v52, %v12703_v44  ;;  %v2275_v13 = vadd.f32 %v2267_v36, %v2239_v25  ;;  %v2279_v35 = vadd.f32 %v2271_v10, %v2243_v45 }
 0x2d4   : >> { %v2303_v22 = vmul.f32 %v6077_v9, %v2299_v56  ;;  %v2307_v2 = vmul.f32 %v6077_v9, %v12703_v44  ;;  %v2276_v37 = vadd.f32 %v2268_v58, %v2240_v51  ;;  %v2280_v57 = vadd.f32 %v2272_v18, %v2244_v63 }
 0x2d5   : >> { %v2304_v46 = vmul.f32 %v6079_v14, %v2300_v6  ;;  %v2308_v21 = vmul.f32 %v6079_v14, %v12703_v44  ;;  %v2309_v15 = vadd.f32 %v2301_v16, %v2273_v62  ;;  %v2313_v32 = vadd.f32 %v2305_v49, %v2277_v47  ;;  %v12705_v16 = vld [vmem:[#allocation79_spill] sm:$0xff] }
 0x2d6   : >> { %v2335_v43 = vmul.f32 %v8992_v41, %v12704_v55  ;;  %v2310_v48 = vadd.f32 %v2302_v29, %v2274_v11  ;;  %v2314_v17 = vadd.f32 %v2306_v4, %v2278_v38  ;;  %v2336_v54 = vmul.f32 %v8998_v40, %v12704_v55  ;;  %v12706_v38 = vld [vmem:[#allocation81_spill] sm:$0xff] }
 0x2d7   : >> { %v6081_v5 = vpop.eup %6080  ;;  %v2311_v56 = vadd.f32 %v2303_v22, %v2275_v13  ;;  %v2315_v31 = vadd.f32 %v2307_v2, %v2279_v35  ;;  %v2312_v53 = vadd.f32 %v2304_v46, %v2276_v37  ;;  %v2316_v24 = vadd.f32 %v2308_v21, %v2280_v57  ;;  %v12707_v13 = vld [vmem:[#allocation80_spill] sm:$0xff]  ;;  %v12708_v57 = vld [vmem:[#allocation82_spill] sm:$0xff] }
 0x2d8   : >> { %v6083_v27 = vpop.eup %6082  ;;  %v2337_v25 = vmul.f32 %v6081_v5, %v2333_v39  ;;  %v2341_v45 = vmul.f32 %v6081_v5, %v12704_v55 }
 0x2d9   : >> { %v6085_v6 = vpop.eup %6084  ;;  %v2338_v52 = vmul.f32 %v6083_v27, %v2334_v28  ;;  %v2342_v51 = vmul.f32 %v6083_v27, %v12704_v55 }
 0x2da   : >> { %v6087_v63 = vpop.eup %6086  ;;  %v2339_v41 = vmul.f32 %v6085_v6, %v2335_v43  ;;  %v2343_v36 = vmul.f32 %v6085_v6, %v12704_v55  ;;  %v2345_v10 = vadd.f32 %v2337_v25, %v2309_v15  ;;  %v2349_v9 = vadd.f32 %v2341_v45, %v2313_v32 }
 0x2db   : >> { %v2340_v58 = vmul.f32 %v6087_v63, %v2336_v54  ;;  %v2344_v40 = vmul.f32 %v6087_v63, %v12704_v55  ;;  %v2346_v18 = vadd.f32 %v2338_v52, %v2310_v48  ;;  %v2350_v14 = vadd.f32 %v2342_v51, %v2314_v17 }
 0x2dc   : >> { %v2347_v39 = vadd.f32 %v2339_v41, %v2311_v56  ;;  %v2351_v62 = vadd.f32 %v2343_v36, %v2315_v31  ;;  %v2353_v47 = vadd.f32 1.0, %v2345_v10  ;;  %v2357_v46 = vmul.f32 %v2349_v9, %v12705_v16 }
 0x2dd   : >> { %v2348_v49 = vadd.f32 %v2340_v58, %v2312_v53  ;;  %v2352_v28 = vadd.f32 %v2344_v40, %v2316_v24  ;;  %v2354_v11 = vadd.f32 1.0, %v2346_v18  ;;  %v2358_v29 = vmul.f32 %v2350_v14, %v12706_v38 }
 0x2de   : >> { %v2355_v4 = vadd.f32 1.0, %v2347_v39  ;;  %v2359_v35 = vmul.f32 %v2351_v62, %v12707_v13  ;;  %v2361_v22 = vsub.f32 0.0, %v2357_v46  ;;  %v2365_v2 = vmul.f32 %v2353_v47, %v2353_v47 }
 0x2df   : >> { %v2356_v37 = vadd.f32 1.0, %v2348_v49  ;;  %v2360_v21 = vmul.f32 %v2352_v28, %v12708_v57  ;;  %v2362_v15 = vsub.f32 0.0, %v2358_v29  ;;  %v2366_v32 = vmul.f32 %v2354_v11, %v2354_v11 }
 0x2e0   : >> { %v2363_v43 = vsub.f32 0.0, %v2359_v35  ;;  %v2367_v5 = vmul.f32 %v2355_v4, %v2355_v4  ;;  %v2369_v48 = vmul.f32 %v2361_v22, %v2361_v22 }
 0x2e1   : >> { %v2364_v17 = vsub.f32 0.0, %v2360_v21  ;;  %v2368_v54 = vmul.f32 %v2356_v37, %v2356_v37  ;;  %v2370_v27 = vmul.f32 %v2362_v15, %v2362_v15 }
 0x2e2   : >> { %v2371_v56 = vmul.f32 %v2363_v43, %v2363_v43  ;;  %v2373_v31 = vadd.f32 %v2369_v48, %v2365_v2 }
 0x2e3   : >> { %v2372_v25 = vmul.f32 %v2364_v17, %v2364_v17  ;;  %v2374_v45 = vadd.f32 %v2370_v27, %v2366_v32 }
 0x2e4   : >> { %v2375_v6 = vadd.f32 %v2371_v56, %v2367_v5  ;;  %6088 = vrcp.f32 %v2373_v31 }
 0x2e5   : >> { %v2376_v53 = vadd.f32 %v2372_v25, %v2368_v54  ;;  %6090 = vrcp.f32 %v2374_v45  ;;  %v12715_v45 = vld [vmem:[#allocation42_spill] sm:$0xff] }
 0x2e6   : >> { %6092 = vrcp.f32 %v2375_v6 }
 0x2e7   : >> { %6094 = vrcp.f32 %v2376_v53 }
 0x2f1   : >> { %v6089_v24 = vpop.eup %6088 }
 0x2f2   : >> { %v6091_v52 = vpop.eup %6090  ;;  %v2381_v51 = vmul.f32 %v6089_v24, %v2353_v47  ;;  %v2385_v63 = vmul.f32 %v6089_v24, %v2361_v22 }
 0x2f3   : >> { %v6093_v41 = vpop.eup %6092  ;;  %v2382_v36 = vmul.f32 %v6091_v52, %v2354_v11  ;;  %v2386_v10 = vmul.f32 %v6091_v52, %v2362_v15 }
 0x2f4   : >> { %v6095_v9 = vpop.eup %6094  ;;  %v2383_v58 = vmul.f32 %v6093_v41, %v2355_v4  ;;  %v2387_v40 = vmul.f32 %v6093_v41, %v2363_v43  ;;  %v2389_v18 = vsub.f32 0.0, %v2385_v63  ;;  %v2393_v14 = vadd.f32 %v2381_v51, %v8763_v50  ;;  %v12710_v43 = vld [vmem:[#allocation40_spill] sm:$0xff]  ;;  %v12717_v63 = vld [vmem:[#allocation43_spill] sm:$0xff] }
 0x2f5   : >> { %v2384_v39 = vmul.f32 %v6095_v9, %v2356_v37  ;;  %v2388_v62 = vmul.f32 %v6095_v9, %v2364_v17  ;;  %v2390_v46 = vsub.f32 0.0, %v2386_v10  ;;  %v2394_v49 = vadd.f32 %v2382_v36, %v8767_v33  ;;  %v12709_v33 = vld [vmem:[#allocation39_spill] sm:$0xff]  ;;  %v12718_v36 = vld [vmem:[#allocation44_spill] sm:$0xff] }
 0x2f6   : >> { %v2391_v28 = vsub.f32 0.0, %v2387_v40  ;;  %v2395_v29 = vadd.f32 %v2383_v58, %v8770_v7  ;;  %v9063_v35 = vmul.f32 0.5, %v2393_v14  ;;  %v2401_v47 = vadd.f32 %v2389_v18, %v12705_v16  ;;  %v12719_v58 = vld [vmem:[#allocation45_spill] sm:$0xff]  ;;  %v12720_v18 = vld [vmem:[#allocation46_spill] sm:$0xff] }
 0x2f7   : >> { %v2392_v11 = vsub.f32 0.0, %v2388_v62  ;;  %v2396_v22 = vadd.f32 %v2384_v39, %v8777_v34  ;;  %v9067_v4 = vmul.f32 0.5, %v2394_v49  ;;  %v2402_v2 = vadd.f32 %v2390_v46, %v12706_v38  ;;  %v12712_v38 = vld [vmem:[#allocation41_spill] sm:$0xff] }
 0x2f8   : >> { %v9070_v50 = vmul.f32 0.5, %v2395_v29  ;;  %v2403_v37 = vadd.f32 %v2391_v28, %v12707_v13  ;;  %v2405_v21 = vmul.f32 0.5, %v2401_v47  ;;  %v9075_v15 = vsub.f32 %v9063_v35, %v12709_v33 }
 0x2f9   : >> { %v9077_v7 = vmul.f32 0.5, %v2396_v22  ;;  %v2404_v16 = vadd.f32 %v2392_v11, %v12708_v57  ;;  %v2406_v32 = vmul.f32 0.5, %v2402_v2  ;;  %v2418_v34 = vsub.f32 %v9067_v4, %v12710_v43 }
 0x2fa   : >> { %v2407_v5 = vmul.f32 0.5, %v2403_v37  ;;  %v9082_v48 = vmin.f32 %v2405_v21, -1e-09  ;;  %v2419_v17 = vsub.f32 %v9070_v50, %v12712_v38  ;;  %v2421_v27 = vmul.f32 %v9075_v15, %v9075_v15  ;;  %v12721_v37 = vld [vmem:[#allocation47_spill] sm:$0xff]  ;;  %v12732_v38 = vld [vmem:[#allocation60_spill] sm:$0xff] }
 0x2fb   : >> { %v2408_v13 = vmul.f32 0.5, %v2404_v16  ;;  %v9086_v54 = vmin.f32 %v2406_v32, -1e-09  ;;  %v2422_v31 = vmul.f32 %v2418_v34, %v2418_v34  ;;  %v2420_v6 = vsub.f32 %v9077_v7, %v12715_v45  ;;  %v12722_v16 = vld [vmem:[#allocation48_spill] sm:$0xff] }
 0x2fc   : >> { %12711 = vst [vmem:[#allocation85_spill] sm:$0xff] %v9082_v48  ;;  %v9090_v56 = vmin.f32 %v2407_v5, -1e-09  ;;  %v9094_v57 = vmul.f32 %v9082_v48, %v9082_v48  ;;  %v2423_v52 = vmul.f32 %v2419_v17, %v2419_v17  ;;  %v2445_v41 = vsub.f32 %v9063_v35, %v12717_v63  ;;  %v12723_v5 = vld [vmem:[#allocation49_spill] sm:$0xff] }
 0x2fd   : >> { %12713 = vst [vmem:[#allocation83_spill] sm:$0xff] %v9086_v54  ;;  %v9098_v25 = vmul.f32 %v9086_v54, %v9086_v54  ;;  %v9102_v53 = vmin.f32 %v2408_v13, -1e-09  ;;  %v2446_v10 = vsub.f32 %v9067_v4, %v12718_v36  ;;  %v2447_v40 = vsub.f32 %v9070_v50, %v12719_v58  ;;  %v12729_v58 = vld [vmem:[#allocation54_spill] sm:$0xff] }
 0x2fe   : >> { %12714 = vst [vmem:[#allocation84_spill] sm:$0xff] %v9090_v56  ;;  %v9106_v24 = vmul.f32 %v9090_v56, %v9090_v56  ;;  %v2425_v51 = vadd.f32 %v2421_v27, %v9094_v57  ;;  %v2448_v14 = vsub.f32 %v9077_v7, %v12720_v18  ;;  %v2424_v39 = vmul.f32 %v2420_v6, %v2420_v6  ;;  %v12727_v18 = vld [vmem:[#allocation53_spill] sm:$0xff] }
 0x2ff   : >> { %12716 = vst [vmem:[#allocation79_spill] sm:$0xff] %v9102_v53  ;;  %v2426_v9 = vadd.f32 %v2422_v31, %v9098_v25  ;;  %v2449_v62 = vmul.f32 %v2445_v41, %v2445_v41  ;;  %v2450_v46 = vmul.f32 %v2446_v10, %v2446_v10  ;;  %v9120_v49 = vmul.f32 %v9102_v53, %v9102_v53 }
 0x300   : >> { %v2427_v28 = vadd.f32 %v2423_v52, %v9106_v24  ;;  %v2451_v29 = vmul.f32 %v2447_v40, %v2447_v40  ;;  %v2452_v47 = vmul.f32 %v2448_v14, %v2448_v14  ;;  %6096 = vrcp.f32 %v2425_v51  ;;  %v12724_v52 = vld [vmem:[#allocation50_spill] sm:$0xff] }
 0x301   : >> { %v2453_v11 = vadd.f32 %v2449_v62, %v9094_v57  ;;  %6098 = vrcp.f32 %v2426_v9  ;;  %v2454_v22 = vadd.f32 %v2450_v46, %v9098_v25  ;;  %v2481_v21 = vsub.f32 %v9063_v35, %v12721_v37 }
 0x302   : >> { %v2455_v2 = vadd.f32 %v2451_v29, %v9106_v24  ;;  %v2482_v32 = vsub.f32 %v9067_v4, %v12722_v16  ;;  %v2483_v13 = vsub.f32 %v9070_v50, %v12723_v5  ;;  %v2428_v27 = vadd.f32 %v2424_v39, %v9120_v49  ;;  %v12725_v29 = vld [vmem:[#allocation51_spill] sm:$0xff] }
 0x303   : >> { %6100 = vrcp.f32 %v2427_v28  ;;  %v2456_v31 = vadd.f32 %v2452_v47, %v9120_v49  ;;  %v2484_v51 = vsub.f32 %v9077_v7, %v12724_v52  ;;  %v2485_v9 = vmul.f32 %v2481_v21, %v2481_v21  ;;  %v12726_v47 = vld [vmem:[#allocation52_spill] sm:$0xff] }
 0x304   : >> { %6102 = vrcp.f32 %v2453_v11  ;;  %v2486_v62 = vmul.f32 %v2482_v32, %v2482_v32  ;;  %v2487_v46 = vmul.f32 %v2483_v13, %v2483_v13  ;;  %v2517_v37 = vsub.f32 %v9063_v35, %v12725_v29  ;;  %v12728_v29 = vld [vmem:[#allocation56_spill] sm:$0xff] }
 0x305   : >> { %6104 = vrcp.f32 %v2454_v22  ;;  %v2488_v16 = vmul.f32 %v2484_v51, %v2484_v51  ;;  %v2489_v5 = vadd.f32 %v2485_v9, %v9094_v57  ;;  %v2518_v11 = vsub.f32 %v9067_v4, %v12726_v47 }
 0x306   : >> { %6106 = vrcp.f32 %v2455_v2  ;;  %v2490_v39 = vadd.f32 %v2486_v62, %v9098_v25  ;;  %v2491_v28 = vadd.f32 %v2487_v46, %v9106_v24  ;;  %v2521_v52 = vmul.f32 %v2517_v37, %v2517_v37 }
 0x307   : >> { %6108 = vrcp.f32 %v2428_v27  ;;  %v2492_v22 = vadd.f32 %v2488_v16, %v9120_v49  ;;  %v2519_v2 = vsub.f32 %v9070_v50, %v12727_v18  ;;  %v2520_v9 = vsub.f32 %v9077_v7, %v12728_v29 }
 0x308   : >> { %6110 = vrcp.f32 %v2456_v31  ;;  %v2433_v27 = vmul.f32 %v9075_v15, %v12729_v58  ;;  %v2434_v62 = vmul.f32 %v2418_v34, %v12729_v58  ;;  %v2435_v31 = vmul.f32 %v2419_v17, %v12729_v58 }
 0x309   : >> { %6112 = vrcp.f32 %v2489_v5  ;;  %v2436_v5 = vmul.f32 %v2420_v6, %v12729_v58  ;;  %v2461_v46 = vmul.f32 %v2445_v41, %v12523_v0  ;;  %v2522_v16 = vmul.f32 %v2518_v11, %v2518_v11 }
 0x30a   : >> { %6114 = vrcp.f32 %v2490_v39  ;;  %v2462_v47 = vmul.f32 %v2446_v10, %v12523_v0  ;;  %v2463_v18 = vmul.f32 %v2447_v40, %v12523_v0  ;;  %v2464_v29 = vmul.f32 %v2448_v14, %v12523_v0 }
 0x30b   : >> { %6116 = vrcp.f32 %v2491_v28  ;;  %v2525_v36 = vadd.f32 %v2521_v52, %v9094_v57  ;;  %v2497_v34 = vmul.f32 %v2481_v21, %v12524_v20  ;;  %v2523_v28 = vmul.f32 %v2519_v2, %v2519_v2 }
 0x30c   : >> { %6118 = vrcp.f32 %v2492_v22  ;;  %v2524_v17 = vmul.f32 %v2520_v9, %v2520_v9  ;;  %v2498_v6 = vmul.f32 %v2482_v32, %v12524_v20  ;;  %v2499_v41 = vmul.f32 %v2483_v13, %v12524_v20  ;;  %v12731_v22 = vld [vmem:[#allocation59_spill] sm:$0xff] }
 0x30d   : >> { %v6097_v39 = vpop.eup %6096  ;;  %v9162_v63 = vmul.f32 %v2484_v51, %v12524_v20  ;;  %v9165_v10 = vmul.f32 %v2517_v37, %v7257_v61  ;;  %v2526_v14 = vadd.f32 %v2522_v16, %v9098_v25  ;;  %v9169_v52 = vmul.f32 %v2518_v11, %v7257_v61 }
 0x30e   : >> { %v6099_v15 = vpop.eup %6098  ;;  %v9172_v21 = vmul.f32 %v2519_v2, %v7257_v61  ;;  %v2553_v32 = vsub.f32 %v9063_v35, %v12731_v22  ;;  %v2437_v13 = vmul.f32 %v6097_v39, %v2433_v27  ;;  %v2441_v51 = vmul.f32 %v6097_v39, %v12729_v58  ;;  %v12733_v27 = vld [vmem:[#allocation61_spill] sm:$0xff] }
 0x30f   : >> { %6120 = vrcp.f32 %v2525_v36  ;;  %v2554_v37 = vsub.f32 %v9067_v4, %v12732_v38  ;;  %v2438_v33 = vmul.f32 %v6099_v15, %v2434_v62  ;;  %v2442_v16 = vmul.f32 %v6099_v15, %v12729_v58 }
 0x310   : >> { %v6101_v40 = vpop.eup %6100  ;;  %12730 = vst [vmem:[#allocation81_spill] sm:$0xff] %v9172_v21  ;;  %v2527_v11 = vadd.f32 %v2523_v28, %v9106_v24  ;;  %v2528_v2 = vadd.f32 %v2524_v17, %v9120_v49  ;;  %v9185_v39 = vsub.f32 %v9070_v50, %v12733_v27  ;;  %6122 = vrcp.f32 %v2526_v14 }
 0x311   : >> { %v6103_v45 = vpop.eup %6102  ;;  %v2439_v56 = vmul.f32 %v6101_v40, %v2435_v31  ;;  %v2443_v22 = vmul.f32 %v6101_v40, %v12729_v58  ;;  %v9189_v62 = vmul.f32 %v2520_v9, %v7257_v61  ;;  %v2557_v15 = vmul.f32 %v2553_v32, %v2553_v32  ;;  %v12736_v31 = vld [vmem:[#allocation62_spill] sm:$0xff] }
 0x312   : >> { %v6105_v43 = vpop.eup %6104  ;;  %v2465_v54 = vmul.f32 %v6103_v45, %v2461_v46  ;;  %12734 = vst [vmem:[#allocation80_spill] sm:$0xff] %v9185_v39  ;;  %v2469_v38 = vmul.f32 %v6103_v45, %v12523_v0  ;;  %v9194_v40 = vsub.f32 %v9077_v7, %v12736_v31  ;;  %v2558_v46 = vmul.f32 %v2554_v37, %v2554_v37 }
 0x313   : >> { %v6107_v53 = vpop.eup %6106  ;;  %12735 = vst [vmem:[#allocation82_spill] sm:$0xff] %v9189_v62  ;;  %v2466_v48 = vmul.f32 %v6105_v43, %v2462_v47  ;;  %v2470_v17 = vmul.f32 %v6105_v43, %v12523_v0  ;;  %6124 = vrcp.f32 %v2527_v11  ;;  %v2559_v47 = vmul.f32 %v9185_v39, %v9185_v39 }
 0x314   : >> { %v6109_v36 = vpop.eup %6108  ;;  %v2467_v44 = vmul.f32 %v6107_v53, %v2463_v18  ;;  %v2471_v12 = vmul.f32 %v6107_v53, %v12523_v0  ;;  %v2473_v14 = vadd.f32 %v2465_v54, %v2437_v13  ;;  %6126 = vrcp.f32 %v2528_v2 }
 0x315   : >> { %v6111_v28 = vpop.eup %6110  ;;  %v2440_v27 = vmul.f32 %v6109_v36, %v2436_v5  ;;  %v2444_v9 = vmul.f32 %v6109_v36, %v12729_v58  ;;  %v2477_v62 = vadd.f32 %v2469_v38, %v2441_v51  ;;  %v2561_v21 = vadd.f32 %v2557_v15, %v9094_v57 }
 0x316   : >> { %v6113_v55 = vpop.eup %6112  ;;  %v2468_v8 = vmul.f32 %v6111_v28, %v2464_v29  ;;  %v2472_v31 = vmul.f32 %v6111_v28, %v12523_v0  ;;  %v2474_v5 = vadd.f32 %v2466_v48, %v2438_v33  ;;  %v2478_v18 = vadd.f32 %v2470_v17, %v2442_v16 }
 0x317   : >> { %v6115_v45 = vpop.eup %6114  ;;  %v2560_v53 = vmul.f32 %v9194_v40, %v9194_v40  ;;  %v2562_v11 = vadd.f32 %v2558_v46, %v9098_v25  ;;  %v2475_v36 = vadd.f32 %v2467_v44, %v2439_v56  ;;  %v2479_v54 = vadd.f32 %v2471_v12, %v2443_v22 }
 0x318   : >> { %v6117_v43 = vpop.eup %6116  ;;  %v2501_v13 = vmul.f32 %v6113_v55, %v2497_v34  ;;  %v2505_v2 = vmul.f32 %v6113_v55, %v12524_v20  ;;  %v2502_v39 = vmul.f32 %v6115_v45, %v2498_v6  ;;  %v2506_v28 = vmul.f32 %v6115_v45, %v12524_v20 }
 0x319   : >> { %v6119_v58 = vpop.eup %6118  ;;  %v2503_v29 = vmul.f32 %v6117_v43, %v2499_v41  ;;  %v2507_v38 = vmul.f32 %v6117_v43, %v12524_v20  ;;  %v2476_v51 = vadd.f32 %v2468_v8, %v2440_v27  ;;  %v2480_v33 = vadd.f32 %v2472_v31, %v2444_v9 }
 0x31a   : >> { %6128 = vrcp.f32 %v2561_v21  ;;  %v9209_v48 = vmul.f32 %v2553_v32, %v7324_v23  ;;  %v2563_v16 = vadd.f32 %v2559_v47, %v9106_v24  ;;  %v2564_v12 = vadd.f32 %v2560_v53, %v9120_v49 }
 0x31b   : >> { %6130 = vrcp.f32 %v2562_v11  ;;  %v9214_v44 = vmul.f32 %v2554_v37, %v7324_v23  ;;  %v2504_v56 = vmul.f32 %v6119_v58, %v9162_v63  ;;  %v2508_v34 = vmul.f32 %v6119_v58, %v12524_v20 }
 0x31c   : >> { %v6121_v55 = vpop.eup %6120  ;;  %v2509_v6 = vadd.f32 %v2501_v13, %v2473_v14  ;;  %v2513_v8 = vadd.f32 %v2505_v2, %v2477_v62  ;;  %v2510_v41 = vadd.f32 %v2502_v39, %v2474_v5  ;;  %v2511_v21 = vadd.f32 %v2503_v29, %v2475_v36 }
 0x31d   : >> { %v2514_v22 = vadd.f32 %v2506_v28, %v2478_v18  ;;  %v2515_v32 = vadd.f32 %v2507_v38, %v2479_v54  ;;  %v9220_v27 = vsub.f32 %v9063_v35, %v12529_v42  ;;  %v9224_v15 = vsub.f32 %v9067_v4, %v12530_v26  ;;  %v6123_v58 = vpop.eup %6122  ;;  %v12737_v28 = vld [vmem:[#allocation81_spill] sm:$0xff] }
 0x31e   : >> { %v9228_v37 = vsub.f32 %v9070_v50, %v12531_v30  ;;  %v9232_v63 = vsub.f32 %v9077_v7, %v12532_v1  ;;  %v2537_v39 = vmul.f32 %v6121_v55, %v9165_v10  ;;  %v2541_v62 = vmul.f32 %v6121_v55, %v7257_v61 }
 0x31f   : >> { %6132 = vrcp.f32 %v2563_v16  ;;  %v9238_v17 = vsub.f32 %v9063_v35, %v12569_v60  ;;  %v2593_v31 = vmul.f32 %v9220_v27, %v9220_v27  ;;  %v2594_v46 = vmul.f32 %v9224_v15, %v9224_v15 }
 0x320   : >> { %v2595_v45 = vmul.f32 %v9228_v37, %v9228_v37  ;;  %v2596_v9 = vmul.f32 %v9232_v63, %v9232_v63  ;;  %v6125_v10 = vpop.eup %6124  ;;  %v2512_v14 = vadd.f32 %v2504_v56, %v2476_v51  ;;  %v2516_v47 = vadd.f32 %v2508_v34, %v2480_v33 }
 0x321   : >> { %6134 = vrcp.f32 %v2564_v12  ;;  %v9250_v43 = vsub.f32 %v9067_v4, %v12570_v59  ;;  %v6127_v5 = vpop.eup %6126  ;;  %v2597_v18 = vadd.f32 %v2593_v31, %v9094_v57  ;;  %v2598_v53 = vadd.f32 %v2594_v46, %v9098_v25  ;;  %v12738_v31 = vld [vmem:[#allocation82_spill] sm:$0xff] }
 0x322   : >> { %v9256_v11 = vsub.f32 %v9070_v50, %v12571_v3  ;;  %v9260_v36 = vsub.f32 %v9077_v7, %v12572_v19  ;;  %v2538_v54 = vmul.f32 %v6123_v58, %v9169_v52  ;;  %v2542_v13 = vmul.f32 %v6123_v58, %v7257_v61 }
 0x323   : >> { %v2599_v2 = vadd.f32 %v2595_v45, %v9106_v24  ;;  %v2600_v29 = vadd.f32 %v2596_v9, %v9120_v49  ;;  %v2539_v38 = vmul.f32 %v6125_v10, %v12737_v28  ;;  %v2543_v51 = vmul.f32 %v6125_v10, %v7257_v61 }
 0x324   : >> { %6136 = vrcp.f32 %v2597_v18  ;;  %v2629_v33 = vmul.f32 %v9238_v17, %v9238_v17  ;;  %v2545_v16 = vadd.f32 %v2537_v39, %v2509_v6  ;;  %v2549_v12 = vadd.f32 %v2541_v62, %v2513_v8  ;;  %v12739_v18 = vld [vmem:[#allocation72_spill] sm:$0xff] }
 0x325   : >> { %6138 = vrcp.f32 %v2598_v53  ;;  %v2630_v52 = vmul.f32 %v9250_v43, %v9250_v43  ;;  %v2631_v55 = vmul.f32 %v9256_v11, %v9256_v11  ;;  %v2632_v56 = vmul.f32 %v9260_v36, %v9260_v36 }
 0x326   : >> { %6140 = vrcp.f32 %v2599_v2  ;;  %v2633_v34 = vadd.f32 %v2629_v33, %v9094_v57  ;;  %v2540_v46 = vmul.f32 %v6127_v5, %v12738_v31  ;;  %v2544_v45 = vmul.f32 %v6127_v5, %v7257_v61  ;;  %v12740_v2 = vld [vmem:[#allocation73_spill] sm:$0xff]  ;;  %v12741_v33 = vld [vmem:[#allocation74_spill] sm:$0xff] }
 0x327   : >> { %v6129_v58 = vpop.eup %6128  ;;  %6142 = vrcp.f32 %v2600_v29  ;;  %v2634_v6 = vadd.f32 %v2630_v52, %v9098_v25  ;;  %v2546_v39 = vadd.f32 %v2538_v54, %v2510_v41  ;;  %v2635_v62 = vadd.f32 %v2631_v55, %v9106_v24  ;;  %v12742_v52 = vld [vmem:[#allocation80_spill] sm:$0xff] }
 0x328   : >> { %v6131_v8 = vpop.eup %6130  ;;  %v2636_v9 = vadd.f32 %v2632_v56, %v9120_v49  ;;  %6144 = vrcp.f32 %v2633_v34  ;;  %v2550_v10 = vadd.f32 %v2542_v13, %v2514_v22  ;;  %v9284_v53 = vsub.f32 %v9063_v35, %v12739_v18  ;;  %v12743_v13 = vld [vmem:[#allocation75_spill] sm:$0xff] }
 0x329   : >> { %6146 = vrcp.f32 %v2634_v6  ;;  %v9288_v28 = vsub.f32 %v9067_v4, %v12740_v2  ;;  %v2547_v5 = vadd.f32 %v2539_v38, %v2511_v21  ;;  %v2551_v29 = vadd.f32 %v2543_v51, %v2515_v32 }
 0x32a   : >> { %6148 = vrcp.f32 %v2635_v62  ;;  %v9292_v41 = vsub.f32 %v9070_v50, %v12741_v33  ;;  %v2548_v54 = vadd.f32 %v2540_v46, %v2512_v14  ;;  %v2571_v22 = vmul.f32 %v12742_v52, %v7324_v23 }
 0x32b   : >> { %6150 = vrcp.f32 %v2636_v9  ;;  %v9298_v55 = vsub.f32 %v9077_v7, %v12743_v13  ;;  %v2552_v34 = vadd.f32 %v2544_v45, %v2516_v47  ;;  %v2573_v31 = vmul.f32 %v6129_v58, %v9209_v48  ;;  %v12744_v45 = vld [vmem:[#allocation76_spill] sm:$0xff] }
 0x32c   : >> { %v6133_v56 = vpop.eup %6132  ;;  %v2665_v21 = vmul.f32 %v9284_v53, %v9284_v53  ;;  %v2666_v32 = vmul.f32 %v9288_v28, %v9288_v28  ;;  %v2572_v14 = vmul.f32 %v9194_v40, %v7324_v23  ;;  %v2577_v38 = vmul.f32 %v6129_v58, %v7324_v23 }
 0x32d   : >> { %v2667_v51 = vmul.f32 %v9292_v41, %v9292_v41  ;;  %v2668_v46 = vmul.f32 %v9298_v55, %v9298_v55  ;;  %v2574_v48 = vmul.f32 %v6131_v8, %v9214_v44  ;;  %v2605_v6 = vmul.f32 %v9220_v27, %v12744_v45 }
 0x32e   : >> { %v6135_v47 = vpop.eup %6134  ;;  %v2669_v62 = vadd.f32 %v2665_v21, %v9094_v57  ;;  %v2670_v9 = vadd.f32 %v2666_v32, %v9098_v25  ;;  %v2578_v40 = vmul.f32 %v6131_v8, %v7324_v23  ;;  %v2606_v58 = vmul.f32 %v9224_v15, %v12744_v45 }
 0x32f   : >> { %v2671_v52 = vadd.f32 %v2667_v51, %v9106_v24  ;;  %v2672_v13 = vadd.f32 %v2668_v46, %v9120_v49  ;;  %v2581_v33 = vadd.f32 %v2573_v31, %v2545_v16  ;;  %v2607_v44 = vmul.f32 %v9228_v37, %v12744_v45  ;;  %v12745_v31 = vld [vmem:[#allocation77_spill] sm:$0xff] }
 0x330   : >> { %v2608_v27 = vmul.f32 %v9232_v63, %v12744_v45  ;;  %6152 = vrcp.f32 %v2669_v62  ;;  %v2575_v21 = vmul.f32 %v6133_v56, %v2571_v22  ;;  %v2579_v25 = vmul.f32 %v6133_v56, %v7324_v23 }
 0x331   : >> { %v6137_v57 = vpop.eup %6136  ;;  %v2585_v8 = vadd.f32 %v2577_v38, %v2549_v12  ;;  %6154 = vrcp.f32 %v2670_v9  ;;  %v2576_v15 = vmul.f32 %v6135_v47, %v2572_v14  ;;  %v2580_v24 = vmul.f32 %v6135_v47, %v7324_v23 }
 0x332   : >> { %v6139_v32 = vpop.eup %6138  ;;  %v2582_v51 = vadd.f32 %v2574_v48, %v2546_v39  ;;  %6156 = vrcp.f32 %v2671_v52  ;;  %v2586_v16 = vadd.f32 %v2578_v40, %v2550_v10  ;;  %v2641_v37 = vmul.f32 %v9238_v17, %v12745_v31 }
 0x333   : >> { %v6141_v49 = vpop.eup %6140  ;;  %v2642_v63 = vmul.f32 %v9250_v43, %v12745_v31  ;;  %6158 = vrcp.f32 %v2672_v13  ;;  %v2609_v46 = vmul.f32 %v6137_v57, %v2605_v6  ;;  %v2613_v12 = vmul.f32 %v6137_v57, %v12744_v45 }
 0x334   : >> { %v6143_v22 = vpop.eup %6142  ;;  %v2643_v56 = vmul.f32 %v9256_v11, %v12745_v31  ;;  %v2644_v39 = vmul.f32 %v9260_v36, %v12745_v31  ;;  %v2583_v38 = vadd.f32 %v2575_v21, %v2547_v5  ;;  %v2587_v10 = vadd.f32 %v2579_v25, %v2551_v29  ;;  %v12746_v11 = vld [vmem:[#allocation78_spill] sm:$0xff] }
 0x335   : >> { %v6145_v14 = vpop.eup %6144  ;;  %v2610_v47 = vmul.f32 %v6139_v32, %v2606_v58  ;;  %v2614_v17 = vmul.f32 %v6139_v32, %v12744_v45  ;;  %v2584_v62 = vadd.f32 %v2576_v15, %v2548_v54  ;;  %v2588_v43 = vadd.f32 %v2580_v24, %v2552_v34 }
 0x336   : >> { %v6147_v48 = vpop.eup %6146  ;;  %v2611_v13 = vmul.f32 %v6141_v49, %v2607_v44  ;;  %v2615_v6 = vmul.f32 %v6141_v49, %v12744_v45  ;;  %v2612_v40 = vmul.f32 %v6143_v22, %v2608_v27  ;;  %v2616_v52 = vmul.f32 %v6143_v22, %v12744_v45 }
 0x337   : >> { %v6149_v9 = vpop.eup %6148  ;;  %v2677_v57 = vmul.f32 %v9284_v53, %v12746_v11  ;;  %v2678_v36 = vmul.f32 %v9288_v28, %v12746_v11  ;;  %v2617_v29 = vadd.f32 %v2609_v46, %v2581_v33  ;;  %v2621_v58 = vadd.f32 %v2613_v12, %v2585_v8 }
 0x338   : >> { %v6151_v5 = vpop.eup %6150  ;;  %v2645_v21 = vmul.f32 %v6145_v14, %v2641_v37  ;;  %v2649_v54 = vmul.f32 %v6145_v14, %v12745_v31  ;;  %v2618_v34 = vadd.f32 %v2610_v47, %v2582_v51  ;;  %v2622_v44 = vadd.f32 %v2614_v17, %v2586_v16 }
 0x339   : >> { %v2646_v25 = vmul.f32 %v6147_v48, %v2642_v63  ;;  %v2650_v32 = vmul.f32 %v6147_v48, %v12745_v31  ;;  %v2619_v27 = vadd.f32 %v2611_v13, %v2583_v38  ;;  %v2623_v15 = vadd.f32 %v2615_v6, %v2587_v10 }
 0x33a   : >> { %v2647_v24 = vmul.f32 %v6149_v9, %v2643_v56  ;;  %v2651_v49 = vmul.f32 %v6149_v9, %v12745_v31  ;;  %v2620_v53 = vadd.f32 %v2612_v40, %v2584_v62  ;;  %v2624_v22 = vadd.f32 %v2616_v52, %v2588_v43 }
 0x33b   : >> { %v2648_v45 = vmul.f32 %v6151_v5, %v2644_v39  ;;  %v2652_v28 = vmul.f32 %v6151_v5, %v12745_v31  ;;  %v2653_v33 = vadd.f32 %v2645_v21, %v2617_v29  ;;  %v2657_v8 = vadd.f32 %v2649_v54, %v2621_v58  ;;  %v12747_v21 = vld [vmem:[#allocation85_spill] sm:$0xff] }
 0x33c   : >> { %v2679_v37 = vmul.f32 %v9292_v41, %v12746_v11  ;;  %v2654_v16 = vadd.f32 %v2646_v25, %v2618_v34  ;;  %v2658_v63 = vadd.f32 %v2650_v32, %v2622_v44  ;;  %v2680_v46 = vmul.f32 %v9298_v55, %v12746_v11  ;;  %v12748_v44 = vld [vmem:[#allocation83_spill] sm:$0xff] }
 0x33d   : >> { %v6153_v51 = vpop.eup %6152  ;;  %v2655_v56 = vadd.f32 %v2647_v24, %v2619_v27  ;;  %v2659_v14 = vadd.f32 %v2651_v49, %v2623_v15  ;;  %v2656_v47 = vadd.f32 %v2648_v45, %v2620_v53  ;;  %v2660_v17 = vadd.f32 %v2652_v28, %v2624_v22  ;;  %v12749_v27 = vld [vmem:[#allocation84_spill] sm:$0xff]  ;;  %v12750_v22 = vld [vmem:[#allocation79_spill] sm:$0xff] }
 0x33e   : >> { %v6155_v12 = vpop.eup %6154  ;;  %v2681_v38 = vmul.f32 %v6153_v51, %v2677_v57  ;;  %v2685_v10 = vmul.f32 %v6153_v51, %v12746_v11 }
 0x33f   : >> { %v6157_v39 = vpop.eup %6156  ;;  %v2682_v48 = vmul.f32 %v6155_v12, %v2678_v36  ;;  %v2686_v62 = vmul.f32 %v6155_v12, %v12746_v11 }
 0x340   : >> { %v6159_v43 = vpop.eup %6158  ;;  %v2683_v41 = vmul.f32 %v6157_v39, %v2679_v37  ;;  %v2687_v13 = vmul.f32 %v6157_v39, %v12746_v11  ;;  %v2689_v6 = vadd.f32 %v2681_v38, %v2653_v33  ;;  %v2693_v9 = vadd.f32 %v2685_v10, %v2657_v8 }
 0x341   : >> { %v2684_v40 = vmul.f32 %v6159_v43, %v2680_v46  ;;  %v2688_v55 = vmul.f32 %v6159_v43, %v12746_v11  ;;  %v2690_v52 = vadd.f32 %v2682_v48, %v2654_v16  ;;  %v2694_v5 = vadd.f32 %v2686_v62, %v2658_v63 }
 0x342   : >> { %v2691_v57 = vadd.f32 %v2683_v41, %v2655_v56  ;;  %v2695_v29 = vadd.f32 %v2687_v13, %v2659_v14  ;;  %v2697_v58 = vadd.f32 1.0, %v2689_v6  ;;  %v2701_v45 = vmul.f32 %v2693_v9, %v12747_v21 }
 0x343   : >> { %v2692_v54 = vadd.f32 %v2684_v40, %v2656_v47  ;;  %v2696_v36 = vadd.f32 %v2688_v55, %v2660_v17  ;;  %v2698_v34 = vadd.f32 1.0, %v2690_v52  ;;  %v2702_v25 = vmul.f32 %v2694_v5, %v12748_v44 }
 0x344   : >> { %v2699_v32 = vadd.f32 1.0, %v2691_v57  ;;  %v2703_v15 = vmul.f32 %v2695_v29, %v12749_v27  ;;  %v2705_v24 = vsub.f32 0.0, %v2701_v45  ;;  %v2709_v49 = vmul.f32 %v2697_v58, %v2697_v58 }
 0x345   : >> { %v2700_v53 = vadd.f32 1.0, %v2692_v54  ;;  %v2704_v28 = vmul.f32 %v2696_v36, %v12750_v22  ;;  %v2706_v33 = vsub.f32 0.0, %v2702_v25  ;;  %v2710_v8 = vmul.f32 %v2698_v34, %v2698_v34 }
 0x346   : >> { %v2707_v37 = vsub.f32 0.0, %v2703_v15  ;;  %v2711_v51 = vmul.f32 %v2699_v32, %v2699_v32  ;;  %v2713_v16 = vmul.f32 %v2705_v24, %v2705_v24 }
 0x347   : >> { %v2708_v63 = vsub.f32 0.0, %v2704_v28  ;;  %v2712_v46 = vmul.f32 %v2700_v53, %v2700_v53  ;;  %v2714_v12 = vmul.f32 %v2706_v33, %v2706_v33 }
 0x348   : >> { %v2715_v56 = vmul.f32 %v2707_v37, %v2707_v37  ;;  %v2717_v14 = vadd.f32 %v2713_v16, %v2709_v49 }
 0x349   : >> { %v2716_v38 = vmul.f32 %v2708_v63, %v2708_v63  ;;  %v2718_v10 = vadd.f32 %v2714_v12, %v2710_v8 }
 0x34a   : >> { %v2719_v39 = vadd.f32 %v2715_v56, %v2711_v51  ;;  %6160 = vrcp.f32 %v2717_v14 }
 0x34b   : >> { %v2720_v47 = vadd.f32 %v2716_v38, %v2712_v46  ;;  %6162 = vrcp.f32 %v2718_v10  ;;  %v12757_v10 = vld [vmem:[#allocation42_spill] sm:$0xff] }
 0x34c   : >> { %6164 = vrcp.f32 %v2719_v39 }
 0x34d   : >> { %6166 = vrcp.f32 %v2720_v47 }
 0x357   : >> { %v6161_v17 = vpop.eup %6160 }
 0x358   : >> { %v6163_v48 = vpop.eup %6162  ;;  %v2725_v62 = vmul.f32 %v6161_v17, %v2697_v58  ;;  %v2729_v43 = vmul.f32 %v6161_v17, %v2705_v24 }
 0x359   : >> { %v6165_v41 = vpop.eup %6164  ;;  %v2726_v13 = vmul.f32 %v6163_v48, %v2698_v34  ;;  %v2730_v6 = vmul.f32 %v6163_v48, %v2706_v33 }
 0x35a   : >> { %v6167_v9 = vpop.eup %6166  ;;  %v2727_v40 = vmul.f32 %v6165_v41, %v2699_v32  ;;  %v2731_v55 = vmul.f32 %v6165_v41, %v2707_v37  ;;  %v2733_v52 = vsub.f32 0.0, %v2729_v43  ;;  %v2737_v5 = vadd.f32 %v2725_v62, %v9063_v35  ;;  %v12752_v37 = vld [vmem:[#allocation40_spill] sm:$0xff]  ;;  %v12759_v43 = vld [vmem:[#allocation43_spill] sm:$0xff] }
 0x35b   : >> { %v2728_v57 = vmul.f32 %v6167_v9, %v2700_v53  ;;  %v2732_v29 = vmul.f32 %v6167_v9, %v2708_v63  ;;  %v2734_v45 = vsub.f32 0.0, %v2730_v6  ;;  %v2738_v54 = vadd.f32 %v2726_v13, %v9067_v4  ;;  %v12751_v4 = vld [vmem:[#allocation39_spill] sm:$0xff]  ;;  %v12760_v13 = vld [vmem:[#allocation44_spill] sm:$0xff] }
 0x35c   : >> { %v2735_v36 = vsub.f32 0.0, %v2731_v55  ;;  %v2739_v25 = vadd.f32 %v2727_v40, %v9070_v50  ;;  %v9363_v15 = vmul.f32 0.5, %v2737_v5  ;;  %v2745_v58 = vadd.f32 %v2733_v52, %v12747_v21  ;;  %v12761_v40 = vld [vmem:[#allocation45_spill] sm:$0xff]  ;;  %v12762_v52 = vld [vmem:[#allocation46_spill] sm:$0xff] }
 0x35d   : >> { %v2736_v34 = vsub.f32 0.0, %v2732_v29  ;;  %v2740_v24 = vadd.f32 %v2728_v57, %v9077_v7  ;;  %v9367_v32 = vmul.f32 0.5, %v2738_v54  ;;  %v2746_v49 = vadd.f32 %v2734_v45, %v12748_v44  ;;  %v12754_v44 = vld [vmem:[#allocation41_spill] sm:$0xff] }
 0x35e   : >> { %v9370_v35 = vmul.f32 0.5, %v2739_v25  ;;  %v2747_v53 = vadd.f32 %v2735_v36, %v12749_v27  ;;  %v2749_v28 = vmul.f32 0.5, %v2745_v58  ;;  %v9375_v33 = vsub.f32 %v9363_v15, %v12751_v4  ;;  %v12764_v4 = vld [vmem:[#allocation48_spill] sm:$0xff] }
 0x35f   : >> { %v9377_v50 = vmul.f32 0.5, %v2740_v24  ;;  %v2748_v21 = vadd.f32 %v2736_v34, %v12750_v22  ;;  %v2750_v8 = vmul.f32 0.5, %v2746_v49  ;;  %v2762_v7 = vsub.f32 %v9367_v32, %v12752_v37 }
 0x360   : >> { %v2751_v51 = vmul.f32 0.5, %v2747_v53  ;;  %v9382_v16 = vmin.f32 %v2749_v28, -1e-09  ;;  %v2763_v63 = vsub.f32 %v9370_v35, %v12754_v44  ;;  %v2765_v12 = vmul.f32 %v9375_v33, %v9375_v33  ;;  %v12763_v53 = vld [vmem:[#allocation47_spill] sm:$0xff] }
 0x361   : >> { %v2752_v27 = vmul.f32 0.5, %v2748_v21  ;;  %v9386_v46 = vmin.f32 %v2750_v8, -1e-09  ;;  %v2766_v14 = vmul.f32 %v2762_v7, %v2762_v7  ;;  %v2764_v39 = vsub.f32 %v9377_v50, %v12757_v10  ;;  %v12765_v8 = vld [vmem:[#allocation49_spill] sm:$0xff] }
 0x362   : >> { %12753 = vst [vmem:[#allocation81_spill] sm:$0xff] %v9382_v16  ;;  %v9390_v56 = vmin.f32 %v2751_v51, -1e-09  ;;  %v9394_v22 = vmul.f32 %v9382_v16, %v9382_v16  ;;  %v2767_v48 = vmul.f32 %v2763_v63, %v2763_v63  ;;  %v2789_v41 = vsub.f32 %v9363_v15, %v12759_v43 }
 0x363   : >> { %12755 = vst [vmem:[#allocation82_spill] sm:$0xff] %v9386_v46  ;;  %v9398_v38 = vmul.f32 %v9386_v46, %v9386_v46  ;;  %v9402_v47 = vmin.f32 %v2752_v27, -1e-09  ;;  %v2790_v6 = vsub.f32 %v9367_v32, %v12760_v13  ;;  %v2791_v55 = vsub.f32 %v9370_v35, %v12761_v40  ;;  %v12766_v27 = vld [vmem:[#allocation50_spill] sm:$0xff] }
 0x364   : >> { %12756 = vst [vmem:[#allocation80_spill] sm:$0xff] %v9390_v56  ;;  %v9406_v17 = vmul.f32 %v9390_v56, %v9390_v56  ;;  %v2769_v62 = vadd.f32 %v2765_v12, %v9394_v22  ;;  %v2792_v5 = vsub.f32 %v9377_v50, %v12762_v52  ;;  %v2768_v57 = vmul.f32 %v2764_v39, %v2764_v39 }
 0x365   : >> { %12758 = vst [vmem:[#allocation85_spill] sm:$0xff] %v9402_v47  ;;  %v2770_v9 = vadd.f32 %v2766_v14, %v9398_v38  ;;  %v2793_v29 = vmul.f32 %v2789_v41, %v2789_v41  ;;  %v2794_v45 = vmul.f32 %v2790_v6, %v2790_v6  ;;  %v9420_v54 = vmul.f32 %v9402_v47, %v9402_v47 }
 0x366   : >> { %v2771_v36 = vadd.f32 %v2767_v48, %v9406_v17  ;;  %v2795_v25 = vmul.f32 %v2791_v55, %v2791_v55  ;;  %v2796_v58 = vmul.f32 %v2792_v5, %v2792_v5  ;;  %6168 = vrcp.f32 %v2769_v62  ;;  %v12767_v62 = vld [vmem:[#allocation51_spill] sm:$0xff] }
 0x367   : >> { %v2797_v34 = vadd.f32 %v2793_v29, %v9394_v22  ;;  %6170 = vrcp.f32 %v2770_v9  ;;  %v2798_v24 = vadd.f32 %v2794_v45, %v9398_v38  ;;  %v2825_v28 = vsub.f32 %v9363_v15, %v12763_v53 }
 0x368   : >> { %v2799_v49 = vadd.f32 %v2795_v25, %v9406_v17  ;;  %v2826_v21 = vsub.f32 %v9367_v32, %v12764_v4  ;;  %v2827_v37 = vsub.f32 %v9370_v35, %v12765_v8  ;;  %v2772_v51 = vadd.f32 %v2768_v57, %v9420_v54  ;;  %v12768_v57 = vld [vmem:[#allocation52_spill] sm:$0xff]  ;;  %v12769_v25 = vld [vmem:[#allocation53_spill] sm:$0xff] }
 0x369   : >> { %6172 = vrcp.f32 %v2771_v36  ;;  %v2800_v44 = vadd.f32 %v2796_v58, %v9420_v54  ;;  %v2828_v12 = vsub.f32 %v9377_v50, %v12766_v27  ;;  %v2829_v14 = vmul.f32 %v2825_v28, %v2825_v28 }
 0x36a   : >> { %6174 = vrcp.f32 %v2797_v34  ;;  %v2830_v10 = vmul.f32 %v2826_v21, %v2826_v21  ;;  %v2831_v48 = vmul.f32 %v2827_v37, %v2827_v37  ;;  %v2861_v43 = vsub.f32 %v9363_v15, %v12767_v62  ;;  %v12770_v34 = vld [vmem:[#allocation56_spill] sm:$0xff] }
 0x36b   : >> { %6176 = vrcp.f32 %v2798_v24  ;;  %v2832_v13 = vmul.f32 %v2828_v12, %v2828_v12  ;;  %v2833_v9 = vadd.f32 %v2829_v14, %v9394_v22  ;;  %v2862_v29 = vsub.f32 %v9367_v32, %v12768_v57  ;;  %v12773_v57 = vld [vmem:[#allocation59_spill] sm:$0xff] }
 0x36c   : >> { %6178 = vrcp.f32 %v2799_v49  ;;  %v2834_v40 = vadd.f32 %v2830_v10, %v9398_v38  ;;  %v2835_v52 = vadd.f32 %v2831_v48, %v9406_v17  ;;  %v2865_v45 = vmul.f32 %v2861_v43, %v2861_v43  ;;  %v12771_v49 = vld [vmem:[#allocation54_spill] sm:$0xff] }
 0x36d   : >> { %6180 = vrcp.f32 %v2772_v51  ;;  %v2836_v36 = vadd.f32 %v2832_v13, %v9420_v54  ;;  %v2863_v58 = vsub.f32 %v9370_v35, %v12769_v25  ;;  %v2864_v24 = vsub.f32 %v9377_v50, %v12770_v34 }
 0x36e   : >> { %6182 = vrcp.f32 %v2800_v44  ;;  %v2777_v53 = vmul.f32 %v9375_v33, %v12771_v49  ;;  %v2778_v4 = vmul.f32 %v2762_v7, %v12771_v49  ;;  %v2779_v8 = vmul.f32 %v2763_v63, %v12771_v49 }
 0x36f   : >> { %6184 = vrcp.f32 %v2833_v9  ;;  %v2780_v51 = vmul.f32 %v2764_v39, %v12771_v49  ;;  %v2805_v44 = vmul.f32 %v2789_v41, %v12523_v0  ;;  %v2866_v27 = vmul.f32 %v2862_v29, %v2862_v29 }
 0x370   : >> { %6186 = vrcp.f32 %v2834_v40  ;;  %v2806_v10 = vmul.f32 %v2790_v6, %v12523_v0  ;;  %v2807_v48 = vmul.f32 %v2791_v55, %v12523_v0  ;;  %v2808_v62 = vmul.f32 %v2792_v5, %v12523_v0 }
 0x371   : >> { %6188 = vrcp.f32 %v2835_v52  ;;  %v2869_v13 = vadd.f32 %v2865_v45, %v9394_v22  ;;  %v2841_v7 = vmul.f32 %v2825_v28, %v12524_v20  ;;  %v2867_v9 = vmul.f32 %v2863_v58, %v2863_v58 }
 0x372   : >> { %6190 = vrcp.f32 %v2836_v36  ;;  %v2868_v63 = vmul.f32 %v2864_v24, %v2864_v24  ;;  %v2842_v39 = vmul.f32 %v2826_v21, %v12524_v20  ;;  %v2843_v41 = vmul.f32 %v2827_v37, %v12524_v20  ;;  %v12774_v36 = vld [vmem:[#allocation60_spill] sm:$0xff] }
 0x373   : >> { %v6169_v14 = vpop.eup %6168  ;;  %v9462_v40 = vmul.f32 %v2828_v12, %v12524_v20  ;;  %v9465_v6 = vmul.f32 %v2861_v43, %v7257_v61  ;;  %v2870_v5 = vadd.f32 %v2866_v27, %v9398_v38  ;;  %v9469_v52 = vmul.f32 %v2862_v29, %v7257_v61 }
 0x374   : >> { %v6171_v33 = vpop.eup %6170  ;;  %v9472_v28 = vmul.f32 %v2863_v58, %v7257_v61  ;;  %v2897_v21 = vsub.f32 %v9363_v15, %v12773_v57  ;;  %v2781_v37 = vmul.f32 %v6169_v14, %v2777_v53  ;;  %v2785_v12 = vmul.f32 %v6169_v14, %v12771_v49  ;;  %v12775_v53 = vld [vmem:[#allocation61_spill] sm:$0xff] }
 0x375   : >> { %6192 = vrcp.f32 %v2869_v13  ;;  %v2898_v43 = vsub.f32 %v9367_v32, %v12774_v36  ;;  %v2782_v34 = vmul.f32 %v6171_v33, %v2778_v4  ;;  %v2786_v27 = vmul.f32 %v6171_v33, %v12771_v49 }
 0x376   : >> { %v6173_v55 = vpop.eup %6172  ;;  %12772 = vst [vmem:[#allocation83_spill] sm:$0xff] %v9472_v28  ;;  %v2871_v29 = vadd.f32 %v2867_v9, %v9406_v17  ;;  %v2872_v58 = vadd.f32 %v2868_v63, %v9420_v54  ;;  %v9485_v14 = vsub.f32 %v9370_v35, %v12775_v53  ;;  %6194 = vrcp.f32 %v2870_v5 }
 0x377   : >> { %v6175_v45 = vpop.eup %6174  ;;  %v2783_v56 = vmul.f32 %v6173_v55, %v2779_v8  ;;  %v2787_v57 = vmul.f32 %v6173_v55, %v12771_v49  ;;  %v9489_v4 = vmul.f32 %v2864_v24, %v7257_v61  ;;  %v2901_v33 = vmul.f32 %v2897_v21, %v2897_v21  ;;  %v12778_v8 = vld [vmem:[#allocation62_spill] sm:$0xff] }
 0x378   : >> { %v6177_v25 = vpop.eup %6176  ;;  %v2809_v46 = vmul.f32 %v6175_v45, %v2805_v44  ;;  %12776 = vst [vmem:[#allocation84_spill] sm:$0xff] %v9485_v14  ;;  %v2813_v36 = vmul.f32 %v6175_v45, %v12523_v0  ;;  %v9494_v55 = vsub.f32 %v9377_v50, %v12778_v8  ;;  %v2902_v44 = vmul.f32 %v2898_v43, %v2898_v43 }
 0x379   : >> { %v6179_v47 = vpop.eup %6178  ;;  %12777 = vst [vmem:[#allocation79_spill] sm:$0xff] %v9489_v4  ;;  %v2810_v16 = vmul.f32 %v6177_v25, %v2806_v10  ;;  %v2814_v63 = vmul.f32 %v6177_v25, %v12523_v0  ;;  %6196 = vrcp.f32 %v2871_v29  ;;  %v2903_v10 = vmul.f32 %v9485_v14, %v9485_v14 }
 0x37a   : >> { %v6181_v13 = vpop.eup %6180  ;;  %v2811_v31 = vmul.f32 %v6179_v47, %v2807_v48  ;;  %v2815_v2 = vmul.f32 %v6179_v47, %v12523_v0  ;;  %v2817_v45 = vadd.f32 %v2809_v46, %v2781_v37  ;;  %6198 = vrcp.f32 %v2872_v58 }
 0x37b   : >> { %v6183_v9 = vpop.eup %6182  ;;  %v2784_v53 = vmul.f32 %v6181_v13, %v2780_v51  ;;  %v2788_v24 = vmul.f32 %v6181_v13, %v12771_v49  ;;  %v2821_v4 = vadd.f32 %v2813_v36, %v2785_v12  ;;  %v2905_v28 = vadd.f32 %v2901_v33, %v9394_v22 }
 0x37c   : >> { %v6185_v11 = vpop.eup %6184  ;;  %v2812_v18 = vmul.f32 %v6183_v9, %v2808_v62  ;;  %v2816_v8 = vmul.f32 %v6183_v9, %v12523_v0  ;;  %v2818_v51 = vadd.f32 %v2810_v16, %v2782_v34  ;;  %v2822_v48 = vadd.f32 %v2814_v63, %v2786_v27 }
 0x37d   : >> { %v6187_v5 = vpop.eup %6186  ;;  %v2904_v47 = vmul.f32 %v9494_v55, %v9494_v55  ;;  %v2906_v29 = vadd.f32 %v2902_v44, %v9398_v38  ;;  %v2819_v49 = vadd.f32 %v2811_v31, %v2783_v56  ;;  %v2823_v46 = vadd.f32 %v2815_v2, %v2787_v57 }
 0x37e   : >> { %v6189_v25 = vpop.eup %6188  ;;  %v2845_v37 = vmul.f32 %v6185_v11, %v2841_v7  ;;  %v2849_v58 = vmul.f32 %v6185_v11, %v12524_v20  ;;  %v2846_v14 = vmul.f32 %v6187_v5, %v2842_v39  ;;  %v2850_v0 = vmul.f32 %v6187_v5, %v12524_v20 }
 0x37f   : >> { %v6191_v13 = vpop.eup %6190  ;;  %v2847_v62 = vmul.f32 %v6189_v25, %v2843_v41  ;;  %v2851_v12 = vmul.f32 %v6189_v25, %v12524_v20  ;;  %v2820_v36 = vadd.f32 %v2812_v18, %v2784_v53  ;;  %v2824_v16 = vadd.f32 %v2816_v8, %v2788_v24 }
 0x380   : >> { %6200 = vrcp.f32 %v2905_v28  ;;  %v9509_v34 = vmul.f32 %v2897_v21, %v7324_v23  ;;  %v2907_v27 = vadd.f32 %v2903_v10, %v9406_v17  ;;  %v2908_v2 = vadd.f32 %v2904_v47, %v9420_v54  ;;  %v12779_v47 = vld [vmem:[#allocation83_spill] sm:$0xff] }
 0x381   : >> { %6202 = vrcp.f32 %v2906_v29  ;;  %v9514_v31 = vmul.f32 %v2898_v43, %v7324_v23  ;;  %v2848_v56 = vmul.f32 %v6191_v13, %v9462_v40  ;;  %v2852_v7 = vmul.f32 %v6191_v13, %v12524_v20 }
 0x382   : >> { %v6193_v11 = vpop.eup %6192  ;;  %v2853_v39 = vadd.f32 %v2845_v37, %v2817_v45  ;;  %v2857_v18 = vadd.f32 %v2849_v58, %v2821_v4  ;;  %v2854_v41 = vadd.f32 %v2846_v14, %v2818_v51  ;;  %v2855_v28 = vadd.f32 %v2847_v62, %v2819_v49 }
 0x383   : >> { %v2858_v57 = vadd.f32 %v2850_v0, %v2822_v48  ;;  %v2859_v21 = vadd.f32 %v2851_v12, %v2823_v46  ;;  %v9520_v33 = vsub.f32 %v9363_v15, %v12529_v42  ;;  %v9524_v9 = vsub.f32 %v9367_v32, %v12530_v26  ;;  %v6195_v40 = vpop.eup %6194  ;;  %v12780_v0 = vld [vmem:[#allocation79_spill] sm:$0xff] }
 0x384   : >> { %v9528_v43 = vsub.f32 %v9370_v35, %v12531_v30  ;;  %v9532_v20 = vsub.f32 %v9377_v50, %v12532_v1  ;;  %v2881_v14 = vmul.f32 %v6193_v11, %v9465_v6  ;;  %v2885_v4 = vmul.f32 %v6193_v11, %v7257_v61 }
 0x385   : >> { %6204 = vrcp.f32 %v2907_v27  ;;  %v9538_v42 = vsub.f32 %v9363_v15, %v12569_v60  ;;  %v2937_v26 = vmul.f32 %v9520_v33, %v9520_v33  ;;  %v2938_v30 = vmul.f32 %v9524_v9, %v9524_v9 }
 0x386   : >> { %v2939_v1 = vmul.f32 %v9528_v43, %v9528_v43  ;;  %v2940_v63 = vmul.f32 %v9532_v20, %v9532_v20  ;;  %v6197_v6 = vpop.eup %6196  ;;  %v2856_v44 = vadd.f32 %v2848_v56, %v2820_v36  ;;  %v2860_v53 = vadd.f32 %v2852_v7, %v2824_v16 }
 0x387   : >> { %6206 = vrcp.f32 %v2908_v2  ;;  %v9550_v60 = vsub.f32 %v9367_v32, %v12570_v59  ;;  %v6199_v5 = vpop.eup %6198  ;;  %v2941_v24 = vadd.f32 %v2937_v26, %v9394_v22  ;;  %v2942_v45 = vadd.f32 %v2938_v30, %v9398_v38  ;;  %v12783_v30 = vld [vmem:[#allocation74_spill] sm:$0xff] }
 0x388   : >> { %v9556_v10 = vsub.f32 %v9370_v35, %v12571_v3  ;;  %v9560_v25 = vsub.f32 %v9377_v50, %v12572_v19  ;;  %v2882_v8 = vmul.f32 %v6195_v40, %v9469_v52  ;;  %v2886_v51 = vmul.f32 %v6195_v40, %v7257_v61  ;;  %v12782_v40 = vld [vmem:[#allocation73_spill] sm:$0xff] }
 0x389   : >> { %v2943_v59 = vadd.f32 %v2939_v1, %v9406_v17  ;;  %v2944_v48 = vadd.f32 %v2940_v63, %v9420_v54  ;;  %v2883_v29 = vmul.f32 %v6197_v6, %v12779_v47  ;;  %v2887_v49 = vmul.f32 %v6197_v6, %v7257_v61  ;;  %v12784_v63 = vld [vmem:[#allocation84_spill] sm:$0xff]  ;;  %v12785_v6 = vld [vmem:[#allocation75_spill] sm:$0xff] }
 0x38a   : >> { %6208 = vrcp.f32 %v2941_v24  ;;  %v2973_v3 = vmul.f32 %v9538_v42, %v9538_v42  ;;  %v2889_v46 = vadd.f32 %v2881_v14, %v2853_v39  ;;  %v2893_v37 = vadd.f32 %v2885_v4, %v2857_v18  ;;  %v12781_v39 = vld [vmem:[#allocation72_spill] sm:$0xff] }
 0x38b   : >> { %6210 = vrcp.f32 %v2942_v45  ;;  %v2974_v19 = vmul.f32 %v9550_v60, %v9550_v60  ;;  %v2975_v52 = vmul.f32 %v9556_v10, %v9556_v10  ;;  %v2976_v58 = vmul.f32 %v9560_v25, %v9560_v25  ;;  %v12786_v47 = vld [vmem:[#allocation76_spill] sm:$0xff] }
 0x38c   : >> { %6212 = vrcp.f32 %v2943_v59  ;;  %v2977_v13 = vadd.f32 %v2973_v3, %v9394_v22  ;;  %v2884_v12 = vmul.f32 %v6199_v5, %v12780_v0  ;;  %v2888_v36 = vmul.f32 %v6199_v5, %v7257_v61 }
 0x38d   : >> { %v6201_v62 = vpop.eup %6200  ;;  %6214 = vrcp.f32 %v2944_v48  ;;  %v2978_v16 = vadd.f32 %v2974_v19, %v9398_v38  ;;  %v2890_v2 = vadd.f32 %v2882_v8, %v2854_v41  ;;  %v2979_v11 = vadd.f32 %v2975_v52, %v9406_v17 }
 0x38e   : >> { %v6203_v27 = vpop.eup %6202  ;;  %v2980_v56 = vadd.f32 %v2976_v58, %v9420_v54  ;;  %6216 = vrcp.f32 %v2977_v13  ;;  %v2894_v7 = vadd.f32 %v2886_v51, %v2858_v57  ;;  %v9584_v18 = vsub.f32 %v9363_v15, %v12781_v39 }
 0x38f   : >> { %6218 = vrcp.f32 %v2978_v16  ;;  %v9588_v14 = vsub.f32 %v9367_v32, %v12782_v40  ;;  %v2891_v4 = vadd.f32 %v2883_v29, %v2855_v28  ;;  %v2895_v26 = vadd.f32 %v2887_v49, %v2859_v21  ;;  %v12787_v16 = vld [vmem:[#allocation77_spill] sm:$0xff] }
 0x390   : >> { %6220 = vrcp.f32 %v2979_v11  ;;  %v9592_v41 = vsub.f32 %v9370_v35, %v12783_v30  ;;  %v2892_v1 = vadd.f32 %v2884_v12, %v2856_v44  ;;  %v2915_v57 = vmul.f32 %v12784_v63, %v7324_v23 }
 0x391   : >> { %6222 = vrcp.f32 %v2980_v56  ;;  %v9598_v5 = vsub.f32 %v9377_v50, %v12785_v6  ;;  %v2896_v45 = vadd.f32 %v2888_v36, %v2860_v53  ;;  %v2917_v8 = vmul.f32 %v6201_v62, %v9509_v34 }
 0x392   : >> { %v6205_v24 = vpop.eup %6204  ;;  %v3009_v28 = vmul.f32 %v9584_v18, %v9584_v18  ;;  %v3010_v21 = vmul.f32 %v9588_v14, %v9588_v14  ;;  %v2916_v44 = vmul.f32 %v9494_v55, %v7324_v23  ;;  %v2921_v51 = vmul.f32 %v6201_v62, %v7324_v23 }
 0x393   : >> { %v3011_v59 = vmul.f32 %v9592_v41, %v9592_v41  ;;  %v3012_v48 = vmul.f32 %v9598_v5, %v9598_v5  ;;  %v2918_v34 = vmul.f32 %v6203_v27, %v9514_v31  ;;  %v2949_v29 = vmul.f32 %v9520_v33, %v12786_v47 }
 0x394   : >> { %v6207_v53 = vpop.eup %6206  ;;  %v3013_v49 = vadd.f32 %v3009_v28, %v9394_v22  ;;  %v3014_v3 = vadd.f32 %v3010_v21, %v9398_v38  ;;  %v2922_v55 = vmul.f32 %v6203_v27, %v7324_v23  ;;  %v2950_v19 = vmul.f32 %v9524_v9, %v12786_v47 }
 0x395   : >> { %v3015_v52 = vadd.f32 %v3011_v59, %v9406_v17  ;;  %v3016_v58 = vadd.f32 %v3012_v48, %v9420_v54  ;;  %v2925_v13 = vadd.f32 %v2917_v8, %v2889_v46  ;;  %v2951_v31 = vmul.f32 %v9528_v43, %v12786_v47 }
 0x396   : >> { %v2952_v33 = vmul.f32 %v9532_v20, %v12786_v47  ;;  %6224 = vrcp.f32 %v3013_v49  ;;  %v2919_v62 = vmul.f32 %v6205_v24, %v2915_v57  ;;  %v2923_v38 = vmul.f32 %v6205_v24, %v7324_v23 }
 0x397   : >> { %v6209_v22 = vpop.eup %6208  ;;  %v2929_v0 = vadd.f32 %v2921_v51, %v2893_v37  ;;  %6226 = vrcp.f32 %v3014_v3  ;;  %v2920_v9 = vmul.f32 %v6207_v53, %v2916_v44  ;;  %v2924_v17 = vmul.f32 %v6207_v53, %v7324_v23 }
 0x398   : >> { %v6211_v12 = vpop.eup %6210  ;;  %v2926_v36 = vadd.f32 %v2918_v34, %v2890_v2  ;;  %6228 = vrcp.f32 %v3015_v52  ;;  %v2930_v46 = vadd.f32 %v2922_v55, %v2894_v7  ;;  %v2985_v43 = vmul.f32 %v9538_v42, %v12787_v16 }
 0x399   : >> { %v6213_v54 = vpop.eup %6212  ;;  %v2986_v20 = vmul.f32 %v9550_v60, %v12787_v16  ;;  %6230 = vrcp.f32 %v3016_v58  ;;  %v2953_v11 = vmul.f32 %v6209_v22, %v2949_v29  ;;  %v2957_v37 = vmul.f32 %v6209_v22, %v12786_v47 }
 0x39a   : >> { %v6215_v27 = vpop.eup %6214  ;;  %v2987_v56 = vmul.f32 %v9556_v10, %v12787_v16  ;;  %v2988_v2 = vmul.f32 %v9560_v25, %v12787_v16  ;;  %v2927_v40 = vadd.f32 %v2919_v62, %v2891_v4  ;;  %v2931_v7 = vadd.f32 %v2923_v38, %v2895_v26  ;;  %v12788_v10 = vld [vmem:[#allocation78_spill] sm:$0xff] }
 0x39b   : >> { %v6217_v39 = vpop.eup %6216  ;;  %v2954_v30 = vmul.f32 %v6211_v12, %v2950_v19  ;;  %v2958_v42 = vmul.f32 %v6211_v12, %v12786_v47  ;;  %v2928_v57 = vadd.f32 %v2920_v9, %v2892_v1  ;;  %v2932_v60 = vadd.f32 %v2924_v17, %v2896_v45 }
 0x39c   : >> { %v6219_v63 = vpop.eup %6218  ;;  %v2955_v6 = vmul.f32 %v6213_v54, %v2951_v31  ;;  %v2959_v24 = vmul.f32 %v6213_v54, %v12786_v47  ;;  %v2956_v28 = vmul.f32 %v6215_v27, %v2952_v33  ;;  %v2960_v21 = vmul.f32 %v6215_v27, %v12786_v47 }
 0x39d   : >> { %v6221_v8 = vpop.eup %6220  ;;  %v3021_v44 = vmul.f32 %v9584_v18, %v12788_v10  ;;  %v3022_v25 = vmul.f32 %v9588_v14, %v12788_v10  ;;  %v2961_v26 = vadd.f32 %v2953_v11, %v2925_v13  ;;  %v2965_v51 = vadd.f32 %v2957_v37, %v2929_v0 }
 0x39e   : >> { %v6223_v4 = vpop.eup %6222  ;;  %v2989_v59 = vmul.f32 %v6217_v39, %v2985_v43  ;;  %v2993_v1 = vmul.f32 %v6217_v39, %v12787_v16  ;;  %v2962_v45 = vadd.f32 %v2954_v30, %v2926_v36  ;;  %v2966_v48 = vadd.f32 %v2958_v42, %v2930_v46  ;;  %v12789_v42 = vld [vmem:[#allocation81_spill] sm:$0xff] }
 0x39f   : >> { %v2990_v53 = vmul.f32 %v6219_v63, %v2986_v20  ;;  %v2994_v34 = vmul.f32 %v6219_v63, %v12787_v16  ;;  %v2963_v29 = vadd.f32 %v2955_v6, %v2927_v40  ;;  %v2967_v49 = vadd.f32 %v2959_v24, %v2931_v7  ;;  %v12790_v24 = vld [vmem:[#allocation82_spill] sm:$0xff] }
 0x3a0   : >> { %v2991_v47 = vmul.f32 %v6221_v8, %v2987_v56  ;;  %v2995_v3 = vmul.f32 %v6221_v8, %v12787_v16  ;;  %v2964_v18 = vadd.f32 %v2956_v28, %v2928_v57  ;;  %v2968_v55 = vadd.f32 %v2960_v21, %v2932_v60  ;;  %v12791_v21 = vld [vmem:[#allocation80_spill] sm:$0xff] }
 0x3a1   : >> { %v2992_v19 = vmul.f32 %v6223_v4, %v2988_v2  ;;  %v2996_v14 = vmul.f32 %v6223_v4, %v12787_v16  ;;  %v2997_v52 = vadd.f32 %v2989_v59, %v2961_v26  ;;  %v3001_v58 = vadd.f32 %v2993_v1, %v2965_v51  ;;  %v12792_v51 = vld [vmem:[#allocation85_spill] sm:$0xff] }
 0x3a2   : >> { %v3023_v13 = vmul.f32 %v9592_v41, %v12788_v10  ;;  %v2998_v33 = vadd.f32 %v2990_v53, %v2962_v45  ;;  %v3002_v22 = vadd.f32 %v2994_v34, %v2966_v48  ;;  %v3024_v62 = vmul.f32 %v9598_v5, %v12788_v10 }
 0x3a3   : >> { %v6225_v31 = vpop.eup %6224  ;;  %v2999_v0 = vadd.f32 %v2991_v47, %v2963_v29  ;;  %v3003_v12 = vadd.f32 %v2995_v3, %v2967_v49  ;;  %v3000_v54 = vadd.f32 %v2992_v19, %v2964_v18  ;;  %v3004_v46 = vadd.f32 %v2996_v14, %v2968_v55 }
 0x3a4   : >> { %v6227_v38 = vpop.eup %6226  ;;  %v3025_v9 = vmul.f32 %v6225_v31, %v3021_v44  ;;  %v3029_v17 = vmul.f32 %v6225_v31, %v12788_v10 }
 0x3a5   : >> { %v6229_v36 = vpop.eup %6228  ;;  %v3026_v16 = vmul.f32 %v6227_v38, %v3022_v25  ;;  %v3030_v43 = vmul.f32 %v6227_v38, %v12788_v10 }
 0x3a6   : >> { %v6231_v20 = vpop.eup %6230  ;;  %v3027_v41 = vmul.f32 %v6229_v36, %v3023_v13  ;;  %v3031_v27 = vmul.f32 %v6229_v36, %v12788_v10  ;;  %v3033_v11 = vadd.f32 %v3025_v9, %v2997_v52  ;;  %v3037_v37 = vadd.f32 %v3029_v17, %v3001_v58 }
 0x3a7   : >> { %v3028_v56 = vmul.f32 %v6231_v20, %v3024_v62  ;;  %v3032_v5 = vmul.f32 %v6231_v20, %v12788_v10  ;;  %v3034_v2 = vadd.f32 %v3026_v16, %v2998_v33  ;;  %v3038_v39 = vadd.f32 %v3030_v43, %v3002_v22 }
 0x3a8   : >> { %v3035_v40 = vadd.f32 %v3027_v41, %v2999_v0  ;;  %v3039_v7 = vadd.f32 %v3031_v27, %v3003_v12  ;;  %v3041_v30 = vadd.f32 1.0, %v3033_v11  ;;  %v3045_v63 = vmul.f32 %v3037_v37, %v12789_v42 }
 0x3a9   : >> { %v3036_v57 = vadd.f32 %v3028_v56, %v3000_v54  ;;  %v3040_v60 = vadd.f32 %v3032_v5, %v3004_v46  ;;  %v3042_v6 = vadd.f32 1.0, %v3034_v2  ;;  %v3046_v8 = vmul.f32 %v3038_v39, %v12790_v24  ;;  %v12799_v39 = vld [vmem:[#allocation38_spill] sm:$0xff] }
 0x3aa   : >> { %v3043_v28 = vadd.f32 1.0, %v3035_v40  ;;  %v3047_v44 = vmul.f32 %v3039_v7, %v12791_v21  ;;  %v3049_v25 = vsub.f32 0.0, %v3045_v63  ;;  %v3053_v4 = vmul.f32 %v3041_v30, %v3041_v30  ;;  %v12803_v63 = vld [vmem:[#allocation36_spill] sm:$0xff] }
 0x3ab   : >> { %v3044_v26 = vadd.f32 1.0, %v3036_v57  ;;  %v3048_v10 = vmul.f32 %v3040_v60, %v12792_v51  ;;  %v3050_v59 = vsub.f32 0.0, %v3046_v8  ;;  %v3054_v1 = vmul.f32 %v3042_v6, %v3042_v6 }
 0x3ac   : >> { %v3051_v45 = vsub.f32 0.0, %v3047_v44  ;;  %v3055_v48 = vmul.f32 %v3043_v28, %v3043_v28  ;;  %v3057_v53 = vmul.f32 %v3049_v25, %v3049_v25 }
 0x3ad   : >> { %v3052_v34 = vsub.f32 0.0, %v3048_v10  ;;  %v3056_v29 = vmul.f32 %v3044_v26, %v3044_v26  ;;  %v3058_v49 = vmul.f32 %v3050_v59, %v3050_v59 }
 0x3ae   : >> { %v3059_v47 = vmul.f32 %v3051_v45, %v3051_v45  ;;  %v3061_v3 = vadd.f32 %v3057_v53, %v3053_v4  ;;  %v12813_v53 = vld [vmem:[#allocation33_spill] sm:$0xff] }
 0x3af   : >> { %v3060_v18 = vmul.f32 %v3052_v34, %v3052_v34  ;;  %v3062_v55 = vadd.f32 %v3058_v49, %v3054_v1 }
 0x3b0   : >> { %v3063_v19 = vadd.f32 %v3059_v47, %v3055_v48  ;;  %6232 = vrcp.f32 %v3061_v3 }
 0x3b1   : >> { %v3064_v14 = vadd.f32 %v3060_v18, %v3056_v29  ;;  %6234 = vrcp.f32 %v3062_v55  ;;  %v12814_v29 = vld [vmem:[#allocation32_spill] sm:$0xff]  ;;  %v12815_v18 = vld [vmem:[#allocation31_spill] sm:$0xff] }
 0x3b2   : >> { %6236 = vrcp.f32 %v3063_v19 }
 0x3b3   : >> { %6238 = vrcp.f32 %v3064_v14 }
 0x3bd   : >> { %v6233_v52 = vpop.eup %6232 }
 0x3be   : >> { %v6235_v58 = vpop.eup %6234  ;;  %v3069_v13 = vmul.f32 %v6233_v52, %v3041_v30  ;;  %v3073_v31 = vmul.f32 %v6233_v52, %v3049_v25 }
 0x3bf   : >> { %v6237_v33 = vpop.eup %6236  ;;  %v3070_v22 = vmul.f32 %v6235_v58, %v3042_v6  ;;  %v3074_v62 = vmul.f32 %v6235_v58, %v3050_v59 }
 0x3c0   : >> { %v6239_v38 = vpop.eup %6238  ;;  %v3071_v0 = vmul.f32 %v6237_v33, %v3043_v28  ;;  %v3081_v12 = vadd.f32 %v3069_v13, %v9363_v15  ;;  %v3075_v9 = vmul.f32 %v6237_v33, %v3051_v45  ;;  %v3077_v17 = vsub.f32 0.0, %v3073_v31  ;;  %v12805_v28 = vld [vmem:[#allocation35_spill] sm:$0xff] }
 0x3c1   : >> { %v3072_v36 = vmul.f32 %v6239_v38, %v3044_v26  ;;  %v3082_v54 = vadd.f32 %v3070_v22, %v9367_v32  ;;  %v3076_v46 = vmul.f32 %v6239_v38, %v3052_v34  ;;  %v3078_v16 = vsub.f32 0.0, %v3074_v62 }
 0x3c2   : >> { %v3083_v43 = vadd.f32 %v3071_v0, %v9370_v35  ;;  %v9663_v11 = vmul.f32 0.5, %v3081_v12   ;;  %v3079_v41 = vsub.f32 0.0, %v3075_v9  ;;  %v3089_v27 = vadd.f32 %v3077_v17, %v12789_v42 }
 0x3c3   : >> { %v3084_v37 = vadd.f32 %v3072_v36, %v9377_v50  ;;  %v9667_v10 = vmul.f32 0.5, %v3082_v54   ;;  %v3080_v5 = vsub.f32 0.0, %v3076_v46  ;;  %v3090_v15 = vadd.f32 %v3078_v16, %v12790_v24 }
 0x3c4   : >> { %12793 = vst [vmem:[#allocation86_spill] sm:$0xff] %v9663_v11  ;;  %v12794_v20 = vmov %v9663_v11  ;;  %v9670_v9 = vmul.f32 0.5, %v3083_v43   ;;  %v3091_v40 = vadd.f32 %v3079_v41, %v12791_v21  ;;  %v3093_v35 = vmul.f32 0.5, %v3089_v27  ;;  %v12802_v11 = vld [vmem:[#allocation37_spill] sm:$0xff] }
 0x3c5   : >> { %12795 = vst [vmem:[#allocation87_spill] sm:$0xff] %v9667_v10  ;;  %v12796_v56 = vmov %v9667_v10  ;;  %v3101_v32 = vsub.f32 %v12794_v20, %v12799_v39  ;;  %v9675_v8 = vmul.f32 0.5, %v3084_v37   ;;  %v3092_v50 = vadd.f32 %v3080_v5, %v12792_v51  ;;  %v12810_v10 = vld [vmem:[#allocation34_spill] sm:$0xff] }
 0x3c6   : >> { %12797 = vst [vmem:[#allocation88_spill] sm:$0xff] %v9670_v9  ;;  %v12798_v2 = vmov %v9670_v9  ;;  %v3102_v7 = vsub.f32 %v12796_v56, %v12802_v11  ;;  %v3094_v42 = vmul.f32 0.5, %v3090_v15  ;;  %v3095_v6 = vmul.f32 0.5, %v3091_v40 }
 0x3c7   : >> { %12800 = vst [vmem:[#allocation89_spill] sm:$0xff] %v9675_v8  ;;  %v12801_v30 = vmov %v9675_v8  ;;  %v3103_v57 = vsub.f32 %v12798_v2, %v12803_v63  ;;  %v3105_v60 = vand.u32 2147483647, %v3101_v32  ;;  %v9682_v24 = vmin.f32 %v3093_v35, -1e-09  }
 0x3c8   : >> { %v3104_v44 = vsub.f32 %v12801_v30, %v12805_v28  ;;  %v3106_v21 = vand.u32 2147483647, %v3102_v7  ;;  %v3096_v25 = vmul.f32 0.5, %v3092_v50  ;;  %v9686_v4 = vmin.f32 %v3094_v42, -1e-09  }
 0x3c9   : >> { %12804 = vst [vmem:[#allocation90_spill] sm:$0xff] %v9682_v24  ;;  %v3107_v8 = vand.u32 2147483647, %v3103_v57  ;;  %v9688_v5 = vmin.f32 %v3095_v6, -1e-09   ;;  %v3121_v51 = vsub.f32 %v9682_v24, %v12810_v10  ;;  %v12819_v7 = vmov %v9682_v24 }
 0x3ca   : >> { %12806 = vst [vmem:[#allocation91_spill] sm:$0xff] %v9686_v4  ;;  %v12807_v26 = vmov %v9686_v4  ;;  %v3108_v1 = vand.u32 2147483647, %v3104_v44  ;;  %v3109_v45 = vmax.f32.f32 %v3105_v60, %v3106_v21  ;;  %v9692_v4 = vmin.f32 %v3096_v25, -1e-09  }
 0x3cb   : >> { %12808 = vst [vmem:[#allocation92_spill] sm:$0xff] %v9688_v5  ;;  %v12809_v59 = vmov %v9688_v5  ;;  %v3122_v34 = vsub.f32 %v12807_v26, %v12813_v53  ;;  %v3125_v47 = vand.u32 2147483647, %v3121_v51  ;;  %v12818_v6 = vmov %v12807_v26 }
 0x3cc   : >> { %12811 = vst [vmem:[#allocation93_spill] sm:$0xff] %v9692_v4  ;;  %v12812_v48 = vmov %v9692_v4  ;;  %v3123_v49 = vsub.f32 %v12809_v59, %v12814_v29  ;;  %v3110_v3 = vmax.f32.f32 %v3107_v8, %v3108_v1  ;;  %v12817_v5 = vmov %v12809_v59 }
 0x3cd   : >> { %v3124_v55 = vsub.f32 %v12812_v48, %v12815_v18  ;;  %v3126_v19 = vand.u32 2147483647, %v3122_v34  ;;  %v12816_v4 = vmov %v12812_v48  ;;  %v12820_v8 = vmov %v12801_v30 }
 0x3ce   : >> { %v3127_v14 = vand.u32 2147483647, %v3123_v49  ;;  %v3111_v52 = vmax.f32.f32 %v3109_v45, %v3110_v3  ;;  %v12822_v10 = vmov %v12796_v56  ;;  %v12823_v11 = vmov %v12794_v20 }
 0x3cf   : >> { %v3128_v58 = vand.u32 2147483647, %v3124_v55  ;;  %v3129_v13 = vmax.f32.f32 %v3125_v47, %v3126_v19 }
 0x3d0   : >> { %3112 = vmax.xlane.f32.xlu0 %v3111_v52 }
 0x3d1   : >> { %v3130_v31 = vmax.f32.f32 %v3127_v14, %v3128_v58 }
 0x3d3   : >> { %v3131_v33 = vmax.f32.f32 %v3129_v13, %v3130_v31 }
 0x3d5   : >> { %3132 = vmax.xlane.f32.xlu0 %v3131_v33 }
 0x459   : >> { %v3113_v22 = vpop.xlane.xlu0 %3112 }
 0x45a   : >> { %v3114_v62 = vrot.slane %v3113_v22, 4 }
 0x45c   : >> { %v3115_v38 = vmax.f32 %v3113_v22, %v3114_v62 }
 0x45e   : >> { %v3133_v0 = vpop.xlane.xlu0 %3132  ;;  %v3116_v12 = vrot.slane %v3115_v38, 2 }
 0x45f   : >> { %v3134_v9 = vrot.slane %v3133_v0, 4 }
 0x460   : >> { %v3117_v17 = vmax.f32 %v3115_v38, %v3116_v12 }
 0x461   : >> { %v3135_v36 = vmax.f32 %v3133_v0, %v3134_v9  ;;  %v12821_v9 = vmov %v12798_v2 }
 0x462   : >> { %v3118_v54 = vrot.slane %v3117_v17, 1 }
 0x463   : >> { %v3136_v46 = vrot.slane %v3135_v36, 2 }
 0x464   : >> { %v3119_v16 = vmax.f32 %v3117_v17, %v3118_v54 }
 0x465   : >> { %v3137_v43 = vmax.f32 %v3135_v36, %v3136_v46 }
 0x466   : >> { %5507 = vpush %v3119_v16 }
 0x467   : >> { %v3138_v41 = vrot.slane %v3137_v43, 1 }
 0x469   : >> { %v3139_v27 = vmax.f32 %v3137_v43, %v3138_v41 }
 0x46b   : >> { %5509 = vpush %v3139_v27 }
 0x497   : >> { %s5508_s6 = spop %5507 }
 0x49c   : >> { %s5510_s7 = spop %5509 }
 0x49d   : >> { %s3141_s8 = smax.f32 %s5510_s7, %s5508_s6 }
 0x49e   : >> { %p296_p6 = scmp.gt.f32.partialorder %s3141_s8, 1e-06 }
 0x4a0   : >> { %p297_p8 = pnand %p296_p6, %p295_p4 }
 0x4a1   : > { %v9733_v37 = vmul.f32 (%p297_p8), %v9682_v24, %v9682_v24  ;;  %v9737_v15 = vmul.f32 (%p297_p8), %v12807_v26, %v12807_v26  ;;  %v9741_v39 = vmul.f32 (%p297_p8), %v12809_v59, %v12809_v59  ;;  %v9745_v32 = vmul.f32 (%p297_p8), %v12812_v48, %v12812_v48  ;;  %v12829_v40 = vld [vmem:[#allocation39_spill] sm:$0xff] (%p297_p8)  ;;  %v12830_v11 = vld [vmem:[#allocation40_spill] sm:$0xff] (%p297_p8)  ;;  %v12831_v7 = vld [vmem:[#allocation41_spill] sm:$0xff] (%p297_p8)  ;;  %p13133_p3 = scmp.ne.s32.totalorder (%p297_p8), %s12433_s24, 0 }
 0x4a2   : > { %300 = sbr.rel (!%p297_p8) target bundleno = 138 (0x8a), region = 102  ;;  %v3152_v35 = vsub.f32 (%p297_p8), %v12794_v20, %v12829_v40  ;;  %v3153_v5 = vsub.f32 (%p297_p8), %v12796_v56, %v12830_v11  ;;  %v3154_v50 = vsub.f32 (%p297_p8), %v12798_v2, %v12831_v7  ;;  %v12832_v42 = vld [vmem:[#allocation42_spill] sm:$0xff] (%p297_p8)  ;;  %v12833_v57 = vld [vmem:[#allocation43_spill] sm:$0xff] (%p297_p8)  ;;  %v12834_v6 = vld [vmem:[#allocation44_spill] sm:$0xff] (%p297_p8) }
 0x4a3   : > { %12825 = vst [vmem:[#allocation24_spill] sm:$0xff] (%p297_p8), %v9733_v37  ;;  %12826 = vst [vmem:[#allocation25_spill] sm:$0xff] (%p297_p8), %v9737_v15  ;;  %v3155_v63 = vsub.f32 (%p297_p8), %v12801_v30, %v12832_v42  ;;  %v3198_v60 = vsub.f32 (%p297_p8), %v12794_v20, %v12833_v57  ;;  %v3199_v28 = vsub.f32 (%p297_p8), %v12796_v56, %v12834_v6  ;;  %v12835_v44 = vld [vmem:[#allocation45_spill] sm:$0xff] (%p297_p8)  ;;  %v12836_v25 = vld [vmem:[#allocation46_spill] sm:$0xff] (%p297_p8) }
 0x4a4   : > { %12827 = vst [vmem:[#allocation26_spill] sm:$0xff] (%p297_p8), %v9741_v39  ;;  %12828 = vst [vmem:[#allocation27_spill] sm:$0xff] (%p297_p8), %v9745_v32  ;;  %v3200_v21 = vsub.f32 (%p297_p8), %v12798_v2, %v12835_v44  ;;  %v3201_v4 = vsub.f32 (%p297_p8), %v12801_v30, %v12836_v25  ;;  %v3156_v8 = vmul.f32 (%p297_p8), %v3152_v35, %v3152_v35  ;;  %v12837_v55 = vld [vmem:[#allocation54_spill] sm:$0xff] (%p297_p8)  ;;  %v12838_v33 = vld [vmem:[#allocation47_spill] sm:$0xff] (%p297_p8) }
 0x4a5   : > { %v3157_v10 = vmul.f32 (%p297_p8), %v3153_v5, %v3153_v5  ;;  %v3158_v51 = vmul.f32 (%p297_p8), %v3154_v50, %v3154_v50  ;;  %v3159_v1 = vmul.f32 (%p297_p8), %v3155_v63, %v3155_v63  ;;  %v3202_v49 = vmul.f32 (%p297_p8), %v3198_v60, %v3198_v60  ;;  %v12839_v62 = vld [vmem:[#allocation48_spill] sm:$0xff] (%p297_p8)  ;;  %v12840_v0 = vld [vmem:[#allocation49_spill] sm:$0xff] (%p297_p8)  ;;  %v12841_v9 = vld [vmem:[#allocation50_spill] sm:$0xff] (%p297_p8) }
 0x4a6   : > { %v9764_v45 = vadd.f32 (%p297_p8), %v3156_v8, %v9733_v37  ;;  %v3203_v47 = vmul.f32 (%p297_p8), %v3199_v28, %v3199_v28  ;;  %v3204_v3 = vmul.f32 (%p297_p8), %v3200_v21, %v3200_v21  ;;  %v3205_v18 = vmul.f32 (%p297_p8), %v3201_v4, %v3201_v4  ;;  %v12842_v46 = vld [vmem:[#allocation51_spill] sm:$0xff] (%p297_p8)  ;;  %v12851_v44 = vld [vmem:[#allocation61_spill] sm:$0xff] (%p297_p8) }
 0x4a7   : > { %v9767_v53 = vadd.f32 %v3157_v10, %v9737_v15  ;;  %v9770_v34 = vadd.f32 %v3158_v51, %v9741_v39  ;;  %v9773_v29 = vadd.f32 %v3159_v1, %v9745_v32  ;;  %v9777_v19 = vmul.f32 %v3152_v35, %v12837_v55 }
 0x4a8   : > { %6240 = vrcp.f32 %v9764_v45  ;;  %v9781_v14 = vmul.f32 %v3153_v5, %v12837_v55  ;;  %v9784_v52 = vadd.f32 %v3202_v49, %v9733_v37  ;;  %v9787_v58 = vadd.f32 %v3203_v47, %v9737_v15  ;;  %v12843_v5 = vld [vmem:[#allocation55_spill] sm:$0xff]  ;;  %v12845_v47 = vld [vmem:[#allocation53_spill] sm:$0xff] }
 0x4a9   : > { %6242 = vrcp.f32 %v9767_v53  ;;  %v9791_v13 = vadd.f32 %v3204_v3, %v9741_v39  ;;  %v9794_v31 = vadd.f32 %v3205_v18, %v9745_v32  ;;  %v3252_v22 = vsub.f32 %v12794_v20, %v12838_v33 }
 0x4aa   : > { %6244 = vrcp.f32 %v9770_v34  ;;  %v3253_v38 = vsub.f32 %v12796_v56, %v12839_v62  ;;  %v3254_v12 = vsub.f32 %v12798_v2, %v12840_v0  ;;  %v3255_v17 = vsub.f32 %v12801_v30, %v12841_v9  ;;  %v12848_v62 = vld [vmem:[#allocation59_spill] sm:$0xff] }
 0x4ab   : > { %6246 = vrcp.f32 %v9773_v29  ;;  %v9806_v36 = vmul.f32 %v3154_v50, %v12837_v55  ;;  %v3256_v54 = vmul.f32 %v3252_v22, %v3252_v22  ;;  %v3306_v16 = vsub.f32 %v12794_v20, %v12842_v46 }
 0x4ac   : > { %6248 = vrcp.f32 %v9784_v52  ;;  %v3257_v43 = vmul.f32 %v3253_v38, %v3253_v38  ;;  %v3258_v41 = vmul.f32 %v3254_v12, %v3254_v12  ;;  %v3259_v27 = vmul.f32 %v3255_v17, %v3255_v17 }
 0x4ad   : > { %6250 = vrcp.f32 %v9787_v58  ;;  %v9813_v35 = vmul.f32 %v3155_v63, %v12837_v55  ;;  %v9817_v8 = vmul.f32 %v3198_v60, %v12843_v5  ;;  %v9820_v50 = vadd.f32 %v3256_v54, %v9733_v37  ;;  %v12844_v60 = vld [vmem:[#allocation52_spill] sm:$0xff] }
 0x4ae   : > { %6252 = vrcp.f32 %v9791_v13  ;;  %v9824_v10 = vadd.f32 %v3257_v43, %v9737_v15  ;;  %v9827_v51 = vadd.f32 %v3258_v41, %v9741_v39  ;;  %v9830_v1 = vadd.f32 %v3259_v27, %v9745_v32  ;;  %v12846_v54 = vld [vmem:[#allocation56_spill] sm:$0xff] }
 0x4af   : > { %6254 = vrcp.f32 %v9794_v31  ;;  %v9833_v63 = vmul.f32 %v3199_v28, %v12843_v5  ;;  %v3307_v49 = vsub.f32 %v12796_v56, %v12844_v60  ;;  %v3308_v3 = vsub.f32 %v12798_v2, %v12845_v47  ;;  %v12847_v60 = vld [vmem:[#allocation57_spill] sm:$0xff] }
 0x4b0   : > { %6256 = vrcp.f32 %v9820_v50  ;;  %v9841_v18 = vmul.f32 %v3200_v21, %v12843_v5  ;;  %v3309_v43 = vsub.f32 %v12801_v30, %v12846_v54  ;;  %v3310_v41 = vmul.f32 %v3306_v16, %v3306_v16 }
 0x4b1   : > { %6258 = vrcp.f32 %v9824_v10  ;;  %v9847_v28 = vmul.f32 %v3201_v4, %v12843_v5  ;;  %v3311_v27 = vmul.f32 %v3307_v49, %v3307_v49  ;;  %v3312_v46 = vmul.f32 %v3308_v3, %v3308_v3 }
 0x4b2   : > { %6260 = vrcp.f32 %v9827_v51  ;;  %v9852_v47 = vmul.f32 %v3252_v22, %v12847_v60  ;;  %v3313_v21 = vmul.f32 %v3309_v43, %v3309_v43  ;;  %v9855_v9 = vadd.f32 %v3310_v41, %v9733_v37  ;;  %v12849_v41 = vld [vmem:[#allocation60_spill] sm:$0xff] }
 0x4b3   : > { %6262 = vrcp.f32 %v9830_v1  ;;  %v9858_v0 = vmul.f32 %v3253_v38, %v12847_v60  ;;  %v9861_v54 = vadd.f32 %v3311_v27, %v9737_v15  ;;  %v9864_v4 = vadd.f32 %v3312_v46, %v9741_v39 }
 0x4b4   : > { %v9868_v33 = vsub.f32 %v12794_v20, %v12848_v62  ;;  %v9871_v22 = vadd.f32 %v3313_v21, %v9745_v32  ;;  %6264 = vrcp.f32 %v9855_v9  ;;  %v9876_v38 = vsub.f32 %v12796_v56, %v12849_v41  ;;  %v12853_v21 = vld [vmem:[#allocation62_spill] sm:$0xff] }
 0x4b5   : > { %v6241_v25 = vpop.eup %6240  ;;  %v9880_v27 = vsub.f32 %v12798_v2, %v12851_v44  ;;  %v9884_v62 = vmul.f32 %v3254_v12, %v12847_v60  ;;  %6266 = vrcp.f32 %v9861_v54  ;;  %v9889_v57 = vsub.f32 %v12801_v30, %v12853_v21 }
 0x4b6   : > { %12850 = vst [vmem:[#allocation94_spill] sm:$0xff] %v9876_v38  ;;  %v6243_v46 = vpop.eup %6242  ;;  %v3168_v6 = vmul.f32 %v6241_v25, %v9764_v45  ;;  %v9893_v7 = vmul.f32 %v3255_v17, %v12847_v60  ;;  %6268 = vrcp.f32 %v9864_v4  ;;  %v3364_v45 = vmul.f32 %v9868_v33, %v9868_v33 }
 0x4b7   : > { %12852 = vst [vmem:[#allocation95_spill] sm:$0xff] %v9880_v27  ;;  %12854 = vst [vmem:[#allocation96_spill] sm:$0xff] %v9889_v57  ;;  %v6245_v42 = vpop.eup %6244  ;;  %v3169_v41 = vmul.f32 %v6243_v46, %v9767_v53  ;;  %6270 = vrcp.f32 %v9871_v22  ;;  %v3365_v21 = vmul.f32 %v9876_v38, %v9876_v38  ;;  %v3366_v17 = vmul.f32 %v9880_v27, %v9880_v27 }
 0x4b8   : > { %v6247_v44 = vpop.eup %6246  ;;  %v3170_v12 = vmul.f32 %v6245_v42, %v9770_v34  ;;  %v3172_v11 = vsub.f32 2.0, %v3168_v6  ;;  %v3367_v59 = vmul.f32 %v9889_v57, %v9889_v57  ;;  %v9909_v6 = vmul.f32 %v3306_v16, %v7257_v61 }
 0x4b9   : > { %v6249_v40 = vpop.eup %6248  ;;  %v3171_v53 = vmul.f32 %v6247_v44, %v9773_v29  ;;  %v3173_v48 = vsub.f32 2.0, %v3169_v41  ;;  %v9912_v30 = vmul.f32 %v3307_v49, %v7257_v61  ;;  %v9916_v20 = vmul.f32 %v3308_v3, %v7257_v61 }
 0x4ba   : > { %v6251_v26 = vpop.eup %6250  ;;  %v3174_v24 = vsub.f32 2.0, %v3170_v12  ;;  %v3214_v34 = vmul.f32 %v6249_v40, %v9784_v52  ;;  %v3176_v29 = vmul.f32 %v6241_v25, %v3172_v11  ;;  %v9920_v52 = vmul.f32 %v3309_v43, %v7257_v61 }
 0x4bb   : > { %v6253_v2 = vpop.eup %6252  ;;  %v3175_v56 = vsub.f32 2.0, %v3171_v53  ;;  %v3215_v41 = vmul.f32 %v6251_v26, %v9787_v58  ;;  %v3177_v57 = vmul.f32 %v6243_v46, %v3173_v48  ;;  %v9923_v16 = vadd.f32 %v3364_v45, %v9733_v37 }
 0x4bc   : > { %v6255_v27 = vpop.eup %6254  ;;  %v3216_v12 = vmul.f32 %v6253_v2, %v9791_v13  ;;  %v9927_v11 = vadd.f32 %v3365_v21, %v9737_v15  ;;  %v9930_v25 = vadd.f32 %v3366_v17, %v9741_v39  ;;  %v9933_v58 = vadd.f32 %v3367_v59, %v9745_v32 }
 0x4bd   : > { %v6257_v49 = vpop.eup %6256  ;;  %v3217_v38 = vmul.f32 %v6255_v27, %v9794_v31  ;;  %v3178_v13 = vmul.f32 %v6245_v42, %v3174_v24  ;;  %v3185_v3 = vmul.f32 %v9777_v19, %v3176_v29  ;;  %v3218_v43 = vsub.f32 2.0, %v3214_v34 }
 0x4be   : > { %12855 = vst [vmem:[#allocation97_spill] sm:$0xff] %v9933_v58  ;;  %v6259_v48 = vpop.eup %6258  ;;  %v3219_v46 = vsub.f32 2.0, %v3215_v41  ;;  %v3179_v53 = vmul.f32 %v6247_v44, %v3175_v56  ;;  %v3189_v37 = vmul.f32 %v3176_v29, %v12837_v55  ;;  %v3220_v31 = vsub.f32 2.0, %v3216_v12 }
 0x4bf   : > { %v6261_v45 = vpop.eup %6260  ;;  %v3221_v61 = vsub.f32 2.0, %v3217_v38  ;;  %v3186_v15 = vmul.f32 %v9781_v14, %v3177_v57  ;;  %v3190_v17 = vmul.f32 %v3177_v57, %v12837_v55  ;;  %v3222_v39 = vmul.f32 %v6249_v40, %v3218_v43 }
 0x4c0   : > { %v6263_v21 = vpop.eup %6262  ;;  %v3223_v59 = vmul.f32 %v6251_v26, %v3219_v46  ;;  %v3224_v32 = vmul.f32 %v6253_v2, %v3220_v31  ;;  %v3268_v24 = vmul.f32 %v6257_v49, %v9820_v50  ;;  %v3269_v42 = vmul.f32 %v6259_v48, %v9824_v10 }
 0x4c1   : > { %v3225_v58 = vmul.f32 %v6255_v27, %v3221_v61  ;;  %v6265_v19 = vpop.eup %6264  ;;  %v3231_v56 = vmul.f32 %v9817_v8, %v3222_v39  ;;  %v3270_v38 = vmul.f32 %v6261_v45, %v9827_v51  ;;  %v3271_v34 = vmul.f32 %v6263_v21, %v9830_v1 }
 0x4c2   : > { %v3232_v44 = vmul.f32 %v9833_v63, %v3223_v59  ;;  %v6267_v14 = vpop.eup %6266  ;;  %v3187_v57 = vmul.f32 %v9806_v36, %v3178_v13  ;;  %v3188_v26 = vmul.f32 %v9813_v35, %v3179_v53  ;;  %v3191_v61 = vmul.f32 %v3178_v13, %v12837_v55 }
 0x4c3   : > { %v3192_v2 = vmul.f32 %v3179_v53, %v12837_v55  ;;  %v6269_v40 = vpop.eup %6268  ;;  %v3233_v50 = vmul.f32 %v9841_v18, %v3224_v32  ;;  %v3234_v8 = vmul.f32 %v9847_v28, %v3225_v58  ;;  %v3235_v10 = vmul.f32 %v3222_v39, %v12843_v5 }
 0x4c4   : > { %v3236_v51 = vmul.f32 %v3223_v59, %v12843_v5  ;;  %v6271_v63 = vpop.eup %6270  ;;  %v3237_v1 = vmul.f32 %v3224_v32, %v12843_v5  ;;  %v3238_v36 = vmul.f32 %v3225_v58, %v12843_v5  ;;  %v3239_v27 = vadd.f32 %v3231_v56, %v3185_v3 }
 0x4c5   : > { %v3240_v35 = vadd.f32 %v3232_v44, %v3186_v15  ;;  %v3272_v29 = vsub.f32 2.0, %v3268_v24  ;;  %v3273_v41 = vsub.f32 2.0, %v3269_v42  ;;  %v3274_v12 = vsub.f32 2.0, %v3270_v38 }
 0x4c6   : > { %v3275_v13 = vsub.f32 2.0, %v3271_v34  ;;  %v3322_v43 = vmul.f32 %v6265_v19, %v9855_v9  ;;  %v3323_v18 = vmul.f32 %v6267_v14, %v9861_v54  ;;  %v3324_v28 = vmul.f32 %v6269_v40, %v9864_v4 }
 0x4c7   : > { %v3325_v39 = vmul.f32 %v6271_v63, %v9871_v22  ;;  %v3243_v46 = vadd.f32 %v3235_v10, %v3189_v37  ;;  %v3276_v53 = vmul.f32 %v6257_v49, %v3272_v29  ;;  %v3277_v31 = vmul.f32 %v6259_v48, %v3273_v41 }
 0x4c8   : > { %v3278_v32 = vmul.f32 %v6261_v45, %v3274_v12  ;;  %v3241_v59 = vadd.f32 %v3233_v50, %v3187_v57  ;;  %v3279_v58 = vmul.f32 %v6263_v21, %v3275_v13  ;;  %v3326_v3 = vsub.f32 2.0, %v3322_v43  ;;  %v12859_v12 = vld [vmem:[#allocation64_spill] sm:$0xff]  ;;  %v12860_v13 = vld [vmem:[#allocation86_spill] sm:$0xff] }
 0x4c9   : > { %v3327_v15 = vsub.f32 2.0, %v3323_v18  ;;  %v3285_v24 = vmul.f32 %v9852_v47, %v3276_v53  ;;  %v3286_v42 = vmul.f32 %v9858_v0, %v3277_v31  ;;  %v3328_v56 = vsub.f32 2.0, %v3324_v28  ;;  %v12861_v18 = vld [vmem:[#allocation65_spill] sm:$0xff]  ;;  %v12862_v28 = vld [vmem:[#allocation87_spill] sm:$0xff] }
 0x4ca   : > { %v3287_v9 = vmul.f32 %v9884_v62, %v3278_v32  ;;  %v3242_v54 = vadd.f32 %v3234_v8, %v3188_v26  ;;  %v3288_v4 = vmul.f32 %v9893_v7, %v3279_v58  ;;  %v3289_v22 = vmul.f32 %v3276_v53, %v12847_v60  ;;  %v12863_v53 = vld [vmem:[#allocation66_spill] sm:$0xff] }
 0x4cb   : > { %v3329_v37 = vsub.f32 2.0, %v3325_v39  ;;  %v3244_v49 = vadd.f32 %v3236_v51, %v3190_v17  ;;  %v3245_v48 = vadd.f32 %v3237_v1, %v3191_v61  ;;  %v3246_v45 = vadd.f32 %v3238_v36, %v3192_v2 }
 0x4cc   : > { %v3290_v21 = vmul.f32 %v3277_v31, %v12847_v60  ;;  %v3291_v44 = vmul.f32 %v3278_v32, %v12847_v60  ;;  %v3292_v47 = vmul.f32 %v3279_v58, %v12847_v60  ;;  %v3293_v38 = vadd.f32 %v3285_v24, %v3239_v27  ;;  %v12857_v27 = vld [vmem:[#allocation94_spill] sm:$0xff]  ;;  %v12864_v31 = vld [vmem:[#allocation88_spill] sm:$0xff]  ;;  %v12866_v58 = vld [vmem:[#allocation89_spill] sm:$0xff] }
 0x4cd   : > { %v3294_v0 = vadd.f32 %v3286_v42, %v3240_v35  ;;  %v3295_v34 = vadd.f32 %v3287_v9, %v3241_v59  ;;  %v3330_v62 = vmul.f32 %v6265_v19, %v3326_v3  ;;  %v3331_v57 = vmul.f32 %v6267_v14, %v3327_v15  ;;  %v12856_v14 = vld [vmem:[#allocation58_spill] sm:$0xff]  ;;  %v12865_v59 = vld [vmem:[#allocation67_spill] sm:$0xff]  ;;  %v12868_v9 = vld [vmem:[#allocation68_spill] sm:$0xff] }
 0x4ce   : > { %v3332_v26 = vmul.f32 %v6269_v40, %v3328_v56  ;;  %v3296_v50 = vadd.f32 %v3288_v4, %v3242_v54  ;;  %v3297_v7 = vadd.f32 %v3289_v22, %v3243_v46  ;;  %v3333_v8 = vmul.f32 %v6271_v63, %v3329_v37  ;;  %v12867_v15 = vld [vmem:[#allocation97_spill] sm:$0xff] }
 0x4cf   : > { %6272 = vrcp.f32 %v9923_v16  ;;  %v3298_v17 = vadd.f32 %v3290_v21, %v3244_v49  ;;  %v3339_v61 = vmul.f32 %v9909_v6, %v3330_v62  ;;  %v3340_v2 = vmul.f32 %v9912_v30, %v3331_v57  ;;  %v12858_v30 = vld [vmem:[#allocation95_spill] sm:$0xff] }
 0x4d0   : > { %v3341_v10 = vmul.f32 %v9916_v20, %v3332_v26  ;;  %v3299_v51 = vadd.f32 %v3291_v44, %v3245_v48  ;;  %v3300_v1 = vadd.f32 %v3292_v47, %v3246_v45  ;;  %v3342_v36 = vmul.f32 %v9920_v52, %v3333_v8  ;;  %v12869_v48 = vld [vmem:[#allocation24_spill] sm:$0xff]  ;;  %v12870_v21 = vld [vmem:[#allocation25_spill] sm:$0xff]  ;;  %v12871_v47 = vld [vmem:[#allocation69_spill] sm:$0xff] }
 0x4d1   : > { %v9974_v19 = vmul.f32 %v9868_v33, %v7324_v23  ;;  %v3343_v40 = vmul.f32 %v3330_v62, %v12856_v14  ;;  %v3344_v63 = vmul.f32 %v3331_v57, %v12856_v14  ;;  %v9980_v35 = vmul.f32 %v12857_v27, %v7324_v23  ;;  %v12873_v62 = vld [vmem:[#allocation27_spill] sm:$0xff]  ;;  %v12877_v27 = vld [vmem:[#allocation76_spill] sm:$0xff] }
 0x4d2   : > { %v9984_v6 = vmul.f32 %v12858_v30, %v7324_v23  ;;  %v3345_v20 = vmul.f32 %v3332_v26, %v12856_v14  ;;  %v3346_v52 = vmul.f32 %v3333_v8, %v12856_v14  ;;  %v9988_v29 = vadd.f32 %v3339_v61, %v3293_v38  ;;  %v12874_v26 = vld [vmem:[#allocation70_spill] sm:$0xff] }
 0x4d3   : > { %v9990_v33 = vadd.f32 %v3340_v2, %v3294_v0  ;;  %v9992_v41 = vadd.f32 %v3341_v10, %v3295_v34  ;;  %6274 = vrcp.f32 %v9927_v11  ;;  %v3414_v43 = vsub.f32 %v12860_v13, %v12859_v12  ;;  %v12872_v0 = vld [vmem:[#allocation26_spill] sm:$0xff] }
 0x4d4   : > { %v3415_v39 = vsub.f32 %v12862_v28, %v12861_v18  ;;  %v9999_v46 = vadd.f32 %v3342_v36, %v3296_v50  ;;  %6276 = vrcp.f32 %v9930_v25  ;;  %v3416_v32 = vsub.f32 %v12864_v31, %v12863_v53  ;;  %v12876_v10 = vld [vmem:[#allocation96_spill] sm:$0xff] }
 0x4d5   : > { %v3417_v3 = vsub.f32 %v12866_v58, %v12865_v59  ;;  %6278 = vrcp.f32 %v12867_v15  ;;  %v3418_v24 = vmul.f32 %v3414_v43, %v3414_v43  ;;  %v3468_v56 = vsub.f32 %v12860_v13, %v12868_v9  ;;  %v12882_v12 = vld [vmem:[#allocation77_spill] sm:$0xff] }
 0x4d6   : > { %v3419_v42 = vmul.f32 %v3415_v39, %v3415_v39  ;;  %v10009_v54 = vadd.f32 %v3343_v40, %v3297_v7  ;;  %v10011_v4 = vadd.f32 %v3344_v63, %v3298_v17  ;;  %v3420_v22 = vmul.f32 %v3416_v32, %v3416_v32  ;;  %v12875_v7 = vld [vmem:[#allocation71_spill] sm:$0xff] }
 0x4d7   : > { %v3421_v37 = vmul.f32 %v3417_v3, %v3417_v3  ;;  %v10013_v49 = vadd.f32 %v3345_v20, %v3299_v51  ;;  %v10016_v45 = vadd.f32 %v3418_v24, %v12869_v48  ;;  %v3469_v38 = vsub.f32 %v12862_v28, %v12871_v47 }
 0x4d8   : > { %v10019_v44 = vadd.f32 %v3419_v42, %v12870_v21  ;;  %v10024_v34 = vadd.f32 %v3420_v22, %v12872_v0  ;;  %v3470_v50 = vsub.f32 %v12864_v31, %v12874_v26  ;;  %v3471_v8 = vsub.f32 %v12866_v58, %v12875_v7 }
 0x4d9   : > { %v10027_v57 = vadd.f32 %v3421_v37, %v12873_v62  ;;  %v10033_v17 = vadd.f32 %v3346_v52, %v3300_v1  ;;  %6280 = vrcp.f32 %v10016_v45  ;;  %v3472_v61 = vmul.f32 %v3468_v56, %v3468_v56 }
 0x4da   : > { %v3473_v2 = vmul.f32 %v3469_v38, %v3469_v38  ;;  %v10038_v51 = vmul.f32 %v12876_v10, %v7324_v23  ;;  %6282 = vrcp.f32 %v10019_v44  ;;  %v3474_v36 = vmul.f32 %v3470_v50, %v3470_v50  ;;  %v12880_v10 = vld [vmem:[#allocation74_spill] sm:$0xff] }
 0x4db   : > { %v3475_v40 = vmul.f32 %v3471_v8, %v3471_v8  ;;  %6284 = vrcp.f32 %v10024_v34  ;;  %v10043_v30 = vmul.f32 %v3414_v43, %v12877_v27  ;;  %v10046_v1 = vadd.f32 %v3472_v61, %v12869_v48  ;;  %v12878_v43 = vld [vmem:[#allocation72_spill] sm:$0xff]  ;;  %v12879_v61 = vld [vmem:[#allocation73_spill] sm:$0xff] }
 0x4dc   : > { %v6273_v63 = vpop.eup %6272  ;;  %v10049_v20 = vadd.f32 %v3473_v2, %v12870_v21  ;;  %6286 = vrcp.f32 %v10027_v57  ;;  %v10054_v24 = vadd.f32 %v3474_v36, %v12872_v0  ;;  %v10060_v22 = vmul.f32 %v3415_v39, %v12877_v27 }
 0x4dd   : > { %v3376_v52 = vmul.f32 %v6273_v63, %v9923_v16  ;;  %v10057_v42 = vadd.f32 %v3475_v40, %v12873_v62  ;;  %6288 = vrcp.f32 %v10046_v1  ;;  %v3522_v37 = vsub.f32 %v12860_v13, %v12878_v43  ;;  %v12881_v40 = vld [vmem:[#allocation75_spill] sm:$0xff] }
 0x4de   : > { %v3523_v2 = vsub.f32 %v12862_v28, %v12879_v61  ;;  %6290 = vrcp.f32 %v10049_v20  ;;  %v10070_v36 = vsub.f32 %v12864_v31, %v12880_v10  ;;  %v10074_v7 = vsub.f32 %v12866_v58, %v12881_v40 }
 0x4df   : > { %v3380_v16 = vsub.f32 2.0, %v3376_v52  ;;  %v10077_v39 = vmul.f32 %v3416_v32, %v12877_v27  ;;  %6292 = vrcp.f32 %v10054_v24  ;;  %v3526_v43 = vmul.f32 %v3522_v37, %v3522_v37 }
 0x4e0   : > { %v3527_v26 = vmul.f32 %v3523_v2, %v3523_v2  ;;  %v6275_v47 = vpop.eup %6274  ;;  %v10081_v52 = vmul.f32 %v3417_v3, %v12877_v27  ;;  %6294 = vrcp.f32 %v10057_v42  ;;  %v3528_v10 = vmul.f32 %v10070_v36, %v10070_v36 }
 0x4e1   : > { %v3529_v40 = vmul.f32 %v10074_v7, %v10074_v7  ;;  %v6277_v61 = vpop.eup %6276  ;;  %v3377_v32 = vmul.f32 %v6275_v47, %v9927_v11  ;;  %v3384_v9 = vmul.f32 %v6273_v63, %v3380_v16  ;;  %v10090_v59 = vadd.f32 %v3526_v43, %v12869_v48 }
 0x4e2   : > { %v10093_v53 = vadd.f32 %v3527_v26, %v12870_v21  ;;  %v6279_v3 = vpop.eup %6278  ;;  %v3378_v18 = vmul.f32 %v6277_v61, %v9930_v25  ;;  %v10097_v14 = vmul.f32 %v3468_v56, %v12882_v12  ;;  %v10100_v60 = vmul.f32 %v3469_v38, %v12882_v12 }
 0x4e3   : > { %v10103_v5 = vadd.f32 %v3528_v10, %v12872_v0  ;;  %v3379_v11 = vmul.f32 %v6279_v3, %v12867_v15  ;;  %v3381_v63 = vsub.f32 2.0, %v3377_v32  ;;  %v10107_v48 = vadd.f32 %v3529_v40, %v12873_v62 }
 0x4e4   : > { %6296 = vrcp.f32 %v10090_v59  ;;  %v3382_v21 = vsub.f32 2.0, %v3378_v18  ;;  %v3393_v25 = vmul.f32 %v9974_v19, %v3384_v9  ;;  %v10112_v56 = vmul.f32 %v3470_v50, %v12882_v12  ;;  %v12883_v18 = vld [vmem:[#allocation78_spill] sm:$0xff] }
 0x4e5   : > { %6298 = vrcp.f32 %v10093_v53  ;;  %v3383_v38 = vsub.f32 2.0, %v3379_v11  ;;  %v3385_v26 = vmul.f32 %v6275_v47, %v3381_v63  ;;  %v3397_v0 = vmul.f32 %v3384_v9, %v7324_v23 }
 0x4e6   : > { %6300 = vrcp.f32 %v10103_v5  ;;  %v6281_v15 = vpop.eup %6280  ;;  %v3386_v43 = vmul.f32 %v6277_v61, %v3382_v21  ;;  %v10118_v62 = vmul.f32 %v3471_v8, %v12882_v12  ;;  %v10122_v19 = vmul.f32 %v3522_v37, %v12883_v18 }
 0x4e7   : > { %6302 = vrcp.f32 %v10107_v48  ;;  %v6283_v50 = vpop.eup %6282  ;;  %v3387_v16 = vmul.f32 %v6279_v3, %v3383_v38  ;;  %v3394_v10 = vmul.f32 %v9980_v35, %v3385_v26  ;;  %v3398_v47 = vmul.f32 %v3385_v26, %v7324_v23 }
 0x4e8   : > { %v3430_v9 = vmul.f32 %v6281_v15, %v10016_v45  ;;  %v6285_v40 = vpop.eup %6284  ;;  %v3395_v32 = vmul.f32 %v9984_v6, %v3386_v43  ;;  %v3399_v61 = vmul.f32 %v3386_v43, %v7324_v23  ;;  %v3431_v8 = vmul.f32 %v6283_v50, %v10019_v44 }
 0x4e9   : > { %v10131_v11 = vmul.f32 %v3523_v2, %v12883_v18  ;;  %v6287_v37 = vpop.eup %6286  ;;  %v3396_v63 = vmul.f32 %v10038_v51, %v3387_v16  ;;  %v3400_v3 = vmul.f32 %v3387_v16, %v7324_v23  ;;  %v3401_v35 = vadd.f32 %v3393_v25, %v9988_v29 }
 0x4ea   : > { %v3405_v21 = vadd.f32 %v3397_v0, %v10009_v54  ;;  %v6289_v45 = vpop.eup %6288  ;;  %v3402_v38 = vadd.f32 %v3394_v10, %v9990_v33  ;;  %v3406_v6 = vadd.f32 %v3398_v47, %v10011_v4  ;;  %v3432_v26 = vmul.f32 %v6285_v40, %v10024_v34 }
 0x4eb   : > { %v3433_v44 = vmul.f32 %v6287_v37, %v10027_v57  ;;  %v6291_v2 = vpop.eup %6290  ;;  %v3403_v43 = vadd.f32 %v3395_v32, %v9992_v41  ;;  %v3407_v51 = vadd.f32 %v3399_v61, %v10013_v49  ;;  %v3434_v55 = vsub.f32 2.0, %v3430_v9 }
 0x4ec   : > { %v3435_v16 = vsub.f32 2.0, %v3431_v8  ;;  %v6293_v23 = vpop.eup %6292  ;;  %v3404_v29 = vadd.f32 %v3396_v63, %v9999_v46  ;;  %v3436_v54 = vsub.f32 2.0, %v3432_v26  ;;  %v3484_v33 = vmul.f32 %v6289_v45, %v10046_v1 }
 0x4ed   : > { %v3437_v25 = vsub.f32 2.0, %v3433_v44  ;;  %v6295_v0 = vpop.eup %6294  ;;  %v3438_v4 = vmul.f32 %v6281_v15, %v3434_v55  ;;  %v3485_v34 = vmul.f32 %v6291_v2, %v10049_v20  ;;  %v3486_v57 = vmul.f32 %v6293_v23, %v10054_v24 }
 0x4ee   : > { %v3439_v10 = vmul.f32 %v6283_v50, %v3435_v16  ;;  %v3440_v47 = vmul.f32 %v6285_v40, %v3436_v54  ;;  %v3487_v49 = vmul.f32 %v6295_v0, %v10057_v42  ;;  %v3488_v9 = vsub.f32 2.0, %v3484_v33 }
 0x4ef   : > { %v3441_v41 = vmul.f32 %v6287_v37, %v3437_v25  ;;  %v3447_v32 = vmul.f32 %v10043_v30, %v3438_v4  ;;  %v3451_v61 = vmul.f32 %v3438_v4, %v12877_v27  ;;  %v3408_v55 = vadd.f32 %v3400_v3, %v10033_v17 }
 0x4f0   : > { %v3448_v46 = vmul.f32 %v10060_v22, %v3439_v10  ;;  %v3452_v1 = vmul.f32 %v3439_v10, %v12877_v27  ;;  %v3449_v20 = vmul.f32 %v10077_v39, %v3440_v47  ;;  %v3453_v15 = vmul.f32 %v3440_v47, %v12877_v27 }
 0x4f1   : > { %v6297_v8 = vpop.eup %6296  ;;  %v3450_v24 = vmul.f32 %v10081_v52, %v3441_v41  ;;  %v3454_v42 = vmul.f32 %v3441_v41, %v12877_v27  ;;  %v3455_v40 = vadd.f32 %v3447_v32, %v3401_v35  ;;  %v3459_v37 = vadd.f32 %v3451_v61, %v3405_v21 }
 0x4f2   : > { %v6299_v50 = vpop.eup %6298  ;;  %v3456_v30 = vadd.f32 %v3448_v46, %v3402_v38  ;;  %v3457_v63 = vadd.f32 %v3449_v20, %v3403_v43  ;;  %v3460_v44 = vadd.f32 %v3452_v1, %v3406_v6  ;;  %v3461_v16 = vadd.f32 %v3453_v15, %v3407_v51 }
 0x4f3   : > { %v6301_v22 = vpop.eup %6300  ;;  %v3458_v26 = vadd.f32 %v3450_v24, %v3404_v29  ;;  %v3489_v25 = vsub.f32 2.0, %v3485_v34  ;;  %v3490_v17 = vsub.f32 2.0, %v3486_v57  ;;  %v3491_v3 = vsub.f32 2.0, %v3487_v49 }
 0x4f4   : > { %v6303_v54 = vpop.eup %6302  ;;  %v3492_v39 = vmul.f32 %v6289_v45, %v3488_v9  ;;  %v3538_v52 = vmul.f32 %v6297_v8, %v10090_v59  ;;  %v3539_v33 = vmul.f32 %v6299_v50, %v10093_v53  ;;  %v3540_v4 = vmul.f32 %v6301_v22, %v10103_v5 }
 0x4f5   : > { %v3541_v35 = vmul.f32 %v6303_v54, %v10107_v48  ;;  %v3493_v38 = vmul.f32 %v6291_v2, %v3489_v25  ;;  %v3494_v21 = vmul.f32 %v6293_v23, %v3490_v17  ;;  %v3495_v10 = vmul.f32 %v6295_v0, %v3491_v3  ;;  %v12885_v3 = vld [vmem:[#allocation91_spill] sm:$0xff] }
 0x4f6   : > { %v3501_v43 = vmul.f32 %v10097_v14, %v3492_v39  ;;  %v3505_v6 = vmul.f32 %v3492_v39, %v12882_v12  ;;  %v3542_v51 = vsub.f32 2.0, %v3538_v52  ;;  %v3543_v29 = vsub.f32 2.0, %v3539_v33  ;;  %v12886_v52 = vld [vmem:[#allocation92_spill] sm:$0xff] }
 0x4f7   : > { %v3544_v34 = vsub.f32 2.0, %v3540_v4  ;;  %v3502_v45 = vmul.f32 %v10100_v60, %v3493_v38  ;;  %v3503_v59 = vmul.f32 %v10112_v56, %v3494_v21  ;;  %v3504_v53 = vmul.f32 %v10118_v62, %v3495_v10 }
 0x4f8   : > { %v3506_v5 = vmul.f32 %v3493_v38, %v12882_v12  ;;  %v3462_v57 = vadd.f32 %v3454_v42, %v3408_v55  ;;  %v3507_v48 = vmul.f32 %v3494_v21, %v12882_v12  ;;  %v3508_v23 = vmul.f32 %v3495_v10, %v12882_v12 }
 0x4f9   : > { %v3553_v14 = vmul.f32 %v10070_v36, %v12883_v18  ;;  %v3509_v2 = vadd.f32 %v3501_v43, %v3455_v40  ;;  %v3510_v0 = vadd.f32 %v3502_v45, %v3456_v30  ;;  %v3513_v47 = vadd.f32 %v3505_v6, %v3459_v37 }
 0x4fa   : > { %v3554_v60 = vmul.f32 %v10074_v7, %v12883_v18  ;;  %v3511_v41 = vadd.f32 %v3503_v59, %v3457_v63  ;;  %v3512_v56 = vadd.f32 %v3504_v53, %v3458_v26  ;;  %v3545_v49 = vsub.f32 2.0, %v3541_v35  ;;  %v12887_v35 = vld [vmem:[#allocation93_spill] sm:$0xff] }
 0x4fb   : > { %v3546_v62 = vmul.f32 %v6297_v8, %v3542_v51  ;;  %v3514_v9 = vadd.f32 %v3506_v5, %v3460_v44  ;;  %v3515_v32 = vadd.f32 %v3507_v48, %v3461_v16  ;;  %v3547_v46 = vmul.f32 %v6299_v50, %v3543_v29 }
 0x4fc   : > { %v3548_v61 = vmul.f32 %v6301_v22, %v3544_v34  ;;  %v3516_v1 = vadd.f32 %v3508_v23, %v3462_v57  ;;  %v3549_v55 = vmul.f32 %v6303_v54, %v3545_v49  ;;  %v12884_v54 = vld [vmem:[#allocation90_spill] sm:$0xff] }
 0x4fd   : > { %v3555_v20 = vmul.f32 %v10122_v19, %v3546_v62  ;;  %v3559_v36 = vmul.f32 %v3546_v62, %v12883_v18  ;;  %v3556_v24 = vmul.f32 %v10131_v11, %v3547_v46  ;;  %v3560_v42 = vmul.f32 %v3547_v46, %v12883_v18 }
 0x4fe   : > { %v3557_v15 = vmul.f32 %v3553_v14, %v3548_v61  ;;  %v3561_v7 = vmul.f32 %v3548_v61, %v12883_v18  ;;  %v3558_v40 = vmul.f32 %v3554_v60, %v3549_v55  ;;  %v3562_v8 = vmul.f32 %v3549_v55, %v12883_v18 }
 0x4ff   : > { %v3563_v30 = vadd.f32 %v3555_v20, %v3509_v2  ;;  %v3567_v37 = vadd.f32 %v3559_v36, %v3513_v47  ;;  %v3564_v50 = vadd.f32 %v3556_v24, %v3510_v0  ;;  %v3568_v63 = vadd.f32 %v3560_v42, %v3514_v9 }
 0x500   : > { %v3565_v22 = vadd.f32 %v3557_v15, %v3511_v41  ;;  %v3569_v26 = vadd.f32 %v3561_v7, %v3515_v32  ;;  %v3566_v44 = vadd.f32 %v3558_v40, %v3512_v56  ;;  %v3570_v19 = vadd.f32 %v3562_v8, %v3516_v1 }
 0x501   : > { %v3571_v16 = vadd.f32 1.0, %v3563_v30  ;;  %v3575_v25 = vmul.f32 %v3567_v37, %v12884_v54  ;;  %v3572_v11 = vadd.f32 1.0, %v3564_v50  ;;  %v3576_v39 = vmul.f32 %v3568_v63, %v12885_v3 }
 0x502   : > { %v3573_v17 = vadd.f32 1.0, %v3565_v22  ;;  %v3577_v33 = vmul.f32 %v3569_v26, %v12886_v52  ;;  %v3574_v4 = vadd.f32 1.0, %v3566_v44  ;;  %v3578_v38 = vmul.f32 %v3570_v19, %v12887_v35 }
 0x503   : > { %v3579_v21 = vsub.f32 0.0, %v3575_v25  ;;  %v3583_v10 = vmul.f32 %v3571_v16, %v3571_v16  ;;  %v3580_v43 = vsub.f32 0.0, %v3576_v39  ;;  %v3584_v51 = vmul.f32 %v3572_v11, %v3572_v11 }
 0x504   : > { %v3581_v6 = vsub.f32 0.0, %v3577_v33  ;;  %v3585_v29 = vmul.f32 %v3573_v17, %v3573_v17  ;;  %v3582_v34 = vsub.f32 0.0, %v3578_v38  ;;  %v3586_v45 = vmul.f32 %v3574_v4, %v3574_v4 }
 0x505   : > { %v3587_v59 = vmul.f32 %v3579_v21, %v3579_v21  ;;  %v3588_v53 = vmul.f32 %v3580_v43, %v3580_v43 }
 0x506   : > { %v3589_v5 = vmul.f32 %v3581_v6, %v3581_v6  ;;  %v3590_v57 = vmul.f32 %v3582_v34, %v3582_v34 }
 0x507   : > { %v3591_v48 = vadd.f32 %v3587_v59, %v3583_v10  ;;  %v3592_v23 = vadd.f32 %v3588_v53, %v3584_v51  ;;  %v12897_v53 = vld [vmem:[#allocation42_spill] sm:$0xff] }
 0x508   : > { %v3593_v14 = vadd.f32 %v3589_v5, %v3585_v29  ;;  %v3594_v2 = vadd.f32 %v3590_v57, %v3586_v45 }
 0x509   : > { %6304 = vrcp.f32 %v3591_v48 }
 0x50a   : > { %6306 = vrcp.f32 %v3592_v23 }
 0x50b   : > { %6308 = vrcp.f32 %v3593_v14 }
 0x50c   : > { %6310 = vrcp.f32 %v3594_v2 }
 0x516   : > { %v6305_v0 = vpop.eup %6304 }
 0x517   : > { %v6307_v47 = vpop.eup %6306  ;;  %v3599_v60 = vmul.f32 %v6305_v0, %v3591_v48 }
 0x518   : > { %v6309_v41 = vpop.eup %6308  ;;  %v3600_v56 = vmul.f32 %v6307_v47, %v3592_v23 }
 0x519   : > { %v6311_v49 = vpop.eup %6310  ;;  %v3601_v62 = vmul.f32 %v6309_v41, %v3593_v14  ;;  %v3603_v9 = vsub.f32 2.0, %v3599_v60 }
 0x51a   : > { %v3602_v32 = vmul.f32 %v6311_v49, %v3594_v2  ;;  %v3604_v46 = vsub.f32 2.0, %v3600_v56 }
 0x51b   : > { %v3605_v61 = vsub.f32 2.0, %v3601_v62  ;;  %v3607_v1 = vmul.f32 %v6305_v0, %v3603_v9  ;;  %v12902_v9 = vld [vmem:[#allocation44_spill] sm:$0xff] }
 0x51c   : > { %v3606_v55 = vsub.f32 2.0, %v3602_v32  ;;  %v3608_v20 = vmul.f32 %v6307_v47, %v3604_v46 }
 0x51d   : > { %v3609_v36 = vmul.f32 %v6309_v41, %v3605_v61  ;;  %v3611_v24 = vmul.f32 %v3607_v1, %v3571_v16  ;;  %v3615_v15 = vmul.f32 %v3607_v1, %v3579_v21  ;;  %v12903_v61 = vld [vmem:[#allocation45_spill] sm:$0xff] }
 0x51e   : > { %v3610_v42 = vmul.f32 %v6311_v49, %v3606_v55  ;;  %v3612_v7 = vmul.f32 %v3608_v20, %v3572_v11  ;;  %v3616_v40 = vmul.f32 %v3608_v20, %v3580_v43  ;;  %v12901_v49 = vld [vmem:[#allocation43_spill] sm:$0xff]  ;;  %v12904_v55 = vld [vmem:[#allocation46_spill] sm:$0xff] }
 0x51f   : > { %v3613_v8 = vmul.f32 %v3609_v36, %v3573_v17  ;;  %v3617_v30 = vmul.f32 %v3609_v36, %v3581_v6  ;;  %v3619_v37 = vsub.f32 0.0, %v3615_v15  ;;  %v3623_v50 = vadd.f32 %v3611_v24, %v12860_v13  ;;  %v12893_v6 = vld [vmem:[#allocation40_spill] sm:$0xff] }
 0x520   : > { %v3614_v22 = vmul.f32 %v3610_v42, %v3574_v4  ;;  %v3618_v63 = vmul.f32 %v3610_v42, %v3582_v34  ;;  %v3620_v26 = vsub.f32 0.0, %v3616_v40  ;;  %v3624_v44 = vadd.f32 %v3612_v7, %v12862_v28  ;;  %v12891_v28 = vld [vmem:[#allocation39_spill] sm:$0xff] }
 0x521   : > { %v3621_v19 = vsub.f32 0.0, %v3617_v30  ;;  %v3625_v25 = vadd.f32 %v3613_v8, %v12864_v31  ;;  %v10186_v39 = vmul.f32 0.5, %v3623_v50  ;;  %v3631_v16 = vadd.f32 %v3619_v37, %v12884_v54  ;;  %v12905_v50 = vld [vmem:[#allocation47_spill] sm:$0xff] }
 0x522   : > { %v3622_v33 = vsub.f32 0.0, %v3618_v63  ;;  %v3626_v11 = vadd.f32 %v3614_v22, %v12866_v58  ;;  %v10190_v17 = vmul.f32 0.5, %v3624_v44  ;;  %v3632_v38 = vadd.f32 %v3620_v26, %v12885_v3  ;;  %v12895_v3 = vld [vmem:[#allocation41_spill] sm:$0xff]  ;;  %v12906_v63 = vld [vmem:[#allocation48_spill] sm:$0xff] }
 0x523   : > { %12888 = vst [vmem:[#allocation94_spill] sm:$0xff] %v10186_v39  ;;  %v10193_v13 = vmul.f32 0.5, %v3625_v25  ;;  %v3633_v4 = vadd.f32 %v3621_v19, %v12886_v52  ;;  %v3635_v21 = vmul.f32 0.5, %v3631_v16  ;;  %v3647_v10 = vsub.f32 %v10186_v39, %v12891_v28  ;;  %v12907_v44 = vld [vmem:[#allocation49_spill] sm:$0xff]  ;;  %v12908_v25 = vld [vmem:[#allocation50_spill] sm:$0xff] }
 0x524   : > { %12889 = vst [vmem:[#allocation95_spill] sm:$0xff] %v10190_v17  ;;  %v10198_v31 = vmul.f32 0.5, %v3626_v11  ;;  %v3634_v43 = vadd.f32 %v3622_v33, %v12887_v35  ;;  %v3636_v54 = vmul.f32 0.5, %v3632_v38  ;;  %v3648_v58 = vsub.f32 %v10190_v17, %v12893_v6  ;;  %v12909_v33 = vld [vmem:[#allocation51_spill] sm:$0xff]  ;;  %v12910_v38 = vld [vmem:[#allocation52_spill] sm:$0xff] }
 0x525   : > { %12890 = vst [vmem:[#allocation86_spill] sm:$0xff] %v10193_v13  ;;  %v3637_v51 = vmul.f32 0.5, %v3633_v4  ;;  %v10203_v29 = vmin.f32 %v3635_v21, -1e-09  ;;  %v10207_v34 = vsub.f32 %v10193_v13, %v12895_v3  ;;  %v3651_v52 = vmul.f32 %v3647_v10, %v3647_v10 }
 0x526   : > { %12892 = vst [vmem:[#allocation87_spill] sm:$0xff] %v10198_v31  ;;  %v3638_v45 = vmul.f32 0.5, %v3634_v43  ;;  %v10209_v59 = vmin.f32 %v3636_v54, -1e-09  ;;  %v10213_v5 = vsub.f32 %v10198_v31, %v12897_v53  ;;  %v3652_v35 = vmul.f32 %v3648_v58, %v3648_v58 }
 0x527   : > { %12894 = vst [vmem:[#allocation88_spill] sm:$0xff] %v10203_v29  ;;  %v10215_v57 = vmin.f32 %v3637_v51, -1e-09  ;;  %v10219_v48 = vmul.f32 %v10203_v29, %v10203_v29  ;;  %v3653_v23 = vmul.f32 %v10207_v34, %v10207_v34  ;;  %v3687_v62 = vsub.f32 %v10186_v39, %v12901_v49 }
 0x528   : > { %12896 = vst [vmem:[#allocation89_spill] sm:$0xff] %v10209_v59  ;;  %v10223_v14 = vmin.f32 %v3638_v45, -1e-09  ;;  %v10227_v2 = vmul.f32 %v10209_v59, %v10209_v59  ;;  %v3654_v0 = vmul.f32 %v10213_v5, %v10213_v5  ;;  %v3688_v32 = vsub.f32 %v10190_v17, %v12902_v9 }
 0x529   : > { %12898 = vst [vmem:[#allocation97_spill] sm:$0xff] %v10215_v57  ;;  %v10233_v47 = vmul.f32 %v10215_v57, %v10215_v57  ;;  %v3655_v60 = vadd.f32 %v3651_v52, %v10219_v48  ;;  %v3689_v1 = vsub.f32 %v10193_v13, %v12903_v61  ;;  %v10250_v20 = vsub.f32 %v10198_v31, %v12904_v55  ;;  %v12917_v57 = vld [vmem:[#allocation59_spill] sm:$0xff] }
 0x52a   : > { %12899 = vst [vmem:[#allocation24_spill] sm:$0xff] %v10223_v14  ;;  %v10238_v41 = vmul.f32 %v10223_v14, %v10223_v14  ;;  %v3656_v56 = vadd.f32 %v3652_v35, %v10227_v2  ;;  %v3691_v24 = vmul.f32 %v3687_v62, %v3687_v62  ;;  %v3692_v15 = vmul.f32 %v3688_v32, %v3688_v32 }
 0x52b   : > { %v3657_v46 = vadd.f32 %v3653_v23, %v10233_v47  ;;  %6312 = vrcp.f32 %v3655_v60  ;;  %v3693_v42 = vmul.f32 %v3689_v1, %v3689_v1  ;;  %v3694_v7 = vmul.f32 %v10250_v20, %v10250_v20 }
 0x52c   : > { %12900 = vst [vmem:[#allocation25_spill] sm:$0xff] %v10238_v41  ;;  %v3658_v36 = vadd.f32 %v3654_v0, %v10238_v41  ;;  %6314 = vrcp.f32 %v3656_v56  ;;  %v3695_v40 = vadd.f32 %v3691_v24, %v10219_v48  ;;  %v10257_v8 = vadd.f32 %v3692_v15, %v10227_v2  ;;  %v12911_v0 = vld [vmem:[#allocation53_spill] sm:$0xff]  ;;  %v12912_v15 = vld [vmem:[#allocation56_spill] sm:$0xff] }
 0x52d   : > { %6316 = vrcp.f32 %v3657_v46  ;;  %v10260_v30 = vadd.f32 %v3693_v42, %v10233_v47  ;;  %v10263_v37 = vadd.f32 %v3694_v7, %v10238_v41  ;;  %v3735_v22 = vsub.f32 %v10186_v39, %v12905_v50  ;;  %v12913_v7 = vld [vmem:[#allocation54_spill] sm:$0xff] }
 0x52e   : > { %6318 = vrcp.f32 %v3658_v36  ;;  %v3736_v26 = vsub.f32 %v10190_v17, %v12906_v63  ;;  %v3737_v19 = vsub.f32 %v10193_v13, %v12907_v44  ;;  %v3738_v16 = vsub.f32 %v10198_v31, %v12908_v25 }
 0x52f   : > { %6320 = vrcp.f32 %v3695_v40  ;;  %v3783_v11 = vsub.f32 %v10186_v39, %v12909_v33  ;;  %v10278_v4 = vsub.f32 %v10190_v17, %v12910_v38  ;;  %v3739_v21 = vmul.f32 %v3735_v22, %v3735_v22 }
 0x530   : > { %6322 = vrcp.f32 %v10257_v8  ;;  %v3740_v43 = vmul.f32 %v3736_v26, %v3736_v26  ;;  %v3741_v54 = vmul.f32 %v3737_v19, %v3737_v19  ;;  %v3742_v51 = vmul.f32 %v3738_v16, %v3738_v16 }
 0x531   : > { %6324 = vrcp.f32 %v10260_v30  ;;  %v10283_v52 = vadd.f32 %v3739_v21, %v10219_v48  ;;  %v3785_v24 = vsub.f32 %v10193_v13, %v12911_v0  ;;  %v3786_v42 = vsub.f32 %v10198_v31, %v12912_v15 }
 0x532   : > { %6326 = vrcp.f32 %v10263_v37  ;;  %v10286_v45 = vadd.f32 %v3740_v43, %v10227_v2  ;;  %v10289_v35 = vadd.f32 %v3741_v54, %v10233_v47  ;;  %v10292_v23 = vadd.f32 %v3742_v51, %v10238_v41 }
 0x533   : > { %v10299_v38 = vmul.f32 %v3647_v10, %v12913_v7  ;;  %6328 = vrcp.f32 %v10283_v52  ;;  %v3787_v21 = vmul.f32 %v3783_v11, %v3783_v11  ;;  %v3788_v43 = vmul.f32 %v10278_v4, %v10278_v4 }
 0x534   : > { %v10305_v54 = vmul.f32 %v3648_v58, %v12913_v7  ;;  %6330 = vrcp.f32 %v10286_v45  ;;  %v3789_v51 = vmul.f32 %v3785_v24, %v3785_v24  ;;  %v3790_v33 = vmul.f32 %v3786_v42, %v3786_v42 }
 0x535   : > { %v10310_v15 = vmul.f32 %v10207_v34, %v12913_v7  ;;  %6332 = vrcp.f32 %v10289_v35  ;;  %v10314_v10 = vadd.f32 %v3787_v21, %v10219_v48  ;;  %v10317_v25 = vadd.f32 %v3788_v43, %v10227_v2  ;;  %v12914_v21 = vld [vmem:[#allocation55_spill] sm:$0xff] }
 0x536   : > { %6334 = vrcp.f32 %v10292_v23  ;;  %v10321_v63 = vadd.f32 %v3789_v51, %v10233_v47  ;;  %v10324_v50 = vadd.f32 %v3790_v33, %v10238_v41  ;;  %v3678_v61 = vmul.f32 %v10213_v5, %v12913_v7 }
 0x537   : > { %v10329_v9 = vmul.f32 %v3687_v62, %v12914_v21  ;;  %6336 = vrcp.f32 %v10314_v10  ;;  %v10333_v49 = vmul.f32 %v3688_v32, %v12914_v21  ;;  %v10336_v51 = vmul.f32 %v3689_v1, %v12914_v21 }
 0x538   : > { %v6313_v0 = vpop.eup %6312  ;;  %6338 = vrcp.f32 %v10317_v25  ;;  %v10341_v5 = vmul.f32 %v10250_v20, %v12914_v21  ;;  %v10363_v59 = vsub.f32 %v10186_v39, %v12917_v57  ;;  %v12921_v39 = vld [vmem:[#allocation61_spill] sm:$0xff] }
 0x539   : > { %v6315_v44 = vpop.eup %6314  ;;  %v3663_v58 = vmul.f32 %v6313_v0, %v3655_v60  ;;  %6340 = vrcp.f32 %v10321_v63 }
 0x53a   : > { %v6317_v34 = vpop.eup %6316  ;;  %v3664_v55 = vmul.f32 %v6315_v44, %v3656_v56  ;;  %6342 = vrcp.f32 %v10324_v50  ;;  %12918 = vst [vmem:[#allocation26_spill] sm:$0xff] %v10363_v59 }
 0x53b   : > { %v6319_v43 = vpop.eup %6318  ;;  %v3665_v60 = vmul.f32 %v6317_v34, %v3657_v46  ;;  %v3667_v56 = vsub.f32 2.0, %v3663_v58  ;;  %v12915_v46 = vld [vmem:[#allocation57_spill] sm:$0xff] }
 0x53c   : > { %v3666_v33 = vmul.f32 %v6319_v43, %v3658_v36  ;;  %v6321_v62 = vpop.eup %6320  ;;  %v3668_v53 = vsub.f32 2.0, %v3664_v55  ;;  %v10345_v6 = vmul.f32 %v3735_v22, %v12915_v46  ;;  %v10349_v28 = vmul.f32 %v3736_v26, %v12915_v46 }
 0x53d   : > { %v3669_v3 = vsub.f32 2.0, %v3665_v60  ;;  %v6323_v32 = vpop.eup %6322  ;;  %v3703_v1 = vmul.f32 %v6321_v62, %v3695_v40  ;;  %v10352_v36 = vmul.f32 %v3737_v19, %v12915_v46  ;;  %v10355_v20 = vmul.f32 %v3738_v16, %v12915_v46  ;;  %v12916_v60 = vld [vmem:[#allocation58_spill] sm:$0xff] }
 0x53e   : > { %v6325_v58 = vpop.eup %6324  ;;  %v3670_v14 = vsub.f32 2.0, %v3666_v33  ;;  %v3704_v55 = vmul.f32 %v6323_v32, %v10257_v8  ;;  %v10359_v22 = vmul.f32 %v3783_v11, %v12916_v60  ;;  %v3671_v26 = vmul.f32 %v6313_v0, %v3667_v56  ;;  %v12919_v0 = vld [vmem:[#allocation60_spill] sm:$0xff] }
 0x53f   : > { %v6327_v40 = vpop.eup %6326  ;;  %v3705_v29 = vmul.f32 %v6325_v58, %v10260_v30  ;;  %v10368_v19 = vmul.f32 %v10278_v4, %v12916_v60  ;;  %v10371_v16 = vmul.f32 %v3785_v24, %v12916_v60  ;;  %v3672_v33 = vmul.f32 %v6315_v44, %v3668_v53  ;;  %v12923_v53 = vld [vmem:[#allocation62_spill] sm:$0xff] }
 0x540   : > { %v3673_v8 = vmul.f32 %v6317_v34, %v3669_v3  ;;  %v3706_v11 = vmul.f32 %v6327_v40, %v10263_v37  ;;  %v3707_v18 = vsub.f32 2.0, %v3703_v1  ;;  %v3708_v12 = vsub.f32 2.0, %v3704_v55  ;;  %v6329_v56 = vpop.eup %6328 }
 0x541   : > { %v3709_v27 = vsub.f32 2.0, %v3705_v29  ;;  %v10375_v57 = vmul.f32 %v3786_v42, %v12916_v60  ;;  %v10379_v30 = vsub.f32 %v10190_v17, %v12919_v0  ;;  %v3674_v4 = vmul.f32 %v6319_v43, %v3670_v14  ;;  %v6331_v37 = vpop.eup %6330 }
 0x542   : > { %v10383_v24 = vsub.f32 %v10193_v13, %v12921_v39  ;;  %v10387_v3 = vsub.f32 %v10198_v31, %v12923_v53  ;;  %v10391_v29 = vmul.f32 %v10363_v59, %v10363_v59  ;;  %v3679_v44 = vmul.f32 %v10299_v38, %v3671_v26  ;;  %v6333_v14 = vpop.eup %6332 }
 0x543   : > { %12920 = vst [vmem:[#allocation27_spill] sm:$0xff] %v10379_v30  ;;  %v3683_v42 = vmul.f32 %v3671_v26, %v12913_v7  ;;  %v3710_v34 = vsub.f32 2.0, %v3706_v11  ;;  %v3711_v1 = vmul.f32 %v6321_v62, %v3707_v18  ;;  %v3680_v43 = vmul.f32 %v10305_v54, %v3672_v33  ;;  %v6335_v0 = vpop.eup %6334 }
 0x544   : > { %12922 = vst [vmem:[#allocation96_spill] sm:$0xff] %v10383_v24  ;;  %12924 = vst [vmem:[#allocation90_spill] sm:$0xff] %v10387_v3  ;;  %v3681_v55 = vmul.f32 %v10310_v15, %v3673_v8  ;;  %v3684_v39 = vmul.f32 %v3672_v33, %v12913_v7  ;;  %v3685_v53 = vmul.f32 %v3673_v8, %v12913_v7  ;;  %v6337_v17 = vpop.eup %6336 }
 0x545   : > { %v3712_v31 = vmul.f32 %v6323_v32, %v3708_v12  ;;  %v3713_v59 = vmul.f32 %v6325_v58, %v3709_v27  ;;  %v3751_v13 = vmul.f32 %v6329_v56, %v10283_v52  ;;  %v3752_v38 = vmul.f32 %v6331_v37, %v10286_v45  ;;  %v6339_v62 = vpop.eup %6338 }
 0x546   : > { %v3682_v26 = vmul.f32 %v3678_v61, %v3674_v4  ;;  %v3686_v18 = vmul.f32 %v3674_v4, %v12913_v7  ;;  %v3836_v54 = vmul.f32 %v10379_v30, %v10379_v30  ;;  %v10406_v15 = vmul.f32 %v10383_v24, %v10383_v24  ;;  %v6341_v45 = vpop.eup %6340 }
 0x547   : > { %v3714_v33 = vmul.f32 %v6327_v40, %v3710_v34  ;;  %v3719_v12 = vmul.f32 %v10329_v9, %v3711_v1  ;;  %v3723_v27 = vmul.f32 %v3711_v1, %v12914_v21  ;;  %v3838_v52 = vmul.f32 %v10387_v3, %v10387_v3  ;;  %v6343_v11 = vpop.eup %6342 }
 0x548   : > { %v3720_v61 = vmul.f32 %v10333_v49, %v3712_v31  ;;  %v3721_v32 = vmul.f32 %v10336_v51, %v3713_v59  ;;  %v3753_v58 = vmul.f32 %v6333_v14, %v10289_v35  ;;  %v3754_v8 = vmul.f32 %v6335_v0, %v10292_v23 }
 0x549   : > { %v3724_v4 = vmul.f32 %v3712_v31, %v12914_v21  ;;  %v3725_v40 = vmul.f32 %v3713_v59, %v12914_v21  ;;  %v3755_v9 = vsub.f32 2.0, %v3751_v13  ;;  %v3756_v34 = vsub.f32 2.0, %v3752_v38 }
 0x54a   : > { %v3722_v1 = vmul.f32 %v10341_v5, %v3714_v33  ;;  %v3757_v7 = vsub.f32 2.0, %v3753_v58  ;;  %v3758_v3 = vsub.f32 2.0, %v3754_v8  ;;  %v3799_v24 = vmul.f32 %v6337_v17, %v10314_v10 }
 0x54b   : > { %v3759_v49 = vmul.f32 %v6329_v56, %v3755_v9  ;;  %v3760_v30 = vmul.f32 %v6331_v37, %v3756_v34  ;;  %v3800_v51 = vmul.f32 %v6339_v62, %v10317_v25  ;;  %v3801_v35 = vmul.f32 %v6341_v45, %v10321_v63  ;;  %v12930_v9 = vld [vmem:[#allocation95_spill] sm:$0xff] }
 0x54c   : > { %v3726_v23 = vmul.f32 %v3714_v33, %v12914_v21  ;;  %v3727_v60 = vadd.f32 %v3719_v12, %v3679_v44  ;;  %v3731_v31 = vadd.f32 %v3723_v27, %v3683_v42  ;;  %v3802_v59 = vmul.f32 %v6343_v11, %v10324_v50 }
 0x54d   : > { %v3728_v13 = vadd.f32 %v3720_v61, %v3680_v43  ;;  %v3732_v38 = vadd.f32 %v3724_v4, %v3684_v39  ;;  %v3761_v41 = vmul.f32 %v6333_v14, %v3757_v7  ;;  %v3762_v5 = vmul.f32 %v6335_v0, %v3758_v3 }
 0x54e   : > { %v3767_v58 = vmul.f32 %v10345_v6, %v3759_v49  ;;  %v3768_v10 = vmul.f32 %v10349_v28, %v3760_v30  ;;  %v3771_v56 = vmul.f32 %v3759_v49, %v12915_v46  ;;  %v3772_v25 = vmul.f32 %v3760_v30, %v12915_v46  ;;  %v12932_v49 = vld [vmem:[#allocation86_spill] sm:$0xff] }
 0x54f   : > { %v3729_v37 = vadd.f32 %v3721_v32, %v3681_v55  ;;  %v3803_v63 = vsub.f32 2.0, %v3799_v24  ;;  %v3804_v8 = vsub.f32 2.0, %v3800_v51  ;;  %v3805_v33 = vsub.f32 2.0, %v3801_v35  ;;  %v12933_v35 = vld [vmem:[#allocation67_spill] sm:$0xff] }
 0x550   : > { %v3730_v44 = vadd.f32 %v3722_v1, %v3682_v26  ;;  %v3769_v42 = vmul.f32 %v10352_v36, %v3761_v41  ;;  %v3770_v50 = vmul.f32 %v10355_v20, %v3762_v5  ;;  %v3806_v39 = vsub.f32 2.0, %v3802_v59  ;;  %v12931_v1 = vld [vmem:[#allocation66_spill] sm:$0xff] }
 0x551   : > { %v3733_v7 = vadd.f32 %v3725_v40, %v3685_v53  ;;  %v3734_v0 = vadd.f32 %v3726_v23, %v3686_v18  ;;  %v3773_v6 = vmul.f32 %v3761_v41, %v12915_v46  ;;  %v3774_v28 = vmul.f32 %v3762_v5, %v12915_v46  ;;  %v12934_v23 = vld [vmem:[#allocation87_spill] sm:$0xff] }
 0x552   : > { %v3775_v3 = vadd.f32 %v3767_v58, %v3727_v60  ;;  %v3776_v14 = vadd.f32 %v3768_v10, %v3728_v13  ;;  %v3779_v43 = vadd.f32 %v3771_v56, %v3731_v31  ;;  %v3780_v30 = vadd.f32 %v3772_v25, %v3732_v38  ;;  %v12935_v38 = vld [vmem:[#allocation68_spill] sm:$0xff] }
 0x553   : > { %v3807_v55 = vmul.f32 %v6337_v17, %v3803_v63  ;;  %v3808_v24 = vmul.f32 %v6339_v62, %v3804_v8  ;;  %v3809_v12 = vmul.f32 %v6341_v45, %v3805_v33  ;;  %v10434_v26 = vadd.f32 %v10391_v29, %v10219_v48  ;;  %v12925_v45 = vld [vmem:[#allocation25_spill] sm:$0xff]  ;;  %v12936_v33 = vld [vmem:[#allocation69_spill] sm:$0xff] }
 0x554   : > { %v3777_v36 = vadd.f32 %v3769_v42, %v3729_v37  ;;  %v3778_v20 = vadd.f32 %v3770_v50, %v3730_v44  ;;  %v3810_v27 = vmul.f32 %v6343_v11, %v3806_v39  ;;  %v10437_v53 = vadd.f32 %v3836_v54, %v10227_v2  ;;  %v12926_v11 = vld [vmem:[#allocation58_spill] sm:$0xff] }
 0x555   : > { %v3781_v41 = vadd.f32 %v3773_v6, %v3733_v7  ;;  %v3782_v18 = vadd.f32 %v3774_v28, %v3734_v0  ;;  %v3815_v60 = vmul.f32 %v10359_v22, %v3807_v55  ;;  %v10442_v61 = vadd.f32 %v10406_v15, %v10233_v47  ;;  %v12928_v15 = vld [vmem:[#allocation94_spill] sm:$0xff]  ;;  %v12937_v39 = vld [vmem:[#allocation70_spill] sm:$0xff] }
 0x556   : > { %v3816_v17 = vmul.f32 %v10368_v19, %v3808_v24  ;;  %v3817_v62 = vmul.f32 %v10371_v16, %v3809_v12  ;;  %v3818_v29 = vmul.f32 %v10375_v57, %v3810_v27  ;;  %v10448_v32 = vadd.f32 %v3838_v52, %v12925_v45  ;;  %v12927_v19 = vld [vmem:[#allocation64_spill] sm:$0xff]  ;;  %v12929_v57 = vld [vmem:[#allocation65_spill] sm:$0xff]  ;;  %v12938_v0 = vld [vmem:[#allocation71_spill] sm:$0xff] }
 0x557   : > { %v3819_v54 = vmul.f32 %v3807_v55, %v12926_v11  ;;  %v3820_v4 = vmul.f32 %v3808_v24, %v12926_v11  ;;  %v3821_v40 = vmul.f32 %v3809_v12, %v12926_v11  ;;  %6344 = vrcp.f32 %v10434_v26 }
 0x558   : > { %v3822_v22 = vmul.f32 %v3810_v27, %v12926_v11  ;;  %6346 = vrcp.f32 %v10437_v53  ;;  %v10458_v16 = vsub.f32 %v12928_v15, %v12927_v19  ;;  %v10462_v52 = vsub.f32 %v12930_v9, %v12929_v57 }
 0x559   : > { %v10464_v34 = vadd.f32 %v3815_v60, %v3775_v3  ;;  %6348 = vrcp.f32 %v10442_v61  ;;  %v10469_v51 = vsub.f32 %v12932_v49, %v12931_v1  ;;  %v10473_v31 = vsub.f32 %v12934_v23, %v12933_v35 }
 0x55a   : > { %6350 = vrcp.f32 %v10448_v32  ;;  %v3883_v59 = vmul.f32 %v10458_v16, %v10458_v16  ;;  %v3884_v13 = vmul.f32 %v10462_v52, %v10462_v52  ;;  %v10482_v5 = vsub.f32 %v12928_v15, %v12935_v38 }
 0x55b   : > { %v10484_v58 = vadd.f32 %v3816_v17, %v3776_v14  ;;  %v10486_v10 = vadd.f32 %v3817_v62, %v3777_v36  ;;  %v3885_v56 = vmul.f32 %v10469_v51, %v10469_v51  ;;  %v3886_v25 = vmul.f32 %v10473_v31, %v10473_v31  ;;  %v12940_v62 = vld [vmem:[#allocation73_spill] sm:$0xff] }
 0x55c   : > { %v10492_v37 = vadd.f32 %v3818_v29, %v3778_v20  ;;  %v10495_v63 = vadd.f32 %v3883_v59, %v10219_v48  ;;  %v10498_v8 = vadd.f32 %v3884_v13, %v10227_v2  ;;  %v10502_v44 = vsub.f32 %v12930_v9, %v12936_v33  ;;  %v12944_v59 = vld [vmem:[#allocation27_spill] sm:$0xff] }
 0x55d   : > { %v10505_v42 = vadd.f32 %v3885_v56, %v10233_v47  ;;  %v10508_v50 = vadd.f32 %v3886_v25, %v12925_v45  ;;  %v10512_v7 = vsub.f32 %v12932_v49, %v12937_v39  ;;  %v10516_v6 = vsub.f32 %v12934_v23, %v12938_v0  ;;  %v12945_v56 = vld [vmem:[#allocation75_spill] sm:$0xff] }
 0x55e   : > { %v10518_v28 = vadd.f32 %v3819_v54, %v3779_v43  ;;  %6352 = vrcp.f32 %v10495_v63  ;;  %v3931_v3 = vmul.f32 %v10482_v5, %v10482_v5  ;;  %v3932_v14 = vmul.f32 %v10502_v44, %v10502_v44  ;;  %v12941_v54 = vld [vmem:[#allocation74_spill] sm:$0xff] }
 0x55f   : > { %v10525_v55 = vadd.f32 %v3820_v4, %v3780_v30  ;;  %6354 = vrcp.f32 %v10498_v8  ;;  %v3933_v24 = vmul.f32 %v10512_v7, %v10512_v7  ;;  %v3934_v12 = vmul.f32 %v10516_v6, %v10516_v6  ;;  %v12942_v4 = vld [vmem:[#allocation63_spill] sm:$0xff] }
 0x560   : > { %v10532_v43 = vadd.f32 %v3821_v40, %v3781_v41  ;;  %6356 = vrcp.f32 %v10505_v42  ;;  %v10536_v36 = vadd.f32 %v3931_v3, %v10219_v48  ;;  %v10539_v20 = vadd.f32 %v3932_v14, %v10227_v2  ;;  %v12939_v41 = vld [vmem:[#allocation72_spill] sm:$0xff]  ;;  %v12943_v40 = vld [vmem:[#allocation26_spill] sm:$0xff] }
 0x561   : > { %v10541_v30 = vadd.f32 %v3822_v22, %v3782_v18  ;;  %6358 = vrcp.f32 %v10508_v50  ;;  %v10545_v27 = vadd.f32 %v3933_v24, %v10233_v47  ;;  %v10548_v60 = vadd.f32 %v3934_v12, %v12925_v45 }
 0x562   : > { %6360 = vrcp.f32 %v10536_v36  ;;  %v3975_v17 = vsub.f32 %v12928_v15, %v12939_v41  ;;  %v3976_v29 = vsub.f32 %v12930_v9, %v12940_v62  ;;  %v3977_v18 = vsub.f32 %v12932_v49, %v12941_v54  ;;  %v12946_v41 = vld [vmem:[#allocation96_spill] sm:$0xff] }
 0x563   : > { %v3859_v22 = vmul.f32 %v12943_v40, %v12942_v4  ;;  %v3860_v13 = vmul.f32 %v12944_v59, %v12942_v4  ;;  %6362 = vrcp.f32 %v10539_v20  ;;  %v3978_v25 = vsub.f32 %v12934_v23, %v12945_v56 }
 0x564   : > { %v6345_v3 = vpop.eup %6344  ;;  %6364 = vrcp.f32 %v10545_v27  ;;  %v3979_v14 = vmul.f32 %v3975_v17, %v3975_v17  ;;  %v3980_v24 = vmul.f32 %v3976_v29, %v3976_v29  ;;  %v3981_v12 = vmul.f32 %v3977_v18, %v3977_v18 }
 0x565   : > { %v6347_v62 = vpop.eup %6346  ;;  %v3847_v54 = vmul.f32 %v6345_v3, %v10434_v26  ;;  %v3861_v40 = vmul.f32 %v12946_v41, %v12942_v4  ;;  %6366 = vrcp.f32 %v10548_v60  ;;  %v3982_v59 = vmul.f32 %v3978_v25, %v3978_v25  ;;  %v12947_v41 = vld [vmem:[#allocation90_spill] sm:$0xff] }
 0x566   : > { %v6349_v0 = vpop.eup %6348  ;;  %v3848_v39 = vmul.f32 %v6347_v62, %v10437_v53  ;;  %v10571_v56 = vadd.f32 %v3979_v14, %v10219_v48  ;;  %v10574_v33 = vadd.f32 %v3980_v24, %v10227_v2  ;;  %v10577_v38 = vadd.f32 %v3981_v12, %v10233_v47  ;;  %v12948_v14 = vld [vmem:[#allocation76_spill] sm:$0xff]  ;;  %v12949_v12 = vld [vmem:[#allocation77_spill] sm:$0xff] }
 0x567   : > { %v6351_v35 = vpop.eup %6350  ;;  %v3849_v26 = vmul.f32 %v6349_v0, %v10442_v61  ;;  %v3851_v1 = vsub.f32 2.0, %v3847_v54  ;;  %v3862_v57 = vmul.f32 %v12947_v41, %v12942_v4  ;;  %v10583_v19 = vadd.f32 %v3982_v59, %v12925_v45 }
 0x568   : > { %v3850_v53 = vmul.f32 %v6351_v35, %v10448_v32  ;;  %v3852_v48 = vsub.f32 2.0, %v3848_v39  ;;  %v3907_v2 = vmul.f32 %v10458_v16, %v12948_v14  ;;  %6368 = vrcp.f32 %v10571_v56 }
 0x569   : > { %v3853_v47 = vsub.f32 2.0, %v3849_v26  ;;  %v3855_v24 = vmul.f32 %v6345_v3, %v3851_v1  ;;  %v3908_v61 = vmul.f32 %v10462_v52, %v12948_v14  ;;  %6370 = vrcp.f32 %v10574_v33 }
 0x56a   : > { %v3854_v54 = vsub.f32 2.0, %v3850_v53  ;;  %v3909_v45 = vmul.f32 %v10469_v51, %v12948_v14  ;;  %v3910_v32 = vmul.f32 %v10473_v31, %v12948_v14  ;;  %6372 = vrcp.f32 %v10577_v38 }
 0x56b   : > { %v6353_v39 = vpop.eup %6352  ;;  %v3856_v16 = vmul.f32 %v6347_v62, %v3852_v48  ;;  %v10599_v59 = vmul.f32 %v10482_v5, %v12949_v12  ;;  %v10603_v52 = vmul.f32 %v10502_v44, %v12949_v12  ;;  %6374 = vrcp.f32 %v10583_v19  ;;  %v12950_v44 = vld [vmem:[#allocation78_spill] sm:$0xff] }
 0x56c   : > { %v6355_v1 = vpop.eup %6354  ;;  %v3857_v3 = vmul.f32 %v6349_v0, %v3853_v47  ;;  %v3863_v51 = vmul.f32 %v3859_v22, %v3855_v24  ;;  %v3895_v26 = vmul.f32 %v6353_v39, %v10495_v63  ;;  %v10609_v31 = vmul.f32 %v10512_v7, %v12949_v12 }
 0x56d   : > { %v6357_v62 = vpop.eup %6356  ;;  %v3867_v41 = vmul.f32 %v3855_v24, %v12942_v4  ;;  %v10614_v5 = vmul.f32 %v10516_v6, %v12949_v12  ;;  %v10617_v53 = vmul.f32 %v3975_v17, %v12950_v44  ;;  %v10620_v48 = vmul.f32 %v3976_v29, %v12950_v44 }
 0x56e   : > { %v6359_v0 = vpop.eup %6358  ;;  %v3858_v22 = vmul.f32 %v6351_v35, %v3854_v54  ;;  %v3864_v63 = vmul.f32 %v3860_v13, %v3856_v16  ;;  %v10623_v47 = vmul.f32 %v3977_v18, %v12950_v44  ;;  %v10626_v7 = vmul.f32 %v3978_v25, %v12950_v44 }
 0x56f   : > { %v6361_v24 = vpop.eup %6360  ;;  %v3865_v11 = vmul.f32 %v3861_v40, %v3857_v3  ;;  %v3868_v6 = vmul.f32 %v3856_v16, %v12942_v4  ;;  %v3896_v46 = vmul.f32 %v6355_v1, %v10498_v8  ;;  %v3897_v17 = vmul.f32 %v6357_v62, %v10505_v42 }
 0x570   : > { %v6363_v21 = vpop.eup %6362  ;;  %v3869_v29 = vmul.f32 %v3857_v3, %v12942_v4  ;;  %v3871_v35 = vadd.f32 %v3863_v51, %v10464_v34  ;;  %v3898_v13 = vmul.f32 %v6359_v0, %v10508_v50  ;;  %v3899_v18 = vsub.f32 2.0, %v3895_v26 }
 0x571   : > { %v6365_v54 = vpop.eup %6364  ;;  %v3866_v23 = vmul.f32 %v3862_v57, %v3858_v22  ;;  %v3875_v25 = vadd.f32 %v3867_v41, %v10518_v28  ;;  %v3900_v49 = vsub.f32 2.0, %v3896_v46  ;;  %v3901_v40 = vsub.f32 2.0, %v3897_v17 }
 0x572   : > { %v6367_v9 = vpop.eup %6366  ;;  %v3870_v16 = vmul.f32 %v3858_v22, %v12942_v4  ;;  %v3902_v8 = vsub.f32 2.0, %v3898_v13  ;;  %v3943_v42 = vmul.f32 %v6361_v24, %v10536_v36  ;;  %v3944_v15 = vmul.f32 %v6363_v21, %v10539_v20 }
 0x573   : > { %v3872_v3 = vadd.f32 %v3864_v63, %v10484_v58  ;;  %v3903_v34 = vmul.f32 %v6353_v39, %v3899_v18  ;;  %v3904_v51 = vmul.f32 %v6355_v1, %v3900_v49  ;;  %v3905_v50 = vmul.f32 %v6357_v62, %v3901_v40 }
 0x574   : > { %v3873_v26 = vadd.f32 %v3865_v11, %v10486_v10  ;;  %v3906_v57 = vmul.f32 %v6359_v0, %v3902_v8  ;;  %v3945_v28 = vmul.f32 %v6365_v54, %v10545_v27  ;;  %v3946_v46 = vmul.f32 %v6367_v9, %v10548_v60 }
 0x575   : > { %v6369_v41 = vpop.eup %6368  ;;  %v3874_v22 = vadd.f32 %v3866_v23, %v10492_v37  ;;  %v3911_v17 = vmul.f32 %v3907_v2, %v3903_v34  ;;  %v3912_v13 = vmul.f32 %v3908_v61, %v3904_v51  ;;  %v3913_v36 = vmul.f32 %v3909_v45, %v3905_v50 }
 0x576   : > { %v6371_v4 = vpop.eup %6370  ;;  %v3876_v20 = vadd.f32 %v3868_v6, %v10525_v55  ;;  %v3914_v58 = vmul.f32 %v3910_v32, %v3906_v57  ;;  %v3947_v39 = vsub.f32 2.0, %v3943_v42  ;;  %v3948_v49 = vsub.f32 2.0, %v3944_v15 }
 0x577   : > { %v6373_v1 = vpop.eup %6372  ;;  %v3877_v11 = vadd.f32 %v3869_v29, %v10532_v43  ;;  %v3878_v10 = vadd.f32 %v3870_v16, %v10541_v30  ;;  %v3915_v27 = vmul.f32 %v3903_v34, %v12948_v14  ;;  %v3916_v60 = vmul.f32 %v3904_v51, %v12948_v14 }
 0x578   : > { %v6375_v62 = vpop.eup %6374  ;;  %v3917_v23 = vmul.f32 %v3905_v50, %v12948_v14  ;;  %v3918_v37 = vmul.f32 %v3906_v57, %v12948_v14  ;;  %v3949_v2 = vsub.f32 2.0, %v3945_v28  ;;  %v3950_v61 = vsub.f32 2.0, %v3946_v46 }
 0x579   : > { %v3919_v55 = vadd.f32 %v3911_v17, %v3871_v35  ;;  %v3920_v45 = vadd.f32 %v3912_v13, %v3872_v3  ;;  %v3921_v32 = vadd.f32 %v3913_v36, %v3873_v26  ;;  %v3922_v15 = vadd.f32 %v3914_v58, %v3874_v22 }
 0x57a   : > { %v3951_v0 = vmul.f32 %v6361_v24, %v3947_v39  ;;  %v3952_v63 = vmul.f32 %v6363_v21, %v3948_v49  ;;  %v3953_v43 = vmul.f32 %v6365_v54, %v3949_v2  ;;  %v3954_v6 = vmul.f32 %v6367_v9, %v3950_v61  ;;  %v12951_v61 = vld [vmem:[#allocation88_spill] sm:$0xff] }
 0x57b   : > { %v3991_v30 = vmul.f32 %v6369_v41, %v10571_v56  ;;  %v3992_v29 = vmul.f32 %v6371_v4, %v10574_v33  ;;  %v3993_v18 = vmul.f32 %v6373_v1, %v10577_v38  ;;  %v3994_v40 = vmul.f32 %v6375_v62, %v10583_v19 }
 0x57c   : > { %v3959_v16 = vmul.f32 %v10599_v59, %v3951_v0  ;;  %v3960_v8 = vmul.f32 %v10603_v52, %v3952_v63  ;;  %v3961_v35 = vmul.f32 %v10609_v31, %v3953_v43  ;;  %v3962_v42 = vmul.f32 %v10614_v5, %v3954_v6 }
 0x57d   : > { %v3923_v24 = vadd.f32 %v3915_v27, %v3875_v25  ;;  %v3924_v21 = vadd.f32 %v3916_v60, %v3876_v20  ;;  %v3925_v54 = vadd.f32 %v3917_v23, %v3877_v11  ;;  %v3926_v9 = vadd.f32 %v3918_v37, %v3878_v10 }
 0x57e   : > { %v3963_v56 = vmul.f32 %v3951_v0, %v12949_v12  ;;  %v3964_v33 = vmul.f32 %v3952_v63, %v12949_v12  ;;  %v3965_v38 = vmul.f32 %v3953_v43, %v12949_v12  ;;  %v3966_v19 = vmul.f32 %v3954_v6, %v12949_v12  ;;  %v12954_v63 = vld [vmem:[#allocation24_spill] sm:$0xff] }
 0x57f   : > { %v3995_v3 = vsub.f32 2.0, %v3991_v30  ;;  %v3996_v59 = vsub.f32 2.0, %v3992_v29  ;;  %v3997_v34 = vsub.f32 2.0, %v3993_v18  ;;  %v3998_v52 = vsub.f32 2.0, %v3994_v40 }
 0x580   : > { %v3967_v51 = vadd.f32 %v3959_v16, %v3919_v55  ;;  %v3968_v31 = vadd.f32 %v3960_v8, %v3920_v45  ;;  %v3969_v50 = vadd.f32 %v3961_v35, %v3921_v32  ;;  %v3970_v5 = vadd.f32 %v3962_v42, %v3922_v15  ;;  %v12952_v45 = vld [vmem:[#allocation89_spill] sm:$0xff] }
 0x581   : > { %v3999_v25 = vmul.f32 %v6369_v41, %v3995_v3  ;;  %v4000_v26 = vmul.f32 %v6371_v4, %v3996_v59  ;;  %v4001_v57 = vmul.f32 %v6373_v1, %v3997_v34  ;;  %v4002_v28 = vmul.f32 %v6375_v62, %v3998_v52  ;;  %v12953_v15 = vld [vmem:[#allocation97_spill] sm:$0xff] }
 0x582   : > { %v3971_v46 = vadd.f32 %v3963_v56, %v3923_v24  ;;  %v3972_v22 = vadd.f32 %v3964_v33, %v3924_v21  ;;  %v3973_v17 = vadd.f32 %v3965_v38, %v3925_v54  ;;  %v3974_v13 = vadd.f32 %v3966_v19, %v3926_v9 }
 0x583   : > { %v4007_v36 = vmul.f32 %v10617_v53, %v3999_v25  ;;  %v4008_v20 = vmul.f32 %v10620_v48, %v4000_v26  ;;  %v4009_v58 = vmul.f32 %v10623_v47, %v4001_v57  ;;  %v4010_v39 = vmul.f32 %v10626_v7, %v4002_v28 }
 0x584   : > { %v4011_v49 = vmul.f32 %v3999_v25, %v12950_v44  ;;  %v4012_v11 = vmul.f32 %v4000_v26, %v12950_v44  ;;  %v4013_v4 = vmul.f32 %v4001_v57, %v12950_v44  ;;  %v4014_v41 = vmul.f32 %v4002_v28, %v12950_v44 }
 0x585   : > { %v4015_v1 = vadd.f32 %v4007_v36, %v3967_v51  ;;  %v4016_v10 = vadd.f32 %v4008_v20, %v3968_v31  ;;  %v4017_v27 = vadd.f32 %v4009_v58, %v3969_v50  ;;  %v4018_v60 = vadd.f32 %v4010_v39, %v3970_v5 }
 0x586   : > { %v4019_v62 = vadd.f32 %v4011_v49, %v3971_v46  ;;  %v4020_v53 = vadd.f32 %v4012_v11, %v3972_v22  ;;  %v4021_v23 = vadd.f32 %v4013_v4, %v3973_v17  ;;  %v4022_v48 = vadd.f32 %v4014_v41, %v3974_v13  ;;  %v12955_v4 = vld [vmem:[#allocation94_spill] sm:$0xff] }
 0x587   : > { %v4023_v37 = vadd.f32 1.0, %v4015_v1  ;;  %v4024_v47 = vadd.f32 1.0, %v4016_v10  ;;  %v4025_v2 = vadd.f32 1.0, %v4017_v27  ;;  %v4026_v7 = vadd.f32 1.0, %v4018_v60  ;;  %v12956_v60 = vld [vmem:[#allocation95_spill] sm:$0xff] }
 0x588   : > { %v4027_v55 = vmul.f32 %v4019_v62, %v12951_v61  ;;  %v4028_v32 = vmul.f32 %v4020_v53, %v12952_v45  ;;  %v4029_v0 = vmul.f32 %v4021_v23, %v12953_v15  ;;  %v4030_v43 = vmul.f32 %v4022_v48, %v12954_v63  ;;  %v12957_v23 = vld [vmem:[#allocation86_spill] sm:$0xff] }
 0x589   : > { %v4035_v6 = vmul.f32 %v4023_v37, %v4023_v37  ;;  %v4036_v30 = vmul.f32 %v4024_v47, %v4024_v47  ;;  %v4037_v29 = vmul.f32 %v4025_v2, %v4025_v2  ;;  %v4038_v35 = vmul.f32 %v4026_v7, %v4026_v7 }
 0x58a   : > { %v4031_v18 = vsub.f32 0.0, %v4027_v55  ;;  %v4032_v40 = vsub.f32 0.0, %v4028_v32  ;;  %v4033_v16 = vsub.f32 0.0, %v4029_v0  ;;  %v4034_v8 = vsub.f32 0.0, %v4030_v43 }
 0x58c   : > { %v4039_v42 = vmul.f32 %v4031_v18, %v4031_v18  ;;  %v4040_v24 = vmul.f32 %v4032_v40, %v4032_v40  ;;  %v4041_v21 = vmul.f32 %v4033_v16, %v4033_v16  ;;  %v4042_v54 = vmul.f32 %v4034_v8, %v4034_v8 }
 0x58e   : > { %v4043_v9 = vadd.f32 %v4039_v42, %v4035_v6  ;;  %v4044_v56 = vadd.f32 %v4040_v24, %v4036_v30  ;;  %v4045_v33 = vadd.f32 %v4041_v21, %v4037_v29  ;;  %v4046_v38 = vadd.f32 %v4042_v54, %v4038_v35  ;;  %v12962_v29 = vld [vmem:[#allocation39_spill] sm:$0xff] }
 0x590   : > { %6376 = vrcp.f32 %v4043_v9 }
 0x591   : > { %6378 = vrcp.f32 %v4044_v56 }
 0x592   : > { %6380 = vrcp.f32 %v4045_v33 }
 0x593   : > { %6382 = vrcp.f32 %v4046_v38 }
 0x59d   : > { %v6377_v19 = vpop.eup %6376 }
 0x59e   : > { %v6379_v3 = vpop.eup %6378  ;;  %v4051_v59 = vmul.f32 %v6377_v19, %v4043_v9 }
 0x59f   : > { %v6381_v34 = vpop.eup %6380  ;;  %v4052_v52 = vmul.f32 %v6379_v3, %v4044_v56  ;;  %v12968_v56 = vld [vmem:[#allocation42_spill] sm:$0xff] }
 0x5a0   : > { %v6383_v51 = vpop.eup %6382  ;;  %v4053_v31 = vmul.f32 %v6381_v34, %v4045_v33  ;;  %v4055_v50 = vsub.f32 2.0, %v4051_v59 }
 0x5a1   : > { %v4054_v5 = vmul.f32 %v6383_v51, %v4046_v38  ;;  %v4056_v25 = vsub.f32 2.0, %v4052_v52 }
 0x5a2   : > { %v4057_v26 = vsub.f32 2.0, %v4053_v31  ;;  %v4059_v57 = vmul.f32 %v6377_v19, %v4055_v50 }
 0x5a3   : > { %v4058_v28 = vsub.f32 2.0, %v4054_v5  ;;  %v4060_v46 = vmul.f32 %v6379_v3, %v4056_v25  ;;  %v12972_v25 = vld [vmem:[#allocation43_spill] sm:$0xff] }
 0x5a4   : > { %v4061_v22 = vmul.f32 %v6381_v34, %v4057_v26  ;;  %v4063_v17 = vmul.f32 %v4059_v57, %v4023_v37  ;;  %v4067_v13 = vmul.f32 %v4059_v57, %v4031_v18  ;;  %v12973_v57 = vld [vmem:[#allocation44_spill] sm:$0xff] }
 0x5a5   : > { %v4062_v36 = vmul.f32 %v6383_v51, %v4058_v28  ;;  %v4064_v20 = vmul.f32 %v4060_v46, %v4024_v47  ;;  %v4068_v58 = vmul.f32 %v4060_v46, %v4032_v40  ;;  %v12959_v47 = vld [vmem:[#allocation87_spill] sm:$0xff] }
 0x5a6   : > { %v4065_v39 = vmul.f32 %v4061_v22, %v4025_v2  ;;  %v4069_v49 = vmul.f32 %v4061_v22, %v4033_v16  ;;  %v4071_v11 = vsub.f32 0.0, %v4067_v13  ;;  %v4075_v41 = vadd.f32 %v4063_v17, %v12955_v4  ;;  %v12974_v22 = vld [vmem:[#allocation45_spill] sm:$0xff]  ;;  %v12975_v13 = vld [vmem:[#allocation46_spill] sm:$0xff] }
 0x5a7   : > { %v4066_v1 = vmul.f32 %v4062_v36, %v4026_v7  ;;  %v4070_v10 = vmul.f32 %v4062_v36, %v4034_v8  ;;  %v4072_v27 = vsub.f32 0.0, %v4068_v58  ;;  %v4076_v62 = vadd.f32 %v4064_v20, %v12956_v60  ;;  %v12964_v8 = vld [vmem:[#allocation40_spill] sm:$0xff] }
 0x5a8   : > { %v4073_v53 = vsub.f32 0.0, %v4069_v49  ;;  %v4077_v48 = vadd.f32 %v4065_v39, %v12957_v23  ;;  %v10677_v55 = vmul.f32 0.5, %v4075_v41  ;;  %v4083_v37 = vadd.f32 %v4071_v11, %v12951_v61  ;;  %v12978_v23 = vld [vmem:[#allocation49_spill] sm:$0xff] }
 0x5a9   : > { %v4074_v32 = vsub.f32 0.0, %v4070_v10  ;;  %v4078_v0 = vadd.f32 %v4066_v1, %v12959_v47  ;;  %v10681_v2 = vmul.f32 0.5, %v4076_v62  ;;  %v4084_v43 = vadd.f32 %v4072_v27, %v12952_v45  ;;  %v12966_v45 = vld [vmem:[#allocation41_spill] sm:$0xff]  ;;  %v12976_v27 = vld [vmem:[#allocation47_spill] sm:$0xff]  ;;  %v12977_v62 = vld [vmem:[#allocation48_spill] sm:$0xff] }
 0x5aa   : > { %12958 = vst [vmem:[#allocation91_spill] sm:$0xff] %v10677_v55  ;;  %v10684_v6 = vmul.f32 0.5, %v4077_v48  ;;  %v4085_v7 = vadd.f32 %v4073_v53, %v12953_v15  ;;  %v4087_v30 = vmul.f32 0.5, %v4083_v37  ;;  %v4099_v18 = vsub.f32 %v10677_v55, %v12962_v29  ;;  %v12979_v37 = vld [vmem:[#allocation50_spill] sm:$0xff]  ;;  %v12980_v47 = vld [vmem:[#allocation51_spill] sm:$0xff] }
 0x5ab   : > { %12960 = vst [vmem:[#allocation92_spill] sm:$0xff] %v10681_v2  ;;  %v10689_v40 = vmul.f32 0.5, %v4078_v0  ;;  %v4086_v16 = vadd.f32 %v4074_v32, %v12954_v63  ;;  %v4088_v61 = vmul.f32 0.5, %v4084_v43  ;;  %v4100_v35 = vsub.f32 %v10681_v2, %v12964_v8  ;;  %v12981_v43 = vld [vmem:[#allocation52_spill] sm:$0xff] }
 0x5ac   : > { %12961 = vst [vmem:[#allocation93_spill] sm:$0xff] %v10684_v6  ;;  %v4089_v42 = vmul.f32 0.5, %v4085_v7  ;;  %v10694_v24 = vmin.f32 %v4087_v30, -1e-09  ;;  %v10698_v21 = vsub.f32 %v10684_v6, %v12966_v45  ;;  %v4103_v15 = vmul.f32 %v4099_v18, %v4099_v18 }
 0x5ad   : > { %12963 = vst [vmem:[#allocation25_spill] sm:$0xff] %v10689_v40  ;;  %v4090_v54 = vmul.f32 0.5, %v4086_v16  ;;  %v10700_v9 = vmin.f32 %v4088_v61, -1e-09  ;;  %v10704_v33 = vsub.f32 %v10689_v40, %v12968_v56  ;;  %v4104_v63 = vmul.f32 %v4100_v35, %v4100_v35 }
 0x5ae   : > { %12965 = vst [vmem:[#allocation26_spill] sm:$0xff] %v10694_v24  ;;  %v10706_v38 = vmin.f32 %v4089_v42, -1e-09  ;;  %v10710_v19 = vmul.f32 %v10694_v24, %v10694_v24  ;;  %v4105_v3 = vmul.f32 %v10698_v21, %v10698_v21  ;;  %v4139_v26 = vsub.f32 %v10677_v55, %v12972_v25 }
 0x5af   : > { %12967 = vst [vmem:[#allocation27_spill] sm:$0xff] %v10700_v9  ;;  %v10714_v59 = vmin.f32 %v4090_v54, -1e-09  ;;  %v10718_v34 = vmul.f32 %v10700_v9, %v10700_v9  ;;  %v4106_v52 = vmul.f32 %v10704_v33, %v10704_v33  ;;  %v4140_v28 = vsub.f32 %v10681_v2, %v12973_v57 }
 0x5b0   : > { %12969 = vst [vmem:[#allocation96_spill] sm:$0xff] %v10706_v38  ;;  %v10724_v51 = vmul.f32 %v10706_v38, %v10706_v38  ;;  %v4107_v31 = vadd.f32 %v4103_v15, %v10710_v19  ;;  %v4141_v17 = vsub.f32 %v10684_v6, %v12974_v22  ;;  %v10741_v36 = vsub.f32 %v10689_v40, %v12975_v13  ;;  %v12988_v38 = vld [vmem:[#allocation59_spill] sm:$0xff] }
 0x5b1   : > { %12970 = vst [vmem:[#allocation90_spill] sm:$0xff] %v10714_v59  ;;  %v10729_v50 = vmul.f32 %v10714_v59, %v10714_v59  ;;  %v4108_v5 = vadd.f32 %v4104_v63, %v10718_v34  ;;  %v4143_v58 = vmul.f32 %v4139_v26, %v4139_v26  ;;  %v4144_v39 = vmul.f32 %v4140_v28, %v4140_v28 }
 0x5b2   : > { %v4109_v46 = vadd.f32 %v4105_v3, %v10724_v51  ;;  %6384 = vrcp.f32 %v4107_v31  ;;  %v4145_v49 = vmul.f32 %v4141_v17, %v4141_v17  ;;  %v4146_v11 = vmul.f32 %v10741_v36, %v10741_v36 }
 0x5b3   : > { %12971 = vst [vmem:[#allocation88_spill] sm:$0xff] %v10729_v50  ;;  %v4110_v20 = vadd.f32 %v4106_v52, %v10729_v50  ;;  %6386 = vrcp.f32 %v4108_v5  ;;  %v4147_v4 = vadd.f32 %v4143_v58, %v10710_v19  ;;  %v10748_v41 = vadd.f32 %v4144_v39, %v10718_v34  ;;  %v12982_v52 = vld [vmem:[#allocation53_spill] sm:$0xff]  ;;  %v12983_v39 = vld [vmem:[#allocation56_spill] sm:$0xff] }
 0x5b4   : > { %6388 = vrcp.f32 %v4109_v46  ;;  %v10751_v1 = vadd.f32 %v4145_v49, %v10724_v51  ;;  %v10754_v10 = vadd.f32 %v4146_v11, %v10729_v50  ;;  %v4187_v60 = vsub.f32 %v10677_v55, %v12976_v27  ;;  %v12984_v11 = vld [vmem:[#allocation54_spill] sm:$0xff] }
 0x5b5   : > { %6390 = vrcp.f32 %v4110_v20  ;;  %v4188_v53 = vsub.f32 %v10681_v2, %v12977_v62  ;;  %v4189_v48 = vsub.f32 %v10684_v6, %v12978_v23  ;;  %v4190_v32 = vsub.f32 %v10689_v40, %v12979_v37 }
 0x5b6   : > { %6392 = vrcp.f32 %v4147_v4  ;;  %v4235_v0 = vsub.f32 %v10677_v55, %v12980_v47  ;;  %v10769_v7 = vsub.f32 %v10681_v2, %v12981_v43  ;;  %v4191_v30 = vmul.f32 %v4187_v60, %v4187_v60 }
 0x5b7   : > { %6394 = vrcp.f32 %v10748_v41  ;;  %v4192_v16 = vmul.f32 %v4188_v53, %v4188_v53  ;;  %v4193_v61 = vmul.f32 %v4189_v48, %v4189_v48  ;;  %v4194_v42 = vmul.f32 %v4190_v32, %v4190_v32 }
 0x5b8   : > { %6396 = vrcp.f32 %v10751_v1  ;;  %v10774_v15 = vadd.f32 %v4191_v30, %v10710_v19  ;;  %v4237_v58 = vsub.f32 %v10684_v6, %v12982_v52  ;;  %v4238_v49 = vsub.f32 %v10689_v40, %v12983_v39 }
 0x5b9   : > { %6398 = vrcp.f32 %v10754_v10  ;;  %v10777_v54 = vadd.f32 %v4192_v16, %v10718_v34  ;;  %v10780_v63 = vadd.f32 %v4193_v61, %v10724_v51  ;;  %v10783_v3 = vadd.f32 %v4194_v42, %v10729_v50 }
 0x5ba   : > { %v10790_v43 = vmul.f32 %v4099_v18, %v12984_v11  ;;  %6400 = vrcp.f32 %v10774_v15  ;;  %v4239_v30 = vmul.f32 %v4235_v0, %v4235_v0  ;;  %v4240_v16 = vmul.f32 %v10769_v7, %v10769_v7 }
 0x5bb   : > { %v10796_v61 = vmul.f32 %v4100_v35, %v12984_v11  ;;  %6402 = vrcp.f32 %v10777_v54  ;;  %v4241_v42 = vmul.f32 %v4237_v58, %v4237_v58  ;;  %v4242_v47 = vmul.f32 %v4238_v49, %v4238_v49 }
 0x5bc   : > { %v10801_v39 = vmul.f32 %v10698_v21, %v12984_v11  ;;  %6404 = vrcp.f32 %v10780_v63  ;;  %v10805_v18 = vadd.f32 %v4239_v30, %v10710_v19  ;;  %v10808_v37 = vadd.f32 %v4240_v16, %v10718_v34  ;;  %v12985_v30 = vld [vmem:[#allocation55_spill] sm:$0xff] }
 0x5bd   : > { %6406 = vrcp.f32 %v10783_v3  ;;  %v10812_v62 = vadd.f32 %v4241_v42, %v10724_v51  ;;  %v10815_v27 = vadd.f32 %v4242_v47, %v10729_v50  ;;  %v4130_v22 = vmul.f32 %v10704_v33, %v12984_v11 }
 0x5be   : > { %v10820_v57 = vmul.f32 %v4139_v26, %v12985_v30  ;;  %6408 = vrcp.f32 %v10805_v18  ;;  %v10824_v25 = vmul.f32 %v4140_v28, %v12985_v30  ;;  %v10827_v42 = vmul.f32 %v4141_v17, %v12985_v30 }
 0x5bf   : > { %v6385_v52 = vpop.eup %6384  ;;  %6410 = vrcp.f32 %v10808_v37  ;;  %v10832_v33 = vmul.f32 %v10741_v36, %v12985_v30  ;;  %v10854_v9 = vsub.f32 %v10677_v55, %v12988_v38  ;;  %v12992_v55 = vld [vmem:[#allocation61_spill] sm:$0xff] }
 0x5c0   : > { %v6387_v23 = vpop.eup %6386  ;;  %v4115_v35 = vmul.f32 %v6385_v52, %v4107_v31  ;;  %6412 = vrcp.f32 %v10812_v62 }
 0x5c1   : > { %v6389_v21 = vpop.eup %6388  ;;  %v4116_v13 = vmul.f32 %v6387_v23, %v4108_v5  ;;  %6414 = vrcp.f32 %v10815_v27  ;;  %12989 = vst [vmem:[#allocation89_spill] sm:$0xff] %v10854_v9 }
 0x5c2   : > { %v6391_v16 = vpop.eup %6390  ;;  %v4117_v31 = vmul.f32 %v6389_v21, %v4109_v46  ;;  %v4119_v5 = vsub.f32 2.0, %v4115_v35  ;;  %v12986_v46 = vld [vmem:[#allocation57_spill] sm:$0xff] }
 0x5c3   : > { %v4118_v47 = vmul.f32 %v6391_v16, %v4110_v20  ;;  %v6393_v26 = vpop.eup %6392  ;;  %v4120_v56 = vsub.f32 2.0, %v4116_v13  ;;  %v10836_v8 = vmul.f32 %v4187_v60, %v12986_v46  ;;  %v10840_v29 = vmul.f32 %v4188_v53, %v12986_v46 }
 0x5c4   : > { %v4121_v45 = vsub.f32 2.0, %v4117_v31  ;;  %v6395_v28 = vpop.eup %6394  ;;  %v4155_v17 = vmul.f32 %v6393_v26, %v4147_v4  ;;  %v10843_v20 = vmul.f32 %v4189_v48, %v12986_v46  ;;  %v10846_v36 = vmul.f32 %v4190_v32, %v12986_v46  ;;  %v12987_v31 = vld [vmem:[#allocation58_spill] sm:$0xff] }
 0x5c5   : > { %v6397_v35 = vpop.eup %6396  ;;  %v4122_v59 = vsub.f32 2.0, %v4118_v47  ;;  %v4156_v13 = vmul.f32 %v6395_v28, %v10748_v41  ;;  %v10850_v60 = vmul.f32 %v4235_v0, %v12987_v31  ;;  %v4123_v53 = vmul.f32 %v6385_v52, %v4119_v5  ;;  %v12990_v52 = vld [vmem:[#allocation60_spill] sm:$0xff] }
 0x5c6   : > { %v6399_v4 = vpop.eup %6398  ;;  %v4157_v24 = vmul.f32 %v6397_v35, %v10751_v1  ;;  %v10859_v48 = vmul.f32 %v10769_v7, %v12987_v31  ;;  %v10862_v32 = vmul.f32 %v4237_v58, %v12987_v31  ;;  %v4124_v47 = vmul.f32 %v6387_v23, %v4120_v56  ;;  %v12994_v56 = vld [vmem:[#allocation62_spill] sm:$0xff] }
 0x5c7   : > { %v4125_v41 = vmul.f32 %v6389_v21, %v4121_v45  ;;  %v4158_v0 = vmul.f32 %v6399_v4, %v10754_v10  ;;  %v4159_v44 = vsub.f32 2.0, %v4155_v17  ;;  %v4160_v12 = vsub.f32 2.0, %v4156_v13  ;;  %v6401_v5 = vpop.eup %6400 }
 0x5c8   : > { %v4161_v14 = vsub.f32 2.0, %v4157_v24  ;;  %v10866_v38 = vmul.f32 %v4238_v49, %v12987_v31  ;;  %v10870_v1 = vsub.f32 %v10681_v2, %v12990_v52  ;;  %v4126_v7 = vmul.f32 %v6391_v16, %v4122_v59  ;;  %v6403_v10 = vpop.eup %6402 }
 0x5c9   : > { %v10874_v58 = vsub.f32 %v10684_v6, %v12992_v55  ;;  %v10878_v45 = vsub.f32 %v10689_v40, %v12994_v56  ;;  %v10882_v24 = vmul.f32 %v10854_v9, %v10854_v9  ;;  %v4131_v23 = vmul.f32 %v10790_v43, %v4123_v53  ;;  %v6405_v59 = vpop.eup %6404 }
 0x5ca   : > { %12991 = vst [vmem:[#allocation97_spill] sm:$0xff] %v10870_v1  ;;  %v4135_v49 = vmul.f32 %v4123_v53, %v12984_v11  ;;  %v4162_v21 = vsub.f32 2.0, %v4158_v0  ;;  %v4163_v17 = vmul.f32 %v6393_v26, %v4159_v44  ;;  %v4132_v16 = vmul.f32 %v10796_v61, %v4124_v47  ;;  %v6407_v52 = vpop.eup %6406 }
 0x5cb   : > { %12993 = vst [vmem:[#allocation24_spill] sm:$0xff] %v10874_v58  ;;  %12995 = vst [vmem:[#allocation94_spill] sm:$0xff] %v10878_v45  ;;  %v4133_v13 = vmul.f32 %v10801_v39, %v4125_v41  ;;  %v4136_v55 = vmul.f32 %v4124_v47, %v12984_v11  ;;  %v4137_v56 = vmul.f32 %v4125_v41, %v12984_v11  ;;  %v6409_v2 = vpop.eup %6408 }
 0x5cc   : > { %v4164_v40 = vmul.f32 %v6395_v28, %v4160_v12  ;;  %v4165_v9 = vmul.f32 %v6397_v35, %v4161_v14  ;;  %v4203_v6 = vmul.f32 %v6401_v5, %v10774_v15  ;;  %v4204_v43 = vmul.f32 %v6403_v10, %v10777_v54  ;;  %v6411_v26 = vpop.eup %6410 }
 0x5cd   : > { %v4134_v53 = vmul.f32 %v4130_v22, %v4126_v7  ;;  %v4138_v44 = vmul.f32 %v4126_v7, %v12984_v11  ;;  %v4288_v61 = vmul.f32 %v10870_v1, %v10870_v1  ;;  %v10897_v39 = vmul.f32 %v10874_v58, %v10874_v58  ;;  %v6413_v54 = vpop.eup %6412 }
 0x5ce   : > { %v4166_v47 = vmul.f32 %v6399_v4, %v4162_v21  ;;  %v4171_v12 = vmul.f32 %v10820_v57, %v4163_v17  ;;  %v4175_v14 = vmul.f32 %v4163_v17, %v12985_v30  ;;  %v4290_v15 = vmul.f32 %v10878_v45, %v10878_v45  ;;  %v6415_v0 = vpop.eup %6414 }
 0x5cf   : > { %v4172_v22 = vmul.f32 %v10824_v25, %v4164_v40  ;;  %v4173_v28 = vmul.f32 %v10827_v42, %v4165_v9  ;;  %v4205_v35 = vmul.f32 %v6405_v59, %v10780_v63  ;;  %v4206_v41 = vmul.f32 %v6407_v52, %v10783_v3 }
 0x5d0   : > { %v4176_v7 = vmul.f32 %v4164_v40, %v12985_v30  ;;  %v4177_v4 = vmul.f32 %v4165_v9, %v12985_v30  ;;  %v4207_v57 = vsub.f32 2.0, %v4203_v6  ;;  %v4208_v21 = vsub.f32 2.0, %v4204_v43 }
 0x5d1   : > { %v4174_v17 = vmul.f32 %v10832_v33, %v4166_v47  ;;  %v4209_v11 = vsub.f32 2.0, %v4205_v35  ;;  %v4210_v45 = vsub.f32 2.0, %v4206_v41  ;;  %v4251_v58 = vmul.f32 %v6409_v2, %v10805_v18 }
 0x5d2   : > { %v4211_v25 = vmul.f32 %v6401_v5, %v4207_v57  ;;  %v4212_v1 = vmul.f32 %v6403_v10, %v4208_v21  ;;  %v4252_v42 = vmul.f32 %v6411_v26, %v10808_v37  ;;  %v4253_v63 = vmul.f32 %v6413_v54, %v10812_v62  ;;  %v13001_v57 = vld [vmem:[#allocation92_spill] sm:$0xff] }
 0x5d3   : > { %v4178_v3 = vmul.f32 %v4166_v47, %v12985_v30  ;;  %v4179_v31 = vadd.f32 %v4171_v12, %v4131_v23  ;;  %v4183_v40 = vadd.f32 %v4175_v14, %v4135_v49  ;;  %v4254_v9 = vmul.f32 %v6415_v0, %v10815_v27 }
 0x5d4   : > { %v4180_v6 = vadd.f32 %v4172_v22, %v4132_v16  ;;  %v4184_v43 = vadd.f32 %v4176_v7, %v4136_v55  ;;  %v4213_v50 = vmul.f32 %v6405_v59, %v4209_v11  ;;  %v4214_v33 = vmul.f32 %v6407_v52, %v4210_v45 }
 0x5d5   : > { %v4219_v35 = vmul.f32 %v10836_v8, %v4211_v25  ;;  %v4220_v18 = vmul.f32 %v10840_v29, %v4212_v1  ;;  %v4223_v5 = vmul.f32 %v4211_v25, %v12986_v46  ;;  %v4224_v37 = vmul.f32 %v4212_v1, %v12986_v46  ;;  %v13003_v25 = vld [vmem:[#allocation93_spill] sm:$0xff] }
 0x5d6   : > { %v4181_v10 = vadd.f32 %v4173_v28, %v4133_v13  ;;  %v4255_v62 = vsub.f32 2.0, %v4251_v58  ;;  %v4256_v41 = vsub.f32 2.0, %v4252_v42  ;;  %v4257_v47 = vsub.f32 2.0, %v4253_v63  ;;  %v13004_v63 = vld [vmem:[#allocation67_spill] sm:$0xff] }
 0x5d7   : > { %v4182_v23 = vadd.f32 %v4174_v17, %v4134_v53  ;;  %v4221_v49 = vmul.f32 %v10843_v20, %v4213_v50  ;;  %v4222_v27 = vmul.f32 %v10846_v36, %v4214_v33  ;;  %v4258_v55 = vsub.f32 2.0, %v4254_v9  ;;  %v13002_v17 = vld [vmem:[#allocation66_spill] sm:$0xff] }
 0x5d8   : > { %v4185_v11 = vadd.f32 %v4177_v4, %v4137_v56  ;;  %v4186_v52 = vadd.f32 %v4178_v3, %v4138_v44  ;;  %v4225_v8 = vmul.f32 %v4213_v50, %v12986_v46  ;;  %v4226_v29 = vmul.f32 %v4214_v33, %v12986_v46  ;;  %v13005_v3 = vld [vmem:[#allocation25_spill] sm:$0xff] }
 0x5d9   : > { %v4227_v45 = vadd.f32 %v4219_v35, %v4179_v31  ;;  %v4228_v59 = vadd.f32 %v4220_v18, %v4180_v6  ;;  %v4231_v16 = vadd.f32 %v4223_v5, %v4183_v40  ;;  %v4232_v1 = vadd.f32 %v4224_v37, %v4184_v43  ;;  %v13006_v43 = vld [vmem:[#allocation68_spill] sm:$0xff] }
 0x5da   : > { %v4259_v13 = vmul.f32 %v6409_v2, %v4255_v62  ;;  %v4260_v58 = vmul.f32 %v6411_v26, %v4256_v41  ;;  %v4261_v12 = vmul.f32 %v6413_v54, %v4257_v47  ;;  %v10925_v53 = vadd.f32 %v10882_v24, %v10710_v19  ;;  %v12996_v54 = vld [vmem:[#allocation88_spill] sm:$0xff] }
 0x5db   : > { %v4229_v20 = vadd.f32 %v4221_v49, %v4181_v10  ;;  %v4230_v36 = vadd.f32 %v4222_v27, %v4182_v23  ;;  %v4262_v14 = vmul.f32 %v6415_v0, %v4258_v55  ;;  %v10928_v56 = vadd.f32 %v4288_v61, %v10718_v34  ;;  %v12997_v0 = vld [vmem:[#allocation58_spill] sm:$0xff]  ;;  %v13007_v47 = vld [vmem:[#allocation69_spill] sm:$0xff] }
 0x5dc   : > { %v4233_v50 = vadd.f32 %v4225_v8, %v4185_v11  ;;  %v4234_v44 = vadd.f32 %v4226_v29, %v4186_v52  ;;  %v4267_v31 = vmul.f32 %v10850_v60, %v4259_v13  ;;  %v10933_v22 = vadd.f32 %v10897_v39, %v10724_v51  ;;  %v12999_v39 = vld [vmem:[#allocation91_spill] sm:$0xff]  ;;  %v13008_v55 = vld [vmem:[#allocation70_spill] sm:$0xff]  ;;  %v13009_v52 = vld [vmem:[#allocation71_spill] sm:$0xff] }
 0x5dd   : > { %v4268_v2 = vmul.f32 %v10859_v48, %v4260_v58  ;;  %v4269_v26 = vmul.f32 %v10862_v32, %v4261_v12  ;;  %v4270_v24 = vmul.f32 %v10866_v38, %v4262_v14  ;;  %v10939_v28 = vadd.f32 %v4290_v15, %v12996_v54  ;;  %v12998_v48 = vld [vmem:[#allocation64_spill] sm:$0xff]  ;;  %v13000_v38 = vld [vmem:[#allocation65_spill] sm:$0xff] }
 0x5de   : > { %v4271_v61 = vmul.f32 %v4259_v13, %v12997_v0  ;;  %v4272_v7 = vmul.f32 %v4260_v58, %v12997_v0  ;;  %v4273_v4 = vmul.f32 %v4261_v12, %v12997_v0  ;;  %6416 = vrcp.f32 %v10925_v53 }
 0x5df   : > { %v4274_v60 = vmul.f32 %v4262_v14, %v12997_v0  ;;  %6418 = vrcp.f32 %v10928_v56  ;;  %v10949_v32 = vsub.f32 %v12999_v39, %v12998_v48  ;;  %v10953_v15 = vsub.f32 %v13001_v57, %v13000_v38 }
 0x5e0   : > { %v10955_v21 = vadd.f32 %v4267_v31, %v4227_v45  ;;  %6420 = vrcp.f32 %v10933_v22  ;;  %v10960_v42 = vsub.f32 %v13003_v25, %v13002_v17  ;;  %v10964_v40 = vsub.f32 %v13005_v3, %v13004_v63 }
 0x5e1   : > { %6422 = vrcp.f32 %v10939_v28  ;;  %v4335_v9 = vmul.f32 %v10949_v32, %v10949_v32  ;;  %v4336_v6 = vmul.f32 %v10953_v15, %v10953_v15  ;;  %v10973_v33 = vsub.f32 %v12999_v39, %v13006_v43 }
 0x5e2   : > { %v10975_v35 = vadd.f32 %v4268_v2, %v4228_v59  ;;  %v10977_v18 = vadd.f32 %v4269_v26, %v4229_v20  ;;  %v4337_v5 = vmul.f32 %v10960_v42, %v10960_v42  ;;  %v4338_v37 = vmul.f32 %v10964_v40, %v10964_v40  ;;  %v13011_v26 = vld [vmem:[#allocation73_spill] sm:$0xff] }
 0x5e3   : > { %v10983_v10 = vadd.f32 %v4270_v24, %v4230_v36  ;;  %v10986_v62 = vadd.f32 %v4335_v9, %v10710_v19  ;;  %v10989_v41 = vadd.f32 %v4336_v6, %v10718_v34  ;;  %v10993_v23 = vsub.f32 %v13001_v57, %v13007_v47  ;;  %v13015_v9 = vld [vmem:[#allocation97_spill] sm:$0xff] }
 0x5e4   : > { %v10996_v49 = vadd.f32 %v4337_v5, %v10724_v51  ;;  %v10999_v27 = vadd.f32 %v4338_v37, %v12996_v54  ;;  %v11003_v11 = vsub.f32 %v13003_v25, %v13008_v55  ;;  %v11007_v8 = vsub.f32 %v13005_v3, %v13009_v52  ;;  %v13016_v5 = vld [vmem:[#allocation75_spill] sm:$0xff] }
 0x5e5   : > { %v11009_v29 = vadd.f32 %v4271_v61, %v4231_v16  ;;  %6424 = vrcp.f32 %v10986_v62  ;;  %v4383_v45 = vmul.f32 %v10973_v33, %v10973_v33  ;;  %v4384_v59 = vmul.f32 %v10993_v23, %v10993_v23  ;;  %v13012_v61 = vld [vmem:[#allocation74_spill] sm:$0xff] }
 0x5e6   : > { %v11016_v13 = vadd.f32 %v4272_v7, %v4232_v1  ;;  %6426 = vrcp.f32 %v10989_v41  ;;  %v4385_v58 = vmul.f32 %v11003_v11, %v11003_v11  ;;  %v4386_v12 = vmul.f32 %v11007_v8, %v11007_v8  ;;  %v13013_v7 = vld [vmem:[#allocation63_spill] sm:$0xff] }
 0x5e7   : > { %v11023_v16 = vadd.f32 %v4273_v4, %v4233_v50  ;;  %6428 = vrcp.f32 %v10996_v49  ;;  %v11027_v20 = vadd.f32 %v4383_v45, %v10710_v19  ;;  %v11030_v36 = vadd.f32 %v4384_v59, %v10718_v34  ;;  %v13010_v50 = vld [vmem:[#allocation72_spill] sm:$0xff]  ;;  %v13014_v4 = vld [vmem:[#allocation89_spill] sm:$0xff] }
 0x5e8   : > { %v11032_v1 = vadd.f32 %v4274_v60, %v4234_v44  ;;  %6430 = vrcp.f32 %v10999_v27  ;;  %v11036_v14 = vadd.f32 %v4385_v58, %v10724_v51  ;;  %v11039_v31 = vadd.f32 %v4386_v12, %v12996_v54 }
 0x5e9   : > { %6432 = vrcp.f32 %v11027_v20  ;;  %v4427_v2 = vsub.f32 %v12999_v39, %v13010_v50  ;;  %v4428_v24 = vsub.f32 %v13001_v57, %v13011_v26  ;;  %v4429_v44 = vsub.f32 %v13003_v25, %v13012_v61  ;;  %v13017_v50 = vld [vmem:[#allocation24_spill] sm:$0xff] }
 0x5ea   : > { %v4311_v60 = vmul.f32 %v13014_v4, %v13013_v7  ;;  %v4312_v6 = vmul.f32 %v13015_v9, %v13013_v7  ;;  %6434 = vrcp.f32 %v11030_v36  ;;  %v4430_v37 = vsub.f32 %v13005_v3, %v13016_v5 }
 0x5eb   : > { %v6417_v45 = vpop.eup %6416  ;;  %6436 = vrcp.f32 %v11036_v14  ;;  %v4431_v59 = vmul.f32 %v4427_v2, %v4427_v2  ;;  %v4432_v58 = vmul.f32 %v4428_v24, %v4428_v24  ;;  %v4433_v12 = vmul.f32 %v4429_v44, %v4429_v44 }
 0x5ec   : > { %v6419_v26 = vpop.eup %6418  ;;  %v4299_v61 = vmul.f32 %v6417_v45, %v10925_v53  ;;  %v4313_v4 = vmul.f32 %v13017_v50, %v13013_v7  ;;  %6438 = vrcp.f32 %v11039_v31  ;;  %v4434_v9 = vmul.f32 %v4430_v37, %v4430_v37  ;;  %v13018_v50 = vld [vmem:[#allocation94_spill] sm:$0xff] }
 0x5ed   : > { %v6421_v52 = vpop.eup %6420  ;;  %v4300_v55 = vmul.f32 %v6419_v26, %v10928_v56  ;;  %v11062_v5 = vadd.f32 %v4431_v59, %v10710_v19  ;;  %v11065_v47 = vadd.f32 %v4432_v58, %v10718_v34  ;;  %v11068_v43 = vadd.f32 %v4433_v12, %v10724_v51  ;;  %v13019_v59 = vld [vmem:[#allocation76_spill] sm:$0xff]  ;;  %v13020_v12 = vld [vmem:[#allocation77_spill] sm:$0xff] }
 0x5ee   : > { %v6423_v63 = vpop.eup %6422  ;;  %v4301_v53 = vmul.f32 %v6421_v52, %v10933_v22  ;;  %v4303_v17 = vsub.f32 2.0, %v4299_v61  ;;  %v4314_v38 = vmul.f32 %v13018_v50, %v13013_v7  ;;  %v11074_v48 = vadd.f32 %v4434_v9, %v12996_v54 }
 0x5ef   : > { %v4302_v56 = vmul.f32 %v6423_v63, %v10939_v28  ;;  %v4304_v19 = vsub.f32 2.0, %v4300_v55  ;;  %v4359_v34 = vmul.f32 %v10949_v32, %v13019_v59  ;;  %6440 = vrcp.f32 %v11062_v5 }
 0x5f0   : > { %v4305_v51 = vsub.f32 2.0, %v4301_v53  ;;  %v4307_v58 = vmul.f32 %v6417_v45, %v4303_v17  ;;  %v4360_v22 = vmul.f32 %v10953_v15, %v13019_v59  ;;  %6442 = vrcp.f32 %v11065_v47 }
 0x5f1   : > { %v4306_v61 = vsub.f32 2.0, %v4302_v56  ;;  %v4361_v54 = vmul.f32 %v10960_v42, %v13019_v59  ;;  %v4362_v28 = vmul.f32 %v10964_v40, %v13019_v59  ;;  %6444 = vrcp.f32 %v11068_v43 }
 0x5f2   : > { %v6425_v55 = vpop.eup %6424  ;;  %v4308_v32 = vmul.f32 %v6419_v26, %v4304_v19  ;;  %v11090_v9 = vmul.f32 %v10973_v33, %v13020_v12  ;;  %v11094_v15 = vmul.f32 %v10993_v23, %v13020_v12  ;;  %6446 = vrcp.f32 %v11074_v48  ;;  %v13021_v23 = vld [vmem:[#allocation78_spill] sm:$0xff] }
 0x5f3   : > { %v6427_v17 = vpop.eup %6426  ;;  %v4309_v45 = vmul.f32 %v6421_v52, %v4305_v51  ;;  %v4315_v42 = vmul.f32 %v4311_v60, %v4307_v58  ;;  %v4347_v53 = vmul.f32 %v6425_v55, %v10986_v62  ;;  %v11100_v40 = vmul.f32 %v11003_v11, %v13020_v12 }
 0x5f4   : > { %v6429_v26 = vpop.eup %6428  ;;  %v4319_v50 = vmul.f32 %v4307_v58, %v13013_v7  ;;  %v11105_v33 = vmul.f32 %v11007_v8, %v13020_v12  ;;  %v11108_v56 = vmul.f32 %v4427_v2, %v13021_v23  ;;  %v11111_v19 = vmul.f32 %v4428_v24, %v13021_v23 }
 0x5f5   : > { %v6431_v52 = vpop.eup %6430  ;;  %v4310_v60 = vmul.f32 %v6423_v63, %v4306_v61  ;;  %v4316_v62 = vmul.f32 %v4312_v6, %v4308_v32  ;;  %v11114_v51 = vmul.f32 %v4429_v44, %v13021_v23  ;;  %v11117_v11 = vmul.f32 %v4430_v37, %v13021_v23 }
 0x5f6   : > { %v6433_v58 = vpop.eup %6432  ;;  %v4317_v0 = vmul.f32 %v4313_v4, %v4309_v45  ;;  %v4320_v8 = vmul.f32 %v4308_v32, %v13013_v7  ;;  %v4348_v46 = vmul.f32 %v6427_v17, %v10989_v41  ;;  %v4349_v2 = vmul.f32 %v6429_v26, %v10996_v49 }
 0x5f7   : > { %v6435_v30 = vpop.eup %6434  ;;  %v4321_v24 = vmul.f32 %v4309_v45, %v13013_v7  ;;  %v4323_v63 = vadd.f32 %v4315_v42, %v10955_v21  ;;  %v4350_v6 = vmul.f32 %v6431_v52, %v10999_v27  ;;  %v4351_v44 = vsub.f32 2.0, %v4347_v53 }
 0x5f8   : > { %v6437_v61 = vpop.eup %6436  ;;  %v4318_v3 = vmul.f32 %v4314_v38, %v4310_v60  ;;  %v4327_v37 = vadd.f32 %v4319_v50, %v11009_v29  ;;  %v4352_v25 = vsub.f32 2.0, %v4348_v46  ;;  %v4353_v4 = vsub.f32 2.0, %v4349_v2 }
 0x5f9   : > { %v6439_v57 = vpop.eup %6438  ;;  %v4322_v32 = vmul.f32 %v4310_v60, %v13013_v7  ;;  %v4354_v41 = vsub.f32 2.0, %v4350_v6  ;;  %v4395_v49 = vmul.f32 %v6433_v58, %v11027_v20  ;;  %v4396_v39 = vmul.f32 %v6435_v30, %v11030_v36 }
 0x5fa   : > { %v4324_v45 = vadd.f32 %v4316_v62, %v10975_v35  ;;  %v4355_v21 = vmul.f32 %v6425_v55, %v4351_v44  ;;  %v4356_v42 = vmul.f32 %v6427_v17, %v4352_v25  ;;  %v4357_v27 = vmul.f32 %v6429_v26, %v4353_v4 }
 0x5fb   : > { %v4325_v53 = vadd.f32 %v4317_v0, %v10977_v18  ;;  %v4358_v38 = vmul.f32 %v6431_v52, %v4354_v41  ;;  %v4397_v29 = vmul.f32 %v6437_v61, %v11036_v14  ;;  %v4398_v46 = vmul.f32 %v6439_v57, %v11039_v31 }
 0x5fc   : > { %v6441_v50 = vpop.eup %6440  ;;  %v4326_v60 = vadd.f32 %v4318_v3, %v10983_v10  ;;  %v4363_v2 = vmul.f32 %v4359_v34, %v4355_v21  ;;  %v4364_v6 = vmul.f32 %v4360_v22, %v4356_v42  ;;  %v4365_v20 = vmul.f32 %v4361_v54, %v4357_v27 }
 0x5fd   : > { %v6443_v7 = vpop.eup %6442  ;;  %v4328_v36 = vadd.f32 %v4320_v8, %v11016_v13  ;;  %v4366_v35 = vmul.f32 %v4362_v28, %v4358_v38  ;;  %v4399_v55 = vsub.f32 2.0, %v4395_v49  ;;  %v4400_v25 = vsub.f32 2.0, %v4396_v39 }
 0x5fe   : > { %v6445_v17 = vpop.eup %6444  ;;  %v4329_v0 = vadd.f32 %v4321_v24, %v11023_v16  ;;  %v4330_v18 = vadd.f32 %v4322_v32, %v11032_v1  ;;  %v4367_v14 = vmul.f32 %v4355_v21, %v13019_v59  ;;  %v4368_v31 = vmul.f32 %v4356_v42, %v13019_v59 }
 0x5ff   : > { %v6447_v26 = vpop.eup %6446  ;;  %v4369_v3 = vmul.f32 %v4357_v27, %v13019_v59  ;;  %v4370_v10 = vmul.f32 %v4358_v38, %v13019_v59  ;;  %v4401_v34 = vsub.f32 2.0, %v4397_v29  ;;  %v4402_v22 = vsub.f32 2.0, %v4398_v46 }
 0x600   : > { %v4371_v13 = vadd.f32 %v4363_v2, %v4323_v63  ;;  %v4372_v54 = vadd.f32 %v4364_v6, %v4324_v45  ;;  %v4373_v28 = vadd.f32 %v4365_v20, %v4325_v53  ;;  %v4374_v39 = vadd.f32 %v4366_v35, %v4326_v60 }
 0x601   : > { %v4403_v52 = vmul.f32 %v6433_v58, %v4399_v55  ;;  %v4404_v62 = vmul.f32 %v6435_v30, %v4400_v25  ;;  %v4405_v16 = vmul.f32 %v6437_v61, %v4401_v34  ;;  %v4406_v8 = vmul.f32 %v6439_v57, %v4402_v22  ;;  %v13022_v22 = vld [vmem:[#allocation26_spill] sm:$0xff] }
 0x602   : > { %v4443_v1 = vmul.f32 %v6441_v50, %v11062_v5  ;;  %v4444_v24 = vmul.f32 %v6443_v7, %v11065_v47  ;;  %v4445_v44 = vmul.f32 %v6445_v17, %v11068_v43  ;;  %v4446_v4 = vmul.f32 %v6447_v26, %v11074_v48 }
 0x603   : > { %v4411_v32 = vmul.f32 %v11090_v9, %v4403_v52  ;;  %v4412_v41 = vmul.f32 %v11094_v15, %v4404_v62  ;;  %v4413_v63 = vmul.f32 %v11100_v40, %v4405_v16  ;;  %v4414_v49 = vmul.f32 %v11105_v33, %v4406_v8 }
 0x604   : > { %v4375_v58 = vadd.f32 %v4367_v14, %v4327_v37  ;;  %v4376_v30 = vadd.f32 %v4368_v31, %v4328_v36  ;;  %v4377_v61 = vadd.f32 %v4369_v3, %v4329_v0  ;;  %v4378_v57 = vadd.f32 %v4370_v10, %v4330_v18 }
 0x605   : > { %v4415_v5 = vmul.f32 %v4403_v52, %v13020_v12  ;;  %v4416_v47 = vmul.f32 %v4404_v62, %v13020_v12  ;;  %v4417_v43 = vmul.f32 %v4405_v16, %v13020_v12  ;;  %v4418_v48 = vmul.f32 %v4406_v8, %v13020_v12  ;;  %v13025_v62 = vld [vmem:[#allocation90_spill] sm:$0xff] }
 0x606   : > { %v4447_v45 = vsub.f32 2.0, %v4443_v1  ;;  %v4448_v9 = vsub.f32 2.0, %v4444_v24  ;;  %v4449_v21 = vsub.f32 2.0, %v4445_v44  ;;  %v4450_v15 = vsub.f32 2.0, %v4446_v4 }
 0x607   : > { %v4419_v42 = vadd.f32 %v4411_v32, %v4371_v13  ;;  %v4420_v40 = vadd.f32 %v4412_v41, %v4372_v54  ;;  %v4421_v27 = vadd.f32 %v4413_v63, %v4373_v28  ;;  %v4422_v33 = vadd.f32 %v4414_v49, %v4374_v39  ;;  %v13023_v54 = vld [vmem:[#allocation27_spill] sm:$0xff]  ;;  %v13024_v39 = vld [vmem:[#allocation96_spill] sm:$0xff] }
 0x608   : > { %v4451_v37 = vmul.f32 %v6441_v50, %v4447_v45  ;;  %v4452_v53 = vmul.f32 %v6443_v7, %v4448_v9  ;;  %v4453_v38 = vmul.f32 %v6445_v17, %v4449_v21  ;;  %v4454_v29 = vmul.f32 %v6447_v26, %v4450_v15 }
 0x609   : > { %v4423_v46 = vadd.f32 %v4415_v5, %v4375_v58  ;;  %v4424_v60 = vadd.f32 %v4416_v47, %v4376_v30  ;;  %v4425_v2 = vadd.f32 %v4417_v43, %v4377_v61  ;;  %v4426_v6 = vadd.f32 %v4418_v48, %v4378_v57 }
 0x60a   : > { %v4459_v20 = vmul.f32 %v11108_v56, %v4451_v37  ;;  %v4460_v36 = vmul.f32 %v11111_v19, %v4452_v53  ;;  %v4461_v35 = vmul.f32 %v11114_v51, %v4453_v38  ;;  %v4462_v55 = vmul.f32 %v11117_v11, %v4454_v29 }
 0x60b   : > { %v4463_v25 = vmul.f32 %v4451_v37, %v13021_v23  ;;  %v4464_v0 = vmul.f32 %v4452_v53, %v13021_v23  ;;  %v4465_v7 = vmul.f32 %v4453_v38, %v13021_v23  ;;  %v4466_v50 = vmul.f32 %v4454_v29, %v13021_v23 }
 0x60c   : > { %v4467_v17 = vadd.f32 %v4459_v20, %v4419_v42  ;;  %v4468_v18 = vadd.f32 %v4460_v36, %v4420_v40  ;;  %v4469_v14 = vadd.f32 %v4461_v35, %v4421_v27  ;;  %v4470_v31 = vadd.f32 %v4462_v55, %v4422_v33 }
 0x60d   : > { %v4471_v26 = vadd.f32 %v4463_v25, %v4423_v46  ;;  %v4472_v56 = vadd.f32 %v4464_v0, %v4424_v60  ;;  %v4473_v3 = vadd.f32 %v4465_v7, %v4425_v2  ;;  %v4474_v19 = vadd.f32 %v4466_v50, %v4426_v6  ;;  %v13026_v7 = vld [vmem:[#allocation91_spill] sm:$0xff] }
 0x60e   : > { %v4475_v10 = vadd.f32 1.0, %v4467_v17  ;;  %v4476_v51 = vadd.f32 1.0, %v4468_v18  ;;  %v4477_v34 = vadd.f32 1.0, %v4469_v14  ;;  %v4478_v11 = vadd.f32 1.0, %v4470_v31  ;;  %v13027_v31 = vld [vmem:[#allocation92_spill] sm:$0xff] }
 0x60f   : > { %v4479_v13 = vmul.f32 %v4471_v26, %v13022_v22  ;;  %v4480_v28 = vmul.f32 %v4472_v56, %v13023_v54  ;;  %v4481_v52 = vmul.f32 %v4473_v3, %v13024_v39  ;;  %v4482_v16 = vmul.f32 %v4474_v19, %v13025_v62  ;;  %v13028_v3 = vld [vmem:[#allocation93_spill] sm:$0xff] }
 0x610   : > { %v4487_v8 = vmul.f32 %v4475_v10, %v4475_v10  ;;  %v4488_v1 = vmul.f32 %v4476_v51, %v4476_v51  ;;  %v4489_v24 = vmul.f32 %v4477_v34, %v4477_v34  ;;  %v4490_v63 = vmul.f32 %v4478_v11, %v4478_v11 }
 0x611   : > { %v4483_v44 = vsub.f32 0.0, %v4479_v13  ;;  %v4484_v4 = vsub.f32 0.0, %v4480_v28  ;;  %v4485_v32 = vsub.f32 0.0, %v4481_v52  ;;  %v4486_v41 = vsub.f32 0.0, %v4482_v16 }
 0x613   : > { %v4491_v49 = vmul.f32 %v4483_v44, %v4483_v44  ;;  %v4492_v58 = vmul.f32 %v4484_v4, %v4484_v4  ;;  %v4493_v30 = vmul.f32 %v4485_v32, %v4485_v32  ;;  %v4494_v61 = vmul.f32 %v4486_v41, %v4486_v41 }
 0x615   : > { %v4495_v57 = vadd.f32 %v4491_v49, %v4487_v8  ;;  %v4496_v5 = vadd.f32 %v4492_v58, %v4488_v1  ;;  %v4497_v47 = vadd.f32 %v4493_v30, %v4489_v24  ;;  %v4498_v43 = vadd.f32 %v4494_v61, %v4490_v63  ;;  %v13033_v24 = vld [vmem:[#allocation39_spill] sm:$0xff] }
 0x617   : > { %6448 = vrcp.f32 %v4495_v57 }
 0x618   : > { %6450 = vrcp.f32 %v4496_v5 }
 0x619   : > { %6452 = vrcp.f32 %v4497_v47 }
 0x61a   : > { %6454 = vrcp.f32 %v4498_v43 }
 0x624   : > { %v6449_v48 = vpop.eup %6448 }
 0x625   : > { %v6451_v45 = vpop.eup %6450  ;;  %v4503_v9 = vmul.f32 %v6449_v48, %v4495_v57 }
 0x626   : > { %v6453_v21 = vpop.eup %6452  ;;  %v4504_v15 = vmul.f32 %v6451_v45, %v4496_v5  ;;  %v13039_v5 = vld [vmem:[#allocation42_spill] sm:$0xff] }
 0x627   : > { %v6455_v42 = vpop.eup %6454  ;;  %v4505_v40 = vmul.f32 %v6453_v21, %v4497_v47  ;;  %v4507_v27 = vsub.f32 2.0, %v4503_v9 }
 0x628   : > { %v4506_v33 = vmul.f32 %v6455_v42, %v4498_v43  ;;  %v4508_v37 = vsub.f32 2.0, %v4504_v15 }
 0x629   : > { %v4509_v53 = vsub.f32 2.0, %v4505_v40  ;;  %v4511_v38 = vmul.f32 %v6449_v48, %v4507_v27 }
 0x62a   : > { %v4510_v29 = vsub.f32 2.0, %v4506_v33  ;;  %v4512_v46 = vmul.f32 %v6451_v45, %v4508_v37  ;;  %v13043_v37 = vld [vmem:[#allocation43_spill] sm:$0xff] }
 0x62b   : > { %v4513_v60 = vmul.f32 %v6453_v21, %v4509_v53  ;;  %v4515_v2 = vmul.f32 %v4511_v38, %v4475_v10  ;;  %v4519_v6 = vmul.f32 %v4511_v38, %v4483_v44  ;;  %v13044_v38 = vld [vmem:[#allocation44_spill] sm:$0xff] }
 0x62c   : > { %v4514_v20 = vmul.f32 %v6455_v42, %v4510_v29  ;;  %v4516_v36 = vmul.f32 %v4512_v46, %v4476_v51  ;;  %v4520_v35 = vmul.f32 %v4512_v46, %v4484_v4  ;;  %v13030_v51 = vld [vmem:[#allocation25_spill] sm:$0xff] }
 0x62d   : > { %v4517_v55 = vmul.f32 %v4513_v60, %v4477_v34  ;;  %v4521_v25 = vmul.f32 %v4513_v60, %v4485_v32  ;;  %v4523_v0 = vsub.f32 0.0, %v4519_v6  ;;  %v4527_v50 = vadd.f32 %v4515_v2, %v13026_v7  ;;  %v13045_v60 = vld [vmem:[#allocation45_spill] sm:$0xff]  ;;  %v13046_v6 = vld [vmem:[#allocation46_spill] sm:$0xff] }
 0x62e   : > { %v4518_v17 = vmul.f32 %v4514_v20, %v4478_v11  ;;  %v4522_v18 = vmul.f32 %v4514_v20, %v4486_v41  ;;  %v4524_v14 = vsub.f32 0.0, %v4520_v35  ;;  %v4528_v26 = vadd.f32 %v4516_v36, %v13027_v31  ;;  %v13035_v41 = vld [vmem:[#allocation40_spill] sm:$0xff] }
 0x62f   : > { %v4525_v56 = vsub.f32 0.0, %v4521_v25  ;;  %v4529_v19 = vadd.f32 %v4517_v55, %v13028_v3  ;;  %v11168_v13 = vmul.f32 0.5, %v4527_v50  ;;  %v4535_v10 = vadd.f32 %v4523_v0, %v13022_v22  ;;  %v13049_v3 = vld [vmem:[#allocation49_spill] sm:$0xff] }
 0x630   : > { %v4526_v28 = vsub.f32 0.0, %v4522_v18  ;;  %v4530_v52 = vadd.f32 %v4518_v17, %v13030_v51  ;;  %v11172_v34 = vmul.f32 0.5, %v4528_v26  ;;  %v4536_v16 = vadd.f32 %v4524_v14, %v13023_v54  ;;  %v13037_v54 = vld [vmem:[#allocation41_spill] sm:$0xff]  ;;  %v13047_v14 = vld [vmem:[#allocation47_spill] sm:$0xff]  ;;  %v13048_v26 = vld [vmem:[#allocation48_spill] sm:$0xff] }
 0x631   : > { %13029 = vst [vmem:[#allocation95_spill] sm:$0xff] %v11168_v13  ;;  %v11175_v8 = vmul.f32 0.5, %v4529_v19  ;;  %v4537_v11 = vadd.f32 %v4525_v56, %v13024_v39  ;;  %v4539_v1 = vmul.f32 0.5, %v4535_v10  ;;  %v4551_v44 = vsub.f32 %v11168_v13, %v13033_v24  ;;  %v13050_v10 = vld [vmem:[#allocation50_spill] sm:$0xff]  ;;  %v13051_v51 = vld [vmem:[#allocation51_spill] sm:$0xff] }
 0x632   : > { %13031 = vst [vmem:[#allocation86_spill] sm:$0xff] %v11172_v34  ;;  %v11180_v4 = vmul.f32 0.5, %v4530_v52  ;;  %v4538_v32 = vadd.f32 %v4526_v28, %v13025_v62  ;;  %v4540_v22 = vmul.f32 0.5, %v4536_v16  ;;  %v4552_v63 = vsub.f32 %v11172_v34, %v13035_v41  ;;  %v13052_v16 = vld [vmem:[#allocation52_spill] sm:$0xff] }
 0x633   : > { %13032 = vst [vmem:[#allocation87_spill] sm:$0xff] %v11175_v8  ;;  %v4541_v49 = vmul.f32 0.5, %v4537_v11  ;;  %v11185_v58 = vmin.f32 %v4539_v1, -1e-09  ;;  %v11189_v30 = vsub.f32 %v11175_v8, %v13037_v54  ;;  %v4555_v39 = vmul.f32 %v4551_v44, %v4551_v44 }
 0x634   : > { %13034 = vst [vmem:[#allocation88_spill] sm:$0xff] %v11180_v4  ;;  %v4542_v61 = vmul.f32 0.5, %v4538_v32  ;;  %v11191_v57 = vmin.f32 %v4540_v22, -1e-09  ;;  %v11195_v47 = vsub.f32 %v11180_v4, %v13039_v5  ;;  %v4556_v62 = vmul.f32 %v4552_v63, %v4552_v63 }
 0x635   : > { %13036 = vst [vmem:[#allocation89_spill] sm:$0xff] %v11185_v58  ;;  %v11197_v43 = vmin.f32 %v4541_v49, -1e-09  ;;  %v11201_v48 = vmul.f32 %v11185_v58, %v11185_v58  ;;  %v4557_v45 = vmul.f32 %v11189_v30, %v11189_v30  ;;  %v4591_v53 = vsub.f32 %v11168_v13, %v13043_v37 }
 0x636   : > { %13038 = vst [vmem:[#allocation97_spill] sm:$0xff] %v11191_v57  ;;  %v11205_v9 = vmin.f32 %v4542_v61, -1e-09  ;;  %v11209_v21 = vmul.f32 %v11191_v57, %v11191_v57  ;;  %v4558_v15 = vmul.f32 %v11195_v47, %v11195_v47  ;;  %v4592_v29 = vsub.f32 %v11172_v34, %v13044_v38 }
 0x637   : > { %13040 = vst [vmem:[#allocation24_spill] sm:$0xff] %v11197_v43  ;;  %v11215_v42 = vmul.f32 %v11197_v43, %v11197_v43  ;;  %v4559_v40 = vadd.f32 %v4555_v39, %v11201_v48  ;;  %v4593_v2 = vsub.f32 %v11175_v8, %v13045_v60  ;;  %v11232_v20 = vsub.f32 %v11180_v4, %v13046_v6  ;;  %v13059_v43 = vld [vmem:[#allocation59_spill] sm:$0xff] }
 0x638   : > { %13041 = vst [vmem:[#allocation94_spill] sm:$0xff] %v11205_v9  ;;  %v11220_v27 = vmul.f32 %v11205_v9, %v11205_v9  ;;  %v4560_v33 = vadd.f32 %v4556_v62, %v11209_v21  ;;  %v4595_v35 = vmul.f32 %v4591_v53, %v4591_v53  ;;  %v4596_v55 = vmul.f32 %v4592_v29, %v4592_v29 }
 0x639   : > { %v4561_v46 = vadd.f32 %v4557_v45, %v11215_v42  ;;  %6456 = vrcp.f32 %v4559_v40  ;;  %v4597_v25 = vmul.f32 %v4593_v2, %v4593_v2  ;;  %v4598_v0 = vmul.f32 %v11232_v20, %v11232_v20 }
 0x63a   : > { %13042 = vst [vmem:[#allocation26_spill] sm:$0xff] %v11220_v27  ;;  %v4562_v36 = vadd.f32 %v4558_v15, %v11220_v27  ;;  %6458 = vrcp.f32 %v4560_v33  ;;  %v4599_v7 = vadd.f32 %v4595_v35, %v11201_v48  ;;  %v11239_v50 = vadd.f32 %v4596_v55, %v11209_v21  ;;  %v13053_v15 = vld [vmem:[#allocation53_spill] sm:$0xff]  ;;  %v13054_v55 = vld [vmem:[#allocation56_spill] sm:$0xff] }
 0x63b   : > { %6460 = vrcp.f32 %v4561_v46  ;;  %v11242_v17 = vadd.f32 %v4597_v25, %v11215_v42  ;;  %v11245_v18 = vadd.f32 %v4598_v0, %v11220_v27  ;;  %v4639_v31 = vsub.f32 %v11168_v13, %v13047_v14  ;;  %v13055_v0 = vld [vmem:[#allocation54_spill] sm:$0xff] }
 0x63c   : > { %6462 = vrcp.f32 %v4562_v36  ;;  %v4640_v56 = vsub.f32 %v11172_v34, %v13048_v26  ;;  %v4641_v19 = vsub.f32 %v11175_v8, %v13049_v3  ;;  %v4642_v28 = vsub.f32 %v11180_v4, %v13050_v10 }
 0x63d   : > { %6464 = vrcp.f32 %v4599_v7  ;;  %v4687_v52 = vsub.f32 %v11168_v13, %v13051_v51  ;;  %v11260_v11 = vsub.f32 %v11172_v34, %v13052_v16  ;;  %v4643_v1 = vmul.f32 %v4639_v31, %v4639_v31 }
 0x63e   : > { %6466 = vrcp.f32 %v11239_v50  ;;  %v4644_v32 = vmul.f32 %v4640_v56, %v4640_v56  ;;  %v4645_v22 = vmul.f32 %v4641_v19, %v4641_v19  ;;  %v4646_v49 = vmul.f32 %v4642_v28, %v4642_v28 }
 0x63f   : > { %6468 = vrcp.f32 %v11242_v17  ;;  %v11265_v39 = vadd.f32 %v4643_v1, %v11201_v48  ;;  %v4689_v35 = vsub.f32 %v11175_v8, %v13053_v15  ;;  %v4690_v25 = vsub.f32 %v11180_v4, %v13054_v55 }
 0x640   : > { %6470 = vrcp.f32 %v11245_v18  ;;  %v11268_v61 = vadd.f32 %v4644_v32, %v11209_v21  ;;  %v11271_v62 = vadd.f32 %v4645_v22, %v11215_v42  ;;  %v11274_v45 = vadd.f32 %v4646_v49, %v11220_v27 }
 0x641   : > { %v11281_v16 = vmul.f32 %v4551_v44, %v13055_v0  ;;  %6472 = vrcp.f32 %v11265_v39  ;;  %v4691_v1 = vmul.f32 %v4687_v52, %v4687_v52  ;;  %v4692_v32 = vmul.f32 %v11260_v11, %v11260_v11 }
 0x642   : > { %v11287_v22 = vmul.f32 %v4552_v63, %v13055_v0  ;;  %6474 = vrcp.f32 %v11268_v61  ;;  %v4693_v49 = vmul.f32 %v4689_v35, %v4689_v35  ;;  %v4694_v51 = vmul.f32 %v4690_v25, %v4690_v25 }
 0x643   : > { %v11292_v55 = vmul.f32 %v11189_v30, %v13055_v0  ;;  %6476 = vrcp.f32 %v11271_v62  ;;  %v11296_v44 = vadd.f32 %v4691_v1, %v11201_v48  ;;  %v11299_v10 = vadd.f32 %v4692_v32, %v11209_v21  ;;  %v13056_v1 = vld [vmem:[#allocation55_spill] sm:$0xff] }
 0x644   : > { %6478 = vrcp.f32 %v11274_v45  ;;  %v11303_v26 = vadd.f32 %v4693_v49, %v11215_v42  ;;  %v11306_v14 = vadd.f32 %v4694_v51, %v11220_v27  ;;  %v4582_v60 = vmul.f32 %v11195_v47, %v13055_v0 }
 0x645   : > { %v11311_v38 = vmul.f32 %v4591_v53, %v13056_v1  ;;  %6480 = vrcp.f32 %v11296_v44  ;;  %v11315_v37 = vmul.f32 %v4592_v29, %v13056_v1  ;;  %v11318_v49 = vmul.f32 %v4593_v2, %v13056_v1 }
 0x646   : > { %v6457_v15 = vpop.eup %6456  ;;  %6482 = vrcp.f32 %v11299_v10  ;;  %v11323_v47 = vmul.f32 %v11232_v20, %v13056_v1  ;;  %v11345_v57 = vsub.f32 %v11168_v13, %v13059_v43  ;;  %v13063_v13 = vld [vmem:[#allocation61_spill] sm:$0xff] }
 0x647   : > { %v6459_v3 = vpop.eup %6458  ;;  %v4567_v63 = vmul.f32 %v6457_v15, %v4559_v40  ;;  %6484 = vrcp.f32 %v11303_v26 }
 0x648   : > { %v6461_v30 = vpop.eup %6460  ;;  %v4568_v6 = vmul.f32 %v6459_v3, %v4560_v33  ;;  %6486 = vrcp.f32 %v11306_v14  ;;  %13060 = vst [vmem:[#allocation27_spill] sm:$0xff] %v11345_v57 }
 0x649   : > { %v6463_v32 = vpop.eup %6462  ;;  %v4569_v40 = vmul.f32 %v6461_v30, %v4561_v46  ;;  %v4571_v33 = vsub.f32 2.0, %v4567_v63  ;;  %v13057_v46 = vld [vmem:[#allocation57_spill] sm:$0xff] }
 0x64a   : > { %v4570_v51 = vmul.f32 %v6463_v32, %v4562_v36  ;;  %v6465_v53 = vpop.eup %6464  ;;  %v4572_v5 = vsub.f32 2.0, %v4568_v6  ;;  %v11327_v41 = vmul.f32 %v4639_v31, %v13057_v46  ;;  %v11331_v24 = vmul.f32 %v4640_v56, %v13057_v46 }
 0x64b   : > { %v4573_v54 = vsub.f32 2.0, %v4569_v40  ;;  %v6467_v29 = vpop.eup %6466  ;;  %v4607_v2 = vmul.f32 %v6465_v53, %v4599_v7  ;;  %v11334_v36 = vmul.f32 %v4641_v19, %v13057_v46  ;;  %v11337_v20 = vmul.f32 %v4642_v28, %v13057_v46  ;;  %v13058_v40 = vld [vmem:[#allocation58_spill] sm:$0xff] }
 0x64c   : > { %v6469_v63 = vpop.eup %6468  ;;  %v4574_v9 = vsub.f32 2.0, %v4570_v51  ;;  %v4608_v6 = vmul.f32 %v6467_v29, %v11239_v50  ;;  %v11341_v31 = vmul.f32 %v4687_v52, %v13058_v40  ;;  %v4575_v56 = vmul.f32 %v6457_v15, %v4571_v33  ;;  %v13061_v15 = vld [vmem:[#allocation60_spill] sm:$0xff] }
 0x64d   : > { %v6471_v7 = vpop.eup %6470  ;;  %v4609_v58 = vmul.f32 %v6469_v63, %v11242_v17  ;;  %v11350_v19 = vmul.f32 %v11260_v11, %v13058_v40  ;;  %v11353_v28 = vmul.f32 %v4689_v35, %v13058_v40  ;;  %v4576_v51 = vmul.f32 %v6459_v3, %v4572_v5  ;;  %v13065_v5 = vld [vmem:[#allocation62_spill] sm:$0xff] }
 0x64e   : > { %v4577_v50 = vmul.f32 %v6461_v30, %v4573_v54  ;;  %v4610_v52 = vmul.f32 %v6471_v7, %v11245_v18  ;;  %v4611_v23 = vsub.f32 2.0, %v4607_v2  ;;  %v4612_v12 = vsub.f32 2.0, %v4608_v6  ;;  %v6473_v33 = vpop.eup %6472 }
 0x64f   : > { %v4613_v59 = vsub.f32 2.0, %v4609_v58  ;;  %v11357_v43 = vmul.f32 %v4690_v25, %v13058_v40  ;;  %v11361_v17 = vsub.f32 %v11172_v34, %v13061_v15  ;;  %v4578_v11 = vmul.f32 %v6463_v32, %v4574_v9  ;;  %v6475_v18 = vpop.eup %6474 }
 0x650   : > { %v11365_v35 = vsub.f32 %v11175_v8, %v13063_v13  ;;  %v11369_v54 = vsub.f32 %v11180_v4, %v13065_v5  ;;  %v11373_v58 = vmul.f32 %v11345_v57, %v11345_v57  ;;  %v4583_v3 = vmul.f32 %v11281_v16, %v4575_v56  ;;  %v6477_v9 = vpop.eup %6476 }
 0x651   : > { %13062 = vst [vmem:[#allocation96_spill] sm:$0xff] %v11361_v17  ;;  %v4587_v25 = vmul.f32 %v4575_v56, %v13055_v0  ;;  %v4614_v30 = vsub.f32 2.0, %v4610_v52  ;;  %v4615_v2 = vmul.f32 %v6465_v53, %v4611_v23  ;;  %v4584_v32 = vmul.f32 %v11287_v22, %v4576_v51  ;;  %v6479_v15 = vpop.eup %6478 }
 0x652   : > { %13064 = vst [vmem:[#allocation90_spill] sm:$0xff] %v11365_v35  ;;  %13066 = vst [vmem:[#allocation91_spill] sm:$0xff] %v11369_v54  ;;  %v4585_v6 = vmul.f32 %v11292_v55, %v4577_v50  ;;  %v4588_v13 = vmul.f32 %v4576_v51, %v13055_v0  ;;  %v4589_v5 = vmul.f32 %v4577_v50, %v13055_v0  ;;  %v6481_v34 = vpop.eup %6480 }
 0x653   : > { %v4616_v4 = vmul.f32 %v6467_v29, %v4612_v12  ;;  %v4617_v57 = vmul.f32 %v6469_v63, %v4613_v59  ;;  %v4655_v8 = vmul.f32 %v6473_v33, %v11265_v39  ;;  %v4656_v16 = vmul.f32 %v6475_v18, %v11268_v61  ;;  %v6483_v53 = vpop.eup %6482 }
 0x654   : > { %v4586_v56 = vmul.f32 %v4582_v60, %v4578_v11  ;;  %v4590_v23 = vmul.f32 %v4578_v11, %v13055_v0  ;;  %v4740_v22 = vmul.f32 %v11361_v17, %v11361_v17  ;;  %v11388_v55 = vmul.f32 %v11365_v35, %v11365_v35  ;;  %v6485_v61 = vpop.eup %6484 }
 0x655   : > { %v4618_v51 = vmul.f32 %v6471_v7, %v4614_v30  ;;  %v4623_v12 = vmul.f32 %v11311_v38, %v4615_v2  ;;  %v4627_v59 = vmul.f32 %v4615_v2, %v13056_v1  ;;  %v4742_v39 = vmul.f32 %v11369_v54, %v11369_v54  ;;  %v6487_v50 = vpop.eup %6486 }
 0x656   : > { %v4624_v60 = vmul.f32 %v11315_v37, %v4616_v4  ;;  %v4625_v0 = vmul.f32 %v11318_v49, %v4617_v57  ;;  %v4657_v29 = vmul.f32 %v6477_v9, %v11271_v62  ;;  %v4658_v63 = vmul.f32 %v6479_v15, %v11274_v45 }
 0x657   : > { %v4628_v52 = vmul.f32 %v4616_v4, %v13056_v1  ;;  %v4629_v7 = vmul.f32 %v4617_v57, %v13056_v1  ;;  %v4659_v38 = vsub.f32 2.0, %v4655_v8  ;;  %v4660_v11 = vsub.f32 2.0, %v4656_v16 }
 0x658   : > { %v4626_v30 = vmul.f32 %v11323_v47, %v4618_v51  ;;  %v4661_v2 = vsub.f32 2.0, %v4657_v29  ;;  %v4662_v54 = vsub.f32 2.0, %v4658_v63  ;;  %v4703_v35 = vmul.f32 %v6481_v34, %v11296_v44 }
 0x659   : > { %v4663_v37 = vmul.f32 %v6473_v33, %v4659_v38  ;;  %v4664_v17 = vmul.f32 %v6475_v18, %v4660_v11  ;;  %v4704_v49 = vmul.f32 %v6483_v53, %v11299_v10  ;;  %v4705_v62 = vmul.f32 %v6485_v61, %v11303_v26  ;;  %v13073_v11 = vld [vmem:[#allocation66_spill] sm:$0xff] }
 0x65a   : > { %v4630_v45 = vmul.f32 %v4618_v51, %v13056_v1  ;;  %v4631_v40 = vadd.f32 %v4623_v12, %v4583_v3  ;;  %v4635_v4 = vadd.f32 %v4627_v59, %v4587_v25  ;;  %v4706_v57 = vmul.f32 %v6487_v50, %v11306_v14 }
 0x65b   : > { %v4632_v8 = vadd.f32 %v4624_v60, %v4584_v32  ;;  %v4636_v16 = vadd.f32 %v4628_v52, %v4588_v13  ;;  %v4665_v27 = vmul.f32 %v6477_v9, %v4661_v2  ;;  %v4666_v47 = vmul.f32 %v6479_v15, %v4662_v54 }
 0x65c   : > { %v4671_v29 = vmul.f32 %v11327_v41, %v4663_v37  ;;  %v4672_v44 = vmul.f32 %v11331_v24, %v4664_v17  ;;  %v4675_v33 = vmul.f32 %v4663_v37, %v13057_v46  ;;  %v4676_v10 = vmul.f32 %v4664_v17, %v13057_v46  ;;  %v13075_v37 = vld [vmem:[#allocation67_spill] sm:$0xff] }
 0x65d   : > { %v4633_v18 = vadd.f32 %v4625_v0, %v4585_v6  ;;  %v4707_v26 = vsub.f32 2.0, %v4703_v35  ;;  %v4708_v63 = vsub.f32 2.0, %v4704_v49  ;;  %v4709_v1 = vsub.f32 2.0, %v4705_v62  ;;  %v13068_v0 = vld [vmem:[#allocation58_spill] sm:$0xff]  ;;  %v13076_v49 = vld [vmem:[#allocation88_spill] sm:$0xff] }
 0x65e   : > { %v4634_v3 = vadd.f32 %v4626_v30, %v4586_v56  ;;  %v4673_v25 = vmul.f32 %v11334_v36, %v4665_v27  ;;  %v4674_v14 = vmul.f32 %v11337_v20, %v4666_v47  ;;  %v4710_v13 = vsub.f32 2.0, %v4706_v57  ;;  %v13074_v30 = vld [vmem:[#allocation87_spill] sm:$0xff] }
 0x65f   : > { %v4637_v9 = vadd.f32 %v4629_v7, %v4589_v5  ;;  %v4638_v15 = vadd.f32 %v4630_v45, %v4590_v23  ;;  %v4677_v41 = vmul.f32 %v4665_v27, %v13057_v46  ;;  %v4678_v24 = vmul.f32 %v4666_v47, %v13057_v46  ;;  %v13072_v7 = vld [vmem:[#allocation86_spill] sm:$0xff]  ;;  %v13077_v57 = vld [vmem:[#allocation68_spill] sm:$0xff] }
 0x660   : > { %v4679_v54 = vadd.f32 %v4671_v29, %v4631_v40  ;;  %v4680_v32 = vadd.f32 %v4672_v44, %v4632_v8  ;;  %v4683_v51 = vadd.f32 %v4675_v33, %v4635_v4  ;;  %v4684_v17 = vadd.f32 %v4676_v10, %v4636_v16 }
 0x661   : > { %v4711_v6 = vmul.f32 %v6481_v34, %v4707_v26  ;;  %v4712_v35 = vmul.f32 %v6483_v53, %v4708_v63  ;;  %v4713_v12 = vmul.f32 %v6485_v61, %v4709_v1  ;;  %v11416_v56 = vadd.f32 %v11373_v58, %v11201_v48  ;;  %v13067_v61 = vld [vmem:[#allocation26_spill] sm:$0xff] }
 0x662   : > { %v4681_v36 = vadd.f32 %v4673_v25, %v4633_v18  ;;  %v4682_v20 = vadd.f32 %v4674_v14, %v4634_v3  ;;  %v4714_v59 = vmul.f32 %v6487_v50, %v4710_v13  ;;  %v11419_v5 = vadd.f32 %v4740_v22, %v11209_v21  ;;  %v13078_v26 = vld [vmem:[#allocation69_spill] sm:$0xff]  ;;  %v13079_v25 = vld [vmem:[#allocation70_spill] sm:$0xff]  ;;  %v13080_v13 = vld [vmem:[#allocation71_spill] sm:$0xff] }
 0x663   : > { %v4685_v27 = vadd.f32 %v4677_v41, %v4637_v9  ;;  %v4686_v23 = vadd.f32 %v4678_v24, %v4638_v15  ;;  %v4719_v46 = vmul.f32 %v11341_v31, %v4711_v6  ;;  %v11424_v40 = vadd.f32 %v11388_v55, %v11215_v42  ;;  %v13070_v55 = vld [vmem:[#allocation95_spill] sm:$0xff] }
 0x664   : > { %v4720_v34 = vmul.f32 %v11350_v19, %v4712_v35  ;;  %v4721_v53 = vmul.f32 %v11353_v28, %v4713_v12  ;;  %v4722_v58 = vmul.f32 %v11357_v43, %v4714_v59  ;;  %v11430_v60 = vadd.f32 %v4742_v39, %v13067_v61  ;;  %v13069_v19 = vld [vmem:[#allocation64_spill] sm:$0xff]  ;;  %v13071_v43 = vld [vmem:[#allocation65_spill] sm:$0xff] }
 0x665   : > { %v4723_v22 = vmul.f32 %v4711_v6, %v13068_v0  ;;  %v4724_v50 = vmul.f32 %v4712_v35, %v13068_v0  ;;  %v4725_v52 = vmul.f32 %v4713_v12, %v13068_v0  ;;  %6488 = vrcp.f32 %v11416_v56 }
 0x666   : > { %v4726_v31 = vmul.f32 %v4714_v59, %v13068_v0  ;;  %6490 = vrcp.f32 %v11419_v5  ;;  %v11440_v28 = vsub.f32 %v13070_v55, %v13069_v19  ;;  %v11444_v39 = vsub.f32 %v13072_v7, %v13071_v43  ;;  %v13081_v59 = vld [vmem:[#allocation72_spill] sm:$0xff]  ;;  %v13085_v0 = vld [vmem:[#allocation27_spill] sm:$0xff] }
 0x667   : > { %v11446_v38 = vadd.f32 %v4719_v46, %v4679_v54  ;;  %6492 = vrcp.f32 %v11424_v40  ;;  %v11451_v2 = vsub.f32 %v13074_v30, %v13073_v11  ;;  %v11455_v62 = vsub.f32 %v13076_v49, %v13075_v37  ;;  %v13082_v46 = vld [vmem:[#allocation73_spill] sm:$0xff] }
 0x668   : > { %6494 = vrcp.f32 %v11430_v60  ;;  %v4787_v45 = vmul.f32 %v11440_v28, %v11440_v28  ;;  %v4788_v4 = vmul.f32 %v11444_v39, %v11444_v39  ;;  %v11464_v8 = vsub.f32 %v13070_v55, %v13077_v57 }
 0x669   : > { %v11466_v16 = vadd.f32 %v4720_v34, %v4680_v32  ;;  %v11468_v47 = vadd.f32 %v4721_v53, %v4681_v36  ;;  %v4789_v29 = vmul.f32 %v11451_v2, %v11451_v2  ;;  %v4790_v44 = vmul.f32 %v11455_v62, %v11455_v62  ;;  %v13083_v53 = vld [vmem:[#allocation74_spill] sm:$0xff] }
 0x66a   : > { %v11474_v33 = vadd.f32 %v4722_v58, %v4682_v20  ;;  %v11477_v10 = vadd.f32 %v4787_v45, %v11201_v48  ;;  %v11480_v18 = vadd.f32 %v4788_v4, %v11209_v21  ;;  %v11484_v63 = vsub.f32 %v13072_v7, %v13078_v26  ;;  %v13084_v58 = vld [vmem:[#allocation63_spill] sm:$0xff] }
 0x66b   : > { %v11487_v1 = vadd.f32 %v4789_v29, %v11215_v42  ;;  %v11490_v3 = vadd.f32 %v4790_v44, %v13067_v61  ;;  %v11494_v14 = vsub.f32 %v13074_v30, %v13079_v25  ;;  %v11498_v9 = vsub.f32 %v13076_v49, %v13080_v13 }
 0x66c   : > { %v11500_v15 = vadd.f32 %v4723_v22, %v4683_v51  ;;  %6496 = vrcp.f32 %v11477_v10  ;;  %v4835_v41 = vmul.f32 %v11464_v8, %v11464_v8  ;;  %v4836_v24 = vmul.f32 %v11484_v63, %v11484_v63 }
 0x66d   : > { %v11507_v54 = vadd.f32 %v4724_v50, %v4684_v17  ;;  %6498 = vrcp.f32 %v11480_v18  ;;  %v4837_v32 = vmul.f32 %v11494_v14, %v11494_v14  ;;  %v4838_v6 = vmul.f32 %v11498_v9, %v11498_v9  ;;  %v13086_v50 = vld [vmem:[#allocation96_spill] sm:$0xff] }
 0x66e   : > { %v11514_v51 = vadd.f32 %v4725_v52, %v4685_v27  ;;  %6500 = vrcp.f32 %v11487_v1  ;;  %v11518_v35 = vadd.f32 %v4835_v41, %v11201_v48  ;;  %v11521_v12 = vadd.f32 %v4836_v24, %v11209_v21 }
 0x66f   : > { %v11523_v17 = vadd.f32 %v4726_v31, %v4686_v23  ;;  %6502 = vrcp.f32 %v11490_v3  ;;  %v11527_v36 = vadd.f32 %v4837_v32, %v11215_v42  ;;  %v11530_v20 = vadd.f32 %v4838_v6, %v13067_v61  ;;  %v13087_v31 = vld [vmem:[#allocation75_spill] sm:$0xff] }
 0x670   : > { %6504 = vrcp.f32 %v11518_v35  ;;  %v4879_v27 = vsub.f32 %v13070_v55, %v13081_v59  ;;  %v4880_v34 = vsub.f32 %v13072_v7, %v13082_v46  ;;  %v4881_v23 = vsub.f32 %v13074_v30, %v13083_v53  ;;  %v13088_v6 = vld [vmem:[#allocation90_spill] sm:$0xff] }
 0x671   : > { %v4763_v22 = vmul.f32 %v13085_v0, %v13084_v58  ;;  %v4764_v52 = vmul.f32 %v13086_v50, %v13084_v58  ;;  %6506 = vrcp.f32 %v11521_v12  ;;  %v4882_v45 = vsub.f32 %v13076_v49, %v13087_v31 }
 0x672   : > { %v6489_v4 = vpop.eup %6488  ;;  %6508 = vrcp.f32 %v11527_v36  ;;  %v4883_v29 = vmul.f32 %v4879_v27, %v4879_v27  ;;  %v4884_v44 = vmul.f32 %v4880_v34, %v4880_v34  ;;  %v4885_v41 = vmul.f32 %v4881_v23, %v4881_v23 }
 0x673   : > { %v6491_v24 = vpop.eup %6490  ;;  %v4751_v32 = vmul.f32 %v6489_v4, %v11416_v56  ;;  %v4765_v0 = vmul.f32 %v13088_v6, %v13084_v58  ;;  %6510 = vrcp.f32 %v11530_v20  ;;  %v4886_v50 = vmul.f32 %v4882_v45, %v4882_v45  ;;  %v13089_v6 = vld [vmem:[#allocation91_spill] sm:$0xff] }
 0x674   : > { %v6493_v53 = vpop.eup %6492  ;;  %v4752_v46 = vmul.f32 %v6491_v24, %v11419_v5  ;;  %v11553_v31 = vadd.f32 %v4883_v29, %v11201_v48  ;;  %v11556_v59 = vadd.f32 %v4884_v44, %v11209_v21  ;;  %v11559_v13 = vadd.f32 %v4885_v41, %v11215_v42  ;;  %v13090_v29 = vld [vmem:[#allocation76_spill] sm:$0xff] }
 0x675   : > { %v6495_v25 = vpop.eup %6494  ;;  %v4753_v56 = vmul.f32 %v6493_v53, %v11424_v40  ;;  %v4755_v26 = vsub.f32 2.0, %v4751_v32  ;;  %v4766_v57 = vmul.f32 %v13089_v6, %v13084_v58  ;;  %v11565_v37 = vadd.f32 %v4886_v50, %v13067_v61  ;;  %v13091_v32 = vld [vmem:[#allocation77_spill] sm:$0xff] }
 0x676   : > { %v4754_v5 = vmul.f32 %v6495_v25, %v11430_v60  ;;  %v4756_v48 = vsub.f32 2.0, %v4752_v46  ;;  %v4811_v21 = vmul.f32 %v11440_v28, %v13090_v29  ;;  %6512 = vrcp.f32 %v11553_v31 }
 0x677   : > { %v4757_v42 = vsub.f32 2.0, %v4753_v56  ;;  %v4759_v44 = vmul.f32 %v6489_v4, %v4755_v26  ;;  %v4812_v40 = vmul.f32 %v11444_v39, %v13090_v29  ;;  %6514 = vrcp.f32 %v11556_v59 }
 0x678   : > { %v4758_v41 = vsub.f32 2.0, %v4754_v5  ;;  %v4813_v61 = vmul.f32 %v11451_v2, %v13090_v29  ;;  %v4814_v60 = vmul.f32 %v11455_v62, %v13090_v29  ;;  %6516 = vrcp.f32 %v11559_v13 }
 0x679   : > { %v6497_v46 = vpop.eup %6496  ;;  %v4760_v28 = vmul.f32 %v6491_v24, %v4756_v48  ;;  %v11581_v50 = vmul.f32 %v11464_v8, %v13091_v32  ;;  %v11585_v39 = vmul.f32 %v11484_v63, %v13091_v32  ;;  %6518 = vrcp.f32 %v11565_v37  ;;  %v13092_v63 = vld [vmem:[#allocation78_spill] sm:$0xff] }
 0x67a   : > { %v6499_v26 = vpop.eup %6498  ;;  %v4761_v4 = vmul.f32 %v6493_v53, %v4757_v42  ;;  %v4767_v2 = vmul.f32 %v4763_v22, %v4759_v44  ;;  %v4799_v56 = vmul.f32 %v6497_v46, %v11477_v10  ;;  %v11591_v62 = vmul.f32 %v11494_v14, %v13091_v32 }
 0x67b   : > { %v6501_v24 = vpop.eup %6500  ;;  %v4771_v6 = vmul.f32 %v4759_v44, %v13084_v58  ;;  %v11596_v8 = vmul.f32 %v11498_v9, %v13091_v32  ;;  %v11599_v5 = vmul.f32 %v4879_v27, %v13092_v63  ;;  %v11602_v48 = vmul.f32 %v4880_v34, %v13092_v63 }
 0x67c   : > { %v6503_v53 = vpop.eup %6502  ;;  %v4762_v22 = vmul.f32 %v6495_v25, %v4758_v41  ;;  %v4768_v10 = vmul.f32 %v4764_v52, %v4760_v28  ;;  %v11605_v42 = vmul.f32 %v4881_v23, %v13092_v63  ;;  %v11608_v14 = vmul.f32 %v4882_v45, %v13092_v63 }
 0x67d   : > { %v6505_v44 = vpop.eup %6504  ;;  %v4769_v11 = vmul.f32 %v4765_v0, %v4761_v4  ;;  %v4772_v9 = vmul.f32 %v4760_v28, %v13084_v58  ;;  %v4800_v43 = vmul.f32 %v6499_v26, %v11480_v18  ;;  %v4801_v27 = vmul.f32 %v6501_v24, %v11487_v1 }
 0x67e   : > { %v6507_v19 = vpop.eup %6506  ;;  %v4773_v34 = vmul.f32 %v4761_v4, %v13084_v58  ;;  %v4775_v25 = vadd.f32 %v4767_v2, %v11446_v38  ;;  %v4802_v52 = vmul.f32 %v6503_v53, %v11490_v3  ;;  %v4803_v23 = vsub.f32 2.0, %v4799_v56 }
 0x67f   : > { %v6509_v41 = vpop.eup %6508  ;;  %v4770_v49 = vmul.f32 %v4766_v57, %v4762_v22  ;;  %v4779_v45 = vadd.f32 %v4771_v6, %v11500_v15  ;;  %v4804_v30 = vsub.f32 2.0, %v4800_v43  ;;  %v4805_v0 = vsub.f32 2.0, %v4801_v27 }
 0x680   : > { %v6511_v7 = vpop.eup %6510  ;;  %v4774_v28 = vmul.f32 %v4762_v22, %v13084_v58  ;;  %v4806_v18 = vsub.f32 2.0, %v4802_v52  ;;  %v4847_v1 = vmul.f32 %v6505_v44, %v11518_v35  ;;  %v4848_v55 = vmul.f32 %v6507_v19, %v11521_v12 }
 0x681   : > { %v4776_v4 = vadd.f32 %v4768_v10, %v11466_v16  ;;  %v4807_v38 = vmul.f32 %v6497_v46, %v4803_v23  ;;  %v4808_v2 = vmul.f32 %v6499_v26, %v4804_v30  ;;  %v4809_v3 = vmul.f32 %v6501_v24, %v4805_v0 }
 0x682   : > { %v4777_v56 = vadd.f32 %v4769_v11, %v11468_v47  ;;  %v4810_v57 = vmul.f32 %v6503_v53, %v4806_v18  ;;  %v4849_v15 = vmul.f32 %v6509_v41, %v11527_v36  ;;  %v4850_v43 = vmul.f32 %v6511_v7, %v11530_v20 }
 0x683   : > { %v6513_v6 = vpop.eup %6512  ;;  %v4778_v58 = vadd.f32 %v4770_v49, %v11474_v33  ;;  %v4815_v22 = vmul.f32 %v4811_v21, %v4807_v38  ;;  %v4816_v27 = vmul.f32 %v4812_v40, %v4808_v2  ;;  %v4817_v35 = vmul.f32 %v4813_v61, %v4809_v3 }
 0x684   : > { %v6515_v52 = vpop.eup %6514  ;;  %v4780_v12 = vadd.f32 %v4772_v9, %v11507_v54  ;;  %v4818_v16 = vmul.f32 %v4814_v60, %v4810_v57  ;;  %v4851_v46 = vsub.f32 2.0, %v4847_v1  ;;  %v4852_v30 = vsub.f32 2.0, %v4848_v55 }
 0x685   : > { %v6517_v26 = vpop.eup %6516  ;;  %v4781_v11 = vadd.f32 %v4773_v34, %v11514_v51  ;;  %v4782_v47 = vadd.f32 %v4774_v28, %v11523_v17  ;;  %v4819_v36 = vmul.f32 %v4807_v38, %v13090_v29  ;;  %v4820_v20 = vmul.f32 %v4808_v2, %v13090_v29 }
 0x686   : > { %v6519_v24 = vpop.eup %6518  ;;  %v4821_v49 = vmul.f32 %v4809_v3, %v13090_v29  ;;  %v4822_v33 = vmul.f32 %v4810_v57, %v13090_v29  ;;  %v4853_v21 = vsub.f32 2.0, %v4849_v15  ;;  %v4854_v40 = vsub.f32 2.0, %v4850_v43 }
 0x687   : > { %v4823_v54 = vadd.f32 %v4815_v22, %v4775_v25  ;;  %v4824_v61 = vadd.f32 %v4816_v27, %v4776_v4  ;;  %v4825_v60 = vadd.f32 %v4817_v35, %v4777_v56  ;;  %v4826_v55 = vadd.f32 %v4818_v16, %v4778_v58 }
 0x688   : > { %v4855_v53 = vmul.f32 %v6505_v44, %v4851_v46  ;;  %v4856_v10 = vmul.f32 %v6507_v19, %v4852_v30  ;;  %v4857_v51 = vmul.f32 %v6509_v41, %v4853_v21  ;;  %v4858_v9 = vmul.f32 %v6511_v7, %v4854_v40  ;;  %v13094_v40 = vld [vmem:[#allocation97_spill] sm:$0xff] }
 0x689   : > { %v4895_v17 = vmul.f32 %v6513_v6, %v11553_v31  ;;  %v4896_v34 = vmul.f32 %v6515_v52, %v11556_v59  ;;  %v4897_v23 = vmul.f32 %v6517_v26, %v11559_v13  ;;  %v4898_v0 = vmul.f32 %v6519_v24, %v11565_v37 }
 0x68a   : > { %v4863_v29 = vmul.f32 %v11581_v50, %v4855_v53  ;;  %v4864_v28 = vmul.f32 %v11585_v39, %v4856_v10  ;;  %v4865_v25 = vmul.f32 %v11591_v62, %v4857_v51  ;;  %v4866_v18 = vmul.f32 %v11596_v8, %v4858_v9 }
 0x68b   : > { %v4827_v44 = vadd.f32 %v4819_v36, %v4779_v45  ;;  %v4828_v19 = vadd.f32 %v4820_v20, %v4780_v12  ;;  %v4829_v41 = vadd.f32 %v4821_v49, %v4781_v11  ;;  %v4830_v7 = vadd.f32 %v4822_v33, %v4782_v47  ;;  %v13093_v33 = vld [vmem:[#allocation89_spill] sm:$0xff] }
 0x68c   : > { %v4867_v31 = vmul.f32 %v4855_v53, %v13091_v32  ;;  %v4868_v59 = vmul.f32 %v4856_v10, %v13091_v32  ;;  %v4869_v13 = vmul.f32 %v4857_v51, %v13091_v32  ;;  %v4870_v37 = vmul.f32 %v4858_v9, %v13091_v32 }
 0x68d   : > { %v4899_v1 = vsub.f32 2.0, %v4895_v17  ;;  %v4900_v50 = vsub.f32 2.0, %v4896_v34  ;;  %v4901_v4 = vsub.f32 2.0, %v4897_v23  ;;  %v4902_v39 = vsub.f32 2.0, %v4898_v0 }
 0x68e   : > { %v4871_v38 = vadd.f32 %v4863_v29, %v4823_v54  ;;  %v4872_v62 = vadd.f32 %v4864_v28, %v4824_v61  ;;  %v4873_v2 = vadd.f32 %v4865_v25, %v4825_v60  ;;  %v4874_v8 = vadd.f32 %v4866_v18, %v4826_v55  ;;  %v13095_v61 = vld [vmem:[#allocation24_spill] sm:$0xff] }
 0x68f   : > { %v4903_v45 = vmul.f32 %v6513_v6, %v4899_v1  ;;  %v4904_v3 = vmul.f32 %v6515_v52, %v4900_v50  ;;  %v4905_v56 = vmul.f32 %v6517_v26, %v4901_v4  ;;  %v4906_v57 = vmul.f32 %v6519_v24, %v4902_v39  ;;  %v13096_v55 = vld [vmem:[#allocation94_spill] sm:$0xff] }
 0x690   : > { %v4875_v15 = vadd.f32 %v4867_v31, %v4827_v44  ;;  %v4876_v43 = vadd.f32 %v4868_v59, %v4828_v19  ;;  %v4877_v58 = vadd.f32 %v4869_v13, %v4829_v41  ;;  %v4878_v22 = vadd.f32 %v4870_v37, %v4830_v7 }
 0x691   : > { %v4911_v27 = vmul.f32 %v11599_v5, %v4903_v45  ;;  %v4912_v32 = vmul.f32 %v11602_v48, %v4904_v3  ;;  %v4913_v35 = vmul.f32 %v11605_v42, %v4905_v56  ;;  %v4914_v12 = vmul.f32 %v11608_v14, %v4906_v57 }
 0x692   : > { %v4915_v16 = vmul.f32 %v4903_v45, %v13092_v63  ;;  %v4916_v46 = vmul.f32 %v4904_v3, %v13092_v63  ;;  %v4917_v6 = vmul.f32 %v4905_v56, %v13092_v63  ;;  %v4918_v52 = vmul.f32 %v4906_v57, %v13092_v63 }
 0x693   : > { %v4919_v30 = vadd.f32 %v4911_v27, %v4871_v38  ;;  %v4920_v26 = vadd.f32 %v4912_v32, %v4872_v62  ;;  %v4921_v11 = vadd.f32 %v4913_v35, %v4873_v2  ;;  %v4922_v47 = vadd.f32 %v4914_v12, %v4874_v8  ;;  %v13097_v12 = vld [vmem:[#allocation95_spill] sm:$0xff] }
 0x694   : > { %v4923_v36 = vadd.f32 %v4915_v16, %v4875_v15  ;;  %v4924_v5 = vadd.f32 %v4916_v46, %v4876_v43  ;;  %v4925_v20 = vadd.f32 %v4917_v6, %v4877_v58  ;;  %v4926_v48 = vadd.f32 %v4918_v52, %v4878_v22 }
 0x695   : > { %v4927_v24 = vadd.f32 1.0, %v4919_v30  ;;  %v4928_v42 = vadd.f32 1.0, %v4920_v26  ;;  %v4929_v49 = vadd.f32 1.0, %v4921_v11  ;;  %v4930_v14 = vadd.f32 1.0, %v4922_v47  ;;  %v13098_v30 = vld [vmem:[#allocation86_spill] sm:$0xff]  ;;  %v13099_v47 = vld [vmem:[#allocation87_spill] sm:$0xff] }
 0x696   : > { %v4931_v21 = vmul.f32 %v4923_v36, %v13093_v33  ;;  %v4932_v54 = vmul.f32 %v4924_v5, %v13094_v40  ;;  %v4933_v60 = vmul.f32 %v4925_v20, %v13095_v61  ;;  %v4934_v63 = vmul.f32 %v4926_v48, %v13096_v55 }
 0x697   : > { %v4939_v53 = vmul.f32 %v4927_v24, %v4927_v24  ;;  %v4940_v10 = vmul.f32 %v4928_v42, %v4928_v42  ;;  %v4941_v51 = vmul.f32 %v4929_v49, %v4929_v49  ;;  %v4942_v0 = vmul.f32 %v4930_v14, %v4930_v14 }
 0x698   : > { %v4935_v9 = vsub.f32 0.0, %v4931_v21  ;;  %v4936_v17 = vsub.f32 0.0, %v4932_v54  ;;  %v4937_v34 = vsub.f32 0.0, %v4933_v60  ;;  %v4938_v23 = vsub.f32 0.0, %v4934_v63  ;;  %v13101_v63 = vld [vmem:[#allocation39_spill] sm:$0xff] }
 0x69a   : > { %v4943_v29 = vmul.f32 %v4935_v9, %v4935_v9  ;;  %v4944_v28 = vmul.f32 %v4936_v17, %v4936_v17  ;;  %v4945_v25 = vmul.f32 %v4937_v34, %v4937_v34  ;;  %v4946_v18 = vmul.f32 %v4938_v23, %v4938_v23 }
 0x69c   : > { %v4947_v44 = vadd.f32 %v4943_v29, %v4939_v53  ;;  %v4948_v19 = vadd.f32 %v4944_v28, %v4940_v10  ;;  %v4949_v41 = vadd.f32 %v4945_v25, %v4941_v51  ;;  %v4950_v7 = vadd.f32 %v4946_v18, %v4942_v0  ;;  %v13104_v25 = vld [vmem:[#allocation42_spill] sm:$0xff] }
 0x69e   : > { %6520 = vrcp.f32 %v4947_v44 }
 0x69f   : > { %6522 = vrcp.f32 %v4948_v19 }
 0x6a0   : > { %6524 = vrcp.f32 %v4949_v41 }
 0x6a1   : > { %6526 = vrcp.f32 %v4950_v7 }
 0x6ab   : > { %v6521_v31 = vpop.eup %6520 }
 0x6ac   : > { %v6523_v59 = vpop.eup %6522  ;;  %v4955_v13 = vmul.f32 %v6521_v31, %v4947_v44 }
 0x6ad   : > { %v6525_v37 = vpop.eup %6524  ;;  %v4956_v1 = vmul.f32 %v6523_v59, %v4948_v19 }
 0x6ae   : > { %v6527_v50 = vpop.eup %6526  ;;  %v4957_v4 = vmul.f32 %v6525_v37, %v4949_v41  ;;  %v4959_v39 = vsub.f32 2.0, %v4955_v13 }
 0x6af   : > { %v4958_v38 = vmul.f32 %v6527_v50, %v4950_v7  ;;  %v4960_v62 = vsub.f32 2.0, %v4956_v1  ;;  %v13105_v7 = vld [vmem:[#allocation43_spill] sm:$0xff]  ;;  %v13106_v1 = vld [vmem:[#allocation44_spill] sm:$0xff] }
 0x6b0   : > { %v4961_v2 = vsub.f32 2.0, %v4957_v4  ;;  %v4963_v8 = vmul.f32 %v6521_v31, %v4959_v39 }
 0x6b1   : > { %v4962_v45 = vsub.f32 2.0, %v4958_v38  ;;  %v4964_v3 = vmul.f32 %v6523_v59, %v4960_v62  ;;  %v13107_v38 = vld [vmem:[#allocation45_spill] sm:$0xff] }
 0x6b2   : > { %v4965_v56 = vmul.f32 %v6525_v37, %v4961_v2  ;;  %v4967_v57 = vmul.f32 %v4963_v8, %v4927_v24  ;;  %v4971_v15 = vmul.f32 %v4963_v8, %v4935_v9  ;;  %v13100_v24 = vld [vmem:[#allocation88_spill] sm:$0xff]  ;;  %v13102_v9 = vld [vmem:[#allocation40_spill] sm:$0xff]  ;;  %v13108_v2 = vld [vmem:[#allocation46_spill] sm:$0xff] }
 0x6b3   : > { %v4966_v43 = vmul.f32 %v6527_v50, %v4962_v45  ;;  %v4968_v58 = vmul.f32 %v4964_v3, %v4928_v42  ;;  %v4972_v22 = vmul.f32 %v4964_v3, %v4936_v17 }
 0x6b4   : > { %v4969_v27 = vmul.f32 %v4965_v56, %v4929_v49  ;;  %v4973_v32 = vmul.f32 %v4965_v56, %v4937_v34  ;;  %v4975_v35 = vsub.f32 0.0, %v4971_v15  ;;  %v4979_v16 = vadd.f32 %v4967_v57, %v13097_v12 }
 0x6b5   : > { %v4970_v46 = vmul.f32 %v4966_v43, %v4930_v14  ;;  %v4974_v6 = vmul.f32 %v4966_v43, %v4938_v23  ;;  %v4976_v52 = vsub.f32 0.0, %v4972_v22  ;;  %v4980_v26 = vadd.f32 %v4968_v58, %v13098_v30  ;;  %v13111_v30 = vld [vmem:[#allocation49_spill] sm:$0xff] }
 0x6b6   : > { %v4977_v11 = vsub.f32 0.0, %v4973_v32  ;;  %v4981_v36 = vadd.f32 %v4969_v27, %v13099_v47  ;;  %v11659_v5 = vmul.f32 0.5, %v4979_v16  ;;  %v4987_v20 = vadd.f32 %v4975_v35, %v13093_v33  ;;  %v13109_v16 = vld [vmem:[#allocation47_spill] sm:$0xff] }
 0x6b7   : > { %v4978_v48 = vsub.f32 0.0, %v4974_v6  ;;  %v4982_v42 = vadd.f32 %v4970_v46, %v13100_v24  ;;  %v11663_v49 = vmul.f32 0.5, %v4980_v26  ;;  %v4988_v21 = vadd.f32 %v4976_v52, %v13094_v40  ;;  %v13103_v40 = vld [vmem:[#allocation41_spill] sm:$0xff]  ;;  %v13110_v6 = vld [vmem:[#allocation48_spill] sm:$0xff] }
 0x6b8   : > { %v11666_v54 = vmul.f32 0.5, %v4981_v36  ;;  %v4989_v14 = vadd.f32 %v4977_v11, %v13095_v61  ;;  %v4991_v60 = vmul.f32 0.5, %v4987_v20  ;;  %v5003_v53 = vsub.f32 %v11659_v5, %v13101_v63  ;;  %v13112_v11 = vld [vmem:[#allocation50_spill] sm:$0xff]  ;;  %v13113_v20 = vld [vmem:[#allocation51_spill] sm:$0xff] }
 0x6b9   : > { %v11671_v10 = vmul.f32 0.5, %v4982_v42  ;;  %v4990_v51 = vadd.f32 %v4978_v48, %v13096_v55  ;;  %v4992_v33 = vmul.f32 0.5, %v4988_v21  ;;  %v5004_v17 = vsub.f32 %v11663_v49, %v13102_v9 }
 0x6ba   : > { %v4993_v34 = vmul.f32 0.5, %v4989_v14  ;;  %v11676_v23 = vmin.f32 %v4991_v60, -1e-09  ;;  %v5005_v0 = vsub.f32 %v11666_v54, %v13103_v40  ;;  %v5007_v29 = vmul.f32 %v5003_v53, %v5003_v53  ;;  %v13114_v60 = vld [vmem:[#allocation52_spill] sm:$0xff]  ;;  %v13115_v53 = vld [vmem:[#allocation53_spill] sm:$0xff] }
 0x6bb   : > { %v4994_v61 = vmul.f32 0.5, %v4990_v51  ;;  %v11680_v28 = vmin.f32 %v4992_v33, -1e-09  ;;  %v5006_v18 = vsub.f32 %v11671_v10, %v13104_v25  ;;  %v5008_v44 = vmul.f32 %v5004_v17, %v5004_v17 }
 0x6bc   : > { %v11684_v19 = vmin.f32 %v4993_v34, -1e-09  ;;  %v11688_v55 = vmul.f32 %v11676_v23, %v11676_v23  ;;  %v5009_v41 = vmul.f32 %v5005_v0, %v5005_v0  ;;  %v5036_v31 = vsub.f32 %v11659_v5, %v13105_v7  ;;  %v13116_v34 = vld [vmem:[#allocation56_spill] sm:$0xff]  ;;  %v13119_v7 = vld [vmem:[#allocation61_spill] sm:$0xff] }
 0x6bd   : > { %v11692_v59 = vmin.f32 %v4994_v61, -1e-09  ;;  %v11696_v13 = vmul.f32 %v11680_v28, %v11680_v28  ;;  %v5010_v37 = vmul.f32 %v5006_v18, %v5006_v18  ;;  %v5037_v50 = vsub.f32 %v11663_v49, %v13106_v1  ;;  %v13118_v18 = vld [vmem:[#allocation60_spill] sm:$0xff]  ;;  %v13120_v1 = vld [vmem:[#allocation62_spill] sm:$0xff] }
 0x6be   : > { %v11702_v4 = vmul.f32 %v11684_v19, %v11684_v19  ;;  %v11705_v39 = vadd.f32 %v5007_v29, %v11688_v55  ;;  %v5038_v62 = vsub.f32 %v11666_v54, %v13107_v38  ;;  %v5039_v8 = vsub.f32 %v11671_v10, %v13108_v2  ;;  %v13117_v29 = vld [vmem:[#allocation59_spill] sm:$0xff] }
 0x6bf   : > { %v11713_v45 = vmul.f32 %v11692_v59, %v11692_v59  ;;  %v11716_v3 = vadd.f32 %v5008_v44, %v11696_v13  ;;  %v5040_v56 = vmul.f32 %v5036_v31, %v5036_v31  ;;  %v5041_v57 = vmul.f32 %v5037_v50, %v5037_v50 }
 0x6c0   : > { %v11719_v15 = vadd.f32 %v5009_v41, %v11702_v4  ;;  %6528 = vrcp.f32 %v11705_v39  ;;  %v5042_v43 = vmul.f32 %v5038_v62, %v5038_v62  ;;  %v5043_v58 = vmul.f32 %v5039_v8, %v5039_v8 }
 0x6c1   : > { %v11723_v22 = vadd.f32 %v5010_v37, %v11713_v45  ;;  %6530 = vrcp.f32 %v11716_v3  ;;  %v11727_v27 = vadd.f32 %v5040_v56, %v11688_v55  ;;  %v11730_v32 = vadd.f32 %v5041_v57, %v11696_v13 }
 0x6c2   : > { %6532 = vrcp.f32 %v11719_v15  ;;  %v11734_v35 = vadd.f32 %v5042_v43, %v11702_v4  ;;  %v11737_v12 = vadd.f32 %v5043_v58, %v11713_v45  ;;  %v5073_v46 = vsub.f32 %v11659_v5, %v13109_v16 }
 0x6c3   : > { %6534 = vrcp.f32 %v11723_v22  ;;  %v5074_v52 = vsub.f32 %v11663_v49, %v13110_v6  ;;  %v5075_v26 = vsub.f32 %v11666_v54, %v13111_v30  ;;  %v5076_v47 = vsub.f32 %v11671_v10, %v13112_v11 }
 0x6c4   : > { %6536 = vrcp.f32 %v11727_v27  ;;  %v5077_v36 = vmul.f32 %v5073_v46, %v5073_v46  ;;  %v5110_v48 = vsub.f32 %v11659_v5, %v13113_v20  ;;  %v5111_v63 = vsub.f32 %v11663_v49, %v13114_v60 }
 0x6c5   : > { %6538 = vrcp.f32 %v11730_v32  ;;  %v5078_v24 = vmul.f32 %v5074_v52, %v5074_v52  ;;  %v5079_v42 = vmul.f32 %v5075_v26, %v5075_v26  ;;  %v5080_v21 = vmul.f32 %v5076_v47, %v5076_v47 }
 0x6c6   : > { %6540 = vrcp.f32 %v11734_v35  ;;  %v11754_v14 = vadd.f32 %v5077_v36, %v11688_v55  ;;  %v5112_v51 = vsub.f32 %v11666_v54, %v13115_v53  ;;  %v5113_v40 = vsub.f32 %v11671_v10, %v13116_v34 }
 0x6c7   : > { %6542 = vrcp.f32 %v11737_v12  ;;  %v11762_v33 = vadd.f32 %v5078_v24, %v11696_v13  ;;  %v11765_v9 = vadd.f32 %v5079_v42, %v11702_v4  ;;  %v11768_v17 = vadd.f32 %v5080_v21, %v11713_v45 }
 0x6c8   : > { %6544 = vrcp.f32 %v11754_v14  ;;  %v5114_v0 = vmul.f32 %v5110_v48, %v5110_v48  ;;  %v5147_v61 = vsub.f32 %v11659_v5, %v13117_v29  ;;  %v5115_v25 = vmul.f32 %v5111_v63, %v5111_v63 }
 0x6c9   : > { %6546 = vrcp.f32 %v11762_v33  ;;  %v5148_v44 = vsub.f32 %v11663_v49, %v13118_v18  ;;  %v5116_v41 = vmul.f32 %v5112_v51, %v5112_v51  ;;  %v5149_v31 = vsub.f32 %v11666_v54, %v13119_v7 }
 0x6ca   : > { %6548 = vrcp.f32 %v11765_v9  ;;  %v5117_v37 = vmul.f32 %v5113_v40, %v5113_v40  ;;  %v5150_v50 = vsub.f32 %v11671_v10, %v13120_v1  ;;  %v11785_v62 = vadd.f32 %v5114_v0, %v11688_v55 }
 0x6cb   : > { %6550 = vrcp.f32 %v11768_v17  ;;  %v5151_v2 = vmul.f32 %v5147_v61, %v5147_v61  ;;  %v11788_v56 = vadd.f32 %v5115_v25, %v11696_v13  ;;  %v5152_v57 = vmul.f32 %v5148_v44, %v5148_v44 }
 0x6cc   : > { %v11791_v58 = vadd.f32 %v5116_v41, %v11702_v4  ;;  %v5153_v16 = vmul.f32 %v5149_v31, %v5149_v31  ;;  %v11794_v6 = vadd.f32 %v5117_v37, %v11713_v45  ;;  %v5154_v52 = vmul.f32 %v5150_v50, %v5150_v50 }
 0x6cd   : > { %v6529_v38 = vpop.eup %6528  ;;  %6552 = vrcp.f32 %v11785_v62  ;;  %v11798_v26 = vadd.f32 %v5151_v2, %v11688_v55  ;;  %v11802_v47 = vadd.f32 %v5152_v57, %v11696_v13  ;;  %v5031_v31 = vstv %s7033_s0  ;;  %s5506_s0 = sshll.u32 %s6866_s19, 9  ;;  %s6817_s19 = smov [#allocation11]  }
 0x6ce   : > { %v6531_v8 = vpop.eup %6530  ;;  %6554 = vrcp.f32 %v11788_v56  ;;  %v5019_v20 = vmul.f32 %v6529_v38, %v11705_v39  ;;  %v11808_v24 = vadd.f32 %v5153_v16, %v11702_v4  ;;  %v11814_v63 = vadd.f32 %v5154_v52, %v11713_v45  ;;  %s12006_s15 = scalar_lea.hbm %s12058_s4, %s5506_s0 }
 0x6cf   : > { %v6533_v43 = vpop.eup %6532  ;;  %v5020_v48 = vmul.f32 %v6531_v8, %v11716_v3  ;;  %6556 = vrcp.f32 %v11791_v58  ;;  %v5064_v37 = vstv %s7035_s1  ;;  %s5325_s1 = sshll.u32 %s7051_s22, 4  ;;  %s12008_s1 = int_to_ptr.vmem [resolvable:$true] %s5325_s1 }
 0x6d0   : > { %v6535_v46 = vpop.eup %6534  ;;  %v5021_v21 = vmul.f32 %v6533_v43, %v11719_v15  ;;  %6558 = vrcp.f32 %v11794_v6 }
 0x6d1   : > { %v6537_v30 = vpop.eup %6536  ;;  %v5022_v60 = vmul.f32 %v6535_v46, %v11723_v22  ;;  %6560 = vrcp.f32 %v11798_v26  ;;  %v5023_v22 = vsub.f32 2.0, %v5019_v20  ;;  %v5024_v29 = vsub.f32 2.0, %v5020_v48 }
 0x6d2   : > { %v6539_v11 = vpop.eup %6538  ;;  %v5052_v39 = vmul.f32 %v6537_v30, %v11727_v27  ;;  %6562 = vrcp.f32 %v11802_v47  ;;  %v5025_v27 = vsub.f32 2.0, %v5021_v21 }
 0x6d3   : > { %v6541_v36 = vpop.eup %6540  ;;  %v5053_v3 = vmul.f32 %v6539_v11, %v11730_v32  ;;  %6564 = vrcp.f32 %v11808_v24  ;;  %v5026_v61 = vsub.f32 2.0, %v5022_v60  ;;  %v5027_v1 = vmul.f32 %v6529_v38, %v5023_v22 }
 0x6d4   : > { %v6543_v42 = vpop.eup %6542  ;;  %v5054_v51 = vmul.f32 %v6541_v36, %v11734_v35  ;;  %6566 = vrcp.f32 %v11814_v63  ;;  %v5056_v32 = vsub.f32 2.0, %v5052_v39  ;;  %v5028_v50 = vmul.f32 %v6531_v8, %v5024_v29 }
 0x6d5   : > { %v6545_v53 = vpop.eup %6544  ;;  %v5055_v40 = vmul.f32 %v6543_v42, %v11737_v12  ;;  %v5057_v35 = vsub.f32 2.0, %v5053_v3  ;;  %v5029_v2 = vmul.f32 %v6533_v43, %v5025_v27  ;;  %v5030_v57 = vmul.f32 %v6535_v46, %v5026_v61 }
 0x6d6   : > { %v6547_v34 = vpop.eup %6546  ;;  %v5058_v25 = vsub.f32 2.0, %v5054_v51  ;;  %v5089_v18 = vmul.f32 %v6545_v53, %v11754_v14  ;;  %v5060_v16 = vmul.f32 %v6537_v30, %v5056_v32  ;;  %v5101_v39 = vstv %s7037_s2 }
 0x6d7   : > { %v6549_v15 = vpop.eup %6548  ;;  %v5059_v12 = vsub.f32 2.0, %v5055_v40  ;;  %v5090_v44 = vmul.f32 %v6547_v34, %v11762_v33  ;;  %v5061_v52 = vmul.f32 %v6539_v11, %v5057_v35  ;;  %v11836_v3 = vstv %s7039_s3 }
 0x6d8   : > { %v6551_v0 = vpop.eup %6550  ;;  %v5091_v41 = vmul.f32 %v6549_v15, %v11765_v9  ;;  %v5062_v20 = vmul.f32 %v6541_v36, %v5058_v25  ;;  %v5093_v14 = vsub.f32 2.0, %v5089_v18  ;;  %v11839_v38 = vstv %s7041_s20 }
 0x6d9   : > { %v5092_v7 = vmul.f32 %v6551_v0, %v11768_v17  ;;  %v5063_v33 = vmul.f32 %v6543_v42, %v5059_v12  ;;  %v5094_v21 = vsub.f32 2.0, %v5090_v44  ;;  %v5032_v43 = vmul.f32 %v5031_v31, %v5027_v1  ;;  %v13121_v44 = vld [vmem:[#allocation64_spill] sm:$0xff] }
 0x6da   : > { %v11830_v48 = vpop.eup %6552  ;;  %v5095_v9 = vsub.f32 2.0, %v5091_v41  ;;  %v5033_v46 = vmul.f32 %v5031_v31, %v5028_v50  ;;  %v5034_v30 = vmul.f32 %v5031_v31, %v5029_v2  ;;  %v5035_v11 = vmul.f32 %v5031_v31, %v5030_v57 }
 0x6db   : > { %v5096_v60 = vsub.f32 2.0, %v5092_v7  ;;  %v11832_v17 = vpop.eup %6554  ;;  %v5065_v51 = vmul.f32 %v5064_v37, %v5060_v16  ;;  %v5066_v42 = vmul.f32 %v5064_v37, %v5061_v52  ;;  %v5067_v40 = vmul.f32 %v5064_v37, %v5062_v20  ;;  %v13122_v7 = vld [vmem:[#allocation65_spill] sm:$0xff] }
 0x6dc   : > { %v11841_v8 = vpop.eup %6556  ;;  %v5097_v22 = vmul.f32 %v6545_v53, %v5093_v14  ;;  %v5068_v27 = vmul.f32 %v5064_v37, %v5063_v33  ;;  %v5098_v61 = vmul.f32 %v6547_v34, %v5094_v21  ;;  %v5099_v32 = vmul.f32 %v6549_v15, %v5095_v9  ;;  %v13124_v37 = vld [vmem:[#allocation67_spill] sm:$0xff] }
 0x6dd   : > { %v11843_v36 = vpop.eup %6558  ;;  %v5100_v35 = vmul.f32 %v6551_v0, %v5096_v60  ;;  %v5126_v18 = vmul.f32 %v11830_v48, %v11785_v62  ;;  %v5127_v12 = vmul.f32 %v11832_v17, %v11788_v56  ;;  %v5184_v41 = vsub.f32 %v11659_v5, %v13121_v44  ;;  %v13123_v0 = vld [vmem:[#allocation66_spill] sm:$0xff]  ;;  %v13129_v44 = vld [vmem:[#allocation72_spill] sm:$0xff] }
 0x6de   : > { %v11845_v29 = vpop.eup %6560  ;;  %v5185_v53 = vsub.f32 %v11663_v49, %v13122_v7  ;;  %v5128_v34 = vmul.f32 %v11841_v8, %v11791_v58  ;;  %v11863_v15 = vmul.f32 %v11843_v36, %v11794_v6  ;;  %v5186_v62 = vsub.f32 %v11666_v54, %v13123_v0  ;;  %v13130_v7 = vld [vmem:[#allocation73_spill] sm:$0xff] }
 0x6df   : > { %v11847_v25 = vpop.eup %6562  ;;  %v5187_v56 = vsub.f32 %v11671_v10, %v13124_v37  ;;  %v11871_v50 = vadd.f32 %v5065_v51, %v5032_v43  ;;  %v11873_v2 = vadd.f32 %v5066_v42, %v5033_v46  ;;  %v11875_v57 = vadd.f32 %v5067_v40, %v5034_v30  ;;  %v13131_v37 = vld [vmem:[#allocation74_spill] sm:$0xff] }
 0x6e0   : > { %v11857_v31 = vpop.eup %6564  ;;  %v5102_v16 = vmul.f32 %v5101_v39, %v5097_v22  ;;  %v11877_v58 = vadd.f32 %v5068_v27, %v5035_v11  ;;  %v11879_v52 = vmul.f32 %v5101_v39, %v5098_v61  ;;  %v11881_v6 = vmul.f32 %v5101_v39, %v5099_v32  ;;  %v13126_v32 = vld [vmem:[#allocation69_spill] sm:$0xff] }
 0x6e1   : > { %v11869_v1 = vpop.eup %6566  ;;  %v11883_v20 = vmul.f32 %v5101_v39, %v5100_v35  ;;  %v5130_v14 = vsub.f32 2.0, %v5126_v18  ;;  %v5131_v33 = vsub.f32 2.0, %v5127_v12  ;;  %v5188_v21 = vmul.f32 %v5184_v41, %v5184_v41  ;;  %v13127_v18 = vld [vmem:[#allocation70_spill] sm:$0xff] }
 0x6e2   : > { %v5189_v9 = vmul.f32 %v5185_v53, %v5185_v53  ;;  %v5132_v60 = vsub.f32 2.0, %v5128_v34  ;;  %v5133_v43 = vsub.f32 2.0, %v11863_v15  ;;  %v5190_v46 = vmul.f32 %v5186_v62, %v5186_v62 }
 0x6e3   : > { %v5191_v51 = vmul.f32 %v5187_v56, %v5187_v56  ;;  %v5163_v30 = vmul.f32 %v11845_v29, %v11798_v26  ;;  %v5164_v11 = vmul.f32 %v11847_v25, %v11802_v47  ;;  %v11891_v42 = vadd.f32 %v5188_v21, %v11688_v55  ;;  %v13125_v47 = vld [vmem:[#allocation68_spill] sm:$0xff]  ;;  %v13132_v21 = vld [vmem:[#allocation75_spill] sm:$0xff] }
 0x6e4   : > { %v11894_v39 = vadd.f32 %v5189_v9, %v11696_v13  ;;  %v5165_v40 = vmul.f32 %v11857_v31, %v11808_v24  ;;  %v5166_v22 = vmul.f32 %v11869_v1, %v11814_v63  ;;  %v11901_v27 = vadd.f32 %v5190_v46, %v11702_v4  ;;  %v13128_v63 = vld [vmem:[#allocation71_spill] sm:$0xff] }
 0x6e5   : > { %v11904_v26 = vadd.f32 %v5191_v51, %v11713_v45  ;;  %6568 = vrcp.f32 %v11891_v42  ;;  %v5221_v61 = vsub.f32 %v11659_v5, %v13125_v47  ;;  %v5222_v35 = vsub.f32 %v11663_v49, %v13126_v32 }
 0x6e6   : > { %v5223_v24 = vsub.f32 %v11666_v54, %v13127_v18  ;;  %6570 = vrcp.f32 %v11894_v39  ;;  %v5224_v12 = vsub.f32 %v11671_v10, %v13128_v63  ;;  %v5258_v41 = vsub.f32 %v11659_v5, %v13129_v44 }
 0x6e7   : > { %v5259_v53 = vsub.f32 %v11663_v49, %v13130_v7  ;;  %6572 = vrcp.f32 %v11901_v27  ;;  %v5225_v34 = vmul.f32 %v5221_v61, %v5221_v61  ;;  %v5226_v15 = vmul.f32 %v5222_v35, %v5222_v35 }
 0x6e8   : > { %v5227_v0 = vmul.f32 %v5223_v24, %v5223_v24  ;;  %6574 = vrcp.f32 %v11904_v26  ;;  %v5228_v62 = vmul.f32 %v5224_v12, %v5224_v12  ;;  %v5260_v56 = vsub.f32 %v11666_v54, %v13131_v37 }
 0x6e9   : > { %v5261_v9 = vsub.f32 %v11671_v10, %v13132_v21  ;;  %v11927_v46 = vadd.f32 %v5225_v34, %v11688_v55  ;;  %v11930_v5 = vadd.f32 %v5226_v15, %v11696_v13  ;;  %v5262_v51 = vmul.f32 %v5258_v41, %v5258_v41 }
 0x6ea   : > { %v11933_v49 = vadd.f32 %v5227_v0, %v11702_v4  ;;  %v11936_v47 = vadd.f32 %v5228_v62, %v11713_v45  ;;  %v5263_v61 = vmul.f32 %v5259_v53, %v5259_v53  ;;  %v5264_v32 = vmul.f32 %v5260_v56, %v5260_v56 }
 0x6eb   : > { %v5265_v35 = vmul.f32 %v5261_v9, %v5261_v9  ;;  %v5134_v54 = vmul.f32 %v11830_v48, %v5130_v14  ;;  %v5167_v18 = vsub.f32 2.0, %v5163_v30  ;;  %6576 = vrcp.f32 %v11927_v46 }
 0x6ec   : > { %v11941_v10 = vadd.f32 %v5262_v51, %v11688_v55  ;;  %v5135_v24 = vmul.f32 %v11832_v17, %v5131_v33  ;;  %v5168_v63 = vsub.f32 2.0, %v5164_v11  ;;  %6578 = vrcp.f32 %v11930_v5 }
 0x6ed   : > { %v11946_v12 = vadd.f32 %v5263_v61, %v11696_v13  ;;  %v5136_v44 = vmul.f32 %v11841_v8, %v5132_v60  ;;  %v5169_v41 = vsub.f32 2.0, %v5165_v40  ;;  %6580 = vrcp.f32 %v11933_v49 }
 0x6ee   : > { %v11951_v48 = vadd.f32 %v5264_v32, %v11702_v4  ;;  %v5137_v14 = vmul.f32 %v11843_v36, %v5133_v43  ;;  %v5170_v55 = vsub.f32 2.0, %v5166_v22  ;;  %6582 = vrcp.f32 %v11936_v47 }
 0x6ef   : > { %v11956_v17 = vadd.f32 %v5265_v35, %v11713_v45  ;;  %v5106_v33 = vadd.f32 %v5102_v16, %v11871_v50  ;;  %v5139_v13 = vmul.f32 %v11836_v3, %v5134_v54  ;;  %v5171_v8 = vmul.f32 %v11845_v29, %v5167_v18 }
 0x6f0   : > { %6584 = vrcp.f32 %v11941_v10  ;;  %v5107_v4 = vadd.f32 %v11879_v52, %v11873_v2  ;;  %v5140_v60 = vmul.f32 %v11836_v3, %v5135_v24  ;;  %v5172_v36 = vmul.f32 %v11847_v25, %v5168_v63 }
 0x6f1   : > { %6586 = vrcp.f32 %v11946_v12  ;;  %v5108_v45 = vadd.f32 %v11881_v6, %v11875_v57  ;;  %v5141_v50 = vmul.f32 %v11836_v3, %v5136_v44  ;;  %v5173_v16 = vmul.f32 %v11857_v31, %v5169_v41 }
 0x6f2   : > { %6588 = vrcp.f32 %v11951_v48  ;;  %v6569_v29 = vpop.eup %6568  ;;  %v5109_v2 = vadd.f32 %v11883_v20, %v11877_v58  ;;  %v5142_v52 = vmul.f32 %v11836_v3, %v5137_v14  ;;  %v5174_v25 = vmul.f32 %v11869_v1, %v5170_v55 }
 0x6f3   : > { %6590 = vrcp.f32 %v11956_v17  ;;  %v6571_v43 = vpop.eup %6570  ;;  %v5143_v30 = vadd.f32 %v5139_v13, %v5106_v33  ;;  %v5176_v57 = vmul.f32 %v11839_v38, %v5171_v8  ;;  %v5200_v6 = vmul.f32 %v6569_v29, %v11891_v42 }
 0x6f4   : > { %v6573_v11 = vpop.eup %6572  ;;  %v5144_v31 = vadd.f32 %v5140_v60, %v5107_v4  ;;  %v5177_v40 = vmul.f32 %v11839_v38, %v5172_v36  ;;  %v5201_v22 = vmul.f32 %v6571_v43, %v11894_v39  ;;  %v5212_v58 = vstv %s7043_s17  ;;  %s6661_s17 = scalar_lea.vmem %s12008_s1, 512 }
 0x6f5   : > { %v6575_v20 = vpop.eup %6574  ;;  %v5145_v3 = vadd.f32 %v5141_v50, %v5108_v45  ;;  %v5178_v1 = vmul.f32 %v11839_v38, %v5173_v16  ;;  %v5202_v7 = vmul.f32 %v6573_v11, %v11901_v27  ;;  %v5204_v53 = vsub.f32 2.0, %v5200_v6  ;;  %p6662_p9 = scmp.ne.s32.totalorder %s12008_s1, %s6661_s17 }
 0x6f6   : > { %v5146_v34 = vadd.f32 %v5142_v52, %v5109_v2  ;;  %v5179_v15 = vmul.f32 %v11839_v38, %v5174_v25  ;;  %v5203_v42 = vmul.f32 %v6575_v20, %v11904_v26  ;;  %v5205_v0 = vsub.f32 2.0, %v5201_v22 }
 0x6f7   : > { %v5180_v62 = vadd.f32 %v5176_v57, %v5143_v30  ;;  %v5206_v37 = vsub.f32 2.0, %v5202_v7  ;;  %v5208_v56 = vmul.f32 %v6569_v29, %v5204_v53  ;;  %v5249_v21 = vstv %s7045_s16  ;;  %s5312_s16 = scalar_lea.sflag [#allocation4], %s6983_s23  ;;  %p6663_p7 = pnand %p6662_p9, %p13133_p3 }
 0x6f8   : > { %v6577_v39 = vpop.eup %6576  ;;  %v5181_v9 = vadd.f32 %v5177_v40, %v5144_v31  ;;  %v5207_v51 = vsub.f32 2.0, %v5203_v42  ;;  %v5209_v61 = vmul.f32 %v6571_v43, %v5205_v0  ;;  %v5286_v32 = vstv %s7047_s5  ;;  %s6665_s5 = sshll.u32 %s6817_s19, 4  ;;  %s6666_s5 = int_to_ptr.vmem [resolvable:$false] %s6665_s5 }
 0x6f9   : > { %v6579_v35 = vpop.eup %6578  ;;  %v5182_v54 = vadd.f32 %v5178_v1, %v5145_v3  ;;  %v5210_v18 = vmul.f32 %v6573_v11, %v5206_v37  ;;  %v5213_v27 = vmul.f32 %v5212_v58, %v5208_v56  ;;  %v5237_v24 = vmul.f32 %v6577_v39, %v11927_v46  ;;  %p6664_p5 = pneg %p6663_p7  ;;  %s6667_s20 = scalar_lea.vmem %s6666_s5, 1024 }
 0x6fa   : > { %v6581_v63 = vpop.eup %6580  ;;  %v5183_v38 = vadd.f32 %v5179_v15, %v5146_v34  ;;  %v5211_v44 = vmul.f32 %v6575_v20, %v5207_v51  ;;  %v5214_v26 = vmul.f32 %v5212_v58, %v5209_v61  ;;  %v5238_v41 = vmul.f32 %v6579_v35, %v11930_v5  ;;  %p6668_p10 = scmp.lt.s32.totalorder %s12008_s1, %s6666_s5  ;;  %p6669_p12 = scmp.lt.s32.totalorder %s6667_s20, %s6661_s17 }
 0x6fb   : > { %v6583_v14 = vpop.eup %6582  ;;  %v5215_v55 = vmul.f32 %v5212_v58, %v5210_v18  ;;  %v5217_v33 = vadd.f32 %v5213_v27, %v5180_v62  ;;  %v5239_v13 = vmul.f32 %v6581_v63, %v11933_v49  ;;  %v5241_v8 = vsub.f32 2.0, %v5237_v24 }
 0x6fc   : > { %v5216_v60 = vmul.f32 %v5212_v58, %v5211_v44  ;;  %v5218_v36 = vadd.f32 %v5214_v26, %v5181_v9  ;;  %v5240_v45 = vmul.f32 %v6583_v14, %v11936_v47  ;;  %v5242_v50 = vsub.f32 2.0, %v5238_v41  ;;  %p6670_p0 = por %p6669_p12, %p6668_p10 }
 0x6fd   : > { %v6585_v4 = vpop.eup %6584  ;;  %v5219_v46 = vadd.f32 %v5215_v55, %v5182_v54  ;;  %v5243_v29 = vsub.f32 2.0, %v5239_v13  ;;  %v5245_v2 = vmul.f32 %v6577_v39, %v5241_v8 }
 0x6fe   : > { %v6587_v16 = vpop.eup %6586  ;;  %v5274_v52 = vmul.f32 %v6585_v4, %v11941_v10  ;;  %v5220_v5 = vadd.f32 %v5216_v60, %v5183_v38  ;;  %v5244_v43 = vsub.f32 2.0, %v5240_v45  ;;  %v5246_v30 = vmul.f32 %v6579_v35, %v5242_v50  ;;  %p6671_p13 = pnand %p6670_p0, %p6664_p5 }
 0x6ff   : > { %v6589_v25 = vpop.eup %6588  ;;  %v5275_v57 = vmul.f32 %v6587_v16, %v11946_v12  ;;  %v5247_v6 = vmul.f32 %v6581_v63, %v5243_v29  ;;  %v5250_v11 = vmul.f32 %v5249_v21, %v5245_v2 }
 0x700   : > { %v6591_v49 = vpop.eup %6590  ;;  %v5276_v31 = vmul.f32 %v6589_v25, %v11951_v48  ;;  %v5278_v40 = vsub.f32 2.0, %v5274_v52  ;;  %v5248_v47 = vmul.f32 %v6583_v14, %v5244_v43  ;;  %v5251_v22 = vmul.f32 %v5249_v21, %v5246_v30 }
 0x701   : > { %v5277_v58 = vmul.f32 %v6591_v49, %v11956_v17  ;;  %v5279_v20 = vsub.f32 2.0, %v5275_v57  ;;  %v5252_v3 = vmul.f32 %v5249_v21, %v5247_v6  ;;  %v5254_v1 = vadd.f32 %v5250_v11, %v5217_v33 }
 0x702   : > { %v5280_v10 = vsub.f32 2.0, %v5276_v31  ;;  %v5282_v7 = vmul.f32 %v6585_v4, %v5278_v40  ;;  %v5253_v53 = vmul.f32 %v5249_v21, %v5248_v47  ;;  %v5255_v34 = vadd.f32 %v5251_v22, %v5218_v36 }
 0x703   : > { %v5281_v15 = vsub.f32 2.0, %v5277_v58  ;;  %v5283_v42 = vmul.f32 %v6587_v16, %v5279_v20  ;;  %v5256_v12 = vadd.f32 %v5252_v3, %v5219_v46 }
 0x704   : > { %v5284_v0 = vmul.f32 %v6589_v25, %v5280_v10  ;;  %v5287_v62 = vmul.f32 %v5286_v32, %v5282_v7  ;;  %v5257_v37 = vadd.f32 %v5253_v53, %v5220_v5 }
 0x705   : > { %v5285_v48 = vmul.f32 %v6591_v49, %v5281_v15  ;;  %v5288_v56 = vmul.f32 %v5286_v32, %v5283_v42 }
 0x706   : > { %v5289_v39 = vmul.f32 %v5286_v32, %v5284_v0  ;;  %v5291_v9 = vadd.f32 %v5287_v62, %v5254_v1 }
 0x707   : > { %v5290_v17 = vmul.f32 %v5286_v32, %v5285_v48  ;;  %v5292_v51 = vadd.f32 %v5288_v56, %v5255_v34 }
 0x708   : > { %v5293_v61 = vadd.f32 %v5289_v39, %v5256_v12  ;;  %v5295_v35 = vmul.f32 %v5291_v9, %v11676_v23 }
 0x709   : > { %v5294_v21 = vadd.f32 %v5290_v17, %v5257_v37  ;;  %v5296_v54 = vmul.f32 %v5292_v51, %v11680_v28 }
 0x70a   : > { %v5297_v18 = vmul.f32 %v5293_v61, %v11684_v19  ;;  %v5299_v27 = vand.u32 2147483647, %v5295_v35 }
 0x70b   : > { %v5298_v24 = vmul.f32 %v5294_v21, %v11692_v59  ;;  %v5300_v63 = vand.u32 2147483647, %v5296_v54 }
 0x70c   : > { %v5301_v32 = vand.u32 2147483647, %v5297_v18  ;;  %v5303_v38 = vmul.f32 0.31830987, %v5299_v27 }
 0x70d   : > { %v5302_v44 = vand.u32 2147483647, %v5298_v24  ;;  %v5304_v23 = vmul.f32 0.31830987, %v5300_v63 }
 0x70e   : > { %v5305_v26 = vmul.f32 0.31830987, %v5301_v32  ;;  %5307 = vst [vmem:[%s7051_s22] sm:$0xff] %v5303_v38 }
 0x70f   : > { %v5306_v28 = vmul.f32 0.31830987, %v5302_v44  ;;  %5308 = vst [vmem:[%s7051_s22 + $0x8] sm:$0xff] %v5304_v23 }
 0x710   : > { %5309 = vst [vmem:[%s7051_s22 + $0x10] sm:$0xff] %v5305_v26 }
 0x711   : > { %5310 = vst [vmem:[%s7051_s22 + $0x18] sm:$0xff] %v5306_v28 }
 0x712   : > { %6674 = shalt.err (!%p6671_p13)
}
 0x713   : > { %s6675_s22 = scalar_lea.hbm %s12006_s15, 512  ;;  %s6679_s11 = scalar_lea.hbm %s12058_s4, 1024 }
 0x714   : > { %p6676_p1 = scmp.ne.s32.totalorder %s12006_s15, %s6675_s22  ;;  %p6680_p4 = scmp.lt.s32.totalorder %s12006_s15, %s12058_s4 }
 0x715   : > { %p6681_p6 = scmp.lt.s32.totalorder %s6679_s11, %s6675_s22 }
 0x716   : > { %p6677_p11 = pnand %p6676_p1, %p13133_p3 }
 0x717   : > { %p6682_p8 = por %p6681_p6, %p6680_p4 }
 0x718   : > { %p6678_p2 = pneg %p6677_p11 }
 0x71a   : > { %p6683_p9 = pnand %p6682_p8, %p6678_p2 }
 0x71c   : > { %6686 = shalt.err (!%p6683_p9)
}
 0x71d   : > { %s6818_s14 = smov 128   ;;  %s6819_s21 = smov 8  }
 0x71e   : > { %5525 = dma.vmem_to_hbm [thread:$0]  (%p13133_p3), %s12008_s1, 512, %s12006_s15, %s5312_s16, %s6818_s14, %s6818_s14, %s6819_s21  }
 0x71f PF: > { %s13134_s26 = sld [smem:[#allocation17_spill]] }
 0x720   : > { %s13135_s25 = sld [smem:[#allocation21_spill]] }
 0x721   : > { %s13136_s27 = sld [smem:[#allocation20_spill]] }
 0x725   : > { %s5340_s28 = sand.u32 1, %s13134_s26  }
 0x726   : > { %p13137_p7 = scmp.ne.s32.totalorder %s13135_s25, 0  ;;  %s5341_s30 = scalar_lea.sflag [#allocation4], %s5340_s28 }
 0x727   : > { %p13138_p5 = scmp.ge.s32.totalorder %s13136_s27, 2 }
 0x729   : > { %p5542_p10 = pnand %p13138_p5, %p13137_p7 }
 0x72b   : > { %p5543_p12 = pneg %p5542_p10 }
 0x72d   : > { %6756 = dma.done.wait (%p5543_p12), %s5341_s30, 512  }
 0x72e   : > { %6758 = vsyncadd (%p5543_p12), %s5341_s30, 4294966784  ;;  %s13139_s18 = sld [smem:[#allocation22_spill]] }
 0x72f   : > { %s13140_s15 = sld [smem:[#allocation18_spill]] }
 0x730   : > { %s13141_s16 = sld [smem:[#allocation19_spill]] }
 0x731   : > { %s13142_s17 = sld [smem:[#allocation23_spill]] }
 0x734   : > { %p20_p0 = scmp.ge.s32.totalorder %s13139_s18, 4  }
 0x736   :  { %22 = sbr.rel (!%p20_p0) target bundleno = 13 (0xd), region = 113 }
 0x73b   :  { %5346 = vsyncpa [#allocation3], 1 }
 0x73c   :  { %5348 = vsyncpa [#allocation3 + $0x1], 1 }
 0x73d   :  { %5349 = vsyncpa [#allocation4], 1 }
 0x73e   :  { %5351 = vsyncpa [#allocation4 + $0x1], 1 }
 0x73f   :  { %5352 = vsyncpa [#allocation5], 1 }
 0x740   :  { %5354 = vsyncpa [#allocation5 + $0x1], 1 }
 0x741   :  { %5355 = vsyncpa [#allocation6], 1 }
 0x742   :  { %5357 = vsyncpa [#allocation6 + $0x1], 1 }
 0x743   :  { %5358 = vsyncpa [#allocation9], 1 }

</bundles_post_ra>
